<compile_context>
chip_gen: v7x
topology: tpu7x:2x2x1
jax: 0.10.0
libtpu: 0.0.40
codegen_flags: <defaults>
</compile_context>

<pallas_src>
import functools

import jax
import jax.numpy as jnp
from jax.experimental import pallas as pl
from jax.experimental.pallas import tpu as pltpu


# ----------------------------------------------------------------------------
# Fused forward kernel (specialized to 36x36 inputs -> 8x8 -> 3x3 -> 1x1)
# ----------------------------------------------------------------------------
def _fused_qlearner_kernel(x_ref, w1_ref, b1_ref, w2_ref, b2_ref, w3_ref, b3_ref,
                           wf1_ref, bf1_ref, wf2_ref, bf2_ref,
                           out_ref, a1_ref, a2_ref, *, bt):
    """One grid step == one block of `bt` batch samples.

    x_ref  : (9, 9, bt, 16*C) bf16   x[hq, wq, b, ri*4C+rj*C+c] = img[b,c,4hq+ri,4wq+rj]
    w1_ref : (4, 16*C, 128)   bf16   block q = qi*2+qj (Cout 32 padded to 128)
    w2_ref : (16, 128, 128)   bf16   block = i*4+j     (Cin/Cout padded)
    w3_ref : (1152, 128)      bf16   rows = 9 kernel positions x 128 padded Cin
    wf1_ref: (128, 512), wf2_ref: (512, 128) bf16
    a1_ref : (72*bt, 128) bf16 scratch  conv1 output, row = (h*8+w)*bt + b (+ zero pad)
    a2_ref : (40*bt, 128) bf16 scratch  conv2 at stride 1, row = (y*8+x)*bt + b
    out_ref: (bt, 128) f32              padded q-values
    """
    f32 = jnp.float32
    bf16 = jnp.bfloat16
    kdim = x_ref.shape[-1]                     # 16 * C

    # ---- conv1: 8x8 kernel, stride 4, 36x36 -> 8x8, Cout 32 (pad 128) ----
    # Output row ordering (y*8+x)*bt + b matches the a1 scratch layout.
    acc1 = jnp.zeros((64 * bt, 128), f32)
    for qi in range(2):
        for qj in range(2):
            lhs = x_ref[qi:qi + 8, qj:qj + 8, :, :].reshape(64 * bt, kdim)
            acc1 = acc1 + jnp.dot(lhs, w1_ref[qi * 2 + qj],
                                  preferred_element_type=f32)
    a1_ref[0:64 * bt, :] = jnp.maximum(acc1 + b1_ref[...], 0.0).astype(bf16)
    # Zero the pad rows so the conv2 wrap-reads below never touch stale VMEM.
    a1_ref[64 * bt:72 * bt, :] = jnp.zeros((8 * bt, 128), bf16)

    # ---- conv2: 4x4 kernel, stride 2, 8x8 -> 3x3, Cout 64 (pad 128) ------
    # Computed at stride 1 with a contiguous slice per kernel position:
    # lhs rows (y*8+x)*bt+b map to a1 rows ((y+i)*8+(x+j))*bt+b; columns x>4
    # wrap into the next grid row and produce garbage rows that are never read.
    acc2 = jnp.zeros((40 * bt, 128), f32)
    for i in range(4):
        for j in range(4):
            start = (i * 8 + j) * bt
            acc2 = acc2 + jnp.dot(a1_ref[start:start + 40 * bt, :],
                                  w2_ref[i * 4 + j],
                                  preferred_element_type=f32)
    a2_ref[...] = jnp.maximum(acc2 + b2_ref[...], 0.0).astype(bf16)

    # ---- conv3: 3x3 kernel, stride 1, 3x3 -> 1x1: ONE K=1152 matmul -------
    # Stride-2 conv2 output (y2, x2) lives at stride-1 row pos = 16*y2 + 2*x2.
    rows = []
    for i in range(3):
        for j in range(3):
            p = (16 * i + 2 * j) * bt
            rows.append(a2_ref[p:p + bt, :])
    lhs3 = jnp.concatenate(rows, axis=-1)                       # (bt, 1152) bf16
    feat = jnp.maximum(jnp.dot(lhs3, w3_ref[...], preferred_element_type=f32)
                       + b3_ref[...], 0.0)                      # (bt, 128) f32

    # ---- fully connected head (feature map is 1x1 -> flatten == channels) --
    h = jnp.maximum(jnp.dot(feat.astype(bf16), wf1_ref[...],
                            preferred_element_type=f32) + bf1_ref[...], 0.0)
    q = jnp.dot(h.astype(bf16), wf2_ref[...],
                preferred_element_type=f32) + bf2_ref[...]
    out_ref[...] = q                                            # (bt, 128) f32


# ----------------------------------------------------------------------------
# One-time weight packing (bf16, lane-dense / MXU-friendly layouts)
# ----------------------------------------------------------------------------
def pack_params(params):
    f32, bf16 = jnp.float32, jnp.bfloat16
    C = params["c1_w"].shape[1]

    # conv1 (32, C, 8, 8) -> (4, 16C, 128): block q = qi*2+qj,
    # K index = ri*4C + rj*C + c  (matches the wrapper's input repack).
    w1 = params["c1_w"].astype(f32).reshape(32, C, 2, 4, 2, 4)     # (cout,c,qi,ri,qj,rj)
    w1 = jnp.transpose(w1, (2, 4, 3, 5, 1, 0)).reshape(4, 16 * C, 32)
    w1p = jnp.zeros((4, 16 * C, 128), f32).at[:, :, :32].set(w1).astype(bf16)

    # conv2 (64, 32, 4, 4) -> (16, 128, 128), block = i*4+j.
    w2 = jnp.transpose(params["c2_w"].astype(f32), (2, 3, 1, 0)).reshape(16, 32, 64)
    w2p = jnp.zeros((16, 128, 128), f32).at[:, :32, :64].set(w2).astype(bf16)

    # conv3 (64, 64, 3, 3) -> (9*128, 128): rows grouped by kernel position i*3+j.
    w3 = jnp.transpose(params["c3_w"].astype(f32), (2, 3, 1, 0)).reshape(9, 64, 64)
    w3p = jnp.zeros((9, 128, 128), f32).at[:, :64, :64].set(w3)
    w3p = w3p.reshape(9 * 128, 128).astype(bf16)

    # Feature map is 1x1 spatial so PyTorch's NCHW flatten == channel order;
    # fc1_w rows (padded 64->128) line up with the kernel's feat lanes.
    wf1p = (jnp.zeros((128, 512), f32)
            .at[:64, :].set(params["fc1_w"].astype(f32)).astype(bf16))
    n_act = params["fc2_w"].shape[1]
    wf2p = (jnp.zeros((512, 128), f32)
            .at[:, :n_act].set(params["fc2_w"].astype(f32)).astype(bf16))

    def vec_pad(v, n):
        return jnp.zeros((1, n), f32).at[0, :v.shape[0]].set(v.astype(f32))

    return {
        "w1": w1p, "b1": vec_pad(params["c1_b"], 128),
        "w2": w2p, "b2": vec_pad(params["c2_b"], 128),
        "w3": w3p, "b3": vec_pad(params["c3_b"], 128),
        "wf1": wf1p, "bf1": vec_pad(params["fc1_b"], 512),
        "wf2": wf2p, "bf2": vec_pad(params["fc2_b"], 128),
    }


# ----------------------------------------------------------------------------
# Forward wrapper: one fused pallas_call, grid over batch blocks of size Bt
# ----------------------------------------------------------------------------
def qlearner_forward(packed, state_nchw, num_actions, block_b=16):
    B, C, H, W = state_nchw.shape
    assert (H, W) == (36, 36), "fused kernel is specialized to 36x36 inputs"
    bt = block_b
    assert bt % 8 == 0, "batch block must be a multiple of 8 (sublane tile)"
    bpad = ((B + bt - 1) // bt) * bt

    # Single cheap layout op (no data amplification): NCHW ->
    # (hq, wq, b, ri*4C + rj*C + c) where h = 4*hq + ri, w = 4*wq + rj.
    x = state_nchw.astype(jnp.float32)
    if bpad != B:
        x = jnp.pad(x, ((0, bpad - B), (0, 0), (0, 0), (0, 0)))
    x = x.reshape(bpad, C, 9, 4, 9, 4)            # (b, c, hq, ri, wq, rj)
    x = x.transpose(2, 4, 0, 3, 5, 1)             # (hq, wq, b, ri, rj, c)
    x = x.reshape(9, 9, bpad, 16 * C).astype(jnp.bfloat16)

    kernel = functools.partial(_fused_qlearner_kernel, bt=bt)
    out = pl.pallas_call(
        kernel,
        out_shape=jax.ShapeDtypeStruct((bpad, 128), jnp.float32),
        grid=(bpad // bt,),
        in_specs=[
            pl.BlockSpec((9, 9, bt, 16 * C), lambda g: (0, 0, g, 0)),   # x block
            pl.BlockSpec((4, 16 * C, 128), lambda g: (0, 0, 0)),        # w1
            pl.BlockSpec((1, 128), lambda g: (0, 0)),                   # b1
            pl.BlockSpec((16, 128, 128), lambda g: (0, 0, 0)),          # w2
            pl.BlockSpec((1, 128), lambda g: (0, 0)),                   # b2
            pl.BlockSpec((1152, 128), lambda g: (0, 0)),                # w3
            pl.BlockSpec((1, 128), lambda g: (0, 0)),                   # b3
            pl.BlockSpec((128, 512), lambda g: (0, 0)),                 # fc1 w
            pl.BlockSpec((1, 512), lambda g: (0, 0)),                   # fc1 b
            pl.BlockSpec((512, 128), lambda g: (0, 0)),                 # fc2 w
            pl.BlockSpec((1, 128), lambda g: (0, 0)),                   # fc2 b
        ],
        out_specs=pl.BlockSpec((bt, 128), lambda g: (g, 0)),
        scratch_shapes=[
            pltpu.VMEM((72 * bt, 128), jnp.bfloat16),   # conv1 out (+ zeroed pad rows)
            pltpu.VMEM((40 * bt, 128), jnp.bfloat16),   # conv2 out at W-stride 1
        ],
        compiler_params=pltpu.CompilerParams(
            dimension_semantics=("parallel",)),
    )(x, packed["w1"], packed["b1"], packed["w2"], packed["b2"],
      packed["w3"], packed["b3"], packed["wf1"], packed["bf1"],
      packed["wf2"], packed["bf2"])

    return out[:B, :num_actions]


# ----------------------------------------------------------------------------
# Pure-JAX reference (mirrors torch semantics, f32) for a correctness check
# ----------------------------------------------------------------------------
def reference_forward(params, state_nchw):
    prec = jax.lax.Precision.HIGHEST
    x = state_nchw
    for w, b, s in [
        (params["c1_w"], params["c1_b"], 4),
        (params["c2_w"], params["c2_b"], 2),
        (params["c3_w"], params["c3_b"], 1),
    ]:
        x = jax.lax.conv_general_dilated(
            x, w, window_strides=(s, s), padding="VALID",
            dimension_numbers=("NCHW", "OIHW", "NCHW"), precision=prec)
        x = jnp.maximum(x + b.reshape(1, -1, 1, 1), 0.0)
    x = x.reshape(x.shape[0], -1)
    x = jnp.maximum(jnp.dot(x, params["fc1_w"], precision=prec) + params["fc1_b"], 0.0)
    return jnp.dot(x, params["fc2_w"], precision=prec) + params["fc2_b"]


# ----------------------------------------------------------------------------
# Deterministic parameter init (shapes from the module's __init__)
# ----------------------------------------------------------------------------
def init_params(key, in_channels, num_actions, feature_size):
    def uniform(k, shape, fan_in):
        bound = 1.0 / jnp.sqrt(jnp.float32(fan_in))
        return jax.random.uniform(k, shape, jnp.float32, -bound, bound)

    ks = jax.random.split(key, 10)
    return {
        "c1_w": uniform(ks[0], (32, in_channels, 8, 8), in_channels * 8 * 8),
        "c1_b": uniform(ks[1], (32,), in_channels * 8 * 8),
        "c2_w": uniform(ks[2], (64, 32, 4, 4), 32 * 4 * 4),
        "c2_b": uniform(ks[3], (64,), 32 * 4 * 4),
        "c3_w": uniform(ks[4], (64, 64, 3, 3), 64 * 3 * 3),
        "c3_b": uniform(ks[5], (64,), 64 * 3 * 3),
        # Linear weights stored as (in, out) so forward is x @ W + b
        "fc1_w": uniform(ks[6], (feature_size, 512), feature_size),
        "fc1_b": uniform(ks[7], (512,), feature_size),
        "fc2_w": uniform(ks[8], (512, num_actions), 512),
        "fc2_b": uniform(ks[9], (512,), 512)[:num_actions],
    }


if __name__ == "__main__":
    # TODO(synk): replay buffer / epsilon-greedy act() / target-copy are
    # host-side control logic, not part of the forward pass kernel.
    # Smallest spatial size the conv stack supports: 36 -> 8 -> 3 -> 1.
    B, C, H, W = 32, 4, 36, 36          # realistic DQN batch; grid = (2,)
    NUM_ACTIONS = 6
    FEATURE_SIZE = 64 * 1 * 1           # 64 channels x 1 x 1 after the conv stack

    key = jax.random.PRNGKey(0)
    k_params, k_state = jax.random.split(key)
    params = init_params(k_params, C, NUM_ACTIONS, FEATURE_SIZE)
    packed = pack_params(params)        # one-time weight packing (init-time cost)
    state = jax.random.normal(k_state, (B, C, H, W), jnp.float32)   # NCHW input

    fwd = jax.jit(functools.partial(qlearner_forward,
                                    num_actions=NUM_ACTIONS, block_b=16))
    q = jax.block_until_ready(fwd(packed, state))

    q_ref = reference_forward(params, state)
    assert q.shape == (B, NUM_ACTIONS), q.shape
    max_err = float(jnp.max(jnp.abs(q - q_ref)))
    # bf16 matmul operands (f32 accumulate) -> loosened tolerance vs pure f32.
    assert jnp.allclose(q, q_ref, rtol=3e-2, atol=3e-2), max_err

    print("KERNEL_OK")
</pallas_src>

<mosaic_0001>
module attributes {stable_mosaic.version = 11 : i64} {
  func.func @_fused_qlearner_kernel(%arg0: i32, %arg1: memref<9x9x16x64xbf16, #tpu.memory_space<vmem>>, %arg2: memref<4x64x128xbf16, #tpu.memory_space<vmem>>, %arg3: memref<1x128xf32, #tpu.memory_space<vmem>>, %arg4: memref<16x128x128xbf16, #tpu.memory_space<vmem>>, %arg5: memref<1x128xf32, #tpu.memory_space<vmem>>, %arg6: memref<1152x128xbf16, #tpu.memory_space<vmem>>, %arg7: memref<1x128xf32, #tpu.memory_space<vmem>>, %arg8: memref<128x512xbf16, #tpu.memory_space<vmem>>, %arg9: memref<1x512xf32, #tpu.memory_space<vmem>>, %arg10: memref<512x128xbf16, #tpu.memory_space<vmem>>, %arg11: memref<1x128xf32, #tpu.memory_space<vmem>>, %arg12: memref<16x128xf32, #tpu.memory_space<vmem>>, %arg13: memref<1152x128xbf16, #tpu.memory_space<vmem>>, %arg14: memref<640x128xbf16, #tpu.memory_space<vmem>>) attributes {dimension_semantics = [#tpu.dimension_semantics<parallel>], iteration_bounds = array<i64: 2>, scalar_prefetch = 0 : i64, scratch_operands = 2 : i64, tpu.core_type = #tpu.core_type<tc>, window_params = [{transform_indices = @transform_0, window_bounds = array<i64: 9, 9, 16, 64>}, {pipeline_mode = #tpu.pipeline_mode<synchronous>, transform_indices = @transform_1, window_bounds = array<i64: 4, 64, 128>}, {pipeline_mode = #tpu.pipeline_mode<synchronous>, transform_indices = @transform_2, window_bounds = array<i64: 1, 128>}, {pipeline_mode = #tpu.pipeline_mode<synchronous>, transform_indices = @transform_3, window_bounds = array<i64: 16, 128, 128>}, {pipeline_mode = #tpu.pipeline_mode<synchronous>, transform_indices = @transform_4, window_bounds = array<i64: 1, 128>}, {pipeline_mode = #tpu.pipeline_mode<synchronous>, transform_indices = @transform_5, window_bounds = array<i64: 1152, 128>}, {pipeline_mode = #tpu.pipeline_mode<synchronous>, transform_indices = @transform_6, window_bounds = array<i64: 1, 128>}, {pipeline_mode = #tpu.pipeline_mode<synchronous>, transform_indices = @transform_7, window_bounds = array<i64: 128, 512>}, {pipeline_mode = #tpu.pipeline_mode<synchronous>, transform_indices = @transform_8, window_bounds = array<i64: 1, 512>}, {pipeline_mode = #tpu.pipeline_mode<synchronous>, transform_indices = @transform_9, window_bounds = array<i64: 512, 128>}, {pipeline_mode = #tpu.pipeline_mode<synchronous>, transform_indices = @transform_10, window_bounds = array<i64: 1, 128>}, {transform_indices = @transform_11, window_bounds = array<i64: 16, 128>}]} {
    %cst = arith.constant 0.000000e+00 : f32
    %0 = vector.broadcast %cst : f32 to vector<1024x128xf32>
    %c0 = arith.constant 0 : index
    %c0_0 = arith.constant 0 : index
    %c0_1 = arith.constant 0 : index
    %c0_2 = arith.constant 0 : index
    %1 = vector.load %arg1[%c0, %c0_0, %c0_1, %c0_2] : memref<9x9x16x64xbf16, #tpu.memory_space<vmem>>, vector<8x8x16x64xbf16>
    %2 = vector.shape_cast %1 : vector<8x8x16x64xbf16> to vector<1024x64xbf16>
    %c0_3 = arith.constant 0 : index
    %c0_4 = arith.constant 0 : index
    %c0_5 = arith.constant 0 : index
    %3 = vector.load %arg2[%c0_3, %c0_4, %c0_5] : memref<4x64x128xbf16, #tpu.memory_space<vmem>>, vector<1x64x128xbf16>
    %4 = vector.shape_cast %3 : vector<1x64x128xbf16> to vector<64x128xbf16>
    %cst_6 = arith.constant dense<0.000000e+00> : vector<1024x128xf32>
    %5 = tpu.matmul %2, %4, %cst_6 {dimension_numbers = #tpu.dot_dimension_numbers<[1], [0], [0], [1], [0, 0, 1, 1], [], []>} : vector<1024x64xbf16>, vector<64x128xbf16>, vector<1024x128xf32> -> vector<1024x128xf32>
    %6 = arith.addf %0, %5 : vector<1024x128xf32>
    %c0_7 = arith.constant 0 : index
    %c1 = arith.constant 1 : index
    %c0_8 = arith.constant 0 : index
    %c0_9 = arith.constant 0 : index
    %7 = vector.load %arg1[%c0_7, %c1, %c0_8, %c0_9] : memref<9x9x16x64xbf16, #tpu.memory_space<vmem>>, vector<8x8x16x64xbf16>
    %8 = vector.shape_cast %7 : vector<8x8x16x64xbf16> to vector<1024x64xbf16>
    %c1_10 = arith.constant 1 : index
    %c0_11 = arith.constant 0 : index
    %c0_12 = arith.constant 0 : index
    %9 = vector.load %arg2[%c1_10, %c0_11, %c0_12] : memref<4x64x128xbf16, #tpu.memory_space<vmem>>, vector<1x64x128xbf16>
    %10 = vector.shape_cast %9 : vector<1x64x128xbf16> to vector<64x128xbf16>
    %cst_13 = arith.constant dense<0.000000e+00> : vector<1024x128xf32>
    %11 = tpu.matmul %8, %10, %cst_13 {dimension_numbers = #tpu.dot_dimension_numbers<[1], [0], [0], [1], [0, 0, 1, 1], [], []>} : vector<1024x64xbf16>, vector<64x128xbf16>, vector<1024x128xf32> -> vector<1024x128xf32>
    %12 = arith.addf %6, %11 : vector<1024x128xf32>
    %c1_14 = arith.constant 1 : index
    %c0_15 = arith.constant 0 : index
    %c0_16 = arith.constant 0 : index
    %c0_17 = arith.constant 0 : index
    %13 = vector.load %arg1[%c1_14, %c0_15, %c0_16, %c0_17] : memref<9x9x16x64xbf16, #tpu.memory_space<vmem>>, vector<8x8x16x64xbf16>
    %14 = vector.shape_cast %13 : vector<8x8x16x64xbf16> to vector<1024x64xbf16>
    %c2 = arith.constant 2 : index
    %c0_18 = arith.constant 0 : index
    %c0_19 = arith.constant 0 : index
    %15 = vector.load %arg2[%c2, %c0_18, %c0_19] : memref<4x64x128xbf16, #tpu.memory_space<vmem>>, vector<1x64x128xbf16>
    %16 = vector.shape_cast %15 : vector<1x64x128xbf16> to vector<64x128xbf16>
    %cst_20 = arith.constant dense<0.000000e+00> : vector<1024x128xf32>
    %17 = tpu.matmul %14, %16, %cst_20 {dimension_numbers = #tpu.dot_dimension_numbers<[1], [0], [0], [1], [0, 0, 1, 1], [], []>} : vector<1024x64xbf16>, vector<64x128xbf16>, vector<1024x128xf32> -> vector<1024x128xf32>
    %18 = arith.addf %12, %17 : vector<1024x128xf32>
    %c1_21 = arith.constant 1 : index
    %c1_22 = arith.constant 1 : index
    %c0_23 = arith.constant 0 : index
    %c0_24 = arith.constant 0 : index
    %19 = vector.load %arg1[%c1_21, %c1_22, %c0_23, %c0_24] : memref<9x9x16x64xbf16, #tpu.memory_space<vmem>>, vector<8x8x16x64xbf16>
    %20 = vector.shape_cast %19 : vector<8x8x16x64xbf16> to vector<1024x64xbf16>
    %c3 = arith.constant 3 : index
    %c0_25 = arith.constant 0 : index
    %c0_26 = arith.constant 0 : index
    %21 = vector.load %arg2[%c3, %c0_25, %c0_26] : memref<4x64x128xbf16, #tpu.memory_space<vmem>>, vector<1x64x128xbf16>
    %22 = vector.shape_cast %21 : vector<1x64x128xbf16> to vector<64x128xbf16>
    %cst_27 = arith.constant dense<0.000000e+00> : vector<1024x128xf32>
    %23 = tpu.matmul %20, %22, %cst_27 {dimension_numbers = #tpu.dot_dimension_numbers<[1], [0], [0], [1], [0, 0, 1, 1], [], []>} : vector<1024x64xbf16>, vector<64x128xbf16>, vector<1024x128xf32> -> vector<1024x128xf32>
    %24 = arith.addf %18, %23 : vector<1024x128xf32>
    %c0_28 = arith.constant 0 : index
    %c0_29 = arith.constant 0 : index
    %25 = vector.load %arg3[%c0_28, %c0_29] : memref<1x128xf32, #tpu.memory_space<vmem>>, vector<1x128xf32>
    %26 = vector.broadcast %25 : vector<1x128xf32> to vector<1024x128xf32>
    %27 = arith.addf %24, %26 : vector<1024x128xf32>
    %cst_30 = arith.constant 0.000000e+00 : f32
    %28 = vector.broadcast %cst_30 : f32 to vector<1024x128xf32>
    %29 = arith.maximumf %27, %28 : vector<1024x128xf32>
    %30 = arith.truncf %29 : vector<1024x128xf32> to vector<1024x128xbf16>
    %c0_31 = arith.constant 0 : index
    %c0_32 = arith.constant 0 : index
    %31 = vector.load %arg13[%c0_31, %c0_32] : memref<1152x128xbf16, #tpu.memory_space<vmem>>, vector<1024x128xbf16>
    tpu.vector_store %arg13[%c0_31, %c0_32], %30 {strides = array<i32>} : memref<1152x128xbf16, #tpu.memory_space<vmem>>, vector<1024x128xbf16>,
    %cst_33 = arith.constant 0.000000e+00 : bf16
    %32 = vector.broadcast %cst_33 : bf16 to vector<128x128xbf16>
    %c1024 = arith.constant 1024 : index
    %c0_34 = arith.constant 0 : index
    %33 = vector.load %arg13[%c1024, %c0_34] : memref<1152x128xbf16, #tpu.memory_space<vmem>>, vector<128x128xbf16>
    tpu.vector_store %arg13[%c1024, %c0_34], %32 {strides = array<i32>} : memref<1152x128xbf16, #tpu.memory_space<vmem>>, vector<128x128xbf16>,
    %cst_35 = arith.constant 0.000000e+00 : f32
    %34 = vector.broadcast %cst_35 : f32 to vector<640x128xf32>
    %c0_36 = arith.constant 0 : index
    %c0_37 = arith.constant 0 : index
    %35 = vector.load %arg13[%c0_36, %c0_37] : memref<1152x128xbf16, #tpu.memory_space<vmem>>, vector<640x128xbf16>
    %c0_38 = arith.constant 0 : index
    %c0_39 = arith.constant 0 : index
    %c0_40 = arith.constant 0 : index
    %36 = vector.load %arg4[%c0_38, %c0_39, %c0_40] : memref<16x128x128xbf16, #tpu.memory_space<vmem>>, vector<1x128x128xbf16>
    %37 = vector.shape_cast %36 : vector<1x128x128xbf16> to vector<128x128xbf16>
    %cst_41 = arith.constant dense<0.000000e+00> : vector<640x128xf32>
    %38 = tpu.matmul %35, %37, %cst_41 {dimension_numbers = #tpu.dot_dimension_numbers<[1], [0], [0], [1], [0, 0, 1, 1], [], []>} : vector<640x128xbf16>, vector<128x128xbf16>, vector<640x128xf32> -> vector<640x128xf32>
    %39 = arith.addf %34, %38 : vector<640x128xf32>
    %c16 = arith.constant 16 : index
    %c0_42 = arith.constant 0 : index
    %40 = vector.load %arg13[%c16, %c0_42] : memref<1152x128xbf16, #tpu.memory_space<vmem>>, vector<640x128xbf16>
    %c1_43 = arith.constant 1 : index
    %c0_44 = arith.constant 0 : index
    %c0_45 = arith.constant 0 : index
    %41 = vector.load %arg4[%c1_43, %c0_44, %c0_45] : memref<16x128x128xbf16, #tpu.memory_space<vmem>>, vector<1x128x128xbf16>
    %42 = vector.shape_cast %41 : vector<1x128x128xbf16> to vector<128x128xbf16>
    %cst_46 = arith.constant dense<0.000000e+00> : vector<640x128xf32>
    %43 = tpu.matmul %40, %42, %cst_46 {dimension_numbers = #tpu.dot_dimension_numbers<[1], [0], [0], [1], [0, 0, 1, 1], [], []>} : vector<640x128xbf16>, vector<128x128xbf16>, vector<640x128xf32> -> vector<640x128xf32>
    %44 = arith.addf %39, %43 : vector<640x128xf32>
    %c32 = arith.constant 32 : index
    %c0_47 = arith.constant 0 : index
    %45 = vector.load %arg13[%c32, %c0_47] : memref<1152x128xbf16, #tpu.memory_space<vmem>>, vector<640x128xbf16>
    %c2_48 = arith.constant 2 : index
    %c0_49 = arith.constant 0 : index
    %c0_50 = arith.constant 0 : index
    %46 = vector.load %arg4[%c2_48, %c0_49, %c0_50] : memref<16x128x128xbf16, #tpu.memory_space<vmem>>, vector<1x128x128xbf16>
    %47 = vector.shape_cast %46 : vector<1x128x128xbf16> to vector<128x128xbf16>
    %cst_51 = arith.constant dense<0.000000e+00> : vector<640x128xf32>
    %48 = tpu.matmul %45, %47, %cst_51 {dimension_numbers = #tpu.dot_dimension_numbers<[1], [0], [0], [1], [0, 0, 1, 1], [], []>} : vector<640x128xbf16>, vector<128x128xbf16>, vector<640x128xf32> -> vector<640x128xf32>
    %49 = arith.addf %44, %48 : vector<640x128xf32>
    %c48 = arith.constant 48 : index
    %c0_52 = arith.constant 0 : index
    %50 = vector.load %arg13[%c48, %c0_52] : memref<1152x128xbf16, #tpu.memory_space<vmem>>, vector<640x128xbf16>
    %c3_53 = arith.constant 3 : index
    %c0_54 = arith.constant 0 : index
    %c0_55 = arith.constant 0 : index
    %51 = vector.load %arg4[%c3_53, %c0_54, %c0_55] : memref<16x128x128xbf16, #tpu.memory_space<vmem>>, vector<1x128x128xbf16>
    %52 = vector.shape_cast %51 : vector<1x128x128xbf16> to vector<128x128xbf16>
    %cst_56 = arith.constant dense<0.000000e+00> : vector<640x128xf32>
    %53 = tpu.matmul %50, %52, %cst_56 {dimension_numbers = #tpu.dot_dimension_numbers<[1], [0], [0], [1], [0, 0, 1, 1], [], []>} : vector<640x128xbf16>, vector<128x128xbf16>, vector<640x128xf32> -> vector<640x128xf32>
    %54 = arith.addf %49, %53 : vector<640x128xf32>
    %c128 = arith.constant 128 : index
    %c0_57 = arith.constant 0 : index
    %55 = vector.load %arg13[%c128, %c0_57] : memref<1152x128xbf16, #tpu.memory_space<vmem>>, vector<640x128xbf16>
    %c4 = arith.constant 4 : index
    %c0_58 = arith.constant 0 : index
    %c0_59 = arith.constant 0 : index
    %56 = vector.load %arg4[%c4, %c0_58, %c0_59] : memref<16x128x128xbf16, #tpu.memory_space<vmem>>, vector<1x128x128xbf16>
    %57 = vector.shape_cast %56 : vector<1x128x128xbf16> to vector<128x128xbf16>
    %cst_60 = arith.constant dense<0.000000e+00> : vector<640x128xf32>
    %58 = tpu.matmul %55, %57, %cst_60 {dimension_numbers = #tpu.dot_dimension_numbers<[1], [0], [0], [1], [0, 0, 1, 1], [], []>} : vector<640x128xbf16>, vector<128x128xbf16>, vector<640x128xf32> -> vector<640x128xf32>
    %59 = arith.addf %54, %58 : vector<640x128xf32>
    %c144 = arith.constant 144 : index
    %c0_61 = arith.constant 0 : index
    %60 = vector.load %arg13[%c144, %c0_61] : memref<1152x128xbf16, #tpu.memory_space<vmem>>, vector<640x128xbf16>
    %c5 = arith.constant 5 : index
    %c0_62 = arith.constant 0 : index
    %c0_63 = arith.constant 0 : index
    %61 = vector.load %arg4[%c5, %c0_62, %c0_63] : memref<16x128x128xbf16, #tpu.memory_space<vmem>>, vector<1x128x128xbf16>
    %62 = vector.shape_cast %61 : vector<1x128x128xbf16> to vector<128x128xbf16>
    %cst_64 = arith.constant dense<0.000000e+00> : vector<640x128xf32>
    %63 = tpu.matmul %60, %62, %cst_64 {dimension_numbers = #tpu.dot_dimension_numbers<[1], [0], [0], [1], [0, 0, 1, 1], [], []>} : vector<640x128xbf16>, vector<128x128xbf16>, vector<640x128xf32> -> vector<640x128xf32>
    %64 = arith.addf %59, %63 : vector<640x128xf32>
    %c160 = arith.constant 160 : index
    %c0_65 = arith.constant 0 : index
    %65 = vector.load %arg13[%c160, %c0_65] : memref<1152x128xbf16, #tpu.memory_space<vmem>>, vector<640x128xbf16>
    %c6 = arith.constant 6 : index
    %c0_66 = arith.constant 0 : index
    %c0_67 = arith.constant 0 : index
    %66 = vector.load %arg4[%c6, %c0_66, %c0_67] : memref<16x128x128xbf16, #tpu.memory_space<vmem>>, vector<1x128x128xbf16>
    %67 = vector.shape_cast %66 : vector<1x128x128xbf16> to vector<128x128xbf16>
    %cst_68 = arith.constant dense<0.000000e+00> : vector<640x128xf32>
    %68 = tpu.matmul %65, %67, %cst_68 {dimension_numbers = #tpu.dot_dimension_numbers<[1], [0], [0], [1], [0, 0, 1, 1], [], []>} : vector<640x128xbf16>, vector<128x128xbf16>, vector<640x128xf32> -> vector<640x128xf32>
    %69 = arith.addf %64, %68 : vector<640x128xf32>
    %c176 = arith.constant 176 : index
    %c0_69 = arith.constant 0 : index
    %70 = vector.load %arg13[%c176, %c0_69] : memref<1152x128xbf16, #tpu.memory_space<vmem>>, vector<640x128xbf16>
    %c7 = arith.constant 7 : index
    %c0_70 = arith.constant 0 : index
    %c0_71 = arith.constant 0 : index
    %71 = vector.load %arg4[%c7, %c0_70, %c0_71] : memref<16x128x128xbf16, #tpu.memory_space<vmem>>, vector<1x128x128xbf16>
    %72 = vector.shape_cast %71 : vector<1x128x128xbf16> to vector<128x128xbf16>
    %cst_72 = arith.constant dense<0.000000e+00> : vector<640x128xf32>
    %73 = tpu.matmul %70, %72, %cst_72 {dimension_numbers = #tpu.dot_dimension_numbers<[1], [0], [0], [1], [0, 0, 1, 1], [], []>} : vector<640x128xbf16>, vector<128x128xbf16>, vector<640x128xf32> -> vector<640x128xf32>
    %74 = arith.addf %69, %73 : vector<640x128xf32>
    %c256 = arith.constant 256 : index
    %c0_73 = arith.constant 0 : index
    %75 = vector.load %arg13[%c256, %c0_73] : memref<1152x128xbf16, #tpu.memory_space<vmem>>, vector<640x128xbf16>
    %c8 = arith.constant 8 : index
    %c0_74 = arith.constant 0 : index
    %c0_75 = arith.constant 0 : index
    %76 = vector.load %arg4[%c8, %c0_74, %c0_75] : memref<16x128x128xbf16, #tpu.memory_space<vmem>>, vector<1x128x128xbf16>
    %77 = vector.shape_cast %76 : vector<1x128x128xbf16> to vector<128x128xbf16>
    %cst_76 = arith.constant dense<0.000000e+00> : vector<640x128xf32>
    %78 = tpu.matmul %75, %77, %cst_76 {dimension_numbers = #tpu.dot_dimension_numbers<[1], [0], [0], [1], [0, 0, 1, 1], [], []>} : vector<640x128xbf16>, vector<128x128xbf16>, vector<640x128xf32> -> vector<640x128xf32>
    %79 = arith.addf %74, %78 : vector<640x128xf32>
    %c272 = arith.constant 272 : index
    %c0_77 = arith.constant 0 : index
    %80 = vector.load %arg13[%c272, %c0_77] : memref<1152x128xbf16, #tpu.memory_space<vmem>>, vector<640x128xbf16>
    %c9 = arith.constant 9 : index
    %c0_78 = arith.constant 0 : index
    %c0_79 = arith.constant 0 : index
    %81 = vector.load %arg4[%c9, %c0_78, %c0_79] : memref<16x128x128xbf16, #tpu.memory_space<vmem>>, vector<1x128x128xbf16>
    %82 = vector.shape_cast %81 : vector<1x128x128xbf16> to vector<128x128xbf16>
    %cst_80 = arith.constant dense<0.000000e+00> : vector<640x128xf32>
    %83 = tpu.matmul %80, %82, %cst_80 {dimension_numbers = #tpu.dot_dimension_numbers<[1], [0], [0], [1], [0, 0, 1, 1], [], []>} : vector<640x128xbf16>, vector<128x128xbf16>, vector<640x128xf32> -> vector<640x128xf32>
    %84 = arith.addf %79, %83 : vector<640x128xf32>
    %c288 = arith.constant 288 : index
    %c0_81 = arith.constant 0 : index
    %85 = vector.load %arg13[%c288, %c0_81] : memref<1152x128xbf16, #tpu.memory_space<vmem>>, vector<640x128xbf16>
    %c10 = arith.constant 10 : index
    %c0_82 = arith.constant 0 : index
    %c0_83 = arith.constant 0 : index
    %86 = vector.load %arg4[%c10, %c0_82, %c0_83] : memref<16x128x128xbf16, #tpu.memory_space<vmem>>, vector<1x128x128xbf16>
    %87 = vector.shape_cast %86 : vector<1x128x128xbf16> to vector<128x128xbf16>
    %cst_84 = arith.constant dense<0.000000e+00> : vector<640x128xf32>
    %88 = tpu.matmul %85, %87, %cst_84 {dimension_numbers = #tpu.dot_dimension_numbers<[1], [0], [0], [1], [0, 0, 1, 1], [], []>} : vector<640x128xbf16>, vector<128x128xbf16>, vector<640x128xf32> -> vector<640x128xf32>
    %89 = arith.addf %84, %88 : vector<640x128xf32>
    %c304 = arith.constant 304 : index
    %c0_85 = arith.constant 0 : index
    %90 = vector.load %arg13[%c304, %c0_85] : memref<1152x128xbf16, #tpu.memory_space<vmem>>, vector<640x128xbf16>
    %c11 = arith.constant 11 : index
    %c0_86 = arith.constant 0 : index
    %c0_87 = arith.constant 0 : index
    %91 = vector.load %arg4[%c11, %c0_86, %c0_87] : memref<16x128x128xbf16, #tpu.memory_space<vmem>>, vector<1x128x128xbf16>
    %92 = vector.shape_cast %91 : vector<1x128x128xbf16> to vector<128x128xbf16>
    %cst_88 = arith.constant dense<0.000000e+00> : vector<640x128xf32>
    %93 = tpu.matmul %90, %92, %cst_88 {dimension_numbers = #tpu.dot_dimension_numbers<[1], [0], [0], [1], [0, 0, 1, 1], [], []>} : vector<640x128xbf16>, vector<128x128xbf16>, vector<640x128xf32> -> vector<640x128xf32>
    %94 = arith.addf %89, %93 : vector<640x128xf32>
    %c384 = arith.constant 384 : index
    %c0_89 = arith.constant 0 : index
    %95 = vector.load %arg13[%c384, %c0_89] : memref<1152x128xbf16, #tpu.memory_space<vmem>>, vector<640x128xbf16>
    %c12 = arith.constant 12 : index
    %c0_90 = arith.constant 0 : index
    %c0_91 = arith.constant 0 : index
    %96 = vector.load %arg4[%c12, %c0_90, %c0_91] : memref<16x128x128xbf16, #tpu.memory_space<vmem>>, vector<1x128x128xbf16>
    %97 = vector.shape_cast %96 : vector<1x128x128xbf16> to vector<128x128xbf16>
    %cst_92 = arith.constant dense<0.000000e+00> : vector<640x128xf32>
    %98 = tpu.matmul %95, %97, %cst_92 {dimension_numbers = #tpu.dot_dimension_numbers<[1], [0], [0], [1], [0, 0, 1, 1], [], []>} : vector<640x128xbf16>, vector<128x128xbf16>, vector<640x128xf32> -> vector<640x128xf32>
    %99 = arith.addf %94, %98 : vector<640x128xf32>
    %c400 = arith.constant 400 : index
    %c0_93 = arith.constant 0 : index
    %100 = vector.load %arg13[%c400, %c0_93] : memref<1152x128xbf16, #tpu.memory_space<vmem>>, vector<640x128xbf16>
    %c13 = arith.constant 13 : index
    %c0_94 = arith.constant 0 : index
    %c0_95 = arith.constant 0 : index
    %101 = vector.load %arg4[%c13, %c0_94, %c0_95] : memref<16x128x128xbf16, #tpu.memory_space<vmem>>, vector<1x128x128xbf16>
    %102 = vector.shape_cast %101 : vector<1x128x128xbf16> to vector<128x128xbf16>
    %cst_96 = arith.constant dense<0.000000e+00> : vector<640x128xf32>
    %103 = tpu.matmul %100, %102, %cst_96 {dimension_numbers = #tpu.dot_dimension_numbers<[1], [0], [0], [1], [0, 0, 1, 1], [], []>} : vector<640x128xbf16>, vector<128x128xbf16>, vector<640x128xf32> -> vector<640x128xf32>
    %104 = arith.addf %99, %103 : vector<640x128xf32>
    %c416 = arith.constant 416 : index
    %c0_97 = arith.constant 0 : index
    %105 = vector.load %arg13[%c416, %c0_97] : memref<1152x128xbf16, #tpu.memory_space<vmem>>, vector<640x128xbf16>
    %c14 = arith.constant 14 : index
    %c0_98 = arith.constant 0 : index
    %c0_99 = arith.constant 0 : index
    %106 = vector.load %arg4[%c14, %c0_98, %c0_99] : memref<16x128x128xbf16, #tpu.memory_space<vmem>>, vector<1x128x128xbf16>
    %107 = vector.shape_cast %106 : vector<1x128x128xbf16> to vector<128x128xbf16>
    %cst_100 = arith.constant dense<0.000000e+00> : vector<640x128xf32>
    %108 = tpu.matmul %105, %107, %cst_100 {dimension_numbers = #tpu.dot_dimension_numbers<[1], [0], [0], [1], [0, 0, 1, 1], [], []>} : vector<640x128xbf16>, vector<128x128xbf16>, vector<640x128xf32> -> vector<640x128xf32>
    %109 = arith.addf %104, %108 : vector<640x128xf32>
    %c432 = arith.constant 432 : index
    %c0_101 = arith.constant 0 : index
    %110 = vector.load %arg13[%c432, %c0_101] : memref<1152x128xbf16, #tpu.memory_space<vmem>>, vector<640x128xbf16>
    %c15 = arith.constant 15 : index
    %c0_102 = arith.constant 0 : index
    %c0_103 = arith.constant 0 : index
    %111 = vector.load %arg4[%c15, %c0_102, %c0_103] : memref<16x128x128xbf16, #tpu.memory_space<vmem>>, vector<1x128x128xbf16>
    %112 = vector.shape_cast %111 : vector<1x128x128xbf16> to vector<128x128xbf16>
    %cst_104 = arith.constant dense<0.000000e+00> : vector<640x128xf32>
    %113 = tpu.matmul %110, %112, %cst_104 {dimension_numbers = #tpu.dot_dimension_numbers<[1], [0], [0], [1], [0, 0, 1, 1], [], []>} : vector<640x128xbf16>, vector<128x128xbf16>, vector<640x128xf32> -> vector<640x128xf32>
    %114 = arith.addf %109, %113 : vector<640x128xf32>
    %c0_105 = arith.constant 0 : index
    %c0_106 = arith.constant 0 : index
    %115 = vector.load %arg5[%c0_105, %c0_106] : memref<1x128xf32, #tpu.memory_space<vmem>>, vector<1x128xf32>
    %116 = vector.broadcast %115 : vector<1x128xf32> to vector<640x128xf32>
    %117 = arith.addf %114, %116 : vector<640x128xf32>
    %cst_107 = arith.constant 0.000000e+00 : f32
    %118 = vector.broadcast %cst_107 : f32 to vector<640x128xf32>
    %119 = arith.maximumf %117, %118 : vector<640x128xf32>
    %120 = arith.truncf %119 : vector<640x128xf32> to vector<640x128xbf16>
    %c0_108 = arith.constant 0 : index
    %c0_109 = arith.constant 0 : index
    %121 = vector.load %arg14[%c0_108, %c0_109] : memref<640x128xbf16, #tpu.memory_space<vmem>>, vector<640x128xbf16>
    tpu.vector_store %arg14[%c0_108, %c0_109], %120 {strides = array<i32>} : memref<640x128xbf16, #tpu.memory_space<vmem>>, vector<640x128xbf16>,
    %c0_110 = arith.constant 0 : index
    %c0_111 = arith.constant 0 : index
    %122 = vector.load %arg14[%c0_110, %c0_111] : memref<640x128xbf16, #tpu.memory_space<vmem>>, vector<16x128xbf16>
    %c32_112 = arith.constant 32 : index
    %c0_113 = arith.constant 0 : index
    %123 = vector.load %arg14[%c32_112, %c0_113] : memref<640x128xbf16, #tpu.memory_space<vmem>>, vector<16x128xbf16>
    %c64 = arith.constant 64 : index
    %c0_114 = arith.constant 0 : index
    %124 = vector.load %arg14[%c64, %c0_114] : memref<640x128xbf16, #tpu.memory_space<vmem>>, vector<16x128xbf16>
    %c256_115 = arith.constant 256 : index
    %c0_116 = arith.constant 0 : index
    %125 = vector.load %arg14[%c256_115, %c0_116] : memref<640x128xbf16, #tpu.memory_space<vmem>>, vector<16x128xbf16>
    %c288_117 = arith.constant 288 : index
    %c0_118 = arith.constant 0 : index
    %126 = vector.load %arg14[%c288_117, %c0_118] : memref<640x128xbf16, #tpu.memory_space<vmem>>, vector<16x128xbf16>
    %c320 = arith.constant 320 : index
    %c0_119 = arith.constant 0 : index
    %127 = vector.load %arg14[%c320, %c0_119] : memref<640x128xbf16, #tpu.memory_space<vmem>>, vector<16x128xbf16>
    %c512 = arith.constant 512 : index
    %c0_120 = arith.constant 0 : index
    %128 = vector.load %arg14[%c512, %c0_120] : memref<640x128xbf16, #tpu.memory_space<vmem>>, vector<16x128xbf16>
    %c544 = arith.constant 544 : index
    %c0_121 = arith.constant 0 : index
    %129 = vector.load %arg14[%c544, %c0_121] : memref<640x128xbf16, #tpu.memory_space<vmem>>, vector<16x128xbf16>
    %c576 = arith.constant 576 : index
    %c0_122 = arith.constant 0 : index
    %130 = vector.load %arg14[%c576, %c0_122] : memref<640x128xbf16, #tpu.memory_space<vmem>>, vector<16x128xbf16>
    %131 = tpu.concatenate %122, %123, %124, %125, %126, %127, %128, %129, %130 in 1 : vector<16x128xbf16>, vector<16x128xbf16>, vector<16x128xbf16>, vector<16x128xbf16>, vector<16x128xbf16>, vector<16x128xbf16>, vector<16x128xbf16>, vector<16x128xbf16>, vector<16x128xbf16> -> vector<16x1152xbf16>
    %c0_123 = arith.constant 0 : index
    %c0_124 = arith.constant 0 : index
    %132 = vector.load %arg6[%c0_123, %c0_124] : memref<1152x128xbf16, #tpu.memory_space<vmem>>, vector<1152x128xbf16>
    %cst_125 = arith.constant dense<0.000000e+00> : vector<16x128xf32>
    %133 = tpu.matmul %131, %132, %cst_125 {dimension_numbers = #tpu.dot_dimension_numbers<[1], [0], [0], [1], [0, 0, 1, 1], [], []>} : vector<16x1152xbf16>, vector<1152x128xbf16>, vector<16x128xf32> -> vector<16x128xf32>
    %c0_126 = arith.constant 0 : index
    %c0_127 = arith.constant 0 : index
    %134 = vector.load %arg7[%c0_126, %c0_127] : memref<1x128xf32, #tpu.memory_space<vmem>>, vector<1x128xf32>
    %135 = vector.broadcast %134 : vector<1x128xf32> to vector<16x128xf32>
    %136 = arith.addf %133, %135 : vector<16x128xf32>
    %cst_128 = arith.constant 0.000000e+00 : f32
    %137 = vector.broadcast %cst_128 : f32 to vector<16x128xf32>
    %138 = arith.maximumf %136, %137 : vector<16x128xf32>
    %139 = arith.truncf %138 : vector<16x128xf32> to vector<16x128xbf16>
    %c0_129 = arith.constant 0 : index
    %c0_130 = arith.constant 0 : index
    %140 = vector.load %arg8[%c0_129, %c0_130] : memref<128x512xbf16, #tpu.memory_space<vmem>>, vector<128x512xbf16>
    %cst_131 = arith.constant dense<0.000000e+00> : vector<16x512xf32>
    %141 = tpu.matmul %139, %140, %cst_131 {dimension_numbers = #tpu.dot_dimension_numbers<[1], [0], [0], [1], [0, 0, 1, 1], [], []>} : vector<16x128xbf16>, vector<128x512xbf16>, vector<16x512xf32> -> vector<16x512xf32>
    %c0_132 = arith.constant 0 : index
    %c0_133 = arith.constant 0 : index
    %142 = vector.load %arg9[%c0_132, %c0_133] : memref<1x512xf32, #tpu.memory_space<vmem>>, vector<1x512xf32>
    %143 = vector.broadcast %142 : vector<1x512xf32> to vector<16x512xf32>
    %144 = arith.addf %141, %143 : vector<16x512xf32>
    %cst_134 = arith.constant 0.000000e+00 : f32
    %145 = vector.broadcast %cst_134 : f32 to vector<16x512xf32>
    %146 = arith.maximumf %144, %145 : vector<16x512xf32>
    %147 = arith.truncf %146 : vector<16x512xf32> to vector<16x512xbf16>
    %c0_135 = arith.constant 0 : index
    %c0_136 = arith.constant 0 : index
    %148 = vector.load %arg10[%c0_135, %c0_136] : memref<512x128xbf16, #tpu.memory_space<vmem>>, vector<512x128xbf16>
    %cst_137 = arith.constant dense<0.000000e+00> : vector<16x128xf32>
    %149 = tpu.matmul %147, %148, %cst_137 {dimension_numbers = #tpu.dot_dimension_numbers<[1], [0], [0], [1], [0, 0, 1, 1], [], []>} : vector<16x512xbf16>, vector<512x128xbf16>, vector<16x128xf32> -> vector<16x128xf32>
    %c0_138 = arith.constant 0 : index
    %c0_139 = arith.constant 0 : index
    %150 = vector.load %arg11[%c0_138, %c0_139] : memref<1x128xf32, #tpu.memory_space<vmem>>, vector<1x128xf32>
    %151 = vector.broadcast %150 : vector<1x128xf32> to vector<16x128xf32>
    %152 = arith.addf %149, %151 : vector<16x128xf32>
    %c0_140 = arith.constant 0 : index
    %c0_141 = arith.constant 0 : index
    %153 = vector.load %arg12[%c0_140, %c0_141] : memref<16x128xf32, #tpu.memory_space<vmem>>, vector<16x128xf32>
    tpu.vector_store %arg12[%c0_140, %c0_141], %152 {strides = array<i32>} : memref<16x128xf32, #tpu.memory_space<vmem>>, vector<16x128xf32>,
    return
  }
  func.func @transform_0(%arg0: i32) -> (i32, i32, i32, i32) {
    %c0_i32 = arith.constant 0 : i32
    %c0_i32_0 = arith.constant 0 : i32
    %c0_i32_1 = arith.constant 0 : i32
    %c0_i32_2 = arith.constant 0 : i32
    return %c0_i32, %c0_i32_0, %arg0, %c0_i32_1 : i32, i32, i32, i32
  }
  func.func @transform_1(%arg0: i32) -> (i32, i32, i32) {
    %c0_i32 = arith.constant 0 : i32
    %c0_i32_0 = arith.constant 0 : i32
    %c0_i32_1 = arith.constant 0 : i32
    %c0_i32_2 = arith.constant 0 : i32
    return %c0_i32, %c0_i32_0, %c0_i32_1 : i32, i32, i32
  }
  func.func @transform_2(%arg0: i32) -> (i32, i32) {
    %c0_i32 = arith.constant 0 : i32
    %c0_i32_0 = arith.constant 0 : i32
    %c0_i32_1 = arith.constant 0 : i32
    return %c0_i32, %c0_i32_0 : i32, i32
  }
  func.func @transform_3(%arg0: i32) -> (i32, i32, i32) {
    %c0_i32 = arith.constant 0 : i32
    %c0_i32_0 = arith.constant 0 : i32
    %c0_i32_1 = arith.constant 0 : i32
    %c0_i32_2 = arith.constant 0 : i32
    return %c0_i32, %c0_i32_0, %c0_i32_1 : i32, i32, i32
  }
  func.func @transform_4(%arg0: i32) -> (i32, i32) {
    %c0_i32 = arith.constant 0 : i32
    %c0_i32_0 = arith.constant 0 : i32
    %c0_i32_1 = arith.constant 0 : i32
    return %c0_i32, %c0_i32_0 : i32, i32
  }
  func.func @transform_5(%arg0: i32) -> (i32, i32) {
    %c0_i32 = arith.constant 0 : i32
    %c0_i32_0 = arith.constant 0 : i32
    %c0_i32_1 = arith.constant 0 : i32
    return %c0_i32, %c0_i32_0 : i32, i32
  }
  func.func @transform_6(%arg0: i32) -> (i32, i32) {
    %c0_i32 = arith.constant 0 : i32
    %c0_i32_0 = arith.constant 0 : i32
    %c0_i32_1 = arith.constant 0 : i32
    return %c0_i32, %c0_i32_0 : i32, i32
  }
  func.func @transform_7(%arg0: i32) -> (i32, i32) {
    %c0_i32 = arith.constant 0 : i32
    %c0_i32_0 = arith.constant 0 : i32
    %c0_i32_1 = arith.constant 0 : i32
    return %c0_i32, %c0_i32_0 : i32, i32
  }
  func.func @transform_8(%arg0: i32) -> (i32, i32) {
    %c0_i32 = arith.constant 0 : i32
    %c0_i32_0 = arith.constant 0 : i32
    %c0_i32_1 = arith.constant 0 : i32
    return %c0_i32, %c0_i32_0 : i32, i32
  }
  func.func @transform_9(%arg0: i32) -> (i32, i32) {
    %c0_i32 = arith.constant 0 : i32
    %c0_i32_0 = arith.constant 0 : i32
    %c0_i32_1 = arith.constant 0 : i32
    return %c0_i32, %c0_i32_0 : i32, i32
  }
  func.func @transform_10(%arg0: i32) -> (i32, i32) {
    %c0_i32 = arith.constant 0 : i32
    %c0_i32_0 = arith.constant 0 : i32
    %c0_i32_1 = arith.constant 0 : i32
    return %c0_i32, %c0_i32_0 : i32, i32
  }
  func.func @transform_11(%arg0: i32) -> (i32, i32) {
    %c0_i32 = arith.constant 0 : i32
    %c0_i32_0 = arith.constant 0 : i32
    return %arg0, %c0_i32 : i32, i32
  }
}

</mosaic_0001>

<bundles_post_ra>
// kernel: qlearner_forward.1
= control target key start
LH: loop header
LB: loop body
LE: loop exit
PB: predicated region body
PF: predicated region fallthrough
CT: control target
= control target key end

     0   :  { %s22572_s17 = smov 0   ;;  %s22574_s18 = smov 0   ;;  %s25954_s0 = inlined_call_operand.vmem [shape: bf16[9,9,32,64], index: 0, kind: input, shape index: {}]   ;;  %s25955_s1 = inlined_call_operand.vmem [shape: bf16[4,64,128], index: 1, kind: input, shape index: {}]   ;;  %s25956_s2 = inlined_call_operand.vmem [shape: f32[1,128], index: 2, kind: input, shape index: {}]   ;;  %s25957_s3 = inlined_call_operand.vmem [shape: bf16[16,128,128], index: 3, kind: input, shape index: {}]   ;;  %s25958_s4 = inlined_call_operand.vmem [shape: f32[1,128], index: 4, kind: input, shape index: {}]   ;;  %s25959_s5 = inlined_call_operand.vmem [shape: bf16[1152,128], index: 5, kind: input, shape index: {}]   ;;  %s25960_s6 = inlined_call_operand.vmem [shape: f32[1,128], index: 6, kind: input, shape index: {}]   ;;  %s25961_s7 = inlined_call_operand.vmem [shape: bf16[128,512], index: 7, kind: input, shape index: {}]   ;;  %s25962_s8 = inlined_call_operand.vmem [shape: f32[1,512], index: 8, kind: input, shape index: {}]   ;;  %s25963_s9 = inlined_call_operand.vmem [shape: bf16[512,128], index: 9, kind: input, shape index: {}]   ;;  %s25964_s10 = inlined_call_operand.vmem [shape: f32[1,128], index: 10, kind: input, shape index: {}]   ;;  %s25965_s11 = inlined_call_operand.vmem [shape: f32[32,128], index: 11, kind: output, shape index: {}]  }
   0x1   :  { %s22576_s19 = smov 0  }
   0x2 LB: > { %s16782_s20 = sadd.s32 4294967295, %s22507_s19   ;;  %s22589_s21 = sadd.s32 1, %s22507_s19   ;;  %s22507_s19 = sphi %s22576_s19, %s26418_s19   ;;  %s22503_s18 = sphi %s22574_s18, %s26417_s18   ;;  %s22499_s17 = sphi %s22572_s17, %s26416_s17  }
   0x3   : > { %s25_s22 = ssub.s32 %s22507_s19, %s22589_s21  ;;  %s28_s23 = sadd.s32 1, %s22503_s18 }
   0x4   : > { %p26_p0 = scmp.eq.s32.totalorder %s25_s22, 0  ;;  %p35_p1 = scmp.ne.s32.totalorder %s22503_s18, %s22499_s17 }
   0x5   : > { %p36_p2 = scmp.eq.s32.totalorder %s22507_s19, 0  ;;  %p16785_p4 = scmp.ge.s32.totalorder %s22507_s19, 2 }
   0x6   : > { %s22598_s24 = scalar_select %p26_p0, %s22503_s18, %s28_s23  }
   0x7   : > { %p37_p3 = por %p36_p2, %p35_p1  ;;  %327 = sbr.rel (%p16785_p4) target bundleno = 59 (0x3b), region = 56 }
   0xe   : > { %330 = sbr.rel (!%p37_p3) target bundleno = 59 (0x3b), region = 60  ;;  %s332_s25 = sand.u32 (%p37_p3), 1, %s22503_s18  }
   0xf   : > { %s18237_s26 = sshll.u32 (%p37_p3), %s22507_s19, 3  ;;  %s21903_s27 = smul.u32 (%p37_p3), 648, %s332_s25 }
  0x10   : > { %s22606_s30 = scalar_lea.vmem (%p37_p3), %s25954_s0, %s18237_s26 }
  0x11   : > { %v353_v0 = vld [vmem:[%s22606_s30] sm:$0xff] (%p37_p3)   ;;  %v357_v1 = vld [vmem:[%s22606_s30 + $0x10] sm:$0xff] (%p37_p3)   ;;  %s22614_s12 = scalar_lea.vmem (%p37_p3), [#allocation4], %s21903_s27 }
  0x12   : > { %v361_v2 = vld [vmem:[%s22606_s30 + $0x20] sm:$0xff] (%p37_p3)   ;;  %v365_v3 = vld [vmem:[%s22606_s30 + $0x30] sm:$0xff] (%p37_p3)   ;;  %354 = vst [vmem:[%s22614_s12] sm:$0xff] (%p37_p3), %v353_v0   ;;  %358 = vst [vmem:[%s22614_s12 + $0x8] sm:$0xff] (%p37_p3), %v357_v1  }
  0x13   : > { %v369_v4 = vld [vmem:[%s22606_s30 + $0x40] sm:$0xff] (%p37_p3)   ;;  %v373_v5 = vld [vmem:[%s22606_s30 + $0x50] sm:$0xff] (%p37_p3)   ;;  %362 = vst [vmem:[%s22614_s12 + $0x10] sm:$0xff] (%p37_p3), %v361_v2   ;;  %366 = vst [vmem:[%s22614_s12 + $0x18] sm:$0xff] (%p37_p3), %v365_v3  }
  0x14   : > { %370 = vst [vmem:[%s22614_s12 + $0x20] sm:$0xff] (%p37_p3), %v369_v4   ;;  %374 = vst [vmem:[%s22614_s12 + $0x28] sm:$0xff] (%p37_p3), %v373_v5   ;;  %v377_v6 = vld [vmem:[%s22606_s30 + $0x60] sm:$0xff] (%p37_p3)   ;;  %v381_v7 = vld [vmem:[%s22606_s30 + $0x70] sm:$0xff] (%p37_p3)  }
  0x15   : > { %v385_v8 = vld [vmem:[%s22606_s30 + $0x80] sm:$0xff]   ;;  %378 = vst [vmem:[%s22614_s12 + $0x30] sm:$0xff] %v377_v6   ;;  %382 = vst [vmem:[%s22614_s12 + $0x38] sm:$0xff] %v381_v7   ;;  %v389_v9 = vld [vmem:[%s22606_s30 + $0x90] sm:$0xff]  }
  0x16   : > { %386 = vst [vmem:[%s22614_s12 + $0x40] sm:$0xff] %v385_v8   ;;  %v393_v10 = vld [vmem:[%s22606_s30 + $0xa0] sm:$0xff]   ;;  %v397_v11 = vld [vmem:[%s22606_s30 + $0xb0] sm:$0xff]   ;;  %390 = vst [vmem:[%s22614_s12 + $0x48] sm:$0xff] %v389_v9  }
  0x17   : > { %394 = vst [vmem:[%s22614_s12 + $0x50] sm:$0xff] %v393_v10   ;;  %398 = vst [vmem:[%s22614_s12 + $0x58] sm:$0xff] %v397_v11   ;;  %v401_v12 = vld [vmem:[%s22606_s30 + $0xc0] sm:$0xff]   ;;  %v405_v13 = vld [vmem:[%s22606_s30 + $0xd0] sm:$0xff]  }
  0x18   : > { %v409_v14 = vld [vmem:[%s22606_s30 + $0xe0] sm:$0xff]   ;;  %402 = vst [vmem:[%s22614_s12 + $0x60] sm:$0xff] %v401_v12   ;;  %406 = vst [vmem:[%s22614_s12 + $0x68] sm:$0xff] %v405_v13   ;;  %v413_v15 = vld [vmem:[%s22606_s30 + $0xf0] sm:$0xff]  }
  0x19   : > { %410 = vst [vmem:[%s22614_s12 + $0x70] sm:$0xff] %v409_v14   ;;  %v417_v16 = vld [vmem:[%s22606_s30 + $0x100] sm:$0xff]   ;;  %v421_v17 = vld [vmem:[%s22606_s30 + $0x110] sm:$0xff]   ;;  %414 = vst [vmem:[%s22614_s12 + $0x78] sm:$0xff] %v413_v15  }
  0x1a   : > { %418 = vst [vmem:[%s22614_s12 + $0x80] sm:$0xff] %v417_v16   ;;  %422 = vst [vmem:[%s22614_s12 + $0x88] sm:$0xff] %v421_v17   ;;  %v425_v18 = vld [vmem:[%s22606_s30 + $0x120] sm:$0xff]   ;;  %v429_v19 = vld [vmem:[%s22606_s30 + $0x130] sm:$0xff]  }
  0x1b   : > { %v433_v20 = vld [vmem:[%s22606_s30 + $0x140] sm:$0xff]   ;;  %426 = vst [vmem:[%s22614_s12 + $0x90] sm:$0xff] %v425_v18   ;;  %430 = vst [vmem:[%s22614_s12 + $0x98] sm:$0xff] %v429_v19   ;;  %v437_v21 = vld [vmem:[%s22606_s30 + $0x150] sm:$0xff]  }
  0x1c   : > { %434 = vst [vmem:[%s22614_s12 + $0xa0] sm:$0xff] %v433_v20   ;;  %v441_v22 = vld [vmem:[%s22606_s30 + $0x160] sm:$0xff]   ;;  %v445_v23 = vld [vmem:[%s22606_s30 + $0x170] sm:$0xff]   ;;  %438 = vst [vmem:[%s22614_s12 + $0xa8] sm:$0xff] %v437_v21  }
  0x1d   : > { %442 = vst [vmem:[%s22614_s12 + $0xb0] sm:$0xff] %v441_v22   ;;  %446 = vst [vmem:[%s22614_s12 + $0xb8] sm:$0xff] %v445_v23   ;;  %v449_v24 = vld [vmem:[%s22606_s30 + $0x180] sm:$0xff]   ;;  %v453_v25 = vld [vmem:[%s22606_s30 + $0x190] sm:$0xff]  }
  0x1e   : > { %v457_v26 = vld [vmem:[%s22606_s30 + $0x1a0] sm:$0xff]   ;;  %450 = vst [vmem:[%s22614_s12 + $0xc0] sm:$0xff] %v449_v24   ;;  %454 = vst [vmem:[%s22614_s12 + $0xc8] sm:$0xff] %v453_v25   ;;  %v461_v27 = vld [vmem:[%s22606_s30 + $0x1b0] sm:$0xff]  }
  0x1f   : > { %458 = vst [vmem:[%s22614_s12 + $0xd0] sm:$0xff] %v457_v26   ;;  %v465_v28 = vld [vmem:[%s22606_s30 + $0x1c0] sm:$0xff]   ;;  %v469_v29 = vld [vmem:[%s22606_s30 + $0x1d0] sm:$0xff]   ;;  %462 = vst [vmem:[%s22614_s12 + $0xd8] sm:$0xff] %v461_v27  }
  0x20   : > { %466 = vst [vmem:[%s22614_s12 + $0xe0] sm:$0xff] %v465_v28   ;;  %470 = vst [vmem:[%s22614_s12 + $0xe8] sm:$0xff] %v469_v29   ;;  %v473_v30 = vld [vmem:[%s22606_s30 + $0x1e0] sm:$0xff]   ;;  %v477_v31 = vld [vmem:[%s22606_s30 + $0x1f0] sm:$0xff]  }
  0x21   : > { %v481_v32 = vld [vmem:[%s22606_s30 + $0x200] sm:$0xff]   ;;  %474 = vst [vmem:[%s22614_s12 + $0xf0] sm:$0xff] %v473_v30   ;;  %478 = vst [vmem:[%s22614_s12 + $0xf8] sm:$0xff] %v477_v31   ;;  %v485_v33 = vld [vmem:[%s22606_s30 + $0x210] sm:$0xff]  }
  0x22   : > { %482 = vst [vmem:[%s22614_s12 + $0x100] sm:$0xff] %v481_v32   ;;  %v489_v34 = vld [vmem:[%s22606_s30 + $0x220] sm:$0xff]   ;;  %v493_v35 = vld [vmem:[%s22606_s30 + $0x230] sm:$0xff]   ;;  %486 = vst [vmem:[%s22614_s12 + $0x108] sm:$0xff] %v485_v33  }
  0x23   : > { %490 = vst [vmem:[%s22614_s12 + $0x110] sm:$0xff] %v489_v34   ;;  %494 = vst [vmem:[%s22614_s12 + $0x118] sm:$0xff] %v493_v35   ;;  %v497_v36 = vld [vmem:[%s22606_s30 + $0x240] sm:$0xff]   ;;  %v501_v37 = vld [vmem:[%s22606_s30 + $0x250] sm:$0xff]  }
  0x24   : > { %v505_v38 = vld [vmem:[%s22606_s30 + $0x260] sm:$0xff]   ;;  %498 = vst [vmem:[%s22614_s12 + $0x120] sm:$0xff] %v497_v36   ;;  %502 = vst [vmem:[%s22614_s12 + $0x128] sm:$0xff] %v501_v37   ;;  %v509_v39 = vld [vmem:[%s22606_s30 + $0x270] sm:$0xff]  }
  0x25   : > { %506 = vst [vmem:[%s22614_s12 + $0x130] sm:$0xff] %v505_v38   ;;  %v513_v40 = vld [vmem:[%s22606_s30 + $0x280] sm:$0xff]   ;;  %v517_v41 = vld [vmem:[%s22606_s30 + $0x290] sm:$0xff]   ;;  %510 = vst [vmem:[%s22614_s12 + $0x138] sm:$0xff] %v509_v39  }
  0x26   : > { %514 = vst [vmem:[%s22614_s12 + $0x140] sm:$0xff] %v513_v40   ;;  %518 = vst [vmem:[%s22614_s12 + $0x148] sm:$0xff] %v517_v41   ;;  %v521_v42 = vld [vmem:[%s22606_s30 + $0x2a0] sm:$0xff]   ;;  %v525_v43 = vld [vmem:[%s22606_s30 + $0x2b0] sm:$0xff]  }
  0x27   : > { %v529_v44 = vld [vmem:[%s22606_s30 + $0x2c0] sm:$0xff]   ;;  %522 = vst [vmem:[%s22614_s12 + $0x150] sm:$0xff] %v521_v42   ;;  %526 = vst [vmem:[%s22614_s12 + $0x158] sm:$0xff] %v525_v43   ;;  %v533_v45 = vld [vmem:[%s22606_s30 + $0x2d0] sm:$0xff]  }
  0x28   : > { %530 = vst [vmem:[%s22614_s12 + $0x160] sm:$0xff] %v529_v44   ;;  %v537_v46 = vld [vmem:[%s22606_s30 + $0x2e0] sm:$0xff]   ;;  %v541_v47 = vld [vmem:[%s22606_s30 + $0x2f0] sm:$0xff]   ;;  %534 = vst [vmem:[%s22614_s12 + $0x168] sm:$0xff] %v533_v45  }
  0x29   : > { %538 = vst [vmem:[%s22614_s12 + $0x170] sm:$0xff] %v537_v46   ;;  %542 = vst [vmem:[%s22614_s12 + $0x178] sm:$0xff] %v541_v47   ;;  %v545_v48 = vld [vmem:[%s22606_s30 + $0x300] sm:$0xff]   ;;  %v549_v49 = vld [vmem:[%s22606_s30 + $0x310] sm:$0xff]  }
  0x2a   : > { %v553_v50 = vld [vmem:[%s22606_s30 + $0x320] sm:$0xff]   ;;  %546 = vst [vmem:[%s22614_s12 + $0x180] sm:$0xff] %v545_v48   ;;  %550 = vst [vmem:[%s22614_s12 + $0x188] sm:$0xff] %v549_v49   ;;  %v557_v51 = vld [vmem:[%s22606_s30 + $0x330] sm:$0xff]  }
  0x2b   : > { %554 = vst [vmem:[%s22614_s12 + $0x190] sm:$0xff] %v553_v50   ;;  %v561_v52 = vld [vmem:[%s22606_s30 + $0x340] sm:$0xff]   ;;  %v565_v53 = vld [vmem:[%s22606_s30 + $0x350] sm:$0xff]   ;;  %558 = vst [vmem:[%s22614_s12 + $0x198] sm:$0xff] %v557_v51  }
  0x2c   : > { %562 = vst [vmem:[%s22614_s12 + $0x1a0] sm:$0xff] %v561_v52   ;;  %566 = vst [vmem:[%s22614_s12 + $0x1a8] sm:$0xff] %v565_v53   ;;  %v569_v54 = vld [vmem:[%s22606_s30 + $0x360] sm:$0xff]   ;;  %v573_v55 = vld [vmem:[%s22606_s30 + $0x370] sm:$0xff]  }
  0x2d   : > { %v577_v56 = vld [vmem:[%s22606_s30 + $0x380] sm:$0xff]   ;;  %570 = vst [vmem:[%s22614_s12 + $0x1b0] sm:$0xff] %v569_v54   ;;  %574 = vst [vmem:[%s22614_s12 + $0x1b8] sm:$0xff] %v573_v55   ;;  %v581_v57 = vld [vmem:[%s22606_s30 + $0x390] sm:$0xff]  }
  0x2e   : > { %578 = vst [vmem:[%s22614_s12 + $0x1c0] sm:$0xff] %v577_v56   ;;  %v585_v58 = vld [vmem:[%s22606_s30 + $0x3a0] sm:$0xff]   ;;  %v589_v59 = vld [vmem:[%s22606_s30 + $0x3b0] sm:$0xff]   ;;  %582 = vst [vmem:[%s22614_s12 + $0x1c8] sm:$0xff] %v581_v57  }
  0x2f   : > { %586 = vst [vmem:[%s22614_s12 + $0x1d0] sm:$0xff] %v585_v58   ;;  %590 = vst [vmem:[%s22614_s12 + $0x1d8] sm:$0xff] %v589_v59   ;;  %v593_v60 = vld [vmem:[%s22606_s30 + $0x3c0] sm:$0xff]   ;;  %v597_v61 = vld [vmem:[%s22606_s30 + $0x3d0] sm:$0xff]  }
  0x30   : > { %v601_v62 = vld [vmem:[%s22606_s30 + $0x3e0] sm:$0xff]   ;;  %594 = vst [vmem:[%s22614_s12 + $0x1e0] sm:$0xff] %v593_v60   ;;  %598 = vst [vmem:[%s22614_s12 + $0x1e8] sm:$0xff] %v597_v61   ;;  %v605_v63 = vld [vmem:[%s22606_s30 + $0x3f0] sm:$0xff]  }
  0x31   : > { %602 = vst [vmem:[%s22614_s12 + $0x1f0] sm:$0xff] %v601_v62   ;;  %v609_v0 = vld [vmem:[%s22606_s30 + $0x400] sm:$0xff]   ;;  %v613_v1 = vld [vmem:[%s22606_s30 + $0x410] sm:$0xff]   ;;  %606 = vst [vmem:[%s22614_s12 + $0x1f8] sm:$0xff] %v605_v63  }
  0x32   : > { %610 = vst [vmem:[%s22614_s12 + $0x200] sm:$0xff] %v609_v0   ;;  %614 = vst [vmem:[%s22614_s12 + $0x208] sm:$0xff] %v613_v1   ;;  %v617_v2 = vld [vmem:[%s22606_s30 + $0x420] sm:$0xff]   ;;  %v621_v3 = vld [vmem:[%s22606_s30 + $0x430] sm:$0xff]  }
  0x33   : > { %v625_v4 = vld [vmem:[%s22606_s30 + $0x440] sm:$0xff]   ;;  %618 = vst [vmem:[%s22614_s12 + $0x210] sm:$0xff] %v617_v2   ;;  %622 = vst [vmem:[%s22614_s12 + $0x218] sm:$0xff] %v621_v3   ;;  %v629_v5 = vld [vmem:[%s22606_s30 + $0x450] sm:$0xff]  }
  0x34   : > { %626 = vst [vmem:[%s22614_s12 + $0x220] sm:$0xff] %v625_v4   ;;  %v633_v6 = vld [vmem:[%s22606_s30 + $0x460] sm:$0xff]   ;;  %v637_v7 = vld [vmem:[%s22606_s30 + $0x470] sm:$0xff]   ;;  %630 = vst [vmem:[%s22614_s12 + $0x228] sm:$0xff] %v629_v5  }
  0x35   : > { %634 = vst [vmem:[%s22614_s12 + $0x230] sm:$0xff] %v633_v6   ;;  %638 = vst [vmem:[%s22614_s12 + $0x238] sm:$0xff] %v637_v7   ;;  %v641_v8 = vld [vmem:[%s22606_s30 + $0x480] sm:$0xff]   ;;  %v645_v9 = vld [vmem:[%s22606_s30 + $0x490] sm:$0xff]  }
  0x36   : > { %v649_v10 = vld [vmem:[%s22606_s30 + $0x4a0] sm:$0xff]   ;;  %642 = vst [vmem:[%s22614_s12 + $0x240] sm:$0xff] %v641_v8   ;;  %646 = vst [vmem:[%s22614_s12 + $0x248] sm:$0xff] %v645_v9   ;;  %v653_v11 = vld [vmem:[%s22606_s30 + $0x4b0] sm:$0xff]  }
  0x37   : > { %650 = vst [vmem:[%s22614_s12 + $0x250] sm:$0xff] %v649_v10   ;;  %v657_v12 = vld [vmem:[%s22606_s30 + $0x4c0] sm:$0xff]   ;;  %v661_v13 = vld [vmem:[%s22606_s30 + $0x4d0] sm:$0xff]   ;;  %654 = vst [vmem:[%s22614_s12 + $0x258] sm:$0xff] %v653_v11  }
  0x38   : > { %658 = vst [vmem:[%s22614_s12 + $0x260] sm:$0xff] %v657_v12   ;;  %662 = vst [vmem:[%s22614_s12 + $0x268] sm:$0xff] %v661_v13   ;;  %v665_v14 = vld [vmem:[%s22606_s30 + $0x4e0] sm:$0xff]   ;;  %v669_v15 = vld [vmem:[%s22606_s30 + $0x4f0] sm:$0xff]  }
  0x39   : > { %v673_v16 = vld [vmem:[%s22606_s30 + $0x500] sm:$0xff]   ;;  %666 = vst [vmem:[%s22614_s12 + $0x270] sm:$0xff] %v665_v14   ;;  %670 = vst [vmem:[%s22614_s12 + $0x278] sm:$0xff] %v669_v15  }
  0x3a   : > { %674 = vst [vmem:[%s22614_s12 + $0x280] sm:$0xff] %v673_v16  }
  0x3b PF: > { %p16788_p5 = scmp.ge.s32.totalorder %s22507_s19, 1  ;;  %p1022_p6 = scmp.lt.s32.totalorder %s22507_s19, 3 }
  0x3d   : > { %p1023_p7 = pnand %p16788_p5, %p1022_p6 }
  0x3f   : > { %1026 = sbr.rel (%p1023_p7) target bundleno = 3717 (0xe85), region = 101 }
  0x46   : > { %v21932_v17 = vld [vmem:[%s25955_s1 + $0x20] sm:$0xff]   ;;  %s1029_s15 = sand.u32 1, %s22499_s17   ;;  %v21933_v18 = vld [vmem:[%s25955_s1 + $0x28] sm:$0xff]   ;;  %v21934_v19 = vld [vmem:[%s25955_s1 + $0x30] sm:$0xff]   ;;  %vm1694_vm0 = vcmask 523264   ;;  %vm22511_vm1 = vmmov 0  }
  0x47   : > { %s21904_s23 = smul.u32 648, %s1029_s15  ;;  %19419 = vmatprep.subr.bf16.mxu0 %v21932_v17  ;;  %v21935_v21 = vld [vmem:[%s25955_s1 + $0x38] sm:$0xff]   ;;  %v21938_v22 = vld [vmem:[%s25955_s1] sm:$0xff]   ;;  %v21955_v27 = vld [vmem:[%s25955_s1 + $0x8] sm:$0xff]  }
  0x48   : > { %19420 = vmatpush3.bf16.msra.mxu0 %v21932_v17  ;;  %v21972_v32 = vld [vmem:[%s25955_s1 + $0x10] sm:$0xff]   ;;  %v21989_v43 = vld [vmem:[%s25955_s1 + $0x18] sm:$0xff]   ;;  %v22873_v60 = vld [vmem:[%s25955_s1 + $0x40] sm:$0xff]  }
  0x49   : > { %19421 = vmatprep.subr.bf16.mxu0 %v21933_v18  ;;  %s22784_s27 = scalar_lea.vmem [#allocation4], %s21904_s23 }
  0x4a   : > { %v21936_v20 = vld [vmem:[%s22784_s27 + $0x8] sm:$0xff]   ;;  %v21937_v23 = vld [vmem:[%s22784_s27 + $0x10] sm:$0xff]   ;;  %v21939_v24 = vld [vmem:[%s22784_s27 + $0x18] sm:$0xff]  }
  0x4b   : > { %19427 = vmatprep.mubr.msk.bf16.mxu0 %vm1694_vm0, %v21936_v20  ;;  %v21940_v25 = vld [vmem:[%s22784_s27 + $0x20] sm:$0xff]   ;;  %v21941_v26 = vld [vmem:[%s22784_s27 + $0x28] sm:$0xff]   ;;  %v21942_v28 = vld [vmem:[%s22784_s27 + $0x30] sm:$0xff]  }
  0x4c   : > { %19422 = vmatpush3.bf16.msra.mxu0 %v21933_v18  ;;  %v21943_v29 = vld [vmem:[%s22784_s27 + $0x38] sm:$0xff]   ;;  %v21944_v30 = vld [vmem:[%s22784_s27 + $0x40] sm:$0xff]   ;;  %v21945_v31 = vld [vmem:[%s22784_s27 + $0x50] sm:$0xff]  }
  0x4d   : > { %19423 = vmatprep.subr.bf16.mxu0 %v21934_v19  ;;  %v21946_v33 = vld [vmem:[%s22784_s27 + $0x58] sm:$0xff]   ;;  %v21947_v34 = vld [vmem:[%s22784_s27 + $0x60] sm:$0xff]   ;;  %v21948_v35 = vld [vmem:[%s22784_s27 + $0x68] sm:$0xff]  }
  0x4e   : > { %v21949_v36 = vld [vmem:[%s22784_s27 + $0x70] sm:$0xff]   ;;  %v21950_v37 = vld [vmem:[%s22784_s27 + $0x78] sm:$0xff]   ;;  %v21951_v38 = vld [vmem:[%s22784_s27 + $0x80] sm:$0xff]  }
  0x4f   : > { %v21952_v39 = vld [vmem:[%s22784_s27 + $0x88] sm:$0xff]   ;;  %v21953_v40 = vld [vmem:[%s22784_s27 + $0x98] sm:$0xff]   ;;  %v21954_v41 = vld [vmem:[%s22784_s27 + $0xa0] sm:$0xff]  }
  0x50   : > { %19424 = vmatpush3.bf16.msra.mxu0 %v21934_v19  ;;  %v21956_v42 = vld [vmem:[%s22784_s27 + $0xa8] sm:$0xff]   ;;  %v21957_v44 = vld [vmem:[%s22784_s27 + $0xb0] sm:$0xff]   ;;  %v21958_v45 = vld [vmem:[%s22784_s27 + $0xb8] sm:$0xff]  }
  0x51   : > { %19425 = vmatprep.subr.bf16.mxu0 %v21935_v21  ;;  %v21959_v46 = vld [vmem:[%s22784_s27 + $0xc0] sm:$0xff]   ;;  %v21960_v47 = vld [vmem:[%s22784_s27 + $0xc8] sm:$0xff]   ;;  %v21961_v48 = vld [vmem:[%s22784_s27 + $0xd0] sm:$0xff]  }
  0x52   : > { %v21962_v49 = vld [vmem:[%s22784_s27 + $0xe0] sm:$0xff]   ;;  %v21963_v50 = vld [vmem:[%s22784_s27 + $0xe8] sm:$0xff]   ;;  %v21964_v51 = vld [vmem:[%s22784_s27 + $0xf0] sm:$0xff]  }
  0x53   : > { %v21965_v52 = vld [vmem:[%s22784_s27 + $0xf8] sm:$0xff]   ;;  %v21966_v53 = vld [vmem:[%s22784_s27 + $0x100] sm:$0xff]   ;;  %v21967_v54 = vld [vmem:[%s22784_s27 + $0x108] sm:$0xff]  }
  0x54   : > { %19426 = vmatpush3.bf16.msra.mxu0 %v21935_v21  ;;  %v21968_v55 = vld [vmem:[%s22784_s27 + $0x110] sm:$0xff]   ;;  %v21969_v56 = vld [vmem:[%s22784_s27 + $0x118] sm:$0xff]   ;;  %v21970_v57 = vld [vmem:[%s22784_s27 + $0x128] sm:$0xff]  }
  0x55   : > { %19555 = vmatprep.subr.bf16.mxu0 %v21938_v22  ;;  %v21971_v58 = vld [vmem:[%s22784_s27 + $0x130] sm:$0xff]   ;;  %v21973_v59 = vld [vmem:[%s22784_s27 + $0x138] sm:$0xff]   ;;  %v21974_v61 = vld [vmem:[%s22784_s27 + $0x140] sm:$0xff]  }
  0x56   : > { %v21975_v62 = vld [vmem:[%s22784_s27 + $0x148] sm:$0xff]   ;;  %v21976_v63 = vld [vmem:[%s22784_s27 + $0x150] sm:$0xff]   ;;  %v21977_v0 = vld [vmem:[%s22784_s27 + $0x158] sm:$0xff]  }
  0x57   : > { %19428 = vmatmul.mubr.msk.bf16.vlgmr.msra.gmra.mrb[0].mxu0 %vm1694_vm0, %v21937_v23  ;;  %v21978_v1 = vld [vmem:[%s22784_s27 + $0x160] sm:$0xff]   ;;  %v21979_v2 = vld [vmem:[%s22784_s27 + $0x170] sm:$0xff]   ;;  %v21980_v3 = vld [vmem:[%s22784_s27 + $0x178] sm:$0xff]  }
  0x58   : > { %19556 = vmatpush3.bf16.msra.mxu0 %v21938_v22  ;;  %19431 = vmatprep.mubr.msk.bf16.mxu0 %vm1694_vm0, %v21939_v24  ;;  %v21981_v4 = vld [vmem:[%s22784_s27 + $0x180] sm:$0xff]   ;;  %v21982_v5 = vld [vmem:[%s22784_s27 + $0x188] sm:$0xff]   ;;  %v21983_v6 = vld [vmem:[%s22784_s27 + $0x190] sm:$0xff]  }
  0x59   : > { %19557 = vmatprep.subr.bf16.mxu0 %v21955_v27  ;;  %v21984_v7 = vld [vmem:[%s22784_s27 + $0x198] sm:$0xff]   ;;  %v21985_v8 = vld [vmem:[%s22784_s27 + $0x1a0] sm:$0xff]   ;;  %v21986_v9 = vld [vmem:[%s22784_s27 + $0x1a8] sm:$0xff]  }
  0x5a   : > { %v21987_v10 = vld [vmem:[%s22784_s27 + $0x1b8] sm:$0xff]   ;;  %v21988_v11 = vld [vmem:[%s22784_s27 + $0x1c0] sm:$0xff]   ;;  %v21990_v12 = vld [vmem:[%s22784_s27 + $0x1c8] sm:$0xff]  }
  0x5b   : > { %v21991_v13 = vld [vmem:[%s22784_s27 + $0x1d0] sm:$0xff]   ;;  %v21992_v14 = vld [vmem:[%s22784_s27 + $0x1d8] sm:$0xff]   ;;  %v21993_v15 = vld [vmem:[%s22784_s27 + $0x1e0] sm:$0xff]  }
  0x5c   : > { %19558 = vmatpush3.bf16.msra.mxu0 %v21955_v27  ;;  %v21994_v16 = vld [vmem:[%s22784_s27 + $0x1e8] sm:$0xff]   ;;  %v21995_v17 = vld [vmem:[%s22784_s27 + $0x1f0] sm:$0xff]   ;;  %v21996_v18 = vld [vmem:[%s22784_s27 + $0x200] sm:$0xff]  }
  0x5d   : > { %19559 = vmatprep.subr.bf16.mxu0 %v21972_v32  ;;  %v21997_v19 = vld [vmem:[%s22784_s27 + $0x208] sm:$0xff]   ;;  %v21998_v20 = vld [vmem:[%s22784_s27 + $0x210] sm:$0xff]   ;;  %v21999_v21 = vld [vmem:[%s22784_s27 + $0x218] sm:$0xff]  }
  0x5e   : > { %v22000_v22 = vld [vmem:[%s22784_s27 + $0x220] sm:$0xff]   ;;  %v22001_v23 = vld [vmem:[%s22784_s27 + $0x228] sm:$0xff]   ;;  %v22002_v24 = vld [vmem:[%s22784_s27 + $0x230] sm:$0xff]  }
  0x5f   : > { %19432 = vmatmul.mubr.msk.bf16.gmra.mrb[4].mxu0 %vm1694_vm0, %v21940_v25  ;;  %v22003_v25 = vld [vmem:[%s22784_s27 + $0x238] sm:$0xff]   ;;  %v22005_v27 = vld [vmem:[%s22784_s27 + $0x8] sm:$0xff]  }
  0x60   : > { %19435 = vmatprep.mubr.msk.bf16.mxu0 %vm1694_vm0, %v21941_v26  ;;  %19560 = vmatpush3.bf16.msra.mxu0 %v21972_v32  ;;  %v22004_v26 = vld [vmem:[%s22784_s27] sm:$0xff]  }
  0x61   : > { %19561 = vmatprep.subr.bf16.mxu0 %v21989_v43  ;;  %v22009_v32 = vld [vmem:[%s22784_s27 + $0x20] sm:$0xff]  }
  0x64   : > { %19562 = vmatpush3.bf16.msra.mxu0 %v21989_v43  ;;  %v22020_v43 = vld [vmem:[%s22784_s27 + $0x80] sm:$0xff]  }
  0x65   : > { %19691 = vmatprep.subr.bf16.mxu0 %v22873_v60 }
  0x67   : > { %19436 = vmatmul.mubr.msk.bf16.gmra.mrb[8].mxu0 %vm1694_vm0, %v21942_v28  ;;  %v22007_v28 = vld [vmem:[%s22784_s27 + $0x10] sm:$0xff]  }
  0x68   : > { %19439 = vmatprep.mubr.msk.bf16.mxu0 %vm1694_vm0, %v21943_v29  ;;  %v22023_v29 = vld [vmem:[%s25955_s1 + $0x48] sm:$0xff]  }
  0x6f   : > { %19440 = vmatmul.mubr.msk.bf16.gmra.mrb[12].mxu0 %vm1694_vm0, %v21944_v30  ;;  %v22040_v30 = vld [vmem:[%s25955_s1 + $0x50] sm:$0xff]  }
  0x70   : > { %19443 = vmatprep.mubr.msk.bf16.mxu0 %vm1694_vm0, %v21945_v31  ;;  %v22008_v31 = vld [vmem:[%s22784_s27 + $0x18] sm:$0xff]  }
  0x77   : > { %19444 = vmatmul.mubr.msk.bf16.gmra.mrb[16].mxu0 %vm1694_vm0, %v21946_v33  ;;  %v22010_v33 = vld [vmem:[%s22784_s27 + $0x28] sm:$0xff]  }
  0x78   : > { %19447 = vmatprep.mubr.msk.bf16.mxu0 %vm1694_vm0, %v21947_v34  ;;  %v22011_v34 = vld [vmem:[%s22784_s27 + $0x30] sm:$0xff]  }
  0x7f   : > { %19448 = vmatmul.mubr.msk.bf16.gmra.mrb[20].mxu0 %vm1694_vm0, %v21948_v35  ;;  %v22012_v35 = vld [vmem:[%s22784_s27 + $0x38] sm:$0xff]  }
  0x80   : > { %19451 = vmatprep.mubr.msk.bf16.mxu0 %vm1694_vm0, %v21949_v36  ;;  %v22013_v36 = vld [vmem:[%s22784_s27 + $0x48] sm:$0xff]  }
  0x87   : > { %19452 = vmatmul.mubr.msk.bf16.gmra.mrb[24].mxu0 %vm1694_vm0, %v21950_v37  ;;  %v22014_v37 = vld [vmem:[%s22784_s27 + $0x50] sm:$0xff]  }
  0x88   : > { %19455 = vmatprep.mubr.msk.bf16.mxu0 %vm1694_vm0, %v21951_v38  ;;  %v22015_v38 = vld [vmem:[%s22784_s27 + $0x58] sm:$0xff]  }
  0x8f   : > { %19456 = vmatmul.mubr.msk.bf16.gmra.mrb[28].mxu0 %vm1694_vm0, %v21952_v39  ;;  %v22016_v39 = vld [vmem:[%s22784_s27 + $0x60] sm:$0xff]  }
  0x90   : > { %19459 = vmatprep.mubr.msk.bf16.mxu0 %vm1694_vm0, %v21953_v40  ;;  %v22017_v40 = vld [vmem:[%s22784_s27 + $0x68] sm:$0xff]  }
  0x97   : > { %19460 = vmatmul.mubr.msk.bf16.gmra.mrb[32].mxu0 %vm1694_vm0, %v21954_v41  ;;  %v22018_v41 = vld [vmem:[%s22784_s27 + $0x70] sm:$0xff]  }
  0x98   : > { %19463 = vmatprep.mubr.msk.bf16.mxu0 %vm1694_vm0, %v21956_v42  ;;  %v22019_v42 = vld [vmem:[%s22784_s27 + $0x78] sm:$0xff]  }
  0x9f   : > { %19464 = vmatmul.mubr.msk.bf16.gmra.mrb[36].mxu0 %vm1694_vm0, %v21957_v44  ;;  %v22021_v44 = vld [vmem:[%s22784_s27 + $0x90] sm:$0xff]  }
  0xa0   : > { %19467 = vmatprep.mubr.msk.bf16.mxu0 %vm1694_vm0, %v21958_v45  ;;  %v22022_v45 = vld [vmem:[%s22784_s27 + $0x98] sm:$0xff]  }
  0xa7   : > { %19468 = vmatmul.mubr.msk.bf16.gmra.mrb[40].mxu0 %vm1694_vm0, %v21959_v46  ;;  %v22024_v46 = vld [vmem:[%s22784_s27 + $0xa0] sm:$0xff]  }
  0xa8   : > { %19471 = vmatprep.mubr.msk.bf16.mxu0 %vm1694_vm0, %v21960_v47  ;;  %v22057_v47 = vld [vmem:[%s25955_s1 + $0x58] sm:$0xff]  }
  0xaf   : > { %19472 = vmatmul.mubr.msk.bf16.gmra.mrb[44].mxu0 %vm1694_vm0, %v21961_v48  ;;  %v22025_v48 = vld [vmem:[%s22784_s27 + $0xa8] sm:$0xff]  }
  0xb0   : > { %19475 = vmatprep.mubr.msk.bf16.mxu0 %vm1694_vm0, %v21962_v49  ;;  %v22026_v49 = vld [vmem:[%s22784_s27 + $0xb0] sm:$0xff]  }
  0xb7   : > { %19476 = vmatmul.mubr.msk.bf16.gmra.mrb[48].mxu0 %vm1694_vm0, %v21963_v50  ;;  %v22027_v50 = vld [vmem:[%s22784_s27 + $0xb8] sm:$0xff]  }
  0xb8   : > { %19479 = vmatprep.mubr.msk.bf16.mxu0 %vm1694_vm0, %v21964_v51  ;;  %v22028_v51 = vld [vmem:[%s22784_s27 + $0xc0] sm:$0xff]  }
  0xbf   : > { %19480 = vmatmul.mubr.msk.bf16.gmra.mrb[52].mxu0 %vm1694_vm0, %v21965_v52  ;;  %v22029_v52 = vld [vmem:[%s22784_s27 + $0xc8] sm:$0xff]  }
  0xc0   : > { %19483 = vmatprep.mubr.msk.bf16.mxu0 %vm1694_vm0, %v21966_v53  ;;  %v22030_v53 = vld [vmem:[%s22784_s27 + $0xd8] sm:$0xff]  }
  0xc7   : > { %19484 = vmatmul.mubr.msk.bf16.gmra.mrb[56].mxu0 %vm1694_vm0, %v21967_v54  ;;  %v22031_v54 = vld [vmem:[%s22784_s27 + $0xe0] sm:$0xff]  }
  0xc8   : > { %19487 = vmatprep.mubr.msk.bf16.mxu0 %vm1694_vm0, %v21968_v55  ;;  %v22032_v55 = vld [vmem:[%s22784_s27 + $0xe8] sm:$0xff]  }
  0xcf   : > { %19488 = vmatmul.mubr.msk.bf16.gmra.mrb[60].mxu0 %vm1694_vm0, %v21969_v56  ;;  %v22033_v56 = vld [vmem:[%s22784_s27 + $0xf0] sm:$0xff]  }
  0xd0   : > { %19491 = vmatprep.mubr.msk.bf16.mxu0 %vm1694_vm0, %v21970_v57  ;;  %v22034_v57 = vld [vmem:[%s22784_s27 + $0xf8] sm:$0xff]  }
  0xd7   : > { %19492 = vmatmul.mubr.msk.bf16.gmra.mrb[64].mxu0 %vm1694_vm0, %v21971_v58  ;;  %v22035_v58 = vld [vmem:[%s22784_s27 + $0x100] sm:$0xff]  }
  0xd8   : > { %19495 = vmatprep.mubr.msk.bf16.mxu0 %vm1694_vm0, %v21973_v59  ;;  %v22036_v59 = vld [vmem:[%s22784_s27 + $0x108] sm:$0xff]  }
  0xdf   : > { %19496 = vmatmul.mubr.msk.bf16.gmra.mrb[68].mxu0 %vm1694_vm0, %v21974_v61  ;;  %v22038_v61 = vld [vmem:[%s22784_s27 + $0x120] sm:$0xff]  }
  0xe0   : > { %19499 = vmatprep.mubr.msk.bf16.mxu0 %vm1694_vm0, %v21975_v62  ;;  %v22039_v62 = vld [vmem:[%s22784_s27 + $0x128] sm:$0xff]  }
  0xe7   : > { %19500 = vmatmul.mubr.msk.bf16.gmra.mrb[72].mxu0 %vm1694_vm0, %v21976_v63  ;;  %v22041_v63 = vld [vmem:[%s22784_s27 + $0x130] sm:$0xff]  }
  0xe8   : > { %19503 = vmatprep.mubr.msk.bf16.mxu0 %vm1694_vm0, %v21977_v0  ;;  %v23017_v0 = vld [vmem:[%s25955_s1 + $0x60] sm:$0xff]  }
  0xef   : > { %19504 = vmatmul.mubr.msk.bf16.gmra.mrb[76].mxu0 %vm1694_vm0, %v21978_v1  ;;  %v22042_v1 = vld [vmem:[%s22784_s27 + $0x138] sm:$0xff]  }
  0xf0   : > { %19507 = vmatprep.mubr.msk.bf16.mxu0 %vm1694_vm0, %v21979_v2  ;;  %v22043_v2 = vld [vmem:[%s22784_s27 + $0x140] sm:$0xff]  }
  0xf7   : > { %19508 = vmatmul.mubr.msk.bf16.gmra.mrb[80].mxu0 %vm1694_vm0, %v21980_v3  ;;  %v22044_v3 = vld [vmem:[%s22784_s27 + $0x148] sm:$0xff]  }
  0xf8   : > { %19511 = vmatprep.mubr.msk.bf16.mxu0 %vm1694_vm0, %v21981_v4  ;;  %v22045_v4 = vld [vmem:[%s22784_s27 + $0x150] sm:$0xff]  }
  0xff   : > { %19512 = vmatmul.mubr.msk.bf16.gmra.mrb[84].mxu0 %vm1694_vm0, %v21982_v5  ;;  %v22046_v5 = vld [vmem:[%s22784_s27 + $0x158] sm:$0xff]  }
 0x100   : > { %19515 = vmatprep.mubr.msk.bf16.mxu0 %vm1694_vm0, %v21983_v6  ;;  %v22047_v6 = vld [vmem:[%s22784_s27 + $0x168] sm:$0xff]  }
 0x107   : > { %19516 = vmatmul.mubr.msk.bf16.gmra.mrb[88].mxu0 %vm1694_vm0, %v21984_v7  ;;  %v22048_v7 = vld [vmem:[%s22784_s27 + $0x170] sm:$0xff]  }
 0x108   : > { %19519 = vmatprep.mubr.msk.bf16.mxu0 %vm1694_vm0, %v21985_v8  ;;  %v22049_v8 = vld [vmem:[%s22784_s27 + $0x178] sm:$0xff]  }
 0x10f   : > { %19520 = vmatmul.mubr.msk.bf16.gmra.mrb[92].mxu0 %vm1694_vm0, %v21986_v9  ;;  %v22050_v9 = vld [vmem:[%s22784_s27 + $0x180] sm:$0xff]  }
 0x110   : > { %19523 = vmatprep.mubr.msk.bf16.mxu0 %vm1694_vm0, %v21987_v10  ;;  %v22051_v10 = vld [vmem:[%s22784_s27 + $0x188] sm:$0xff]  }
 0x117   : > { %19524 = vmatmul.mubr.msk.bf16.gmra.mrb[96].mxu0 %vm1694_vm0, %v21988_v11  ;;  %v22052_v11 = vld [vmem:[%s22784_s27 + $0x190] sm:$0xff]  }
 0x118   : > { %19527 = vmatprep.mubr.msk.bf16.mxu0 %vm1694_vm0, %v21990_v12  ;;  %v22053_v12 = vld [vmem:[%s22784_s27 + $0x198] sm:$0xff]  }
 0x11f   : > { %19528 = vmatmul.mubr.msk.bf16.gmra.mrb[100].mxu0 %vm1694_vm0, %v21991_v13  ;;  %v22054_v13 = vld [vmem:[%s22784_s27 + $0x1a0] sm:$0xff]  }
 0x120   : > { %19531 = vmatprep.mubr.msk.bf16.mxu0 %vm1694_vm0, %v21992_v14  ;;  %v22055_v14 = vld [vmem:[%s22784_s27 + $0x1b0] sm:$0xff]  }
 0x127   : > { %19532 = vmatmul.mubr.msk.bf16.gmra.mrb[104].mxu0 %vm1694_vm0, %v21993_v15  ;;  %v22056_v15 = vld [vmem:[%s22784_s27 + $0x1b8] sm:$0xff]  }
 0x128   : > { %19535 = vmatprep.mubr.msk.bf16.mxu0 %vm1694_vm0, %v21994_v16  ;;  %v22058_v16 = vld [vmem:[%s22784_s27 + $0x1c0] sm:$0xff]  }
 0x12f   : > { %19536 = vmatmul.mubr.msk.bf16.gmra.mrb[108].mxu0 %vm1694_vm0, %v21995_v17  ;;  %v22059_v17 = vld [vmem:[%s22784_s27 + $0x1c8] sm:$0xff]  }
 0x130   : > { %19539 = vmatprep.mubr.msk.bf16.mxu0 %vm1694_vm0, %v21996_v18  ;;  %v22060_v18 = vld [vmem:[%s22784_s27 + $0x1d0] sm:$0xff]  }
 0x137   : > { %19540 = vmatmul.mubr.msk.bf16.gmra.mrb[112].mxu0 %vm1694_vm0, %v21997_v19  ;;  %v22061_v19 = vld [vmem:[%s22784_s27 + $0x1d8] sm:$0xff]  }
 0x138   : > { %19543 = vmatprep.mubr.msk.bf16.mxu0 %vm1694_vm0, %v21998_v20  ;;  %v22062_v20 = vld [vmem:[%s22784_s27 + $0x1e0] sm:$0xff]  }
 0x13f   : > { %19544 = vmatmul.mubr.msk.bf16.gmra.mrb[116].mxu0 %vm1694_vm0, %v21999_v21  ;;  %v22063_v21 = vld [vmem:[%s22784_s27 + $0x1e8] sm:$0xff]  }
 0x140   : > { %19547 = vmatprep.mubr.msk.bf16.mxu0 %vm1694_vm0, %v22000_v22  ;;  %v22064_v22 = vld [vmem:[%s22784_s27 + $0x1f8] sm:$0xff]  }
 0x147   : > { %19548 = vmatmul.mubr.msk.bf16.gmra.mrb[120].mxu0 %vm1694_vm0, %v22001_v23  ;;  %v22065_v23 = vld [vmem:[%s22784_s27 + $0x200] sm:$0xff]  }
 0x148   : > { %19551 = vmatprep.mubr.msk.bf16.mxu0 %vm1694_vm0, %v22002_v24  ;;  %v22066_v24 = vld [vmem:[%s22784_s27 + $0x208] sm:$0xff]  }
 0x14f   : > { %19552 = vmatmul.mubr.msk.bf16.gmra.mrb[124].mxu0 %vm1694_vm0, %v22003_v25  ;;  %v22067_v25 = vld [vmem:[%s22784_s27 + $0x210] sm:$0xff]  }
 0x150   : > { %19563 = vmatprep.mubr.msk.bf16.mxu0 %vm1694_vm0, %v22004_v26  ;;  %v22068_v26 = vld [vmem:[%s22784_s27 + $0x218] sm:$0xff]  }
 0x157   : > { %19564 = vmatmul.mubr.msk.bf16.vlgmr.msra.gmra.mrb[0].mxu0 %vm1694_vm0, %v22005_v27  ;;  %v22069_v27 = vld [vmem:[%s22784_s27 + $0x220] sm:$0xff]  }
 0x158   : > { %19692 = vmatpush3.bf16.msra.mxu0 %v22873_v60  ;;  %19567 = vmatprep.mubr.msk.bf16.mxu0 %vm1694_vm0, %v22007_v28  ;;  %v22037_v60 = vld [vmem:[%s22784_s27 + $0x110] sm:$0xff]   ;;  %v22070_v28 = vld [vmem:[%s22784_s27 + $0x228] sm:$0xff]  }
 0x159   : > { %19693 = vmatprep.subr.bf16.mxu0 %v22023_v29 }
 0x15c   : > { %19694 = vmatpush3.bf16.msra.mxu0 %v22023_v29  ;;  %v22071_v29 = vld [vmem:[%s22784_s27 + $0x230] sm:$0xff]  }
 0x15d   : > { %19695 = vmatprep.subr.bf16.mxu0 %v22040_v30 }
 0x15f   : > { %19568 = vmatmul.mubr.msk.bf16.gmra.mrb[4].mxu0 %vm1694_vm0, %v22008_v31  ;;  %v22073_v31 = vld [vmem:[%s22784_s27 + $0x50] sm:$0xff]  }
 0x160   : > { %19571 = vmatprep.mubr.msk.bf16.mxu0 %vm1694_vm0, %v22009_v32  ;;  %19696 = vmatpush3.bf16.msra.mxu0 %v22040_v30  ;;  %v22072_v30 = vld [vmem:[%s22784_s27 + $0x48] sm:$0xff]   ;;  %v22075_v32 = vld [vmem:[%s22784_s27 + $0x58] sm:$0xff]  }
 0x161   : > { %19697 = vmatprep.subr.bf16.mxu0 %v22057_v47 }
 0x164   : > { %19698 = vmatpush3.bf16.msra.mxu0 %v22057_v47  ;;  %v22088_v47 = vld [vmem:[%s22784_s27 + $0xc8] sm:$0xff]  }
 0x165   : > { %19827 = vmatprep.subr.bf16.mxu0 %v23017_v0 }
 0x167   : > { %19572 = vmatmul.mubr.msk.bf16.gmra.mrb[8].mxu0 %vm1694_vm0, %v22010_v33  ;;  %v22091_v33 = vld [vmem:[%s25955_s1 + $0x68] sm:$0xff]  }
 0x168   : > { %19575 = vmatprep.mubr.msk.bf16.mxu0 %vm1694_vm0, %v22011_v34  ;;  %v22108_v34 = vld [vmem:[%s25955_s1 + $0x70] sm:$0xff]  }
 0x16f   : > { %19576 = vmatmul.mubr.msk.bf16.gmra.mrb[12].mxu0 %vm1694_vm0, %v22012_v35  ;;  %v22076_v35 = vld [vmem:[%s22784_s27 + $0x60] sm:$0xff]  }
 0x170   : > { %19579 = vmatprep.mubr.msk.bf16.mxu0 %vm1694_vm0, %v22013_v36  ;;  %v22077_v36 = vld [vmem:[%s22784_s27 + $0x68] sm:$0xff]  }
 0x177   : > { %19580 = vmatmul.mubr.msk.bf16.gmra.mrb[16].mxu0 %vm1694_vm0, %v22014_v37  ;;  %v22078_v37 = vld [vmem:[%s22784_s27 + $0x70] sm:$0xff]  }
 0x178   : > { %19583 = vmatprep.mubr.msk.bf16.mxu0 %vm1694_vm0, %v22015_v38  ;;  %v22079_v38 = vld [vmem:[%s22784_s27 + $0x78] sm:$0xff]  }
 0x17f   : > { %19584 = vmatmul.mubr.msk.bf16.gmra.mrb[20].mxu0 %vm1694_vm0, %v22016_v39  ;;  %v22080_v39 = vld [vmem:[%s22784_s27 + $0x80] sm:$0xff]  }
 0x180   : > { %19587 = vmatprep.mubr.msk.bf16.mxu0 %vm1694_vm0, %v22017_v40  ;;  %v22081_v40 = vld [vmem:[%s22784_s27 + $0x90] sm:$0xff]  }
 0x187   : > { %19588 = vmatmul.mubr.msk.bf16.gmra.mrb[24].mxu0 %vm1694_vm0, %v22018_v41  ;;  %v22082_v41 = vld [vmem:[%s22784_s27 + $0x98] sm:$0xff]  }
 0x188   : > { %19591 = vmatprep.mubr.msk.bf16.mxu0 %vm1694_vm0, %v22019_v42  ;;  %v22083_v42 = vld [vmem:[%s22784_s27 + $0xa0] sm:$0xff]  }
 0x18f   : > { %19592 = vmatmul.mubr.msk.bf16.gmra.mrb[28].mxu0 %vm1694_vm0, %v22020_v43  ;;  %v22084_v43 = vld [vmem:[%s22784_s27 + $0xa8] sm:$0xff]  }
 0x190   : > { %19595 = vmatprep.mubr.msk.bf16.mxu0 %vm1694_vm0, %v22021_v44  ;;  %v22085_v44 = vld [vmem:[%s22784_s27 + $0xb0] sm:$0xff]  }
 0x197   : > { %19596 = vmatmul.mubr.msk.bf16.gmra.mrb[32].mxu0 %vm1694_vm0, %v22022_v45  ;;  %v22086_v45 = vld [vmem:[%s22784_s27 + $0xb8] sm:$0xff]  }
 0x198   : > { %19599 = vmatprep.mubr.msk.bf16.mxu0 %vm1694_vm0, %v22024_v46  ;;  %v22087_v46 = vld [vmem:[%s22784_s27 + $0xc0] sm:$0xff]  }
 0x19f   : > { %19600 = vmatmul.mubr.msk.bf16.gmra.mrb[36].mxu0 %vm1694_vm0, %v22025_v48  ;;  %v22089_v48 = vld [vmem:[%s22784_s27 + $0xd8] sm:$0xff]  }
 0x1a0   : > { %19603 = vmatprep.mubr.msk.bf16.mxu0 %vm1694_vm0, %v22026_v49  ;;  %v22090_v49 = vld [vmem:[%s22784_s27 + $0xe0] sm:$0xff]  }
 0x1a7   : > { %19604 = vmatmul.mubr.msk.bf16.gmra.mrb[40].mxu0 %vm1694_vm0, %v22027_v50  ;;  %v22092_v50 = vld [vmem:[%s22784_s27 + $0xe8] sm:$0xff]  }
 0x1a8   : > { %19607 = vmatprep.mubr.msk.bf16.mxu0 %vm1694_vm0, %v22028_v51  ;;  %v22125_v51 = vld [vmem:[%s25955_s1 + $0x78] sm:$0xff]  }
 0x1af   : > { %19608 = vmatmul.mubr.msk.bf16.gmra.mrb[44].mxu0 %vm1694_vm0, %v22029_v52  ;;  %v22093_v52 = vld [vmem:[%s22784_s27 + $0xf0] sm:$0xff]  }
 0x1b0   : > { %19611 = vmatprep.mubr.msk.bf16.mxu0 %vm1694_vm0, %v22030_v53  ;;  %v22094_v53 = vld [vmem:[%s22784_s27 + $0xf8] sm:$0xff]  }
 0x1b7   : > { %19612 = vmatmul.mubr.msk.bf16.gmra.mrb[48].mxu0 %vm1694_vm0, %v22031_v54  ;;  %v22095_v54 = vld [vmem:[%s22784_s27 + $0x100] sm:$0xff]  }
 0x1b8   : > { %19615 = vmatprep.mubr.msk.bf16.mxu0 %vm1694_vm0, %v22032_v55  ;;  %v22096_v55 = vld [vmem:[%s22784_s27 + $0x108] sm:$0xff]  }
 0x1bf   : > { %19616 = vmatmul.mubr.msk.bf16.gmra.mrb[52].mxu0 %vm1694_vm0, %v22033_v56  ;;  %v22097_v56 = vld [vmem:[%s22784_s27 + $0x110] sm:$0xff]  }
 0x1c0   : > { %19619 = vmatprep.mubr.msk.bf16.mxu0 %vm1694_vm0, %v22034_v57  ;;  %v22098_v57 = vld [vmem:[%s22784_s27 + $0x120] sm:$0xff]  }
 0x1c7   : > { %19620 = vmatmul.mubr.msk.bf16.gmra.mrb[56].mxu0 %vm1694_vm0, %v22035_v58  ;;  %v22099_v58 = vld [vmem:[%s22784_s27 + $0x128] sm:$0xff]  }
 0x1c8   : > { %19623 = vmatprep.mubr.msk.bf16.mxu0 %vm1694_vm0, %v22036_v59  ;;  %v22100_v59 = vld [vmem:[%s22784_s27 + $0x130] sm:$0xff]  }
 0x1cf   : > { %19624 = vmatmul.mubr.msk.bf16.gmra.mrb[60].mxu0 %vm1694_vm0, %v22037_v60  ;;  %v22101_v60 = vld [vmem:[%s22784_s27 + $0x138] sm:$0xff]  }
 0x1d0   : > { %19627 = vmatprep.mubr.msk.bf16.mxu0 %vm1694_vm0, %v22038_v61  ;;  %v22102_v61 = vld [vmem:[%s22784_s27 + $0x140] sm:$0xff]  }
 0x1d7   : > { %19628 = vmatmul.mubr.msk.bf16.gmra.mrb[64].mxu0 %vm1694_vm0, %v22039_v62  ;;  %v22103_v62 = vld [vmem:[%s22784_s27 + $0x148] sm:$0xff]  }
 0x1d8   : > { %19631 = vmatprep.mubr.msk.bf16.mxu0 %vm1694_vm0, %v22041_v63  ;;  %v22104_v63 = vld [vmem:[%s22784_s27 + $0x150] sm:$0xff]  }
 0x1df   : > { %19632 = vmatmul.mubr.msk.bf16.gmra.mrb[68].mxu0 %vm1694_vm0, %v22042_v1  ;;  %v22106_v1 = vld [vmem:[%s22784_s27 + $0x168] sm:$0xff]  }
 0x1e0   : > { %19635 = vmatprep.mubr.msk.bf16.mxu0 %vm1694_vm0, %v22043_v2  ;;  %v22107_v2 = vld [vmem:[%s22784_s27 + $0x170] sm:$0xff]  }
 0x1e7   : > { %19636 = vmatmul.mubr.msk.bf16.gmra.mrb[72].mxu0 %vm1694_vm0, %v22044_v3  ;;  %v22109_v3 = vld [vmem:[%s22784_s27 + $0x178] sm:$0xff]  }
 0x1e8   : > { %19639 = vmatprep.mubr.msk.bf16.mxu0 %vm1694_vm0, %v22045_v4  ;;  %v22110_v4 = vld [vmem:[%s22784_s27 + $0x180] sm:$0xff]  }
 0x1ef   : > { %19640 = vmatmul.mubr.msk.bf16.gmra.mrb[76].mxu0 %vm1694_vm0, %v22046_v5  ;;  %v22111_v5 = vld [vmem:[%s22784_s27 + $0x188] sm:$0xff]  }
 0x1f0   : > { %19643 = vmatprep.mubr.msk.bf16.mxu0 %vm1694_vm0, %v22047_v6  ;;  %v22112_v6 = vld [vmem:[%s22784_s27 + $0x190] sm:$0xff]  }
 0x1f7   : > { %19644 = vmatmul.mubr.msk.bf16.gmra.mrb[80].mxu0 %vm1694_vm0, %v22048_v7  ;;  %v22113_v7 = vld [vmem:[%s22784_s27 + $0x198] sm:$0xff]  }
 0x1f8   : > { %19647 = vmatprep.mubr.msk.bf16.mxu0 %vm1694_vm0, %v22049_v8  ;;  %v22114_v8 = vld [vmem:[%s22784_s27 + $0x1a0] sm:$0xff]  }
 0x1ff   : > { %19648 = vmatmul.mubr.msk.bf16.gmra.mrb[84].mxu0 %vm1694_vm0, %v22050_v9  ;;  %v22115_v9 = vld [vmem:[%s22784_s27 + $0x1b0] sm:$0xff]  }
 0x200   : > { %19651 = vmatprep.mubr.msk.bf16.mxu0 %vm1694_vm0, %v22051_v10  ;;  %v22116_v10 = vld [vmem:[%s22784_s27 + $0x1b8] sm:$0xff]  }
 0x207   : > { %19652 = vmatmul.mubr.msk.bf16.gmra.mrb[88].mxu0 %vm1694_vm0, %v22052_v11  ;;  %v22117_v11 = vld [vmem:[%s22784_s27 + $0x1c0] sm:$0xff]  }
 0x208   : > { %19655 = vmatprep.mubr.msk.bf16.mxu0 %vm1694_vm0, %v22053_v12  ;;  %v22118_v12 = vld [vmem:[%s22784_s27 + $0x1c8] sm:$0xff]  }
 0x20f   : > { %19656 = vmatmul.mubr.msk.bf16.gmra.mrb[92].mxu0 %vm1694_vm0, %v22054_v13  ;;  %v22119_v13 = vld [vmem:[%s22784_s27 + $0x1d0] sm:$0xff]  }
 0x210   : > { %19659 = vmatprep.mubr.msk.bf16.mxu0 %vm1694_vm0, %v22055_v14  ;;  %v22120_v14 = vld [vmem:[%s22784_s27 + $0x1d8] sm:$0xff]  }
 0x217   : > { %19660 = vmatmul.mubr.msk.bf16.gmra.mrb[96].mxu0 %vm1694_vm0, %v22056_v15  ;;  %v22121_v15 = vld [vmem:[%s22784_s27 + $0x1e0] sm:$0xff]  }
 0x218   : > { %19663 = vmatprep.mubr.msk.bf16.mxu0 %vm1694_vm0, %v22058_v16  ;;  %v22122_v16 = vld [vmem:[%s22784_s27 + $0x1e8] sm:$0xff]  }
 0x21f   : > { %19664 = vmatmul.mubr.msk.bf16.gmra.mrb[100].mxu0 %vm1694_vm0, %v22059_v17  ;;  %v22123_v17 = vld [vmem:[%s22784_s27 + $0x1f8] sm:$0xff]  }
 0x220   : > { %19667 = vmatprep.mubr.msk.bf16.mxu0 %vm1694_vm0, %v22060_v18  ;;  %v22124_v18 = vld [vmem:[%s22784_s27 + $0x200] sm:$0xff]  }
 0x227   : > { %19668 = vmatmul.mubr.msk.bf16.gmra.mrb[104].mxu0 %vm1694_vm0, %v22061_v19  ;;  %v22126_v19 = vld [vmem:[%s22784_s27 + $0x208] sm:$0xff]  }
 0x228   : > { %19671 = vmatprep.mubr.msk.bf16.mxu0 %vm1694_vm0, %v22062_v20  ;;  %v22127_v20 = vld [vmem:[%s22784_s27 + $0x210] sm:$0xff]  }
 0x22f   : > { %19672 = vmatmul.mubr.msk.bf16.gmra.mrb[108].mxu0 %vm1694_vm0, %v22063_v21  ;;  %v22128_v21 = vld [vmem:[%s22784_s27 + $0x218] sm:$0xff]  }
 0x230   : > { %19675 = vmatprep.mubr.msk.bf16.mxu0 %vm1694_vm0, %v22064_v22  ;;  %v22129_v22 = vld [vmem:[%s22784_s27 + $0x220] sm:$0xff]  }
 0x237   : > { %19676 = vmatmul.mubr.msk.bf16.gmra.mrb[112].mxu0 %vm1694_vm0, %v22065_v23  ;;  %v22130_v23 = vld [vmem:[%s22784_s27 + $0x228] sm:$0xff]  }
 0x238   : > { %19679 = vmatprep.mubr.msk.bf16.mxu0 %vm1694_vm0, %v22066_v24  ;;  %v22131_v24 = vld [vmem:[%s22784_s27 + $0x230] sm:$0xff]  }
 0x23f   : > { %19680 = vmatmul.mubr.msk.bf16.gmra.mrb[116].mxu0 %vm1694_vm0, %v22067_v25  ;;  %v22132_v25 = vld [vmem:[%s22784_s27 + $0x240] sm:$0xff]  }
 0x240   : > { %19683 = vmatprep.mubr.msk.bf16.mxu0 %vm1694_vm0, %v22068_v26  ;;  %v22133_v26 = vld [vmem:[%s22784_s27 + $0x248] sm:$0xff]  }
 0x247   : > { %19684 = vmatmul.mubr.msk.bf16.gmra.mrb[120].mxu0 %vm1694_vm0, %v22069_v27  ;;  %v22134_v27 = vld [vmem:[%s22784_s27 + $0x250] sm:$0xff]  }
 0x248   : > { %19687 = vmatprep.mubr.msk.bf16.mxu0 %vm1694_vm0, %v22070_v28  ;;  %v22135_v28 = vld [vmem:[%s22784_s27 + $0x258] sm:$0xff]  }
 0x24f   : > { %19688 = vmatmul.mubr.msk.bf16.gmra.mrb[124].mxu0 %vm1694_vm0, %v22071_v29  ;;  %v22136_v29 = vld [vmem:[%s22784_s27 + $0x260] sm:$0xff]  }
 0x250   : > { %19699 = vmatprep.mubr.msk.bf16.mxu0 %vm1694_vm0, %v22072_v30  ;;  %v22137_v30 = vld [vmem:[%s22784_s27 + $0x268] sm:$0xff]  }
 0x257   : > { %19700 = vmatmul.mubr.msk.bf16.vlgmr.msra.gmra.mrb[0].mxu0 %vm1694_vm0, %v22073_v31  ;;  %v22138_v31 = vld [vmem:[%s22784_s27 + $0x270] sm:$0xff]  }
 0x258   : > { %19828 = vmatpush3.bf16.msra.mxu0 %v23017_v0  ;;  %19703 = vmatprep.mubr.msk.bf16.mxu0 %vm1694_vm0, %v22075_v32  ;;  %v22105_v0 = vld [vmem:[%s22784_s27 + $0x158] sm:$0xff]  }
 0x259   : > { %19829 = vmatprep.subr.bf16.mxu0 %v22091_v33  ;;  %v22139_v32 = vld [vmem:[%s22784_s27 + $0x278] sm:$0xff]  }
 0x25c   : > { %19830 = vmatpush3.bf16.msra.mxu0 %v22091_v33  ;;  %v22140_v33 = vld [vmem:[%s22784_s27 + $0x50] sm:$0xff]  }
 0x25d   : > { %19831 = vmatprep.subr.bf16.mxu0 %v22108_v34 }
 0x25f   : > { %19704 = vmatmul.mubr.msk.bf16.gmra.mrb[4].mxu0 %vm1694_vm0, %v22076_v35  ;;  %v22142_v35 = vld [vmem:[%s22784_s27 + $0x60] sm:$0xff]  }
 0x260   : > { %19707 = vmatprep.mubr.msk.bf16.mxu0 %vm1694_vm0, %v22077_v36  ;;  %19832 = vmatpush3.bf16.msra.mxu0 %v22108_v34  ;;  %v22141_v34 = vld [vmem:[%s22784_s27 + $0x58] sm:$0xff]   ;;  %v22143_v36 = vld [vmem:[%s22784_s27 + $0x68] sm:$0xff]  }
 0x261   : > { %19833 = vmatprep.subr.bf16.mxu0 %v22125_v51 }
 0x264   : > { %19834 = vmatpush3.bf16.msra.mxu0 %v22125_v51  ;;  %v22158_v51 = vld [vmem:[%s22784_s27 + $0xf0] sm:$0xff]  }
 0x267   : > { %19708 = vmatmul.mubr.msk.bf16.gmra.mrb[8].mxu0 %vm1694_vm0, %v22078_v37  ;;  %v22144_v37 = vld [vmem:[%s22784_s27 + $0x70] sm:$0xff]  }
 0x268   : > { %19711 = vmatprep.mubr.msk.bf16.mxu0 %vm1694_vm0, %v22079_v38  ;;  %v22145_v38 = vld [vmem:[%s22784_s27 + $0x78] sm:$0xff]  }
 0x26f   : > { %19712 = vmatmul.mubr.msk.bf16.gmra.mrb[12].mxu0 %vm1694_vm0, %v22080_v39  ;;  %v22146_v39 = vld [vmem:[%s22784_s27 + $0x80] sm:$0xff]  }
 0x270   : > { %19715 = vmatprep.mubr.msk.bf16.mxu0 %vm1694_vm0, %v22081_v40  ;;  %v22147_v40 = vld [vmem:[%s22784_s27 + $0x88] sm:$0xff]  }
 0x277   : > { %19716 = vmatmul.mubr.msk.bf16.gmra.mrb[16].mxu0 %vm1694_vm0, %v22082_v41  ;;  %v22148_v41 = vld [vmem:[%s22784_s27 + $0x98] sm:$0xff]  }
 0x278   : > { %19719 = vmatprep.mubr.msk.bf16.mxu0 %vm1694_vm0, %v22083_v42  ;;  %v22149_v42 = vld [vmem:[%s22784_s27 + $0xa0] sm:$0xff]  }
 0x27f   : > { %19720 = vmatmul.mubr.msk.bf16.gmra.mrb[20].mxu0 %vm1694_vm0, %v22084_v43  ;;  %v22150_v43 = vld [vmem:[%s22784_s27 + $0xa8] sm:$0xff]  }
 0x280   : > { %19723 = vmatprep.mubr.msk.bf16.mxu0 %vm1694_vm0, %v22085_v44  ;;  %v22151_v44 = vld [vmem:[%s22784_s27 + $0xb0] sm:$0xff]  }
 0x287   : > { %19724 = vmatmul.mubr.msk.bf16.gmra.mrb[24].mxu0 %vm1694_vm0, %v22086_v45  ;;  %v22152_v45 = vld [vmem:[%s22784_s27 + $0xb8] sm:$0xff]  }
 0x288   : > { %19727 = vmatprep.mubr.msk.bf16.mxu0 %vm1694_vm0, %v22087_v46  ;;  %v22153_v46 = vld [vmem:[%s22784_s27 + $0xc0] sm:$0xff]  }
 0x28f   : > { %19728 = vmatmul.mubr.msk.bf16.gmra.mrb[28].mxu0 %vm1694_vm0, %v22088_v47  ;;  %v22154_v47 = vld [vmem:[%s22784_s27 + $0xc8] sm:$0xff]  }
 0x290   : > { %19731 = vmatprep.mubr.msk.bf16.mxu0 %vm1694_vm0, %v22089_v48  ;;  %v22155_v48 = vld [vmem:[%s22784_s27 + $0xd0] sm:$0xff]  }
 0x297   : > { %19732 = vmatmul.mubr.msk.bf16.gmra.mrb[32].mxu0 %vm1694_vm0, %v22090_v49  ;;  %v22156_v49 = vld [vmem:[%s22784_s27 + $0xe0] sm:$0xff]  }
 0x298   : > { %19735 = vmatprep.mubr.msk.bf16.mxu0 %vm1694_vm0, %v22092_v50  ;;  %v22157_v50 = vld [vmem:[%s22784_s27 + $0xe8] sm:$0xff]  }
 0x29f   : > { %19736 = vmatmul.mubr.msk.bf16.gmra.mrb[36].mxu0 %vm1694_vm0, %v22093_v52  ;;  %v22190_v52 = vld [vmem:[%s25957_s3 + $0x40] sm:$0xff]  }
 0x2a0   : > { %19739 = vmatprep.mubr.msk.bf16.mxu0 %vm1694_vm0, %v22094_v53  ;;  %19963 = vmatprep.subr.bf16.mxu1 %v22190_v52  ;;  %v22159_v53 = vld [vmem:[%s22784_s27 + $0xf8] sm:$0xff]  }
 0x2a1   : > { %19964 = vmatpush3.bf16.msra.mxu1 %v22190_v52 }
 0x2a7   : > { %19740 = vmatmul.mubr.msk.bf16.gmra.mrb[40].mxu0 %vm1694_vm0, %v22095_v54  ;;  %v22160_v54 = vld [vmem:[%s22784_s27 + $0x100] sm:$0xff]  }
 0x2a8   : > { %19743 = vmatprep.mubr.msk.bf16.mxu0 %vm1694_vm0, %v22096_v55  ;;  %v22193_v55 = vld [vmem:[%s25957_s3 + $0x48] sm:$0xff]  }
 0x2a9   : > { %19965 = vmatprep.subr.bf16.mxu1 %v22193_v55 }
 0x2aa   : > { %19966 = vmatpush3.bf16.msra.mxu1 %v22193_v55 }
 0x2af   : > { %19744 = vmatmul.mubr.msk.bf16.gmra.mrb[44].mxu0 %vm1694_vm0, %v22097_v56  ;;  %v22194_v56 = vld [vmem:[%s25957_s3 + $0x50] sm:$0xff]  }
 0x2b0   : > { %19747 = vmatprep.mubr.msk.bf16.mxu0 %vm1694_vm0, %v22098_v57  ;;  %19967 = vmatprep.subr.bf16.mxu1 %v22194_v56  ;;  %v22161_v57 = vld [vmem:[%s22784_s27 + $0x108] sm:$0xff]  }
 0x2b1   : > { %19968 = vmatpush3.bf16.msra.mxu1 %v22194_v56 }
 0x2b7   : > { %19748 = vmatmul.mubr.msk.bf16.gmra.mrb[48].mxu0 %vm1694_vm0, %v22099_v58  ;;  %v22162_v58 = vld [vmem:[%s22784_s27 + $0x110] sm:$0xff]  }
 0x2b8   : > { %19751 = vmatprep.mubr.msk.bf16.mxu0 %vm1694_vm0, %v22100_v59  ;;  %v22197_v59 = vld [vmem:[%s25957_s3 + $0x58] sm:$0xff]  }
 0x2b9   : > { %19969 = vmatprep.subr.bf16.mxu1 %v22197_v59 }
 0x2ba   : > { %19970 = vmatpush3.bf16.msra.mxu1 %v22197_v59 }
 0x2bf   : > { %19752 = vmatmul.mubr.msk.bf16.gmra.mrb[52].mxu0 %vm1694_vm0, %v22101_v60  ;;  %v22198_v60 = vld [vmem:[%s25957_s3 + $0x60] sm:$0xff]  }
 0x2c0   : > { %19755 = vmatprep.mubr.msk.bf16.mxu0 %vm1694_vm0, %v22102_v61  ;;  %v22163_v61 = vld [vmem:[%s22784_s27 + $0x118] sm:$0xff]   ;;  %19971 = vmatprep.subr.bf16.mxu1 %v22198_v60 }
 0x2c1   : > { %19972 = vmatpush3.bf16.msra.mxu1 %v22198_v60 }
 0x2c7   : > { %19756 = vmatmul.mubr.msk.bf16.gmra.mrb[56].mxu0 %vm1694_vm0, %v22103_v62  ;;  %v22164_v62 = vld [vmem:[%s22784_s27 + $0x128] sm:$0xff]  }
 0x2c8   : > { %19759 = vmatprep.mubr.msk.bf16.mxu0 %vm1694_vm0, %v22104_v63  ;;  %v22201_v63 = vld [vmem:[%s25957_s3 + $0x68] sm:$0xff]  }
 0x2c9   : > { %19973 = vmatprep.subr.bf16.mxu1 %v22201_v63 }
 0x2ca   : > { %19974 = vmatpush3.bf16.msra.mxu1 %v22201_v63 }
 0x2cf   : > { %19760 = vmatmul.mubr.msk.bf16.gmra.mrb[60].mxu0 %vm1694_vm0, %v22105_v0  ;;  %v22202_v0 = vld [vmem:[%s25957_s3 + $0x70] sm:$0xff]  }
 0x2d0   : > { %19763 = vmatprep.mubr.msk.bf16.mxu0 %vm1694_vm0, %v22106_v1  ;;  %v22165_v1 = vld [vmem:[%s22784_s27 + $0x130] sm:$0xff]   ;;  %19975 = vmatprep.subr.bf16.mxu1 %v22202_v0 }
 0x2d1   : > { %19976 = vmatpush3.bf16.msra.mxu1 %v22202_v0  ;;  %v22207_v0 = vld [vmem:[%s22784_s27 + $0x258] sm:$0xff]  }
 0x2d7   : > { %19764 = vmatmul.mubr.msk.bf16.gmra.mrb[64].mxu0 %vm1694_vm0, %v22107_v2  ;;  %v22166_v2 = vld [vmem:[%s22784_s27 + $0x138] sm:$0xff]  }
 0x2d8   : > { %19767 = vmatprep.mubr.msk.bf16.mxu0 %vm1694_vm0, %v22109_v3  ;;  %v22205_v3 = vld [vmem:[%s25957_s3 + $0x78] sm:$0xff]  }
 0x2d9   : > { %19977 = vmatprep.subr.bf16.mxu1 %v22205_v3 }
 0x2da   : > { %19978 = vmatpush3.bf16.msra.mxu1 %v22205_v3 }
 0x2df   : > { %19768 = vmatmul.mubr.msk.bf16.gmra.mrb[68].mxu0 %vm1694_vm0, %v22110_v4  ;;  %v22167_v4 = vld [vmem:[%s22784_s27 + $0x140] sm:$0xff]  }
 0x2e0   : > { %19771 = vmatprep.mubr.msk.bf16.mxu0 %vm1694_vm0, %v22111_v5  ;;  %v22168_v5 = vld [vmem:[%s22784_s27 + $0x148] sm:$0xff]  }
 0x2e7   : > { %19772 = vmatmul.mubr.msk.bf16.gmra.mrb[72].mxu0 %vm1694_vm0, %v22112_v6  ;;  %v23302_v6 = vld [vmem:[%s25957_s3] sm:$0xff]  }
 0x2e8   : > { %19775 = vmatprep.mubr.msk.bf16.mxu0 %vm1694_vm0, %v22113_v7  ;;  %v22209_v7 = vld [vmem:[%s25957_s3 + $0x1c0] sm:$0xff]   ;;  %20059 = vmatprep.subr.bf16.mxu1 %v23302_v6 }
 0x2e9   : > { %20635 = vmatprep.subr.bf16.mxu0 %v22209_v7 }
 0x2ef   : > { %19776 = vmatmul.mubr.msk.bf16.gmra.mrb[76].mxu0 %vm1694_vm0, %v22114_v8  ;;  %v22169_v8 = vld [vmem:[%s22784_s27 + $0x150] sm:$0xff]  }
 0x2f0   : > { %19779 = vmatprep.mubr.msk.bf16.mxu0 %vm1694_vm0, %v22115_v9  ;;  %v22170_v9 = vld [vmem:[%s22784_s27 + $0x158] sm:$0xff]  }
 0x2f7   : > { %19780 = vmatmul.mubr.msk.bf16.gmra.mrb[80].mxu0 %vm1694_vm0, %v22116_v10  ;;  %v22212_v10 = vld [vmem:[%s25957_s3 + $0x1c8] sm:$0xff]  }
 0x2f8   : > { %19783 = vmatprep.mubr.msk.bf16.mxu0 %vm1694_vm0, %v22117_v11  ;;  %v22213_v11 = vld [vmem:[%s25957_s3 + $0x1d0] sm:$0xff]  }
 0x2ff   : > { %19784 = vmatmul.mubr.msk.bf16.gmra.mrb[84].mxu0 %vm1694_vm0, %v22118_v12  ;;  %v22171_v12 = vld [vmem:[%s22784_s27 + $0x160] sm:$0xff]  }
 0x300   : > { %19787 = vmatprep.mubr.msk.bf16.mxu0 %vm1694_vm0, %v22119_v13  ;;  %v22172_v13 = vld [vmem:[%s22784_s27 + $0x170] sm:$0xff]  }
 0x307   : > { %19788 = vmatmul.mubr.msk.bf16.gmra.mrb[88].mxu0 %vm1694_vm0, %v22120_v14  ;;  %v22217_v14 = vld [vmem:[%s25957_s3 + $0x1d8] sm:$0xff]  }
 0x308   : > { %19791 = vmatprep.mubr.msk.bf16.mxu0 %vm1694_vm0, %v22121_v15  ;;  %v22218_v15 = vld [vmem:[%s25957_s3 + $0x1e0] sm:$0xff]  }
 0x30f   : > { %19792 = vmatmul.mubr.msk.bf16.gmra.mrb[92].mxu0 %vm1694_vm0, %v22122_v16  ;;  %v22173_v16 = vld [vmem:[%s22784_s27 + $0x178] sm:$0xff]  }
 0x310   : > { %19795 = vmatprep.mubr.msk.bf16.mxu0 %vm1694_vm0, %v22123_v17  ;;  %v22174_v17 = vld [vmem:[%s22784_s27 + $0x180] sm:$0xff]  }
 0x317   : > { %19796 = vmatmul.mubr.msk.bf16.gmra.mrb[96].mxu0 %vm1694_vm0, %v22124_v18  ;;  %v22219_v18 = vld [vmem:[%s25957_s3 + $0x1e8] sm:$0xff]  }
 0x318   : > { %19799 = vmatprep.mubr.msk.bf16.mxu0 %vm1694_vm0, %v22126_v19  ;;  %v22220_v19 = vld [vmem:[%s25957_s3 + $0x1f0] sm:$0xff]  }
 0x31f   : > { %19800 = vmatmul.mubr.msk.bf16.gmra.mrb[100].mxu0 %vm1694_vm0, %v22127_v20  ;;  %v22175_v20 = vld [vmem:[%s22784_s27 + $0x188] sm:$0xff]  }
 0x320   : > { %19803 = vmatprep.mubr.msk.bf16.mxu0 %vm1694_vm0, %v22128_v21  ;;  %v22176_v21 = vld [vmem:[%s22784_s27 + $0x190] sm:$0xff]  }
 0x327   : > { %19804 = vmatmul.mubr.msk.bf16.gmra.mrb[104].mxu0 %vm1694_vm0, %v22129_v22  ;;  %v22221_v22 = vld [vmem:[%s25957_s3 + $0x1f8] sm:$0xff]  }
 0x328   : > { %19807 = vmatprep.mubr.msk.bf16.mxu0 %vm1694_vm0, %v22130_v23  ;;  %v22177_v23 = vld [vmem:[%s22784_s27 + $0x198] sm:$0xff]  }
 0x32f   : > { %19808 = vmatmul.mubr.msk.bf16.gmra.mrb[108].mxu0 %vm1694_vm0, %v22131_v24  ;;  %v22178_v24 = vld [vmem:[%s22784_s27 + $0x1a0] sm:$0xff]  }
 0x330   : > { %19811 = vmatprep.mubr.msk.bf16.mxu0 %vm1694_vm0, %v22132_v25  ;;  %v22179_v25 = vld [vmem:[%s22784_s27 + $0x1a8] sm:$0xff]  }
 0x337   : > { %19812 = vmatmul.mubr.msk.bf16.gmra.mrb[112].mxu0 %vm1694_vm0, %v22133_v26  ;;  %v22180_v26 = vld [vmem:[%s22784_s27 + $0x1b8] sm:$0xff]  }
 0x338   : > { %19815 = vmatprep.mubr.msk.bf16.mxu0 %vm1694_vm0, %v22134_v27  ;;  %v22181_v27 = vld [vmem:[%s22784_s27 + $0x1c0] sm:$0xff]  }
 0x33f   : > { %19816 = vmatmul.mubr.msk.bf16.gmra.mrb[116].mxu0 %vm1694_vm0, %v22135_v28  ;;  %v22182_v28 = vld [vmem:[%s22784_s27 + $0x1c8] sm:$0xff]  }
 0x340   : > { %19819 = vmatprep.mubr.msk.bf16.mxu0 %vm1694_vm0, %v22136_v29  ;;  %v22183_v29 = vld [vmem:[%s22784_s27 + $0x1d0] sm:$0xff]  }
 0x347   : > { %19820 = vmatmul.mubr.msk.bf16.gmra.mrb[120].mxu0 %vm1694_vm0, %v22137_v30  ;;  %v22184_v30 = vld [vmem:[%s22784_s27 + $0x1d8] sm:$0xff]  }
 0x348   : > { %19823 = vmatprep.mubr.msk.bf16.mxu0 %vm1694_vm0, %v22138_v31  ;;  %v22185_v31 = vld [vmem:[%s22784_s27 + $0x1e0] sm:$0xff]  }
 0x34f   : > { %19824 = vmatmul.mubr.msk.bf16.gmra.mrb[124].mxu0 %vm1694_vm0, %v22139_v32  ;;  %v22186_v32 = vld [vmem:[%s22784_s27 + $0x1e8] sm:$0xff]  }
 0x350   : > { %19835 = vmatprep.mubr.msk.bf16.mxu0 %vm1694_vm0, %v22140_v33  ;;  %v22187_v33 = vld [vmem:[%s22784_s27 + $0x1f0] sm:$0xff]  }
 0x357   : > { %19836 = vmatmul.mubr.msk.bf16.vlgmr.msra.gmra.mrb[0].mxu0 %vm1694_vm0, %v22141_v34  ;;  %v22188_v34 = vld [vmem:[%s22784_s27 + $0x200] sm:$0xff]  }
 0x358   : > { %19839 = vmatprep.mubr.msk.bf16.mxu0 %vm1694_vm0, %v22142_v35  ;;  %20636 = vmatpush3.bf16.msra.mxu0 %v22209_v7  ;;  %v22189_v35 = vld [vmem:[%s22784_s27 + $0x208] sm:$0xff]  }
 0x359   : > { %20637 = vmatprep.subr.bf16.mxu0 %v22212_v10 }
 0x35c   : > { %20638 = vmatpush3.bf16.msra.mxu0 %v22212_v10 }
 0x35d   : > { %20639 = vmatprep.subr.bf16.mxu0 %v22213_v11 }
 0x35f   : > { %19840 = vmatmul.mubr.msk.bf16.gmra.mrb[4].mxu0 %vm1694_vm0, %v22143_v36  ;;  %v22191_v36 = vld [vmem:[%s22784_s27 + $0x210] sm:$0xff]  }
 0x360   : > { %19843 = vmatprep.mubr.msk.bf16.mxu0 %vm1694_vm0, %v22144_v37  ;;  %20640 = vmatpush3.bf16.msra.mxu0 %v22213_v11  ;;  %v22192_v37 = vld [vmem:[%s22784_s27 + $0x218] sm:$0xff]  }
 0x361   : > { %20641 = vmatprep.subr.bf16.mxu0 %v22217_v14 }
 0x364   : > { %20642 = vmatpush3.bf16.msra.mxu0 %v22217_v14 }
 0x365   : > { %20643 = vmatprep.subr.bf16.mxu0 %v22218_v15 }
 0x367   : > { %19844 = vmatmul.mubr.msk.bf16.gmra.mrb[8].mxu0 %vm1694_vm0, %v22145_v38  ;;  %v22195_v38 = vld [vmem:[%s22784_s27 + $0x220] sm:$0xff]  }
 0x368   : > { %19847 = vmatprep.mubr.msk.bf16.mxu0 %vm1694_vm0, %v22146_v39  ;;  %20644 = vmatpush3.bf16.msra.mxu0 %v22218_v15  ;;  %v22196_v39 = vld [vmem:[%s22784_s27 + $0x228] sm:$0xff]   ;;  %v22208_v15 = vld [vmem:[%s22784_s27 + $0x260] sm:$0xff]  }
 0x369   : > { %20645 = vmatprep.subr.bf16.mxu0 %v22219_v18 }
 0x36c   : > { %20646 = vmatpush3.bf16.msra.mxu0 %v22219_v18  ;;  %v22210_v18 = vld [vmem:[%s22784_s27 + $0x268] sm:$0xff]  }
 0x36d   : > { %20647 = vmatprep.subr.bf16.mxu0 %v22220_v19 }
 0x36f   : > { %19848 = vmatmul.mubr.msk.bf16.gmra.mrb[12].mxu0 %vm1694_vm0, %v22147_v40  ;;  %v22199_v40 = vld [vmem:[%s22784_s27 + $0x230] sm:$0xff]  }
 0x370   : > { %19851 = vmatprep.mubr.msk.bf16.mxu0 %vm1694_vm0, %v22148_v41  ;;  %20648 = vmatpush3.bf16.msra.mxu0 %v22220_v19  ;;  %v23383_v41 = vld [vmem:[%s25956_s2] ss:$0 sm:$0xff] }
 0x371   : > { %20649 = vmatprep.subr.bf16.mxu0 %v22221_v22 }
 0x374   : > { %20650 = vmatpush3.bf16.msra.mxu0 %v22221_v22  ;;  %v22222_v22 = vld [vmem:[%s25957_s3 + $0x10] sm:$0xff]  }
 0x377   : > { %19852 = vmatmul.mubr.msk.bf16.gmra.mrb[16].mxu0 %vm1694_vm0, %v22149_v42 }
 0x378   : > { %19855 = vmatprep.mubr.msk.bf16.mxu0 %vm1694_vm0, %v22150_v43 }
 0x37f   : > { %19856 = vmatmul.mubr.msk.bf16.gmra.mrb[20].mxu0 %vm1694_vm0, %v22151_v44 }
 0x380   : > { %19859 = vmatprep.mubr.msk.bf16.mxu0 %vm1694_vm0, %v22152_v45  ;;  %v22200_v45 = vld [vmem:[%s22784_s27 + $0x238] sm:$0xff]  }
 0x387   : > { %19860 = vmatmul.mubr.msk.bf16.gmra.mrb[24].mxu0 %vm1694_vm0, %v22153_v46 }
 0x388   : > { %19863 = vmatprep.mubr.msk.bf16.mxu0 %vm1694_vm0, %v22154_v47 }
 0x38f   : > { %19864 = vmatmul.mubr.msk.bf16.gmra.mrb[28].mxu0 %vm1694_vm0, %v22155_v48  ;;  %v22203_v48 = vld [vmem:[%s22784_s27 + $0x248] sm:$0xff]  }
 0x390   : > { %19867 = vmatprep.mubr.msk.bf16.mxu0 %vm1694_vm0, %v22156_v49 }
 0x397   : > { %19868 = vmatmul.mubr.msk.bf16.gmra.mrb[32].mxu0 %vm1694_vm0, %v22157_v50 }
 0x398   : > { %19871 = vmatprep.mubr.msk.bf16.mxu0 %vm1694_vm0, %v22158_v51 }
 0x39f   : > { %19872 = vmatmul.mubr.msk.bf16.gmra.mrb[36].mxu0 %vm1694_vm0, %v22159_v53 }
 0x3a0   : > { %19875 = vmatprep.mubr.msk.bf16.mxu0 %vm1694_vm0, %v22160_v54 }
 0x3a7   : > { %19876 = vmatmul.mubr.msk.bf16.gmra.mrb[40].mxu0 %vm1694_vm0, %v22161_v57 }
 0x3a8   : > { %19879 = vmatprep.mubr.msk.bf16.mxu0 %vm1694_vm0, %v22162_v58 }
 0x3af   : > { %19880 = vmatmul.mubr.msk.bf16.gmra.mrb[44].mxu0 %vm1694_vm0, %v22163_v61  ;;  %v22204_v61 = vld [vmem:[%s22784_s27 + $0x250] sm:$0xff]  }
 0x3b0   : > { %19883 = vmatprep.mubr.msk.bf16.mxu0 %vm1694_vm0, %v22164_v62 }
 0x3b7   : > { %19884 = vmatmul.mubr.msk.bf16.gmra.mrb[48].mxu0 %vm1694_vm0, %v22165_v1 }
 0x3b8   : > { %19887 = vmatprep.mubr.msk.bf16.mxu0 %vm1694_vm0, %v22166_v2 }
 0x3bf   : > { %19888 = vmatmul.mubr.msk.bf16.gmra.mrb[52].mxu0 %vm1694_vm0, %v22167_v4 }
 0x3c0   : > { %19891 = vmatprep.mubr.msk.bf16.mxu0 %vm1694_vm0, %v22168_v5 }
 0x3c7   : > { %19892 = vmatmul.mubr.msk.bf16.gmra.mrb[56].mxu0 %vm1694_vm0, %v22169_v8 }
 0x3c8   : > { %19895 = vmatprep.mubr.msk.bf16.mxu0 %vm1694_vm0, %v22170_v9 }
 0x3cf   : > { %19896 = vmatmul.mubr.msk.bf16.gmra.mrb[60].mxu0 %vm1694_vm0, %v22171_v12  ;;  %v22216_v12 = vld [vmem:[%s25957_s3 + $0x8] sm:$0xff]  }
 0x3d0   : > { %19899 = vmatprep.mubr.msk.bf16.mxu0 %vm1694_vm0, %v22172_v13 }
 0x3d7   : > { %19900 = vmatmul.mubr.msk.bf16.gmra.mrb[64].mxu0 %vm1694_vm0, %v22173_v16 }
 0x3d8   : > { %19903 = vmatprep.mubr.msk.bf16.mxu0 %vm1694_vm0, %v22174_v17 }
 0x3df   : > { %19904 = vmatmul.mubr.msk.bf16.gmra.mrb[68].mxu0 %vm1694_vm0, %v22175_v20 }
 0x3e0   : > { %19907 = vmatprep.mubr.msk.bf16.mxu0 %vm1694_vm0, %v22176_v21 }
 0x3e7   : > { %19908 = vmatmul.mubr.msk.bf16.gmra.mrb[72].mxu0 %vm1694_vm0, %v22177_v23 }
 0x3e8   : > { %19911 = vmatprep.mubr.msk.bf16.mxu0 %vm1694_vm0, %v22178_v24 }
 0x3ef   : > { %19912 = vmatmul.mubr.msk.bf16.gmra.mrb[76].mxu0 %vm1694_vm0, %v22179_v25 }
 0x3f0   : > { %19915 = vmatprep.mubr.msk.bf16.mxu0 %vm1694_vm0, %v22180_v26 }
 0x3f7   : > { %19916 = vmatmul.mubr.msk.bf16.gmra.mrb[80].mxu0 %vm1694_vm0, %v22181_v27 }
 0x3f8   : > { %19919 = vmatprep.mubr.msk.bf16.mxu0 %vm1694_vm0, %v22182_v28 }
 0x3ff   : > { %19920 = vmatmul.mubr.msk.bf16.gmra.mrb[84].mxu0 %vm1694_vm0, %v22183_v29  ;;  %v22223_v29 = vld [vmem:[%s25957_s3 + $0x18] sm:$0xff]  }
 0x400   : > { %19923 = vmatprep.mubr.msk.bf16.mxu0 %vm1694_vm0, %v22184_v30 }
 0x407   : > { %19924 = vmatmul.mubr.msk.bf16.gmra.mrb[88].mxu0 %vm1694_vm0, %v22185_v31 }
 0x408   : > { %19927 = vmatprep.mubr.msk.bf16.mxu0 %vm1694_vm0, %v22186_v32  ;;  %v22211_v32 = vld [vmem:[%s22784_s27 + $0x270] sm:$0xff]  }
 0x40f   : > { %19928 = vmatmul.mubr.msk.bf16.gmra.mrb[92].mxu0 %vm1694_vm0, %v22187_v33 }
 0x410   : > { %19931 = vmatprep.mubr.msk.bf16.mxu0 %vm1694_vm0, %v22188_v34 }
 0x417   : > { %19932 = vmatmul.mubr.msk.bf16.gmra.mrb[96].mxu0 %vm1694_vm0, %v22189_v35  ;;  %v22214_v35 = vld [vmem:[%s22784_s27 + $0x278] sm:$0xff]  }
 0x418   : > { %19935 = vmatprep.mubr.msk.bf16.mxu0 %vm1694_vm0, %v22191_v36 }
 0x41f   : > { %19936 = vmatmul.mubr.msk.bf16.gmra.mrb[100].mxu0 %vm1694_vm0, %v22192_v37 }
 0x420   : > { %19939 = vmatprep.mubr.msk.bf16.mxu0 %vm1694_vm0, %v22195_v38 }
 0x427   : > { %19940 = vmatmul.mubr.msk.bf16.gmra.mrb[104].mxu0 %vm1694_vm0, %v22196_v39  ;;  %v22224_v39 = vld [vmem:[%s25957_s3 + $0x20] sm:$0xff]  }
 0x428   : > { %19943 = vmatprep.mubr.msk.bf16.mxu0 %vm1694_vm0, %v22199_v40 }
 0x42a   : > { %v19837_v42 = vpop.f32.mrb[0].mxu0 }
 0x42b   : > { %v6216_v43 = vadd.f32 %v19837_v42, %v23383_v41  ;;  %v5568_v44 = vpop.f32.mrb[1].mxu0 }
 0x42c   : > { %v6214_v46 = vadd.f32 %v23383_v41, %v5568_v44  ;;  %v19838_v47 = vpop.f32.mrb[2].mxu0 }
 0x42d   : > { %v6217_v49 = vadd.f32 %v19838_v47, %v23383_v41  ;;  %v5571_v50 = vpop.f32.mrb[3].mxu0  ;;  %v6344_v52 = vmax.f32 %v6216_v43, 0.0 }
 0x42e   : > { %v6215_v51 = vadd.f32 %v23383_v41, %v5571_v50  ;;  %v6342_v54 = vmax.f32 %v6214_v46, 0.0 }
 0x42f   : > { %19944 = vmatmul.mubr.msk.bf16.gmra.mrb[108].mxu0 %vm1694_vm0, %v22200_v45  ;;  %v6345_v53 = vmax.f32 %v6217_v49, 0.0 }
 0x430   : > { %v6343_v55 = vmax.f32 %v6215_v51, 0.0  ;;  %19947 = vmatprep.mubr.msk.bf16.mxu0 %vm1694_vm0, %v22203_v48  ;;  %v22225_v48 = vld [vmem:[%s25957_s3 + $0x28] sm:$0xff]  }
 0x431   : > { %v23394_v56 = vpack.c.bf16 %v6345_v53, %v6344_v52  ;;  %v22215_v51 = vld [vmem:[%s22784_s27 + $0x280] sm:$0xff]   ;;  %s16789_s27 = sshll.u32 %s16782_s20, 1 }
 0x432   : > { %v19841_v57 = vpop.f32.mrb[4].mxu0  ;;  %v23396_v58 = vpack.c.bf16 %v6343_v55, %v6342_v54  ;;  %p1070_p8 = scmp.lt.s32.totalorder %s16789_s27, 3 }
 0x433   : > { %v6220_v59 = vadd.f32 %v19841_v57, %v23383_v41  ;;  %v5584_v60 = vpop.f32.mrb[5].mxu0  ;;  %19979 = vmatprep.mubr.bf16.mxu1 %v23394_v56 }
 0x434   : > { %v6218_v62 = vadd.f32 %v23383_v41, %v5584_v60  ;;  %v19842_v63 = vpop.f32.mrb[6].mxu0  ;;  %s26420_s27 = smov (!%p1070_p8, %s16789_s27), 3 }
 0x435   : > { %v6221_v1 = vadd.f32 %v19842_v63, %v23383_v41  ;;  %v5587_v2 = vpop.f32.mrb[7].mxu0  ;;  %v6348_v4 = vmax.f32 %v6220_v59, 0.0  ;;  %v22226_v59 = vld [vmem:[%s25957_s3 + $0x30] sm:$0xff]   ;;  %s16790_s25 = sshll.u32 %s26420_s27, 3 }
 0x436   : > { %v6219_v3 = vadd.f32 %v23383_v41, %v5587_v2  ;;  %v6346_v7 = vmax.f32 %v6218_v62, 0.0  ;;  %s1073_s26 = scalar_lea.vmem %s25965_s11, %s16790_s25 }
 0x437   : > { %v6349_v5 = vmax.f32 %v6221_v1, 0.0  ;;  %19948 = vmatmul.mubr.msk.bf16.gmra.mrb[112].mxu0 %vm1694_vm0, %v22204_v61 }
 0x438   : > { %v6347_v8 = vmax.f32 %v6219_v3, 0.0  ;;  %19951 = vmatprep.mubr.msk.bf16.mxu0 %vm1694_vm0, %v22207_v0  ;;  %v22227_v3 = vld [vmem:[%s25957_s3 + $0x38] sm:$0xff]  }
 0x439   : > { %v23407_v9 = vpack.c.bf16 %v6349_v5, %v6348_v4 }
 0x43a   : > { %v19845_v10 = vpop.f32.mrb[8].mxu0  ;;  %v23409_v11 = vpack.c.bf16 %v6347_v8, %v6346_v7 }
 0x43b   : > { %v6224_v13 = vadd.f32 %v19845_v10, %v23383_v41  ;;  %v5600_v14 = vpop.f32.mrb[9].mxu0 }
 0x43c   : > { %v6222_v16 = vadd.f32 %v23383_v41, %v5600_v14  ;;  %v19846_v17 = vpop.f32.mrb[10].mxu0  ;;  %19980 = vmatmul.mubr.bf16.vlgmr.msra.gmra.mrb[0].mxu1 %v23409_v11 }
 0x43d   : > { %v6225_v19 = vadd.f32 %v19846_v17, %v23383_v41  ;;  %v5603_v20 = vpop.f32.mrb[11].mxu0  ;;  %19983 = vmatprep.mubr.bf16.mxu1 %v23407_v9  ;;  %20060 = vmatpush3.bf16.msra.mxu1 %v23302_v6  ;;  %v6352_v23 = vmax.f32 %v6224_v13, 0.0 }
 0x43e   : > { %v6223_v21 = vadd.f32 %v23383_v41, %v5603_v20  ;;  %20061 = vmatprep.subr.bf16.mxu1 %v22216_v12  ;;  %v6350_v25 = vmax.f32 %v6222_v16, 0.0 }
 0x43f   : > { %v6353_v24 = vmax.f32 %v6225_v19, 0.0  ;;  %19952 = vmatmul.mubr.msk.bf16.gmra.mrb[116].mxu0 %vm1694_vm0, %v22208_v15 }
 0x440   : > { %v6351_v26 = vmax.f32 %v6223_v21, 0.0  ;;  %19955 = vmatprep.mubr.msk.bf16.mxu0 %vm1694_vm0, %v22210_v18 }
 0x441   : > { %v23428_v27 = vpack.c.bf16 %v6353_v24, %v6352_v23  ;;  %20062 = vmatpush3.bf16.msra.mxu1 %v22216_v12 }
 0x442   : > { %v23430_v6 = vpack.c.bf16 %v6351_v26, %v6350_v25  ;;  %v19849_v28 = vpop.f32.mrb[12].mxu0  ;;  %20063 = vmatprep.subr.bf16.mxu1 %v22222_v22 }
 0x443   : > { %v6228_v30 = vadd.f32 %v19849_v28, %v23383_v41  ;;  %v5616_v31 = vpop.f32.mrb[13].mxu0 }
 0x444   : > { %v6226_v33 = vadd.f32 %v23383_v41, %v5616_v31  ;;  %v19850_v34 = vpop.f32.mrb[14].mxu0  ;;  %19984 = vmatmul.mubr.bf16.gmra.mrb[4].mxu1 %v23430_v6 }
 0x445   : > { %v6229_v36 = vadd.f32 %v19850_v34, %v23383_v41  ;;  %v5619_v37 = vpop.f32.mrb[15].mxu0  ;;  %19987 = vmatprep.mubr.bf16.mxu1 %v23428_v27  ;;  %20064 = vmatpush3.bf16.msra.mxu1 %v22222_v22  ;;  %v6356_v40 = vmax.f32 %v6228_v30, 0.0  ;;  %v23495_v34 = vld [vmem:[%s25957_s3 + $0x80] sm:$0xff]  }
 0x446   : > { %v6227_v38 = vadd.f32 %v23383_v41, %v5619_v37  ;;  %20065 = vmatprep.subr.bf16.mxu1 %v22223_v29  ;;  %v6354_v43 = vmax.f32 %v6226_v33, 0.0 }
 0x447   : > { %v6357_v42 = vmax.f32 %v6229_v36, 0.0  ;;  %19956 = vmatmul.mubr.msk.bf16.gmra.mrb[120].mxu0 %vm1694_vm0, %v22211_v32 }
 0x448   : > { %v6355_v44 = vmax.f32 %v6227_v38, 0.0  ;;  %19959 = vmatprep.mubr.msk.bf16.mxu0 %vm1694_vm0, %v22214_v35 }
 0x449   : > { %v23448_v45 = vpack.c.bf16 %v6357_v42, %v6356_v40  ;;  %20066 = vmatpush3.bf16.msra.mxu1 %v22223_v29 }
 0x44a   : > { %v23450_v46 = vpack.c.bf16 %v6355_v44, %v6354_v43  ;;  %v19853_v47 = vpop.f32.mrb[16].mxu0  ;;  %20067 = vmatprep.subr.bf16.mxu1 %v22224_v39 }
 0x44b   : > { %26042 = vst [vmem:[#allocation5_spill] sm:$0xff] %v23448_v45  ;;  %v6232_v49 = vadd.f32 %v19853_v47, %v23383_v41  ;;  %v5632_v50 = vpop.f32.mrb[17].mxu0 }
 0x44c   : > { %26043 = vst [vmem:[#allocation6_spill] sm:$0xff] %v23450_v46  ;;  %v6230_v52 = vadd.f32 %v23383_v41, %v5632_v50  ;;  %v19854_v53 = vpop.f32.mrb[18].mxu0  ;;  %19988 = vmatmul.mubr.bf16.gmra.mrb[8].mxu1 %v23450_v46  ;;  %v22230_v50 = vld [vmem:[%s25957_s3 + $0x248] sm:$0xff]  }
 0x44d   : > { %v6233_v54 = vadd.f32 %v19854_v53, %v23383_v41  ;;  %v5635_v55 = vpop.f32.mrb[19].mxu0  ;;  %19991 = vmatprep.mubr.bf16.mxu1 %v23448_v45  ;;  %20068 = vmatpush3.bf16.msra.mxu1 %v22224_v39  ;;  %v6360_v60 = vmax.f32 %v6232_v49, 0.0  ;;  %v22229_v39 = vld [vmem:[%s25957_s3 + $0x240] sm:$0xff]  }
 0x44e   : > { %v6231_v57 = vadd.f32 %v23383_v41, %v5635_v55  ;;  %20069 = vmatprep.subr.bf16.mxu1 %v22225_v48  ;;  %v6358_v62 = vmax.f32 %v6230_v52, 0.0  ;;  %20827 = vmatprep.subr.bf16.mxu0 %v22229_v39 }
 0x44f   : > { %v6361_v61 = vmax.f32 %v6233_v54, 0.0  ;;  %19960 = vmatmul.mubr.msk.bf16.gmra.mrb[124].mxu0 %vm1694_vm0, %v22215_v51 }
 0x450   : > { %v6359_v63 = vmax.f32 %v6231_v57, 0.0 }
 0x451   : > { %v23466_v0 = vpack.c.bf16 %v6361_v61, %v6360_v60  ;;  %20070 = vmatpush3.bf16.msra.mxu1 %v22225_v48  ;;  %v22231_v60 = vld [vmem:[%s25957_s3 + $0x250] sm:$0xff]  }
 0x452   : > { %v23468_v1 = vpack.c.bf16 %v6359_v63, %v6358_v62  ;;  %v19857_v2 = vpop.f32.mrb[20].mxu0  ;;  %20071 = vmatprep.subr.bf16.mxu1 %v22226_v59 }
 0x453   : > { %26044 = vst [vmem:[#allocation7_spill] sm:$0xff] %v23466_v0  ;;  %v6236_v4 = vadd.f32 %v19857_v2, %v23383_v41  ;;  %v5648_v5 = vpop.f32.mrb[21].mxu0 }
 0x454   : > { %26045 = vst [vmem:[#allocation8_spill] sm:$0xff] %v23468_v1  ;;  %v6234_v7 = vadd.f32 %v23383_v41, %v5648_v5  ;;  %v19858_v8 = vpop.f32.mrb[22].mxu0  ;;  %19992 = vmatmul.mubr.bf16.gmra.mrb[12].mxu1 %v23468_v1 }
 0x455   : > { %v6237_v10 = vadd.f32 %v19858_v8, %v23383_v41  ;;  %v5651_v12 = vpop.f32.mrb[23].mxu0  ;;  %19995 = vmatprep.mubr.bf16.mxu1 %v23466_v0  ;;  %20072 = vmatpush3.bf16.msra.mxu1 %v22226_v59  ;;  %v6364_v14 = vmax.f32 %v6236_v4, 0.0 }
 0x456   : > { %v6235_v13 = vadd.f32 %v23383_v41, %v5651_v12  ;;  %20073 = vmatprep.subr.bf16.mxu1 %v22227_v3  ;;  %v6362_v16 = vmax.f32 %v6234_v7, 0.0  ;;  %v22233_v7 = vld [vmem:[%s25957_s3 + $0x258] sm:$0xff]  }
 0x457   : > { %v6365_v15 = vmax.f32 %v6237_v10, 0.0 }
 0x458   : > { %v6363_v17 = vmax.f32 %v6235_v13, 0.0 }
 0x459   : > { %v23479_v18 = vpack.c.bf16 %v6365_v15, %v6364_v14  ;;  %20074 = vmatpush3.bf16.msra.mxu1 %v22227_v3 }
 0x45a   : > { %v23481_v19 = vpack.c.bf16 %v6363_v17, %v6362_v16  ;;  %v19861_v20 = vpop.f32.mrb[24].mxu0  ;;  %20155 = vmatprep.subr.bf16.mxu1 %v23495_v34  ;;  %v22234_v17 = vld [vmem:[%s25957_s3 + $0x260] sm:$0xff]  }
 0x45b   : > { %26046 = vst [vmem:[#allocation9_spill] sm:$0xff] %v23479_v18  ;;  %v6240_v21 = vadd.f32 %v19861_v20, %v23383_v41  ;;  %v5664_v22 = vpop.f32.mrb[25].mxu0  ;;  %20651 = vmatprep.mubr.bf16.mxu0 %v23479_v18 }
 0x45c   : > { %26047 = vst [vmem:[#allocation10_spill] sm:$0xff] %v23481_v19  ;;  %v6238_v23 = vadd.f32 %v23383_v41, %v5664_v22  ;;  %v19862_v24 = vpop.f32.mrb[26].mxu0  ;;  %19996 = vmatmul.mubr.bf16.gmra.mrb[16].mxu1 %v23481_v19 }
 0x45d   : > { %v6241_v25 = vadd.f32 %v19862_v24, %v23383_v41  ;;  %v5667_v26 = vpop.f32.mrb[27].mxu0  ;;  %19999 = vmatprep.mubr.bf16.mxu1 %v23479_v18  ;;  %v6368_v29 = vmax.f32 %v6240_v21, 0.0 }
 0x45e   : > { %v6239_v28 = vadd.f32 %v23383_v41, %v5667_v26  ;;  %v6366_v31 = vmax.f32 %v6238_v23, 0.0 }
 0x45f   : > { %v6369_v30 = vmax.f32 %v6241_v25, 0.0 }
 0x460   : > { %v6367_v32 = vmax.f32 %v6239_v28, 0.0  ;;  %v22235_v28 = vld [vmem:[%s25957_s3 + $0x268] sm:$0xff]  }
 0x461   : > { %v23490_v33 = vpack.c.bf16 %v6369_v30, %v6368_v29 }
 0x462   : > { %v23497_v35 = vpack.c.bf16 %v6367_v32, %v6366_v31  ;;  %v19865_v36 = vpop.f32.mrb[28].mxu0 }
 0x463   : > { %26048 = vst [vmem:[#allocation11_spill] sm:$0xff] %v23490_v33  ;;  %v6244_v37 = vadd.f32 %v19865_v36, %v23383_v41  ;;  %v5680_v38 = vpop.f32.mrb[29].mxu0 }
 0x464   : > { %26049 = vst [vmem:[#allocation12_spill] sm:$0xff] %v23497_v35  ;;  %v6242_v40 = vadd.f32 %v23383_v41, %v5680_v38  ;;  %v19866_v42 = vpop.f32.mrb[30].mxu0  ;;  %20000 = vmatmul.mubr.bf16.gmra.mrb[20].mxu1 %v23497_v35  ;;  %20652 = vmatmul.mubr.bf16.vlgmr.msra.gmra.mrb[128].mxu0 %v23497_v35 }
 0x465   : > { %v6245_v43 = vadd.f32 %v19866_v42, %v23383_v41  ;;  %v5683_v44 = vpop.f32.mrb[31].mxu0  ;;  %20003 = vmatprep.mubr.bf16.mxu1 %v23490_v33  ;;  %20655 = vmatprep.mubr.bf16.mxu0 %v23490_v33  ;;  %v6372_v48 = vmax.f32 %v6244_v37, 0.0 }
 0x466   : > { %v6243_v47 = vadd.f32 %v23383_v41, %v5683_v44  ;;  %20828 = vmatpush3.bf16.msra.mxu0 %v22229_v39  ;;  %v6370_v51 = vmax.f32 %v6242_v40, 0.0  ;;  %v22236_v39 = vld [vmem:[%s25957_s3 + $0x270] sm:$0xff]  }
 0x467   : > { %v6373_v49 = vmax.f32 %v6245_v43, 0.0  ;;  %20829 = vmatprep.subr.bf16.mxu0 %v22230_v50 }
 0x468   : > { %v6371_v52 = vmax.f32 %v6243_v47, 0.0 }
 0x469   : > { %v23514_v53 = vpack.c.bf16 %v6373_v49, %v6372_v48 }
 0x46a   : > { %v23516_v54 = vpack.c.bf16 %v6371_v52, %v6370_v51  ;;  %v19869_v55 = vpop.f32.mrb[32].mxu0  ;;  %20830 = vmatpush3.bf16.msra.mxu0 %v22230_v50  ;;  %v22237_v50 = vld [vmem:[%s25957_s3 + $0x278] sm:$0xff]  }
 0x46b   : > { %26050 = vst [vmem:[#allocation13_spill] sm:$0xff] %v23514_v53  ;;  %v6248_v57 = vadd.f32 %v19869_v55, %v23383_v41  ;;  %v5696_v59 = vpop.f32.mrb[33].mxu0  ;;  %20831 = vmatprep.subr.bf16.mxu0 %v22231_v60 }
 0x46c   : > { %26051 = vst [vmem:[#allocation14_spill] sm:$0xff] %v23516_v54  ;;  %v6246_v61 = vadd.f32 %v23383_v41, %v5696_v59  ;;  %v19870_v62 = vpop.f32.mrb[34].mxu0  ;;  %20004 = vmatmul.mubr.bf16.gmra.mrb[24].mxu1 %v23516_v54  ;;  %20656 = vmatmul.mubr.bf16.gmra.mrb[132].mxu0 %v23516_v54 }
 0x46d   : > { %v6249_v63 = vadd.f32 %v19870_v62, %v23383_v41  ;;  %v5699_v2 = vpop.f32.mrb[35].mxu0  ;;  %20007 = vmatprep.mubr.bf16.mxu1 %v23514_v53  ;;  %20659 = vmatprep.mubr.bf16.mxu0 %v23514_v53  ;;  %v6376_v4 = vmax.f32 %v6248_v57, 0.0 }
 0x46e   : > { %v6247_v3 = vadd.f32 %v23383_v41, %v5699_v2  ;;  %20832 = vmatpush3.bf16.msra.mxu0 %v22231_v60  ;;  %v6374_v8 = vmax.f32 %v6246_v61, 0.0 }
 0x46f   : > { %v6377_v5 = vmax.f32 %v6249_v63, 0.0  ;;  %20833 = vmatprep.subr.bf16.mxu0 %v22233_v7 }
 0x470   : > { %v6375_v10 = vmax.f32 %v6247_v3, 0.0 }
 0x471   : > { %v23532_v12 = vpack.c.bf16 %v6377_v5, %v6376_v4 }
 0x472   : > { %v23534_v13 = vpack.c.bf16 %v6375_v10, %v6374_v8  ;;  %v19873_v14 = vpop.f32.mrb[36].mxu0  ;;  %20834 = vmatpush3.bf16.msra.mxu0 %v22233_v7 }
 0x473   : > { %26052 = vst [vmem:[#allocation15_spill] sm:$0xff] %v23532_v12  ;;  %v6252_v15 = vadd.f32 %v19873_v14, %v23383_v41  ;;  %v5712_v16 = vpop.f32.mrb[37].mxu0  ;;  %20835 = vmatprep.subr.bf16.mxu0 %v22234_v17 }
 0x474   : > { %26053 = vst [vmem:[#allocation16_spill] sm:$0xff] %v23534_v13  ;;  %v6250_v20 = vadd.f32 %v23383_v41, %v5712_v16  ;;  %v19874_v21 = vpop.f32.mrb[38].mxu0  ;;  %20008 = vmatmul.mubr.bf16.gmra.mrb[28].mxu1 %v23534_v13  ;;  %20660 = vmatmul.mubr.bf16.gmra.mrb[136].mxu0 %v23534_v13 }
 0x475   : > { %v6253_v22 = vadd.f32 %v19874_v21, %v23383_v41  ;;  %v5715_v23 = vpop.f32.mrb[39].mxu0  ;;  %20011 = vmatprep.mubr.bf16.mxu1 %v23532_v12  ;;  %20663 = vmatprep.mubr.bf16.mxu0 %v23532_v12  ;;  %v6380_v25 = vmax.f32 %v6252_v15, 0.0 }
 0x476   : > { %v6251_v24 = vadd.f32 %v23383_v41, %v5715_v23  ;;  %20836 = vmatpush3.bf16.msra.mxu0 %v22234_v17  ;;  %v6378_v29 = vmax.f32 %v6250_v20, 0.0 }
 0x477   : > { %v6381_v26 = vmax.f32 %v6253_v22, 0.0  ;;  %20837 = vmatprep.subr.bf16.mxu0 %v22235_v28 }
 0x478   : > { %v6379_v30 = vmax.f32 %v6251_v24, 0.0 }
 0x479   : > { %v23550_v31 = vpack.c.bf16 %v6381_v26, %v6380_v25 }
 0x47a   : > { %v23552_v32 = vpack.c.bf16 %v6379_v30, %v6378_v29  ;;  %v19877_v36 = vpop.f32.mrb[40].mxu0  ;;  %20838 = vmatpush3.bf16.msra.mxu0 %v22235_v28 }
 0x47b   : > { %26054 = vst [vmem:[#allocation17_spill] sm:$0xff] %v23550_v31  ;;  %v6256_v37 = vadd.f32 %v19877_v36, %v23383_v41  ;;  %v5728_v38 = vpop.f32.mrb[41].mxu0  ;;  %20839 = vmatprep.subr.bf16.mxu0 %v22236_v39 }
 0x47c   : > { %26055 = vst [vmem:[#allocation18_spill] sm:$0xff] %v23552_v32  ;;  %v6254_v40 = vadd.f32 %v23383_v41, %v5728_v38  ;;  %v19878_v42 = vpop.f32.mrb[42].mxu0  ;;  %20012 = vmatmul.mubr.bf16.gmra.mrb[32].mxu1 %v23552_v32  ;;  %20664 = vmatmul.mubr.bf16.gmra.mrb[140].mxu0 %v23552_v32 }
 0x47d   : > { %v6257_v43 = vadd.f32 %v19878_v42, %v23383_v41  ;;  %v5731_v44 = vpop.f32.mrb[43].mxu0  ;;  %20015 = vmatprep.mubr.bf16.mxu1 %v23550_v31  ;;  %20667 = vmatprep.mubr.bf16.mxu0 %v23550_v31  ;;  %v6384_v48 = vmax.f32 %v6256_v37, 0.0 }
 0x47e   : > { %v6255_v47 = vadd.f32 %v23383_v41, %v5731_v44  ;;  %20840 = vmatpush3.bf16.msra.mxu0 %v22236_v39  ;;  %v6382_v51 = vmax.f32 %v6254_v40, 0.0 }
 0x47f   : > { %v6385_v49 = vmax.f32 %v6257_v43, 0.0  ;;  %20841 = vmatprep.subr.bf16.mxu0 %v22237_v50 }
 0x480   : > { %v6383_v52 = vmax.f32 %v6255_v47, 0.0 }
 0x481   : > { %v23568_v55 = vpack.c.bf16 %v6385_v49, %v6384_v48 }
 0x482   : > { %v23570_v57 = vpack.c.bf16 %v6383_v52, %v6382_v51  ;;  %v19881_v59 = vpop.f32.mrb[44].mxu0  ;;  %20842 = vmatpush3.bf16.msra.mxu0 %v22237_v50 }
 0x483   : > { %v6260_v60 = vadd.f32 %v19881_v59, %v23383_v41  ;;  %v5744_v61 = vpop.f32.mrb[45].mxu0 }
 0x484   : > { %26056 = vst [vmem:[#allocation19_spill] sm:$0xff] %v23570_v57  ;;  %v6258_v62 = vadd.f32 %v23383_v41, %v5744_v61  ;;  %v19882_v63 = vpop.f32.mrb[46].mxu0  ;;  %20016 = vmatmul.mubr.bf16.gmra.mrb[36].mxu1 %v23570_v57  ;;  %20668 = vmatmul.mubr.bf16.gmra.mrb[144].mxu0 %v23570_v57 }
 0x485   : > { %v6261_v2 = vadd.f32 %v19882_v63, %v23383_v41  ;;  %v5747_v3 = vpop.f32.mrb[47].mxu0  ;;  %20019 = vmatprep.mubr.bf16.mxu1 %v23568_v55  ;;  %20671 = vmatprep.mubr.bf16.mxu0 %v23568_v55  ;;  %v6388_v5 = vmax.f32 %v6260_v60, 0.0 }
 0x486   : > { %v6259_v4 = vadd.f32 %v23383_v41, %v5747_v3  ;;  %v6386_v8 = vmax.f32 %v6258_v62, 0.0 }
 0x487   : > { %v6389_v7 = vmax.f32 %v6261_v2, 0.0 }
 0x488   : > { %v6387_v10 = vmax.f32 %v6259_v4, 0.0 }
 0x489   : > { %v23580_v14 = vpack.c.bf16 %v6389_v7, %v6388_v5 }
 0x48a   : > { %v23582_v15 = vpack.c.bf16 %v6387_v10, %v6386_v8  ;;  %v19885_v16 = vpop.f32.mrb[48].mxu0 }
 0x48b   : > { %v6264_v17 = vadd.f32 %v19885_v16, %v23383_v41  ;;  %v5760_v20 = vpop.f32.mrb[49].mxu0 }
 0x48c   : > { %v6262_v21 = vadd.f32 %v23383_v41, %v5760_v20  ;;  %v19886_v22 = vpop.f32.mrb[50].mxu0  ;;  %20020 = vmatmul.mubr.bf16.gmra.mrb[40].mxu1 %v23582_v15  ;;  %20672 = vmatmul.mubr.bf16.gmra.mrb[148].mxu0 %v23582_v15 }
 0x48d   : > { %v6265_v23 = vadd.f32 %v19886_v22, %v23383_v41  ;;  %v5763_v24 = vpop.f32.mrb[51].mxu0  ;;  %20023 = vmatprep.mubr.bf16.mxu1 %v23580_v14  ;;  %20675 = vmatprep.mubr.bf16.mxu0 %v23580_v14  ;;  %v6392_v26 = vmax.f32 %v6264_v17, 0.0 }
 0x48e   : > { %v6263_v25 = vadd.f32 %v23383_v41, %v5763_v24  ;;  %v6390_v29 = vmax.f32 %v6262_v21, 0.0 }
 0x48f   : > { %v6393_v28 = vmax.f32 %v6265_v23, 0.0 }
 0x490   : > { %v6391_v30 = vmax.f32 %v6263_v25, 0.0 }
 0x491   : > { %v23592_v36 = vpack.c.bf16 %v6393_v28, %v6392_v26 }
 0x492   : > { %v23594_v37 = vpack.c.bf16 %v6391_v30, %v6390_v29  ;;  %v19889_v38 = vpop.f32.mrb[52].mxu0 }
 0x493   : > { %v6268_v39 = vadd.f32 %v19889_v38, %v23383_v41  ;;  %v5776_v40 = vpop.f32.mrb[53].mxu0 }
 0x494   : > { %26057 = vst [vmem:[#allocation20_spill] sm:$0xff] %v23594_v37  ;;  %v6266_v42 = vadd.f32 %v23383_v41, %v5776_v40  ;;  %v19890_v43 = vpop.f32.mrb[54].mxu0  ;;  %20024 = vmatmul.mubr.bf16.gmra.mrb[44].mxu1 %v23594_v37  ;;  %20676 = vmatmul.mubr.bf16.gmra.mrb[152].mxu0 %v23594_v37 }
 0x495   : > { %v6269_v44 = vadd.f32 %v19890_v43, %v23383_v41  ;;  %v5779_v47 = vpop.f32.mrb[55].mxu0  ;;  %20027 = vmatprep.mubr.bf16.mxu1 %v23592_v36  ;;  %20679 = vmatprep.mubr.bf16.mxu0 %v23592_v36  ;;  %v6396_v49 = vmax.f32 %v6268_v39, 0.0 }
 0x496   : > { %v6267_v48 = vadd.f32 %v23383_v41, %v5779_v47  ;;  %v6394_v51 = vmax.f32 %v6266_v42, 0.0 }
 0x497   : > { %v6397_v50 = vmax.f32 %v6269_v44, 0.0 }
 0x498   : > { %v6395_v52 = vmax.f32 %v6267_v48, 0.0 }
 0x499   : > { %v23604_v59 = vpack.c.bf16 %v6397_v50, %v6396_v49 }
 0x49a   : > { %v23606_v60 = vpack.c.bf16 %v6395_v52, %v6394_v51  ;;  %v19893_v61 = vpop.f32.mrb[56].mxu0 }
 0x49b   : > { %v6272_v62 = vadd.f32 %v19893_v61, %v23383_v41  ;;  %v5792_v63 = vpop.f32.mrb[57].mxu0 }
 0x49c   : > { %v6270_v2 = vadd.f32 %v23383_v41, %v5792_v63  ;;  %v19894_v3 = vpop.f32.mrb[58].mxu0  ;;  %20028 = vmatmul.mubr.bf16.gmra.mrb[48].mxu1 %v23606_v60  ;;  %20680 = vmatmul.mubr.bf16.gmra.mrb[156].mxu0 %v23606_v60 }
 0x49d   : > { %v6273_v4 = vadd.f32 %v19894_v3, %v23383_v41  ;;  %v5795_v5 = vpop.f32.mrb[59].mxu0  ;;  %20031 = vmatprep.mubr.bf16.mxu1 %v23604_v59  ;;  %20683 = vmatprep.mubr.bf16.mxu0 %v23604_v59  ;;  %v6400_v8 = vmax.f32 %v6272_v62, 0.0 }
 0x49e   : > { %v6271_v7 = vadd.f32 %v23383_v41, %v5795_v5  ;;  %v6398_v16 = vmax.f32 %v6270_v2, 0.0 }
 0x49f   : > { %v6401_v10 = vmax.f32 %v6273_v4, 0.0 }
 0x4a0   : > { %v6399_v17 = vmax.f32 %v6271_v7, 0.0 }
 0x4a1   : > { %v23616_v20 = vpack.c.bf16 %v6401_v10, %v6400_v8 }
 0x4a2   : > { %v23618_v21 = vpack.c.bf16 %v6399_v17, %v6398_v16  ;;  %v19897_v22 = vpop.f32.mrb[60].mxu0 }
 0x4a3   : > { %26058 = vst [vmem:[#allocation21_spill] sm:$0xff] %v23616_v20  ;;  %v6276_v23 = vadd.f32 %v19897_v22, %v23383_v41  ;;  %v5808_v24 = vpop.f32.mrb[61].mxu0 }
 0x4a4   : > { %26059 = vst [vmem:[#allocation22_spill] sm:$0xff] %v23618_v21  ;;  %v6274_v25 = vadd.f32 %v23383_v41, %v5808_v24  ;;  %v19898_v26 = vpop.f32.mrb[62].mxu0  ;;  %20032 = vmatmul.mubr.bf16.gmra.mrb[52].mxu1 %v23618_v21  ;;  %20684 = vmatmul.mubr.bf16.gmra.mrb[160].mxu0 %v23618_v21 }
 0x4a5   : > { %v6277_v28 = vadd.f32 %v19898_v26, %v23383_v41  ;;  %v5811_v29 = vpop.f32.mrb[63].mxu0  ;;  %20035 = vmatprep.mubr.bf16.mxu1 %v23616_v20  ;;  %20687 = vmatprep.mubr.bf16.mxu0 %v23616_v20  ;;  %v6404_v38 = vmax.f32 %v6276_v23, 0.0 }
 0x4a6   : > { %v6275_v30 = vadd.f32 %v23383_v41, %v5811_v29  ;;  %v6402_v40 = vmax.f32 %v6274_v25, 0.0 }
 0x4a7   : > { %v6405_v39 = vmax.f32 %v6277_v28, 0.0 }
 0x4a8   : > { %v6403_v42 = vmax.f32 %v6275_v30, 0.0 }
 0x4a9   : > { %v23628_v43 = vpack.c.bf16 %v6405_v39, %v6404_v38 }
 0x4aa   : > { %v23630_v44 = vpack.c.bf16 %v6403_v42, %v6402_v40  ;;  %v19901_v47 = vpop.f32.mrb[64].mxu0 }
 0x4ab   : > { %26060 = vst [vmem:[#allocation23_spill] sm:$0xff] %v23628_v43  ;;  %v6280_v48 = vadd.f32 %v19901_v47, %v23383_v41  ;;  %v5824_v49 = vpop.f32.mrb[65].mxu0 }
 0x4ac   : > { %26061 = vst [vmem:[#allocation24_spill] sm:$0xff] %v23630_v44  ;;  %v6278_v50 = vadd.f32 %v23383_v41, %v5824_v49  ;;  %v19902_v51 = vpop.f32.mrb[66].mxu0  ;;  %20036 = vmatmul.mubr.bf16.gmra.mrb[56].mxu1 %v23630_v44  ;;  %20688 = vmatmul.mubr.bf16.gmra.mrb[164].mxu0 %v23630_v44 }
 0x4ad   : > { %v6281_v52 = vadd.f32 %v19902_v51, %v23383_v41  ;;  %v5827_v61 = vpop.f32.mrb[67].mxu0  ;;  %20039 = vmatprep.mubr.bf16.mxu1 %v23628_v43  ;;  %20691 = vmatprep.mubr.bf16.mxu0 %v23628_v43  ;;  %v6408_v63 = vmax.f32 %v6280_v48, 0.0 }
 0x4ae   : > { %v6279_v62 = vadd.f32 %v23383_v41, %v5827_v61  ;;  %v6406_v3 = vmax.f32 %v6278_v50, 0.0 }
 0x4af   : > { %v6409_v2 = vmax.f32 %v6281_v52, 0.0 }
 0x4b0   : > { %v6407_v4 = vmax.f32 %v6279_v62, 0.0 }
 0x4b1   : > { %v23640_v5 = vpack.c.bf16 %v6409_v2, %v6408_v63 }
 0x4b2   : > { %v23642_v7 = vpack.c.bf16 %v6407_v4, %v6406_v3  ;;  %v19905_v8 = vpop.f32.mrb[68].mxu0 }
 0x4b3   : > { %v6284_v10 = vadd.f32 %v19905_v8, %v23383_v41  ;;  %v5840_v16 = vpop.f32.mrb[69].mxu0 }
 0x4b4   : > { %v6282_v17 = vadd.f32 %v23383_v41, %v5840_v16  ;;  %v19906_v22 = vpop.f32.mrb[70].mxu0  ;;  %20040 = vmatmul.mubr.bf16.gmra.mrb[60].mxu1 %v23642_v7  ;;  %20692 = vmatmul.mubr.bf16.gmra.mrb[168].mxu0 %v23642_v7 }
 0x4b5   : > { %v6285_v23 = vadd.f32 %v19906_v22, %v23383_v41  ;;  %v5843_v24 = vpop.f32.mrb[71].mxu0  ;;  %20043 = vmatprep.mubr.bf16.mxu1 %v23640_v5  ;;  %20695 = vmatprep.mubr.bf16.mxu0 %v23640_v5  ;;  %v6412_v26 = vmax.f32 %v6284_v10, 0.0 }
 0x4b6   : > { %v6283_v25 = vadd.f32 %v23383_v41, %v5843_v24  ;;  %v6410_v29 = vmax.f32 %v6282_v17, 0.0 }
 0x4b7   : > { %v6413_v28 = vmax.f32 %v6285_v23, 0.0 }
 0x4b8   : > { %v6411_v30 = vmax.f32 %v6283_v25, 0.0 }
 0x4b9   : > { %v23652_v38 = vpack.c.bf16 %v6413_v28, %v6412_v26 }
 0x4ba   : > { %v23654_v39 = vpack.c.bf16 %v6411_v30, %v6410_v29  ;;  %v19909_v40 = vpop.f32.mrb[72].mxu0 }
 0x4bb   : > { %v6288_v42 = vadd.f32 %v19909_v40, %v23383_v41  ;;  %v5856_v47 = vpop.f32.mrb[73].mxu0 }
 0x4bc   : > { %v6286_v48 = vadd.f32 %v23383_v41, %v5856_v47  ;;  %v19910_v49 = vpop.f32.mrb[74].mxu0  ;;  %20044 = vmatmul.mubr.bf16.gmra.mrb[64].mxu1 %v23654_v39  ;;  %20696 = vmatmul.mubr.bf16.gmra.mrb[172].mxu0 %v23654_v39 }
 0x4bd   : > { %v6289_v50 = vadd.f32 %v19910_v49, %v23383_v41  ;;  %v5859_v51 = vpop.f32.mrb[75].mxu0  ;;  %20047 = vmatprep.mubr.bf16.mxu1 %v23652_v38  ;;  %20699 = vmatprep.mubr.bf16.mxu0 %v23652_v38  ;;  %v6416_v61 = vmax.f32 %v6288_v42, 0.0 }
 0x4be   : > { %v6287_v52 = vadd.f32 %v23383_v41, %v5859_v51  ;;  %v6414_v63 = vmax.f32 %v6286_v48, 0.0 }
 0x4bf   : > { %v6417_v62 = vmax.f32 %v6289_v50, 0.0 }
 0x4c0   : > { %v6415_v2 = vmax.f32 %v6287_v52, 0.0 }
 0x4c1   : > { %v23664_v3 = vpack.c.bf16 %v6417_v62, %v6416_v61 }
 0x4c2   : > { %v23666_v4 = vpack.c.bf16 %v6415_v2, %v6414_v63  ;;  %v19913_v8 = vpop.f32.mrb[76].mxu0 }
 0x4c3   : > { %v6292_v10 = vadd.f32 %v19913_v8, %v23383_v41  ;;  %v5872_v16 = vpop.f32.mrb[77].mxu0 }
 0x4c4   : > { %v6290_v17 = vadd.f32 %v23383_v41, %v5872_v16  ;;  %v19914_v22 = vpop.f32.mrb[78].mxu0  ;;  %20048 = vmatmul.mubr.bf16.gmra.mrb[68].mxu1 %v23666_v4  ;;  %20700 = vmatmul.mubr.bf16.gmra.mrb[176].mxu0 %v23666_v4 }
 0x4c5   : > { %v6293_v23 = vadd.f32 %v19914_v22, %v23383_v41  ;;  %v5875_v24 = vpop.f32.mrb[79].mxu0  ;;  %20051 = vmatprep.mubr.bf16.mxu1 %v23664_v3  ;;  %20703 = vmatprep.mubr.bf16.mxu0 %v23664_v3  ;;  %v6420_v26 = vmax.f32 %v6292_v10, 0.0 }
 0x4c6   : > { %v6291_v25 = vadd.f32 %v23383_v41, %v5875_v24  ;;  %v6418_v29 = vmax.f32 %v6290_v17, 0.0 }
 0x4c7   : > { %v6421_v28 = vmax.f32 %v6293_v23, 0.0 }
 0x4c8   : > { %v6419_v30 = vmax.f32 %v6291_v25, 0.0 }
 0x4c9   : > { %v23676_v40 = vpack.c.bf16 %v6421_v28, %v6420_v26 }
 0x4ca   : > { %v23678_v42 = vpack.c.bf16 %v6419_v30, %v6418_v29  ;;  %v19917_v47 = vpop.f32.mrb[80].mxu0 }
 0x4cb   : > { %v6296_v48 = vadd.f32 %v19917_v47, %v23383_v41  ;;  %v5888_v49 = vpop.f32.mrb[81].mxu0 }
 0x4cc   : > { %v6294_v50 = vadd.f32 %v23383_v41, %v5888_v49  ;;  %v19918_v51 = vpop.f32.mrb[82].mxu0  ;;  %20052 = vmatmul.mubr.bf16.gmra.mrb[72].mxu1 %v23678_v42  ;;  %20704 = vmatmul.mubr.bf16.gmra.mrb[180].mxu0 %v23678_v42 }
 0x4cd   : > { %v6297_v52 = vadd.f32 %v19918_v51, %v23383_v41  ;;  %v5891_v61 = vpop.f32.mrb[83].mxu0  ;;  %20055 = vmatprep.mubr.bf16.mxu1 %v23676_v40  ;;  %20707 = vmatprep.mubr.bf16.mxu0 %v23676_v40  ;;  %v6424_v63 = vmax.f32 %v6296_v48, 0.0 }
 0x4ce   : > { %v6295_v62 = vadd.f32 %v23383_v41, %v5891_v61  ;;  %v6422_v8 = vmax.f32 %v6294_v50, 0.0 }
 0x4cf   : > { %v6425_v2 = vmax.f32 %v6297_v52, 0.0 }
 0x4d0   : > { %v6423_v10 = vmax.f32 %v6295_v62, 0.0  ;;  %v22232_v62 = vld [vmem:[%s25957_s3 + $0x88] sm:$0xff]  }
 0x4d1   : > { %v23688_v16 = vpack.c.bf16 %v6425_v2, %v6424_v63 }
 0x4d2   : > { %v23690_v17 = vpack.c.bf16 %v6423_v10, %v6422_v8  ;;  %v19921_v22 = vpop.f32.mrb[84].mxu0 }
 0x4d3   : > { %v6300_v23 = vadd.f32 %v19921_v22, %v23383_v41  ;;  %v5904_v24 = vpop.f32.mrb[85].mxu0 }
 0x4d4   : > { %v6298_v25 = vadd.f32 %v23383_v41, %v5904_v24  ;;  %v19922_v26 = vpop.f32.mrb[86].mxu0  ;;  %20056 = vmatmul.mubr.bf16.gmra.mrb[76].mxu1 %v23690_v17  ;;  %20708 = vmatmul.mubr.bf16.gmra.mrb[184].mxu0 %v23690_v17  ;;  %v22238_v24 = vld [vmem:[%s25957_s3 + $0x90] sm:$0xff]  }
 0x4d5   : > { %v6301_v28 = vadd.f32 %v19922_v26, %v23383_v41  ;;  %v5907_v29 = vpop.f32.mrb[87].mxu0  ;;  %20075 = vmatprep.mubr.bf16.mxu1 %v23396_v58  ;;  %20711 = vmatprep.mubr.bf16.mxu0 %v23688_v16  ;;  %v6428_v47 = vmax.f32 %v6300_v23, 0.0 }
 0x4d6   : > { %v6299_v30 = vadd.f32 %v23383_v41, %v5907_v29  ;;  %v6426_v49 = vmax.f32 %v6298_v25, 0.0 }
 0x4d7   : > { %v6429_v48 = vmax.f32 %v6301_v28, 0.0 }
 0x4d8   : > { %v6427_v50 = vmax.f32 %v6299_v30, 0.0 }
 0x4d9   : > { %v23700_v51 = vpack.c.bf16 %v6429_v48, %v6428_v47 }
 0x4da   : > { %v23702_v52 = vpack.c.bf16 %v6427_v50, %v6426_v49  ;;  %v19925_v61 = vpop.f32.mrb[88].mxu0  ;;  %v22239_v49 = vld [vmem:[%s25957_s3 + $0x98] sm:$0xff]  }
 0x4db   : > { %v6304_v63 = vadd.f32 %v19925_v61, %v23383_v41  ;;  %v5920_v58 = vpop.f32.mrb[89].mxu0 }
 0x4dc   : > { %v6302_v2 = vadd.f32 %v23383_v41, %v5920_v58  ;;  %v19926_v8 = vpop.f32.mrb[90].mxu0  ;;  %20076 = vmatmul.mubr.bf16.vlgmr.msra.gmra.mrb[80].mxu1 %v23394_v56  ;;  %20712 = vmatmul.mubr.bf16.gmra.mrb[188].mxu0 %v23702_v52 }
 0x4dd   : > { %v6305_v10 = vadd.f32 %v19926_v8, %v23383_v41  ;;  %v5923_v22 = vpop.f32.mrb[91].mxu0  ;;  %20079 = vmatprep.mubr.bf16.mxu1 %v23409_v11  ;;  %20156 = vmatpush3.bf16.msra.mxu1 %v23495_v34  ;;  %v6432_v25 = vmax.f32 %v6304_v63, 0.0 }
 0x4de   : > { %v6303_v23 = vadd.f32 %v23383_v41, %v5923_v22  ;;  %20715 = vmatprep.mubr.bf16.mxu0 %v23700_v51  ;;  %20157 = vmatprep.subr.bf16.mxu1 %v22232_v62  ;;  %v6430_v26 = vmax.f32 %v6302_v2, 0.0 }
 0x4df   : > { %v6433_v56 = vmax.f32 %v6305_v10, 0.0  ;;  %v22240_v10 = vld [vmem:[%s25957_s3 + $0xa0] sm:$0xff]  }
 0x4e0   : > { %v6431_v28 = vmax.f32 %v6303_v23, 0.0 }
 0x4e1   : > { %v23719_v29 = vpack.c.bf16 %v6433_v56, %v6432_v25  ;;  %20158 = vmatpush3.bf16.msra.mxu1 %v22232_v62 }
 0x4e2   : > { %v23721_v30 = vpack.c.bf16 %v6431_v28, %v6430_v26  ;;  %v19929_v47 = vpop.f32.mrb[92].mxu0  ;;  %20159 = vmatprep.subr.bf16.mxu1 %v22238_v24 }
 0x4e3   : > { %26062 = vst [vmem:[#allocation25_spill] sm:$0xff] %v23719_v29  ;;  %v6308_v34 = vadd.f32 %v19929_v47, %v23383_v41  ;;  %v5936_v48 = vpop.f32.mrb[93].mxu0 }
 0x4e4   : > { %v6306_v50 = vadd.f32 %v23383_v41, %v5936_v48  ;;  %v19930_v61 = vpop.f32.mrb[94].mxu0  ;;  %20080 = vmatmul.mubr.bf16.gmra.mrb[84].mxu1 %v23407_v9  ;;  %20716 = vmatmul.mubr.bf16.gmra.mrb[192].mxu0 %v23721_v30 }
 0x4e5   : > { %v6309_v62 = vadd.f32 %v19930_v61, %v23383_v41  ;;  %v5939_v63 = vpop.f32.mrb[95].mxu0  ;;  %20083 = vmatprep.mubr.bf16.mxu1 %v23430_v6  ;;  %20719 = vmatprep.mubr.bf16.mxu0 %v23719_v29  ;;  %v6436_v2 = vmax.f32 %v6308_v34, 0.0 }
 0x4e6   : > { %v6307_v58 = vadd.f32 %v23383_v41, %v5939_v63  ;;  %20160 = vmatpush3.bf16.msra.mxu1 %v22238_v24  ;;  %v6434_v22 = vmax.f32 %v6306_v50, 0.0  ;;  %v22241_v24 = vld [vmem:[%s25957_s3 + $0xa8] sm:$0xff]  }
 0x4e7   : > { %v6437_v8 = vmax.f32 %v6309_v62, 0.0  ;;  %20161 = vmatprep.subr.bf16.mxu1 %v22239_v49 }
 0x4e8   : > { %v6435_v23 = vmax.f32 %v6307_v58, 0.0  ;;  %v22242_v58 = vld [vmem:[%s25957_s3 + $0xb0] sm:$0xff]  }
 0x4e9   : > { %v23737_v25 = vpack.c.bf16 %v6437_v8, %v6436_v2 }
 0x4ea   : > { %v23739_v56 = vpack.c.bf16 %v6435_v23, %v6434_v22  ;;  %v19933_v26 = vpop.f32.mrb[96].mxu0  ;;  %20162 = vmatpush3.bf16.msra.mxu1 %v22239_v49 }
 0x4eb   : > { %v6312_v28 = vadd.f32 %v19933_v26, %v23383_v41  ;;  %v5952_v47 = vpop.f32.mrb[97].mxu0  ;;  %20163 = vmatprep.subr.bf16.mxu1 %v22240_v10 }
 0x4ec   : > { %v6310_v34 = vadd.f32 %v23383_v41, %v5952_v47  ;;  %v19934_v48 = vpop.f32.mrb[98].mxu0  ;;  %20084 = vmatmul.mubr.bf16.gmra.mrb[88].mxu1 %v23428_v27  ;;  %20720 = vmatmul.mubr.bf16.gmra.mrb[196].mxu0 %v23739_v56  ;;  %v22243_v47 = vld [vmem:[%s25957_s3 + $0xb8] sm:$0xff]  }
 0x4ed   : > { %v6313_v50 = vadd.f32 %v19934_v48, %v23383_v41  ;;  %v5955_v61 = vpop.f32.mrb[99].mxu0  ;;  %20087 = vmatprep.mubr.bf16.mxu1 %v23450_v46  ;;  %20723 = vmatprep.mubr.bf16.mxu0 %v23737_v25  ;;  %v6440_v62 = vmax.f32 %v6312_v28, 0.0 }
 0x4ee   : > { %v6311_v49 = vadd.f32 %v23383_v41, %v5955_v61  ;;  %20164 = vmatpush3.bf16.msra.mxu1 %v22240_v10  ;;  %v6438_v2 = vmax.f32 %v6310_v34, 0.0  ;;  %v23762_v41 = vld [vmem:[%s25956_s2] ss:$0 sm:$0xff] }
 0x4ef   : > { %v6441_v63 = vmax.f32 %v6313_v50, 0.0  ;;  %20165 = vmatprep.subr.bf16.mxu1 %v22241_v24 }
 0x4f0   : > { %v6439_v8 = vmax.f32 %v6311_v49, 0.0 }
 0x4f1   : > { %v23755_v22 = vpack.c.bf16 %v6441_v63, %v6440_v62 }
 0x4f2   : > { %v23757_v23 = vpack.c.bf16 %v6439_v8, %v6438_v2  ;;  %v19937_v26 = vpop.f32.mrb[100].mxu0  ;;  %20166 = vmatpush3.bf16.msra.mxu1 %v22241_v24 }
 0x4f3   : > { %26063 = vst [vmem:[#allocation26_spill] sm:$0xff] %v23755_v22  ;;  %v6316_v10 = vadd.f32 %v23762_v41, %v19937_v26  ;;  %v5968_v28 = vpop.f32.mrb[101].mxu0  ;;  %20167 = vmatprep.subr.bf16.mxu1 %v22242_v58 }
 0x4f4   : > { %v6314_v34 = vadd.f32 %v23762_v41, %v5968_v28  ;;  %v19938_v48 = vpop.f32.mrb[102].mxu0  ;;  %20088 = vmatmul.mubr.bf16.gmra.mrb[92].mxu1 %v23448_v45  ;;  %20724 = vmatmul.mubr.bf16.gmra.mrb[200].mxu0 %v23757_v23 }
 0x4f5   : > { %v6317_v24 = vadd.f32 %v23762_v41, %v19938_v48  ;;  %v5971_v50 = vpop.f32.mrb[103].mxu0  ;;  %20091 = vmatprep.mubr.bf16.mxu1 %v23468_v1  ;;  %20727 = vmatprep.mubr.bf16.mxu0 %v23755_v22  ;;  %v6444_v49 = vmax.f32 %v6316_v10, 0.0 }
 0x4f6   : > { %v6315_v61 = vadd.f32 %v23762_v41, %v5971_v50  ;;  %20168 = vmatpush3.bf16.msra.mxu1 %v22242_v58  ;;  %v6442_v63 = vmax.f32 %v6314_v34, 0.0  ;;  %v23786_v58 = vld [vmem:[%s25957_s3 + $0xc0] sm:$0xff]  }
 0x4f7   : > { %v6445_v62 = vmax.f32 %v6317_v24, 0.0  ;;  %20169 = vmatprep.subr.bf16.mxu1 %v22243_v47 }
 0x4f8   : > { %v6443_v2 = vmax.f32 %v6315_v61, 0.0 }
 0x4f9   : > { %v23775_v8 = vpack.c.bf16 %v6445_v62, %v6444_v49 }
 0x4fa   : > { %v23777_v26 = vpack.c.bf16 %v6443_v2, %v6442_v63  ;;  %v19941_v28 = vpop.f32.mrb[104].mxu0  ;;  %20170 = vmatpush3.bf16.msra.mxu1 %v22243_v47 }
 0x4fb   : > { %26064 = vst [vmem:[#allocation27_spill] sm:$0xff] %v23775_v8  ;;  %v6320_v48 = vadd.f32 %v23762_v41, %v19941_v28  ;;  %v5984_v45 = vpop.f32.mrb[105].mxu0  ;;  %20251 = vmatprep.subr.bf16.mxu1 %v23786_v58  ;;  %v22245_v28 = vld [vmem:[%s25957_s3 + $0x2c0] sm:$0xff]  }
 0x4fc   : > { %26065 = vst [vmem:[#allocation28_spill] sm:$0xff] %v23777_v26  ;;  %v6318_v1 = vadd.f32 %v23762_v41, %v5984_v45  ;;  %v19942_v46 = vpop.f32.mrb[106].mxu0  ;;  %20092 = vmatmul.mubr.bf16.gmra.mrb[96].mxu1 %v23466_v0  ;;  %20728 = vmatmul.mubr.bf16.gmra.mrb[204].mxu0 %v23777_v26 }
 0x4fd   : > { %v6321_v10 = vadd.f32 %v23762_v41, %v19942_v46  ;;  %v5987_v34 = vpop.f32.mrb[107].mxu0  ;;  %20095 = vmatprep.mubr.bf16.mxu1 %v23481_v19  ;;  %20843 = vmatprep.mubr.bf16.mxu0 %v23532_v12  ;;  %v6448_v45 = vmax.f32 %v6320_v48, 0.0 }
 0x4fe   : > { %v6319_v47 = vadd.f32 %v23762_v41, %v5987_v34  ;;  %v6446_v50 = vmax.f32 %v6318_v1, 0.0  ;;  %21019 = vmatprep.subr.bf16.mxu0 %v22245_v28 }
 0x4ff   : > { %v6449_v24 = vmax.f32 %v6321_v10, 0.0 }
 0x500   : > { %v6447_v61 = vmax.f32 %v6319_v47, 0.0 }
 0x501   : > { %v23793_v49 = vpack.c.bf16 %v6449_v24, %v6448_v45  ;;  %v22246_v24 = vld [vmem:[%s25957_s3 + $0x2c8] sm:$0xff]  }
 0x502   : > { %v23795_v62 = vpack.c.bf16 %v6447_v61, %v6446_v50  ;;  %v19945_v63 = vpop.f32.mrb[108].mxu0 }
 0x503   : > { %26066 = vst [vmem:[#allocation29_spill] sm:$0xff] %v23793_v49  ;;  %v6324_v46 = vadd.f32 %v23762_v41, %v19945_v63  ;;  %v6000_v2 = vpop.f32.mrb[109].mxu0 }
 0x504   : > { %26067 = vst [vmem:[#allocation30_spill] sm:$0xff] %v23795_v62  ;;  %v6322_v34 = vadd.f32 %v23762_v41, %v6000_v2  ;;  %v19946_v19 = vpop.f32.mrb[110].mxu0  ;;  %20096 = vmatmul.mubr.bf16.gmra.mrb[100].mxu1 %v23479_v18  ;;  %20844 = vmatmul.mubr.bf16.vlgmr.msra.gmra.mrb[208].mxu0 %v23552_v32 }
 0x505   : > { %v6325_v1 = vadd.f32 %v23762_v41, %v19946_v19  ;;  %v6003_v48 = vpop.f32.mrb[111].mxu0  ;;  %20099 = vmatprep.mubr.bf16.mxu1 %v23497_v35  ;;  %20847 = vmatprep.mubr.bf16.mxu0 %v23550_v31  ;;  %v6452_v47 = vmax.f32 %v6324_v46, 0.0  ;;  %v22247_v46 = vld [vmem:[%s25957_s3 + $0x2d0] sm:$0xff]  }
 0x506   : > { %v6323_v10 = vadd.f32 %v23762_v41, %v6003_v48  ;;  %21020 = vmatpush3.bf16.msra.mxu0 %v22245_v28  ;;  %v6450_v50 = vmax.f32 %v6322_v34, 0.0 }
 0x507   : > { %v6453_v45 = vmax.f32 %v6325_v1, 0.0  ;;  %21021 = vmatprep.subr.bf16.mxu0 %v22246_v24 }
 0x508   : > { %v6451_v61 = vmax.f32 %v6323_v10, 0.0 }
 0x509   : > { %v23811_v63 = vpack.c.bf16 %v6453_v45, %v6452_v47 }
 0x50a   : > { %v23813_v19 = vpack.c.bf16 %v6451_v61, %v6450_v50  ;;  %v19949_v2 = vpop.f32.mrb[112].mxu0  ;;  %21022 = vmatpush3.bf16.msra.mxu0 %v22246_v24 }
 0x50b   : > { %26068 = vst [vmem:[#allocation31_spill] sm:$0xff] %v23811_v63  ;;  %v6328_v35 = vadd.f32 %v23762_v41, %v19949_v2  ;;  %v6016_v18 = vpop.f32.mrb[113].mxu0  ;;  %21023 = vmatprep.subr.bf16.mxu0 %v22247_v46 }
 0x50c   : > { %26069 = vst [vmem:[#allocation32_spill] sm:$0xff] %v23813_v19  ;;  %v6326_v28 = vadd.f32 %v23762_v41, %v6016_v18  ;;  %v19950_v1 = vpop.f32.mrb[114].mxu0  ;;  %20100 = vmatmul.mubr.bf16.gmra.mrb[104].mxu1 %v23490_v33  ;;  %20848 = vmatmul.mubr.bf16.gmra.mrb[212].mxu0 %v23570_v57  ;;  %v22249_v18 = vld [vmem:[%s25957_s3 + $0x2d8] sm:$0xff]  }
 0x50d   : > { %v6329_v34 = vadd.f32 %v23762_v41, %v19950_v1  ;;  %v6019_v48 = vpop.f32.mrb[115].mxu0  ;;  %20103 = vmatprep.mubr.bf16.mxu1 %v23516_v54  ;;  %20851 = vmatprep.mubr.bf16.mxu0 %v23568_v55  ;;  %v6456_v47 = vmax.f32 %v6328_v35, 0.0 }
 0x50e   : > { %v6327_v10 = vadd.f32 %v23762_v41, %v6019_v48  ;;  %21024 = vmatpush3.bf16.msra.mxu0 %v22247_v46  ;;  %v6454_v50 = vmax.f32 %v6326_v28, 0.0  ;;  %v22250_v28 = vld [vmem:[%s25957_s3 + $0x2e0] sm:$0xff]  }
 0x50f   : > { %v6457_v45 = vmax.f32 %v6329_v34, 0.0  ;;  %v19981_v24 = vpop.f32.mrb[0].mxu1  ;;  %21025 = vmatprep.subr.bf16.mxu0 %v22249_v18 }
 0x510   : > { %v6455_v61 = vmax.f32 %v6327_v10, 0.0  ;;  %v23829_v2 = vpop.f32.mrb[1].mxu1 }
 0x511   : > { %26070 = vst [vmem:[#allocation33_spill] sm:$0xff] %v23829_v2  ;;  %v23831_v1 = vpack.c.bf16 %v6457_v45, %v6456_v47  ;;  %v19982_v54 = vpop.f32.mrb[2].mxu1 }
 0x512   : > { %v23833_v33 = vpack.c.bf16 %v6455_v61, %v6454_v50  ;;  %v19953_v48 = vpop.f32.mrb[116].mxu0  ;;  %v23835_v63 = vpop.f32.mrb[3].mxu1  ;;  %21026 = vmatpush3.bf16.msra.mxu0 %v22249_v18  ;;  %v22251_v61 = vld [vmem:[%s25957_s3 + $0x2e8] sm:$0xff]  }
 0x513   : > { %26071 = vst [vmem:[#allocation34_spill] sm:$0xff] %v23831_v1  ;;  %26073 = vst [vmem:[#allocation36_spill] sm:$0xff] %v23835_v63  ;;  %v6332_v35 = vadd.f32 %v23762_v41, %v19953_v48  ;;  %v6032_v46 = vpop.f32.mrb[117].mxu0  ;;  %21027 = vmatprep.subr.bf16.mxu0 %v22250_v28 }
 0x514   : > { %26072 = vst [vmem:[#allocation35_spill] sm:$0xff] %v23833_v33  ;;  %v6330_v34 = vadd.f32 %v23762_v41, %v6032_v46  ;;  %v19954_v10 = vpop.f32.mrb[118].mxu0  ;;  %20104 = vmatmul.mubr.bf16.gmra.mrb[108].mxu1 %v23514_v53  ;;  %20852 = vmatmul.mubr.bf16.gmra.mrb[216].mxu0 %v23582_v15 }
 0x515   : > { %v6333_v54 = vadd.f32 %v23762_v41, %v19954_v10  ;;  %v6035_v47 = vpop.f32.mrb[119].mxu0  ;;  %20107 = vmatprep.mubr.bf16.mxu1 %v23534_v13  ;;  %20855 = vmatprep.mubr.bf16.mxu0 %v23580_v14  ;;  %v6460_v24 = vmax.f32 %v6332_v35, 0.0 }
 0x516   : > { %v6331_v45 = vadd.f32 %v23762_v41, %v6035_v47  ;;  %21028 = vmatpush3.bf16.msra.mxu0 %v22250_v28  ;;  %v6458_v48 = vmax.f32 %v6330_v34, 0.0  ;;  %v22252_v34 = vld [vmem:[%s25957_s3 + $0x2f0] sm:$0xff]  }
 0x517   : > { %v6461_v18 = vmax.f32 %v6333_v54, 0.0  ;;  %v19985_v50 = vpop.f32.mrb[4].mxu1  ;;  %21029 = vmatprep.subr.bf16.mxu0 %v22251_v61 }
 0x518   : > { %v6459_v46 = vmax.f32 %v6331_v45, 0.0  ;;  %v23851_v1 = vpop.f32.mrb[5].mxu1 }
 0x519   : > { %26074 = vst [vmem:[#allocation37_spill] sm:$0xff] %v23851_v1  ;;  %v23853_v10 = vpack.c.bf16 %v6461_v18, %v6460_v24  ;;  %v19986_v63 = vpop.f32.mrb[6].mxu1 }
 0x51a   : > { %v23855_v2 = vpack.c.bf16 %v6459_v46, %v6458_v48  ;;  %v19957_v47 = vpop.f32.mrb[120].mxu0  ;;  %v23857_v13 = vpop.f32.mrb[7].mxu1  ;;  %21030 = vmatpush3.bf16.msra.mxu0 %v22251_v61  ;;  %v22253_v46 = vld [vmem:[%s25957_s3 + $0x2f8] sm:$0xff]  }
 0x51b   : > { %26075 = vst [vmem:[#allocation38_spill] sm:$0xff] %v23853_v10  ;;  %26077 = vst [vmem:[#allocation40_spill] sm:$0xff] %v23857_v13  ;;  %v6336_v35 = vadd.f32 %v23762_v41, %v19957_v47  ;;  %v6048_v28 = vpop.f32.mrb[121].mxu0  ;;  %21031 = vmatprep.subr.bf16.mxu0 %v22252_v34 }
 0x51c   : > { %26076 = vst [vmem:[#allocation39_spill] sm:$0xff] %v23855_v2  ;;  %v6334_v54 = vadd.f32 %v23762_v41, %v6048_v28  ;;  %v19958_v45 = vpop.f32.mrb[122].mxu0  ;;  %20108 = vmatmul.mubr.bf16.gmra.mrb[112].mxu1 %v23532_v12  ;;  %20856 = vmatmul.mubr.bf16.gmra.mrb[220].mxu0 %v23594_v37 }
 0x51d   : > { %v6337_v63 = vadd.f32 %v23762_v41, %v19958_v45  ;;  %v6051_v24 = vpop.f32.mrb[123].mxu0  ;;  %20111 = vmatprep.mubr.bf16.mxu1 %v23552_v32  ;;  %20859 = vmatprep.mubr.bf16.mxu0 %v23592_v36  ;;  %v6464_v50 = vmax.f32 %v6336_v35, 0.0 }
 0x51e   : > { %v6335_v18 = vadd.f32 %v23762_v41, %v6051_v24  ;;  %21032 = vmatpush3.bf16.msra.mxu0 %v22252_v34  ;;  %v6462_v47 = vmax.f32 %v6334_v54, 0.0 }
 0x51f   : > { %v6465_v61 = vmax.f32 %v6337_v63, 0.0  ;;  %v19989_v48 = vpop.f32.mrb[8].mxu1  ;;  %21033 = vmatprep.subr.bf16.mxu0 %v22253_v46 }
 0x520   : > { %v6463_v28 = vmax.f32 %v6335_v18, 0.0  ;;  %v23873_v10 = vpop.f32.mrb[9].mxu1 }
 0x521   : > { %v23875_v45 = vpack.c.bf16 %v6465_v61, %v6464_v50  ;;  %v19990_v2 = vpop.f32.mrb[10].mxu1 }
 0x522   : > { %v23877_v13 = vpack.c.bf16 %v6463_v28, %v6462_v47  ;;  %v19961_v24 = vpop.f32.mrb[124].mxu0  ;;  %v23879_v1 = vpop.f32.mrb[11].mxu1  ;;  %21034 = vmatpush3.bf16.msra.mxu0 %v22253_v46 }
 0x523   : > { %26078 = vst [vmem:[#allocation41_spill] sm:$0xff] %v23875_v45  ;;  %26080 = vst [vmem:[#allocation43_spill] sm:$0xff] %v23879_v1  ;;  %v6340_v35 = vadd.f32 %v23762_v41, %v19961_v24  ;;  %v6064_v34 = vpop.f32.mrb[125].mxu0 }
 0x524   : > { %26079 = vst [vmem:[#allocation42_spill] sm:$0xff] %v23877_v13  ;;  %v6338_v63 = vadd.f32 %v23762_v41, %v6064_v34  ;;  %v19962_v48 = vpop.f32.mrb[126].mxu0  ;;  %20112 = vmatmul.mubr.bf16.gmra.mrb[116].mxu1 %v23550_v31  ;;  %20860 = vmatmul.mubr.bf16.gmra.mrb[224].mxu0 %v23606_v60 }
 0x525   : > { %v6341_v54 = vadd.f32 %v23762_v41, %v19962_v48  ;;  %v6067_v2 = vpop.f32.mrb[127].mxu0  ;;  %20115 = vmatprep.mubr.bf16.mxu1 %v23570_v57  ;;  %20863 = vmatprep.mubr.bf16.mxu0 %v23604_v59  ;;  %v6468_v50 = vmax.f32 %v6340_v35, 0.0 }
 0x526   : > { %v6339_v18 = vadd.f32 %v23762_v41, %v6067_v2  ;;  %v6466_v46 = vmax.f32 %v6338_v63, 0.0 }
 0x527   : > { %v6469_v61 = vmax.f32 %v6341_v54, 0.0  ;;  %v19993_v47 = vpop.f32.mrb[12].mxu1 }
 0x528   : > { %v6467_v28 = vmax.f32 %v6339_v18, 0.0  ;;  %v6810_v24 = vpop.f32.mrb[13].mxu1 }
 0x529   : > { %v23889_v34 = vpack.c.bf16 %v6469_v61, %v6468_v50  ;;  %v19994_v45 = vpop.f32.mrb[14].mxu1 }
 0x52a   : > { %v23891_v13 = vpack.c.bf16 %v6467_v28, %v6466_v46  ;;  %v6813_v1 = vpop.f32.mrb[15].mxu1 }
 0x52b   : > { %26081 = vst [vmem:[#allocation44_spill] sm:$0xff] %v23889_v34 }
 0x52c   : > { %26082 = vst [vmem:[#allocation45_spill] sm:$0xff] %v23891_v13  ;;  %20116 = vmatmul.mubr.bf16.gmra.mrb[120].mxu1 %v23568_v55  ;;  %20864 = vmatmul.mubr.bf16.gmra.mrb[228].mxu0 %v23618_v21 }
 0x52d   : > { %20119 = vmatprep.mubr.bf16.mxu1 %v23582_v15  ;;  %20867 = vmatprep.mubr.bf16.mxu0 %v23616_v20 }
 0x52f   : > { %v19997_v41 = vpop.f32.mrb[16].mxu1 }
 0x530   : > { %v6826_v35 = vpop.f32.mrb[17].mxu1 }
 0x531   : > { %v19998_v48 = vpop.f32.mrb[18].mxu1 }
 0x532   : > { %v6829_v63 = vpop.f32.mrb[19].mxu1 }
 0x534   : > { %20120 = vmatmul.mubr.bf16.gmra.mrb[124].mxu1 %v23580_v14  ;;  %20868 = vmatmul.mubr.bf16.gmra.mrb[232].mxu0 %v23630_v44 }
 0x535   : > { %20123 = vmatprep.mubr.bf16.mxu1 %v23594_v37  ;;  %20871 = vmatprep.mubr.bf16.mxu0 %v23628_v43 }
 0x537   : > { %v20001_v1 = vpop.f32.mrb[20].mxu1  ;;  %v20653_v45 = vpop.f32.mrb[128].mxu0 }
 0x538   : > { %v6842_v54 = vpop.f32.mrb[21].mxu1  ;;  %v23901_v2 = vpop.f32.mrb[129].mxu0 }
 0x539   : > { %26083 = vst [vmem:[#allocation46_spill] sm:$0xff] %v23901_v2  ;;  %v20002_v18 = vpop.f32.mrb[22].mxu1  ;;  %v20654_v50 = vpop.f32.mrb[130].mxu0 }
 0x53a   : > { %v6845_v61 = vpop.f32.mrb[23].mxu1  ;;  %v23903_v47 = vpop.f32.mrb[131].mxu0 }
 0x53b   : > { %26084 = vst [vmem:[#allocation47_spill] sm:$0xff] %v23903_v47 }
 0x53c   : > { %20124 = vmatmul.mubr.bf16.gmra.mrb[128].mxu1 %v23592_v36  ;;  %20872 = vmatmul.mubr.bf16.gmra.mrb[236].mxu0 %v23642_v7 }
 0x53d   : > { %20127 = vmatprep.mubr.bf16.mxu1 %v23606_v60  ;;  %20875 = vmatprep.mubr.bf16.mxu0 %v23640_v5 }
 0x53f   : > { %v20005_v46 = vpop.f32.mrb[24].mxu1  ;;  %v20657_v28 = vpop.f32.mrb[132].mxu0 }
 0x540   : > { %v6858_v24 = vpop.f32.mrb[25].mxu1  ;;  %v23909_v41 = vpop.f32.mrb[133].mxu0 }
 0x541   : > { %26085 = vst [vmem:[#allocation48_spill] sm:$0xff] %v23909_v41  ;;  %v20006_v35 = vpop.f32.mrb[26].mxu1  ;;  %v20658_v48 = vpop.f32.mrb[134].mxu0 }
 0x542   : > { %v6861_v63 = vpop.f32.mrb[27].mxu1  ;;  %v23911_v1 = vpop.f32.mrb[135].mxu0 }
 0x543   : > { %26086 = vst [vmem:[#allocation49_spill] sm:$0xff] %v23911_v1 }
 0x544   : > { %20128 = vmatmul.mubr.bf16.gmra.mrb[132].mxu1 %v23604_v59  ;;  %20876 = vmatmul.mubr.bf16.gmra.mrb[240].mxu0 %v23654_v39 }
 0x545   : > { %20131 = vmatprep.mubr.bf16.mxu1 %v23618_v21  ;;  %20879 = vmatprep.mubr.bf16.mxu0 %v23652_v38 }
 0x547   : > { %v20009_v45 = vpop.f32.mrb[28].mxu1  ;;  %v20661_v54 = vpop.f32.mrb[136].mxu0 }
 0x548   : > { %v6874_v18 = vpop.f32.mrb[29].mxu1  ;;  %v23917_v50 = vpop.f32.mrb[137].mxu0 }
 0x549   : > { %26087 = vst [vmem:[#allocation50_spill] sm:$0xff] %v23917_v50  ;;  %v20010_v61 = vpop.f32.mrb[30].mxu1  ;;  %v20662_v46 = vpop.f32.mrb[138].mxu0 }
 0x54a   : > { %v6877_v28 = vpop.f32.mrb[31].mxu1  ;;  %v23919_v24 = vpop.f32.mrb[139].mxu0 }
 0x54b   : > { %26088 = vst [vmem:[#allocation51_spill] sm:$0xff] %v23919_v24 }
 0x54c   : > { %20132 = vmatmul.mubr.bf16.gmra.mrb[136].mxu1 %v23616_v20  ;;  %20880 = vmatmul.mubr.bf16.gmra.mrb[244].mxu0 %v23666_v4 }
 0x54d   : > { %20135 = vmatprep.mubr.bf16.mxu1 %v23630_v44  ;;  %20883 = vmatprep.mubr.bf16.mxu0 %v23664_v3 }
 0x54f   : > { %v20013_v35 = vpop.f32.mrb[32].mxu1  ;;  %v20665_v48 = vpop.f32.mrb[140].mxu0 }
 0x550   : > { %v23925_v63 = vpop.f32.mrb[33].mxu1  ;;  %v10359_v45 = vpop.f32.mrb[141].mxu0 }
 0x551   : > { %v20014_v54 = vpop.f32.mrb[34].mxu1  ;;  %v20666_v18 = vpop.f32.mrb[142].mxu0 }
 0x552   : > { %v23927_v61 = vpop.f32.mrb[35].mxu1  ;;  %v10362_v46 = vpop.f32.mrb[143].mxu0 }
 0x554   : > { %20136 = vmatmul.mubr.bf16.gmra.mrb[140].mxu1 %v23628_v43  ;;  %20884 = vmatmul.mubr.bf16.gmra.mrb[248].mxu0 %v23678_v42 }
 0x555   : > { %20139 = vmatprep.mubr.bf16.mxu1 %v23642_v7  ;;  %20887 = vmatprep.mubr.bf16.mxu0 %v23676_v40 }
 0x557   : > { %v20017_v28 = vpop.f32.mrb[36].mxu1  ;;  %v20669_v24 = vpop.f32.mrb[144].mxu0 }
 0x558   : > { %v23933_v35 = vpop.f32.mrb[37].mxu1  ;;  %v10375_v48 = vpop.f32.mrb[145].mxu0 }
 0x559   : > { %v20018_v50 = vpop.f32.mrb[38].mxu1  ;;  %v20670_v45 = vpop.f32.mrb[146].mxu0 }
 0x55a   : > { %v23935_v54 = vpop.f32.mrb[39].mxu1  ;;  %v10378_v18 = vpop.f32.mrb[147].mxu0 }
 0x55c   : > { %20140 = vmatmul.mubr.bf16.gmra.mrb[144].mxu1 %v23640_v5  ;;  %20888 = vmatmul.mubr.bf16.gmra.mrb[252].mxu0 %v23690_v17 }
 0x55d   : > { %20143 = vmatprep.mubr.bf16.mxu1 %v23654_v39  ;;  %20891 = vmatprep.mubr.bf16.mxu0 %v23688_v16 }
 0x55f   : > { %v20021_v46 = vpop.f32.mrb[40].mxu1  ;;  %v20673_v1 = vpop.f32.mrb[148].mxu0 }
 0x560   : > { %v23941_v28 = vpop.f32.mrb[41].mxu1  ;;  %v10391_v24 = vpop.f32.mrb[149].mxu0 }
 0x561   : > { %v20022_v41 = vpop.f32.mrb[42].mxu1  ;;  %v20674_v48 = vpop.f32.mrb[150].mxu0 }
 0x562   : > { %v23943_v50 = vpop.f32.mrb[43].mxu1  ;;  %v10394_v45 = vpop.f32.mrb[151].mxu0 }
 0x563   : > { %26089 = vst [vmem:[#allocation52_spill] sm:$0xff] %v23943_v50 }
 0x564   : > { %20144 = vmatmul.mubr.bf16.gmra.mrb[148].mxu1 %v23652_v38  ;;  %20892 = vmatmul.mubr.bf16.gmra.mrb[0].mxu0 %v23702_v52 }
 0x565   : > { %20147 = vmatprep.mubr.bf16.mxu1 %v23666_v4  ;;  %20895 = vmatprep.mubr.bf16.mxu0 %v23700_v51 }
 0x567   : > { %v20025_v18 = vpop.f32.mrb[44].mxu1  ;;  %v20677_v47 = vpop.f32.mrb[152].mxu0 }
 0x568   : > { %v6938_v46 = vpop.f32.mrb[45].mxu1  ;;  %v10407_v1 = vpop.f32.mrb[153].mxu0 }
 0x569   : > { %v20026_v2 = vpop.f32.mrb[46].mxu1  ;;  %v20678_v34 = vpop.f32.mrb[154].mxu0 }
 0x56a   : > { %v6941_v24 = vpop.f32.mrb[47].mxu1  ;;  %v10410_v41 = vpop.f32.mrb[155].mxu0 }
 0x56c   : > { %20148 = vmatmul.mubr.bf16.gmra.mrb[152].mxu1 %v23664_v3  ;;  %20896 = vmatmul.mubr.bf16.gmra.mrb[4].mxu0 %v23721_v30 }
 0x56d   : > { %20151 = vmatprep.mubr.bf16.mxu1 %v23678_v42  ;;  %20899 = vmatprep.mubr.bf16.mxu0 %v23719_v29 }
 0x56f   : > { %v20029_v48 = vpop.f32.mrb[48].mxu1  ;;  %v20681_v45 = vpop.f32.mrb[156].mxu0 }
 0x570   : > { %v6954_v13 = vpop.f32.mrb[49].mxu1  ;;  %v10423_v50 = vpop.f32.mrb[157].mxu0 }
 0x571   : > { %v20030_v18 = vpop.f32.mrb[50].mxu1  ;;  %v20682_v47 = vpop.f32.mrb[158].mxu0 }
 0x572   : > { %v6957_v46 = vpop.f32.mrb[51].mxu1  ;;  %v10426_v1 = vpop.f32.mrb[159].mxu0  ;;  %v22248_v18 = vld [vmem:[%s25957_s3 + $0xc8] sm:$0xff]  }
 0x574   : > { %20152 = vmatmul.mubr.bf16.gmra.mrb[156].mxu1 %v23676_v40  ;;  %20900 = vmatmul.mubr.bf16.gmra.mrb[8].mxu0 %v23739_v56 }
 0x575   : > { %20171 = vmatprep.mubr.bf16.mxu1 %v23409_v11  ;;  %20903 = vmatprep.mubr.bf16.mxu0 %v23737_v25  ;;  %v22254_v11 = vld [vmem:[%s25957_s3 + $0xd0] sm:$0xff]  }
 0x577   : > { %v20033_v34 = vpop.f32.mrb[52].mxu1  ;;  %v20685_v2 = vpop.f32.mrb[160].mxu0 }
 0x578   : > { %v6970_v24 = vpop.f32.mrb[53].mxu1  ;;  %v23957_v41 = vpop.f32.mrb[161].mxu0 }
 0x579   : > { %26090 = vst [vmem:[#allocation53_spill] sm:$0xff] %v23957_v41  ;;  %v20034_v48 = vpop.f32.mrb[54].mxu1  ;;  %v20686_v13 = vpop.f32.mrb[162].mxu0 }
 0x57a   : > { %v6973_v50 = vpop.f32.mrb[55].mxu1  ;;  %v23959_v45 = vpop.f32.mrb[163].mxu0 }
 0x57b   : > { %26091 = vst [vmem:[#allocation54_spill] sm:$0xff] %v23959_v45  ;;  %v26094_v50 = vld [vmem:[#allocation6_spill] sm:$0xff] }
 0x57c   : > { %20172 = vmatmul.mubr.bf16.vlgmr.msra.gmra.mrb[160].mxu1 %v23407_v9  ;;  %20904 = vmatmul.mubr.bf16.gmra.mrb[12].mxu0 %v23757_v23 }
 0x57d   : > { %20175 = vmatprep.mubr.bf16.mxu1 %v23430_v6  ;;  %20252 = vmatpush3.bf16.msra.mxu1 %v23786_v58  ;;  %v22255_v58 = vld [vmem:[%s25957_s3 + $0xd8] sm:$0xff]  }
 0x57e   : > { %20907 = vmatprep.mubr.bf16.mxu0 %v23755_v22  ;;  %20253 = vmatprep.subr.bf16.mxu1 %v22248_v18 }
 0x57f   : > { %v20037_v47 = vpop.f32.mrb[56].mxu1  ;;  %v20689_v46 = vpop.f32.mrb[164].mxu0 }
 0x580   : > { %v6986_v1 = vpop.f32.mrb[57].mxu1  ;;  %v23972_v34 = vpop.f32.mrb[165].mxu0 }
 0x581   : > { %26092 = vst [vmem:[#allocation55_spill] sm:$0xff] %v23972_v34  ;;  %v20038_v2 = vpop.f32.mrb[58].mxu1  ;;  %v20690_v24 = vpop.f32.mrb[166].mxu0  ;;  %20254 = vmatpush3.bf16.msra.mxu1 %v22248_v18  ;;  %v22256_v18 = vld [vmem:[%s25957_s3 + $0xe0] sm:$0xff]  }
 0x582   : > { %v6989_v48 = vpop.f32.mrb[59].mxu1  ;;  %v23974_v13 = vpop.f32.mrb[167].mxu0  ;;  %20255 = vmatprep.subr.bf16.mxu1 %v22254_v11 }
 0x583   : > { %26093 = vst [vmem:[#allocation56_spill] sm:$0xff] %v23974_v13 }
 0x584   : > { %20176 = vmatmul.mubr.bf16.gmra.mrb[164].mxu1 %v23428_v27  ;;  %20908 = vmatmul.mubr.bf16.gmra.mrb[16].mxu0 %v23777_v26 }
 0x585   : > { %20179 = vmatprep.mubr.bf16.mxu1 %v26094_v50  ;;  %20911 = vmatprep.mubr.bf16.mxu0 %v23775_v8 }
 0x586   : > { %20256 = vmatpush3.bf16.msra.mxu1 %v22254_v11  ;;  %v22257_v11 = vld [vmem:[%s25957_s3 + $0xe8] sm:$0xff]  }
 0x587   : > { %v20041_v47 = vpop.f32.mrb[60].mxu1  ;;  %v20693_v46 = vpop.f32.mrb[168].mxu0  ;;  %20257 = vmatprep.subr.bf16.mxu1 %v22255_v58 }
 0x588   : > { %v7002_v1 = vpop.f32.mrb[61].mxu1  ;;  %v23986_v2 = vpop.f32.mrb[169].mxu0  ;;  %v26097_v47 = vld [vmem:[#allocation5_spill] sm:$0xff]  ;;  %v26098_v46 = vld [vmem:[#allocation8_spill] sm:$0xff] }
 0x589   : > { %26095 = vst [vmem:[#allocation6_spill] sm:$0xff] %v23986_v2  ;;  %v20042_v24 = vpop.f32.mrb[62].mxu1  ;;  %v20694_v48 = vpop.f32.mrb[170].mxu0 }
 0x58a   : > { %v7005_v13 = vpop.f32.mrb[63].mxu1  ;;  %v23988_v34 = vpop.f32.mrb[171].mxu0  ;;  %20258 = vmatpush3.bf16.msra.mxu1 %v22255_v58 }
 0x58b   : > { %26096 = vst [vmem:[#allocation57_spill] sm:$0xff] %v23988_v34  ;;  %20259 = vmatprep.subr.bf16.mxu1 %v22256_v18  ;;  %v22258_v13 = vld [vmem:[%s25957_s3 + $0xf0] sm:$0xff]  }
 0x58c   : > { %20180 = vmatmul.mubr.bf16.gmra.mrb[168].mxu1 %v26097_v47  ;;  %20912 = vmatmul.mubr.bf16.gmra.mrb[20].mxu0 %v23795_v62 }
 0x58d   : > { %20183 = vmatprep.mubr.bf16.mxu1 %v26098_v46  ;;  %20915 = vmatprep.mubr.bf16.mxu0 %v23793_v49 }
 0x58e   : > { %20260 = vmatpush3.bf16.msra.mxu1 %v22256_v18  ;;  %v22259_v18 = vld [vmem:[%s25957_s3 + $0xf8] sm:$0xff]  }
 0x58f   : > { %v20045_v1 = vpop.f32.mrb[64].mxu1  ;;  %v20697_v24 = vpop.f32.mrb[172].mxu0  ;;  %20261 = vmatprep.subr.bf16.mxu1 %v22257_v11 }
 0x590   : > { %v24000_v58 = vpop.f32.mrb[65].mxu1  ;;  %v10487_v48 = vpop.f32.mrb[173].mxu0  ;;  %v26101_v1 = vld [vmem:[#allocation10_spill] sm:$0xff]  ;;  %v26102_v24 = vld [vmem:[#allocation31_spill] sm:$0xff] }
 0x591   : > { %26099 = vst [vmem:[#allocation5_spill] sm:$0xff] %v24000_v58  ;;  %v20046_v34 = vpop.f32.mrb[66].mxu1  ;;  %v20698_v2 = vpop.f32.mrb[174].mxu0 }
 0x592   : > { %v24002_v45 = vpop.f32.mrb[67].mxu1  ;;  %v10490_v41 = vpop.f32.mrb[175].mxu0  ;;  %20262 = vmatpush3.bf16.msra.mxu1 %v22257_v11 }
 0x593   : > { %26100 = vst [vmem:[#allocation58_spill] sm:$0xff] %v24002_v45  ;;  %20263 = vmatprep.subr.bf16.mxu1 %v22258_v13 }
 0x594   : > { %20184 = vmatmul.mubr.bf16.gmra.mrb[172].mxu1 %v23466_v0  ;;  %20916 = vmatmul.mubr.bf16.gmra.mrb[24].mxu0 %v23813_v19  ;;  %v26105_v0 = vld [vmem:[#allocation9_spill] sm:$0xff] }
 0x595   : > { %20187 = vmatprep.mubr.bf16.mxu1 %v26101_v1  ;;  %20919 = vmatprep.mubr.bf16.mxu0 %v26102_v24  ;;  %v26113_v1 = vld [vmem:[#allocation36_spill] sm:$0xff] }
 0x596   : > { %20264 = vmatpush3.bf16.msra.mxu1 %v22258_v13  ;;  %v24020_v13 = vld [vmem:[%s25957_s3 + $0x100] sm:$0xff]  }
 0x597   : > { %v20049_v34 = vpop.f32.mrb[68].mxu1  ;;  %v20701_v2 = vpop.f32.mrb[176].mxu0  ;;  %20265 = vmatprep.subr.bf16.mxu1 %v22259_v18 }
 0x598   : > { %v24011_v48 = vpop.f32.mrb[69].mxu1  ;;  %v10503_v41 = vpop.f32.mrb[177].mxu0  ;;  %v26106_v34 = vld [vmem:[#allocation12_spill] sm:$0xff] }
 0x599   : > { %26103 = vst [vmem:[#allocation59_spill] sm:$0xff] %v24011_v48  ;;  %v20050_v11 = vpop.f32.mrb[70].mxu1  ;;  %v20702_v45 = vpop.f32.mrb[178].mxu0 }
 0x59a   : > { %v24013_v58 = vpop.f32.mrb[71].mxu1  ;;  %v10506_v46 = vpop.f32.mrb[179].mxu0  ;;  %20266 = vmatpush3.bf16.msra.mxu1 %v22259_v18 }
 0x59b   : > { %26104 = vst [vmem:[#allocation60_spill] sm:$0xff] %v24013_v58  ;;  %20347 = vmatprep.subr.bf16.mxu1 %v24020_v13 }
 0x59c   : > { %20188 = vmatmul.mubr.bf16.gmra.mrb[176].mxu1 %v26105_v0  ;;  %20920 = vmatmul.mubr.bf16.gmra.mrb[28].mxu0 %v23833_v33  ;;  %v22261_v0 = vld [vmem:[%s25957_s3 + $0x340] sm:$0xff]  }
 0x59d   : > { %20191 = vmatprep.mubr.bf16.mxu1 %v26106_v34  ;;  %21035 = vmatprep.mubr.bf16.mxu0 %v23550_v31  ;;  %v26109_v33 = vld [vmem:[#allocation11_spill] sm:$0xff]  ;;  %v26110_v34 = vld [vmem:[#allocation14_spill] sm:$0xff] }
 0x59e   : > { %21211 = vmatprep.subr.bf16.mxu0 %v22261_v0 }
 0x59f   : > { %v20053_v45 = vpop.f32.mrb[72].mxu1  ;;  %v20705_v2 = vpop.f32.mrb[180].mxu0 }
 0x5a0   : > { %v24025_v41 = vpop.f32.mrb[73].mxu1  ;;  %v10519_v46 = vpop.f32.mrb[181].mxu0 }
 0x5a1   : > { %26107 = vst [vmem:[#allocation61_spill] sm:$0xff] %v24025_v41  ;;  %v20054_v18 = vpop.f32.mrb[74].mxu1  ;;  %v20706_v11 = vpop.f32.mrb[182].mxu0 }
 0x5a2   : > { %v24027_v58 = vpop.f32.mrb[75].mxu1  ;;  %v10522_v48 = vpop.f32.mrb[183].mxu0 }
 0x5a3   : > { %26108 = vst [vmem:[#allocation62_spill] sm:$0xff] %v24027_v58  ;;  %v22262_v48 = vld [vmem:[%s25957_s3 + $0x348] sm:$0xff]  }
 0x5a4   : > { %20192 = vmatmul.mubr.bf16.gmra.mrb[180].mxu1 %v26109_v33  ;;  %21036 = vmatmul.mubr.bf16.vlgmr.msra.gmra.mrb[32].mxu0 %v23570_v57 }
 0x5a5   : > { %20195 = vmatprep.mubr.bf16.mxu1 %v26110_v34  ;;  %21039 = vmatprep.mubr.bf16.mxu0 %v23568_v55  ;;  %v22263_v34 = vld [vmem:[%s25957_s3 + $0x350] sm:$0xff]  }
 0x5a6   : > { %21212 = vmatpush3.bf16.msra.mxu0 %v22261_v0  ;;  %v26111_v0 = vld [vmem:[#allocation16_spill] sm:$0xff] }
 0x5a7   : > { %v20057_v45 = vpop.f32.mrb[76].mxu1  ;;  %v20709_v2 = vpop.f32.mrb[184].mxu0  ;;  %21213 = vmatprep.subr.bf16.mxu0 %v22262_v48 }
 0x5a8   : > { %v7066_v46 = vpop.f32.mrb[77].mxu1  ;;  %v10535_v18 = vpop.f32.mrb[185].mxu0 }
 0x5a9   : > { %v20058_v11 = vpop.f32.mrb[78].mxu1  ;;  %v20710_v58 = vpop.f32.mrb[186].mxu0 }
 0x5aa   : > { %v7069_v41 = vpop.f32.mrb[79].mxu1  ;;  %v10538_v33 = vpop.f32.mrb[187].mxu0  ;;  %21214 = vmatpush3.bf16.msra.mxu0 %v22262_v48  ;;  %v26112_v48 = vld [vmem:[#allocation33_spill] sm:$0xff] }
 0x5ab   : > { %21215 = vmatprep.subr.bf16.mxu0 %v22263_v34  ;;  %v22265_v33 = vld [vmem:[%s25957_s3 + $0x358] sm:$0xff]  }
 0x5ac   : > { %20196 = vmatmul.mubr.bf16.gmra.mrb[184].mxu1 %v23514_v53  ;;  %21040 = vmatmul.mubr.bf16.gmra.mrb[36].mxu0 %v23582_v15 }
 0x5ad   : > { %20199 = vmatprep.mubr.bf16.mxu1 %v26111_v0  ;;  %21043 = vmatprep.mubr.bf16.mxu0 %v23580_v14 }
 0x5ae   : > { %21216 = vmatpush3.bf16.msra.mxu0 %v22263_v34  ;;  %v22266_v34 = vld [vmem:[%s25957_s3 + $0x360] sm:$0xff]  }
 0x5af   : > { %v20077_v45 = vpop.f32.mrb[80].mxu1  ;;  %v20713_v2 = vpop.f32.mrb[188].mxu0  ;;  %21217 = vmatprep.subr.bf16.mxu0 %v22265_v33 }
 0x5b0   : > { %v7163_v58 = vpop.f32.mrb[81].mxu1  ;;  %v10551_v41 = vpop.f32.mrb[189].mxu0 }
 0x5b1   : > { %v24050_v46 = vadd.f32 %v7163_v58, %v26112_v48  ;;  %v20078_v18 = vpop.f32.mrb[82].mxu1  ;;  %v20714_v11 = vpop.f32.mrb[190].mxu0 }
 0x5b2   : > { %v7166_v53 = vpop.f32.mrb[83].mxu1  ;;  %v10554_v0 = vpop.f32.mrb[191].mxu0  ;;  %21218 = vmatpush3.bf16.msra.mxu0 %v22265_v33  ;;  %v26115_v33 = vld [vmem:[#allocation37_spill] sm:$0xff] }
 0x5b3   : > { %v24053_v24 = vadd.f32 %v7166_v53, %v26113_v1  ;;  %21219 = vmatprep.subr.bf16.mxu0 %v22266_v34  ;;  %v22267_v53 = vld [vmem:[%s25957_s3 + $0x368] sm:$0xff]  }
 0x5b4   : > { %20200 = vmatmul.mubr.bf16.gmra.mrb[188].mxu1 %v23532_v12  ;;  %21044 = vmatmul.mubr.bf16.gmra.mrb[40].mxu0 %v23594_v37 }
 0x5b5   : > { %20203 = vmatprep.mubr.bf16.mxu1 %v23552_v32  ;;  %21047 = vmatprep.mubr.bf16.mxu0 %v23592_v36  ;;  %v26117_v32 = vld [vmem:[#allocation40_spill] sm:$0xff] }
 0x5b6   : > { %21220 = vmatpush3.bf16.msra.mxu0 %v22266_v34  ;;  %v22268_v34 = vld [vmem:[%s25957_s3 + $0x370] sm:$0xff]  }
 0x5b7   : > { %v20081_v45 = vpop.f32.mrb[84].mxu1  ;;  %v20717_v2 = vpop.f32.mrb[192].mxu0  ;;  %21221 = vmatprep.subr.bf16.mxu0 %v22267_v53 }
 0x5b8   : > { %v7179_v1 = vpop.f32.mrb[85].mxu1  ;;  %v24065_v0 = vpop.f32.mrb[193].mxu0 }
 0x5b9   : > { %26114 = vst [vmem:[#allocation33_spill] sm:$0xff] %v24065_v0  ;;  %v24068_v58 = vadd.f32 %v7179_v1, %v26115_v33  ;;  %v20082_v41 = vpop.f32.mrb[86].mxu1  ;;  %v20718_v48 = vpop.f32.mrb[194].mxu0 }
 0x5ba   : > { %v7182_v18 = vpop.f32.mrb[87].mxu1  ;;  %v24070_v11 = vpop.f32.mrb[195].mxu0  ;;  %21222 = vmatpush3.bf16.msra.mxu0 %v22267_v53 }
 0x5bb   : > { %26116 = vst [vmem:[#allocation36_spill] sm:$0xff] %v24070_v11  ;;  %v24073_v45 = vadd.f32 %v7182_v18, %v26117_v32  ;;  %21223 = vmatprep.subr.bf16.mxu0 %v22268_v34  ;;  %v22269_v32 = vld [vmem:[%s25957_s3 + $0x378] sm:$0xff]  }
 0x5bc   : > { %20204 = vmatmul.mubr.bf16.gmra.mrb[192].mxu1 %v23550_v31  ;;  %21048 = vmatmul.mubr.bf16.gmra.mrb[44].mxu0 %v23606_v60 }
 0x5bd   : > { %20207 = vmatprep.mubr.bf16.mxu1 %v23570_v57  ;;  %21051 = vmatprep.mubr.bf16.mxu0 %v23604_v59  ;;  %v26120_v57 = vld [vmem:[#allocation43_spill] sm:$0xff] }
 0x5be   : > { %21224 = vmatpush3.bf16.msra.mxu0 %v22268_v34 }
 0x5bf   : > { %v20085_v2 = vpop.f32.mrb[88].mxu1  ;;  %v20721_v1 = vpop.f32.mrb[196].mxu0  ;;  %21225 = vmatprep.subr.bf16.mxu0 %v22269_v32 }
 0x5c0   : > { %v7195_v53 = vpop.f32.mrb[89].mxu1  ;;  %v24085_v33 = vpop.f32.mrb[197].mxu0 }
 0x5c1   : > { %26118 = vst [vmem:[#allocation37_spill] sm:$0xff] %v24085_v33  ;;  %v24088_v41 = vadd.f32 %v7195_v53, %v23873_v10  ;;  %v20086_v48 = vpop.f32.mrb[90].mxu1  ;;  %v20722_v18 = vpop.f32.mrb[198].mxu0 }
 0x5c2   : > { %v7198_v11 = vpop.f32.mrb[91].mxu1  ;;  %v24090_v0 = vpop.f32.mrb[199].mxu0  ;;  %21226 = vmatpush3.bf16.msra.mxu0 %v22269_v32 }
 0x5c3   : > { %26119 = vst [vmem:[#allocation40_spill] sm:$0xff] %v24090_v0  ;;  %v24093_v2 = vadd.f32 %v7198_v11, %v26120_v57 }
 0x5c4   : > { %20208 = vmatmul.mubr.bf16.gmra.mrb[196].mxu1 %v23568_v55  ;;  %21052 = vmatmul.mubr.bf16.gmra.mrb[48].mxu0 %v23618_v21 }
 0x5c5   : > { %20211 = vmatprep.mubr.bf16.mxu1 %v23582_v15  ;;  %21055 = vmatprep.mubr.bf16.mxu0 %v23616_v20 }
 0x5c7   : > { %v20089_v10 = vpop.f32.mrb[92].mxu1  ;;  %v20725_v34 = vpop.f32.mrb[200].mxu0 }
 0x5c8   : > { %v7211_v1 = vpop.f32.mrb[93].mxu1  ;;  %v24099_v53 = vpop.f32.mrb[201].mxu0 }
 0x5c9   : > { %26121 = vst [vmem:[#allocation43_spill] sm:$0xff] %v24099_v53  ;;  %v20090_v48 = vpop.f32.mrb[94].mxu1  ;;  %v20726_v18 = vpop.f32.mrb[202].mxu0 }
 0x5ca   : > { %v7214_v0 = vpop.f32.mrb[95].mxu1  ;;  %v24101_v33 = vpop.f32.mrb[203].mxu0 }
 0x5cb   : > { %26122 = vst [vmem:[#allocation63_spill] sm:$0xff] %v24101_v33 }
 0x5cc   : > { %20212 = vmatmul.mubr.bf16.gmra.mrb[200].mxu1 %v23580_v14  ;;  %21056 = vmatmul.mubr.bf16.gmra.mrb[52].mxu0 %v23630_v44 }
 0x5cd   : > { %20215 = vmatprep.mubr.bf16.mxu1 %v23594_v37  ;;  %21059 = vmatprep.mubr.bf16.mxu0 %v23628_v43 }
 0x5cf   : > { %v20093_v57 = vpop.f32.mrb[96].mxu1  ;;  %v20729_v11 = vpop.f32.mrb[204].mxu0 }
 0x5d0   : > { %v7227_v32 = vpop.f32.mrb[97].mxu1  ;;  %v10615_v10 = vpop.f32.mrb[205].mxu0 }
 0x5d1   : > { %v20094_v34 = vpop.f32.mrb[98].mxu1  ;;  %v20730_v1 = vpop.f32.mrb[206].mxu0 }
 0x5d2   : > { %v7230_v53 = vpop.f32.mrb[99].mxu1  ;;  %v10618_v48 = vpop.f32.mrb[207].mxu0 }
 0x5d4   : > { %20216 = vmatmul.mubr.bf16.gmra.mrb[204].mxu1 %v23592_v36  ;;  %21060 = vmatmul.mubr.bf16.gmra.mrb[56].mxu0 %v23642_v7 }
 0x5d5   : > { %20219 = vmatprep.mubr.bf16.mxu1 %v23606_v60  ;;  %21063 = vmatprep.mubr.bf16.mxu0 %v23640_v5 }
 0x5d7   : > { %v20097_v0 = vpop.f32.mrb[100].mxu1  ;;  %v20845_v18 = vpop.f32.mrb[208].mxu0 }
 0x5d8   : > { %v7243_v33 = vpop.f32.mrb[101].mxu1  ;;  %v24111_v37 = vpop.f32.mrb[209].mxu0 }
 0x5d9   : > { %26123 = vst [vmem:[#allocation64_spill] sm:$0xff] %v24111_v37  ;;  %v20098_v57 = vpop.f32.mrb[102].mxu1  ;;  %v20846_v11 = vpop.f32.mrb[210].mxu0 }
 0x5da   : > { %v7246_v32 = vpop.f32.mrb[103].mxu1  ;;  %v24113_v10 = vpop.f32.mrb[211].mxu0 }
 0x5db   : > { %26124 = vst [vmem:[#allocation65_spill] sm:$0xff] %v24113_v10 }
 0x5dc   : > { %20220 = vmatmul.mubr.bf16.gmra.mrb[208].mxu1 %v23604_v59  ;;  %21064 = vmatmul.mubr.bf16.gmra.mrb[60].mxu0 %v23654_v39 }
 0x5dd   : > { %20223 = vmatprep.mubr.bf16.mxu1 %v23618_v21  ;;  %21067 = vmatprep.mubr.bf16.mxu0 %v23652_v38 }
 0x5df   : > { %v20101_v53 = vpop.f32.mrb[104].mxu1  ;;  %v20849_v34 = vpop.f32.mrb[212].mxu0 }
 0x5e0   : > { %v7259_v1 = vpop.f32.mrb[105].mxu1  ;;  %v24119_v48 = vpop.f32.mrb[213].mxu0 }
 0x5e1   : > { %26125 = vst [vmem:[#allocation66_spill] sm:$0xff] %v24119_v48  ;;  %v20102_v33 = vpop.f32.mrb[106].mxu1  ;;  %v20850_v0 = vpop.f32.mrb[214].mxu0 }
 0x5e2   : > { %v7262_v18 = vpop.f32.mrb[107].mxu1  ;;  %v24121_v57 = vpop.f32.mrb[215].mxu0 }
 0x5e3   : > { %26126 = vst [vmem:[#allocation67_spill] sm:$0xff] %v24121_v57 }
 0x5e4   : > { %20224 = vmatmul.mubr.bf16.gmra.mrb[212].mxu1 %v23616_v20  ;;  %21068 = vmatmul.mubr.bf16.gmra.mrb[64].mxu0 %v23666_v4 }
 0x5e5   : > { %20227 = vmatprep.mubr.bf16.mxu1 %v23630_v44  ;;  %21071 = vmatprep.mubr.bf16.mxu0 %v23664_v3 }
 0x5e7   : > { %v20105_v11 = vpop.f32.mrb[108].mxu1  ;;  %v20853_v32 = vpop.f32.mrb[216].mxu0 }
 0x5e8   : > { %v7275_v53 = vpop.f32.mrb[109].mxu1  ;;  %v24127_v34 = vpop.f32.mrb[217].mxu0 }
 0x5e9   : > { %26127 = vst [vmem:[#allocation68_spill] sm:$0xff] %v24127_v34  ;;  %v20106_v1 = vpop.f32.mrb[110].mxu1  ;;  %v20854_v48 = vpop.f32.mrb[218].mxu0 }
 0x5ea   : > { %v7278_v33 = vpop.f32.mrb[111].mxu1  ;;  %v24129_v0 = vpop.f32.mrb[219].mxu0 }
 0x5eb   : > { %26128 = vst [vmem:[#allocation69_spill] sm:$0xff] %v24129_v0 }
 0x5ec   : > { %20228 = vmatmul.mubr.bf16.gmra.mrb[216].mxu1 %v23628_v43  ;;  %21072 = vmatmul.mubr.bf16.gmra.mrb[68].mxu0 %v23678_v42 }
 0x5ed   : > { %20231 = vmatprep.mubr.bf16.mxu1 %v23642_v7  ;;  %21075 = vmatprep.mubr.bf16.mxu0 %v23676_v40 }
 0x5ef   : > { %v20109_v18 = vpop.f32.mrb[112].mxu1  ;;  %v20857_v57 = vpop.f32.mrb[220].mxu0 }
 0x5f0   : > { %v7291_v11 = vpop.f32.mrb[113].mxu1  ;;  %v11435_v32 = vpop.f32.mrb[221].mxu0 }
 0x5f1   : > { %v24136_v53 = vadd.f32 %v7291_v11, %v23925_v63  ;;  %v20110_v1 = vpop.f32.mrb[114].mxu1  ;;  %v20858_v48 = vpop.f32.mrb[222].mxu0 }
 0x5f2   : > { %v7294_v33 = vpop.f32.mrb[115].mxu1  ;;  %v11438_v34 = vpop.f32.mrb[223].mxu0 }
 0x5f3   : > { %v24139_v0 = vadd.f32 %v7294_v33, %v23927_v61 }
 0x5f4   : > { %20232 = vmatmul.mubr.bf16.gmra.mrb[220].mxu1 %v23640_v5  ;;  %21076 = vmatmul.mubr.bf16.gmra.mrb[72].mxu0 %v23690_v17 }
 0x5f5   : > { %20235 = vmatprep.mubr.bf16.mxu1 %v23654_v39  ;;  %21079 = vmatprep.mubr.bf16.mxu0 %v23688_v16 }
 0x5f7   : > { %v20113_v57 = vpop.f32.mrb[116].mxu1  ;;  %v20861_v18 = vpop.f32.mrb[224].mxu0 }
 0x5f8   : > { %v7307_v32 = vpop.f32.mrb[117].mxu1  ;;  %v11451_v63 = vpop.f32.mrb[225].mxu0 }
 0x5f9   : > { %v24146_v11 = vadd.f32 %v7307_v32, %v23933_v35  ;;  %v20114_v1 = vpop.f32.mrb[118].mxu1  ;;  %v20862_v34 = vpop.f32.mrb[226].mxu0 }
 0x5fa   : > { %v7310_v48 = vpop.f32.mrb[119].mxu1  ;;  %v11454_v61 = vpop.f32.mrb[227].mxu0 }
 0x5fb   : > { %v24149_v33 = vadd.f32 %v7310_v48, %v23935_v54  ;;  %v26129_v48 = vld [vmem:[#allocation52_spill] sm:$0xff] }
 0x5fc   : > { %20236 = vmatmul.mubr.bf16.gmra.mrb[224].mxu1 %v23652_v38  ;;  %21080 = vmatmul.mubr.bf16.gmra.mrb[76].mxu0 %v23702_v52 }
 0x5fd   : > { %20239 = vmatprep.mubr.bf16.mxu1 %v23666_v4  ;;  %21083 = vmatprep.mubr.bf16.mxu0 %v23700_v51 }
 0x5ff   : > { %v20117_v57 = vpop.f32.mrb[120].mxu1  ;;  %v20865_v18 = vpop.f32.mrb[228].mxu0 }
 0x600   : > { %v7323_v63 = vpop.f32.mrb[121].mxu1  ;;  %v11467_v35 = vpop.f32.mrb[229].mxu0 }
 0x601   : > { %v24156_v32 = vadd.f32 %v7323_v63, %v23941_v28  ;;  %v20118_v1 = vpop.f32.mrb[122].mxu1  ;;  %v20866_v34 = vpop.f32.mrb[230].mxu0 }
 0x602   : > { %v7326_v61 = vpop.f32.mrb[123].mxu1  ;;  %v11470_v54 = vpop.f32.mrb[231].mxu0 }
 0x603   : > { %v24159_v10 = vadd.f32 %v7326_v61, %v26129_v48 }
 0x604   : > { %20240 = vmatmul.mubr.bf16.gmra.mrb[228].mxu1 %v23664_v3  ;;  %21084 = vmatmul.mubr.bf16.gmra.mrb[80].mxu0 %v23721_v30 }
 0x605   : > { %26130 = vst [vmem:[#allocation52_spill] sm:$0xff] %v24159_v10  ;;  %20243 = vmatprep.mubr.bf16.mxu1 %v23678_v42  ;;  %21087 = vmatprep.mubr.bf16.mxu0 %v23719_v29 }
 0x607   : > { %v20121_v57 = vpop.f32.mrb[124].mxu1  ;;  %v20869_v18 = vpop.f32.mrb[232].mxu0 }
 0x608   : > { %v7339_v35 = vpop.f32.mrb[125].mxu1  ;;  %v11483_v28 = vpop.f32.mrb[233].mxu0 }
 0x609   : > { %v20122_v63 = vpop.f32.mrb[126].mxu1  ;;  %v20870_v1 = vpop.f32.mrb[234].mxu0 }
 0x60a   : > { %v7342_v34 = vpop.f32.mrb[127].mxu1  ;;  %v11486_v37 = vpop.f32.mrb[235].mxu0 }
 0x60c   : > { %20244 = vmatmul.mubr.bf16.gmra.mrb[232].mxu1 %v23676_v40  ;;  %21088 = vmatmul.mubr.bf16.gmra.mrb[84].mxu0 %v23739_v56 }
 0x60d   : > { %20247 = vmatprep.mubr.bf16.mxu1 %v23690_v17  ;;  %21091 = vmatprep.mubr.bf16.mxu0 %v23737_v25 }
 0x60f   : > { %v20125_v61 = vpop.f32.mrb[128].mxu1  ;;  %v20873_v54 = vpop.f32.mrb[236].mxu0 }
 0x610   : > { %v7355_v48 = vpop.f32.mrb[129].mxu1  ;;  %v11499_v10 = vpop.f32.mrb[237].mxu0 }
 0x611   : > { %v20126_v57 = vpop.f32.mrb[130].mxu1  ;;  %v20874_v18 = vpop.f32.mrb[238].mxu0 }
 0x612   : > { %v7358_v35 = vpop.f32.mrb[131].mxu1  ;;  %v11502_v28 = vpop.f32.mrb[239].mxu0  ;;  %v22264_v57 = vld [vmem:[%s25957_s3 + $0x108] sm:$0xff]  }
 0x614   : > { %20248 = vmatmul.mubr.bf16.gmra.mrb[236].mxu1 %v23688_v16  ;;  %21092 = vmatmul.mubr.bf16.gmra.mrb[88].mxu0 %v23757_v23 }
 0x615   : > { %20267 = vmatprep.mubr.bf16.mxu1 %v23407_v9  ;;  %21095 = vmatprep.mubr.bf16.mxu0 %v23755_v22  ;;  %v22270_v9 = vld [vmem:[%s25957_s3 + $0x110] sm:$0xff]  }
 0x617   : > { %v20129_v37 = vpop.f32.mrb[132].mxu1  ;;  %v20877_v63 = vpop.f32.mrb[240].mxu0 }
 0x618   : > { %v7371_v1 = vpop.f32.mrb[133].mxu1  ;;  %v24173_v34 = vpop.f32.mrb[241].mxu0 }
 0x619   : > { %26131 = vst [vmem:[#allocation70_spill] sm:$0xff] %v24173_v34  ;;  %v20130_v61 = vpop.f32.mrb[134].mxu1  ;;  %v20878_v54 = vpop.f32.mrb[242].mxu0 }
 0x61a   : > { %v7374_v10 = vpop.f32.mrb[135].mxu1  ;;  %v24175_v48 = vpop.f32.mrb[243].mxu0 }
 0x61b   : > { %26132 = vst [vmem:[#allocation71_spill] sm:$0xff] %v24175_v48  ;;  %v22272_v10 = vld [vmem:[%s25957_s3 + $0x120] sm:$0xff]   ;;  %v26142_v48 = vld [vmem:[#allocation58_spill] sm:$0xff] }
 0x61c   : > { %20268 = vmatmul.mubr.bf16.vlgmr.msra.gmra.mrb[240].mxu1 %v23430_v6  ;;  %21096 = vmatmul.mubr.bf16.gmra.mrb[92].mxu0 %v23777_v26 }
 0x61d   : > { %20271 = vmatprep.mubr.bf16.mxu1 %v23428_v27  ;;  %20348 = vmatpush3.bf16.msra.mxu1 %v24020_v13  ;;  %v22271_v27 = vld [vmem:[%s25957_s3 + $0x118] sm:$0xff]  }
 0x61e   : > { %21099 = vmatprep.mubr.bf16.mxu0 %v23775_v8  ;;  %20349 = vmatprep.subr.bf16.mxu1 %v22264_v57 }
 0x61f   : > { %v20133_v18 = vpop.f32.mrb[136].mxu1  ;;  %v20881_v35 = vpop.f32.mrb[244].mxu0 }
 0x620   : > { %v7387_v28 = vpop.f32.mrb[137].mxu1  ;;  %v24188_v37 = vpop.f32.mrb[245].mxu0 }
 0x621   : > { %26133 = vst [vmem:[#allocation72_spill] sm:$0xff] %v24188_v37  ;;  %v20134_v63 = vpop.f32.mrb[138].mxu1  ;;  %v20882_v6 = vpop.f32.mrb[246].mxu0  ;;  %20350 = vmatpush3.bf16.msra.mxu1 %v22264_v57 }
 0x622   : > { %v7390_v1 = vpop.f32.mrb[139].mxu1  ;;  %v24190_v61 = vpop.f32.mrb[247].mxu0  ;;  %20351 = vmatprep.subr.bf16.mxu1 %v22270_v9  ;;  %v26138_v6 = vld [vmem:[#allocation7_spill] sm:$0xff] }
 0x623   : > { %26134 = vst [vmem:[#allocation73_spill] sm:$0xff] %v24190_v61  ;;  %v26139_v1 = vld [vmem:[#allocation31_spill] sm:$0xff] }
 0x624   : > { %20272 = vmatmul.mubr.bf16.gmra.mrb[244].mxu1 %v26094_v50  ;;  %21100 = vmatmul.mubr.bf16.gmra.mrb[96].mxu0 %v23795_v62 }
 0x625   : > { %20275 = vmatprep.mubr.bf16.mxu1 %v26097_v47  ;;  %21103 = vmatprep.mubr.bf16.mxu0 %v23793_v49  ;;  %v22273_v47 = vld [vmem:[%s25957_s3 + $0x128] sm:$0xff]  }
 0x626   : > { %20352 = vmatpush3.bf16.msra.mxu1 %v22270_v9  ;;  %v26137_v9 = vld [vmem:[#allocation8_spill] sm:$0xff] }
 0x627   : > { %v20137_v13 = vpop.f32.mrb[140].mxu1  ;;  %v20885_v54 = vpop.f32.mrb[248].mxu0  ;;  %20353 = vmatprep.subr.bf16.mxu1 %v22271_v27 }
 0x628   : > { %v7403_v57 = vpop.f32.mrb[141].mxu1  ;;  %v24202_v18 = vpop.f32.mrb[249].mxu0 }
 0x629   : > { %26135 = vst [vmem:[#allocation74_spill] sm:$0xff] %v24202_v18  ;;  %v20138_v35 = vpop.f32.mrb[142].mxu1  ;;  %v20886_v28 = vpop.f32.mrb[250].mxu0 }
 0x62a   : > { %v7406_v50 = vpop.f32.mrb[143].mxu1  ;;  %v24204_v63 = vpop.f32.mrb[251].mxu0  ;;  %20354 = vmatpush3.bf16.msra.mxu1 %v22271_v27  ;;  %v22274_v27 = vld [vmem:[%s25957_s3 + $0x130] sm:$0xff]  }
 0x62b   : > { %26136 = vst [vmem:[#allocation75_spill] sm:$0xff] %v24204_v63  ;;  %20355 = vmatprep.subr.bf16.mxu1 %v22272_v10  ;;  %v26140_v28 = vld [vmem:[#allocation5_spill] sm:$0xff] }
 0x62c   : > { %20276 = vmatmul.mubr.bf16.gmra.mrb[248].mxu1 %v26137_v9  ;;  %21104 = vmatmul.mubr.bf16.gmra.mrb[100].mxu0 %v23813_v19 }
 0x62d   : > { %20279 = vmatprep.mubr.bf16.mxu1 %v26138_v6  ;;  %21107 = vmatprep.mubr.bf16.mxu0 %v26139_v1 }
 0x62e   : > { %20356 = vmatpush3.bf16.msra.mxu1 %v22272_v10  ;;  %v22275_v10 = vld [vmem:[%s25957_s3 + $0x138] sm:$0xff]  }
 0x62f   : > { %v20141_v13 = vpop.f32.mrb[144].mxu1  ;;  %v20889_v54 = vpop.f32.mrb[252].mxu0  ;;  %20357 = vmatprep.subr.bf16.mxu1 %v22273_v47 }
 0x630   : > { %v7419_v57 = vpop.f32.mrb[145].mxu1  ;;  %v11563_v35 = vpop.f32.mrb[253].mxu0  ;;  %v26144_v13 = vld [vmem:[#allocation10_spill] sm:$0xff]  ;;  %v26145_v54 = vld [vmem:[#allocation35_spill] sm:$0xff] }
 0x631   : > { %v24217_v50 = vadd.f32 %v7419_v57, %v26140_v28  ;;  %v20142_v63 = vpop.f32.mrb[146].mxu1  ;;  %v20890_v18 = vpop.f32.mrb[254].mxu0  ;;  %v26146_v35 = vld [vmem:[#allocation9_spill] sm:$0xff]  ;;  %v26147_v57 = vld [vmem:[#allocation34_spill] sm:$0xff] }
 0x632   : > { %v7422_v61 = vpop.f32.mrb[147].mxu1  ;;  %v11566_v37 = vpop.f32.mrb[255].mxu0  ;;  %20358 = vmatpush3.bf16.msra.mxu1 %v22273_v47 }
 0x633   : > { %26141 = vst [vmem:[#allocation8_spill] sm:$0xff] %v24217_v50  ;;  %v24220_v34 = vadd.f32 %v7422_v61, %v26142_v48  ;;  %20359 = vmatprep.subr.bf16.mxu1 %v22274_v27  ;;  %v26148_v61 = vld [vmem:[#allocation59_spill] sm:$0xff] }
 0x634   : > { %20280 = vmatmul.mubr.bf16.gmra.mrb[252].mxu1 %v26144_v13  ;;  %21108 = vmatmul.mubr.bf16.gmra.mrb[104].mxu0 %v26145_v54  ;;  %v26150_v13 = vld [vmem:[#allocation60_spill] sm:$0xff] }
 0x635   : > { %26143 = vst [vmem:[#allocation5_spill] sm:$0xff] %v24220_v34  ;;  %20283 = vmatprep.mubr.bf16.mxu1 %v26146_v35  ;;  %21111 = vmatprep.mubr.bf16.mxu0 %v26147_v57  ;;  %v26152_v35 = vld [vmem:[#allocation12_spill] sm:$0xff]  ;;  %v26153_v57 = vld [vmem:[#allocation39_spill] sm:$0xff] }
 0x636   : > { %20360 = vmatpush3.bf16.msra.mxu1 %v22274_v27  ;;  %v24240_v27 = vld [vmem:[%s25957_s3 + $0x140] sm:$0xff]  }
 0x637   : > { %v20145_v18 = vpop.f32.mrb[148].mxu1  ;;  %v20893_v37 = vpop.f32.mrb[0].mxu0  ;;  %20361 = vmatprep.subr.bf16.mxu1 %v22275_v10 }
 0x638   : > { %v7435_v63 = vpop.f32.mrb[149].mxu1  ;;  %v11579_v48 = vpop.f32.mrb[1].mxu0  ;;  %v26154_v18 = vld [vmem:[#allocation11_spill] sm:$0xff] }
 0x639   : > { %v24230_v47 = vadd.f32 %v7435_v63, %v26148_v61  ;;  %v20146_v28 = vpop.f32.mrb[150].mxu1  ;;  %v20894_v34 = vpop.f32.mrb[2].mxu0 }
 0x63a   : > { %v7438_v50 = vpop.f32.mrb[151].mxu1  ;;  %v11582_v6 = vpop.f32.mrb[3].mxu0  ;;  %20362 = vmatpush3.bf16.msra.mxu1 %v22275_v10 }
 0x63b   : > { %26149 = vst [vmem:[#allocation58_spill] sm:$0xff] %v24230_v47  ;;  %v24233_v54 = vadd.f32 %v7438_v50, %v26150_v13  ;;  %20443 = vmatprep.subr.bf16.mxu1 %v24240_v27  ;;  %v26155_v13 = vld [vmem:[#allocation61_spill] sm:$0xff] }
 0x63c   : > { %20284 = vmatmul.mubr.bf16.gmra.mrb[0].mxu1 %v26152_v35  ;;  %21112 = vmatmul.mubr.bf16.gmra.mrb[108].mxu0 %v26153_v57  ;;  %v26159_v35 = vld [vmem:[#allocation14_spill] sm:$0xff] }
 0x63d   : > { %26151 = vst [vmem:[#allocation59_spill] sm:$0xff] %v24233_v54  ;;  %20287 = vmatprep.mubr.bf16.mxu1 %v26154_v18  ;;  %21227 = vmatprep.mubr.bf16.mxu0 %v23592_v36  ;;  %v26157_v54 = vld [vmem:[#allocation62_spill] sm:$0xff]  ;;  %v22277_v18 = vld [vmem:[%s25957_s3 + $0x3c0] sm:$0xff]  }
 0x63e   : > { %21403 = vmatprep.subr.bf16.mxu0 %v22277_v18 }
 0x63f   : > { %v20149_v34 = vpop.f32.mrb[152].mxu1  ;;  %v20897_v6 = vpop.f32.mrb[4].mxu0 }
 0x640   : > { %v7451_v10 = vpop.f32.mrb[153].mxu1  ;;  %v11595_v50 = vpop.f32.mrb[5].mxu0  ;;  %v26160_v34 = vld [vmem:[#allocation13_spill] sm:$0xff] }
 0x641   : > { %v24246_v37 = vadd.f32 %v7451_v10, %v26155_v13  ;;  %v20150_v63 = vpop.f32.mrb[154].mxu1  ;;  %v20898_v48 = vpop.f32.mrb[6].mxu0 }
 0x642   : > { %v7454_v61 = vpop.f32.mrb[155].mxu1  ;;  %v11598_v28 = vpop.f32.mrb[7].mxu0 }
 0x643   : > { %26156 = vst [vmem:[#allocation60_spill] sm:$0xff] %v24246_v37  ;;  %v24249_v47 = vadd.f32 %v7454_v61, %v26157_v54  ;;  %v22278_v54 = vld [vmem:[%s25957_s3 + $0x3c8] sm:$0xff]  }
 0x644   : > { %20288 = vmatmul.mubr.bf16.gmra.mrb[4].mxu1 %v26159_v35  ;;  %21228 = vmatmul.mubr.bf16.vlgmr.msra.gmra.mrb[112].mxu0 %v23606_v60  ;;  %v26161_v37 = vld [vmem:[#allocation16_spill] sm:$0xff] }
 0x645   : > { %26158 = vst [vmem:[#allocation61_spill] sm:$0xff] %v24249_v47  ;;  %20291 = vmatprep.mubr.bf16.mxu1 %v26160_v34  ;;  %21231 = vmatprep.mubr.bf16.mxu0 %v23604_v59  ;;  %v22279_v47 = vld [vmem:[%s25957_s3 + $0x3d0] sm:$0xff]  }
 0x646   : > { %21404 = vmatpush3.bf16.msra.mxu0 %v22277_v18 }
 0x647   : > { %v20153_v6 = vpop.f32.mrb[156].mxu1  ;;  %v20901_v10 = vpop.f32.mrb[8].mxu0  ;;  %21405 = vmatprep.subr.bf16.mxu0 %v22278_v54 }
 0x648   : > { %v7467_v50 = vpop.f32.mrb[157].mxu1  ;;  %v11611_v13 = vpop.f32.mrb[9].mxu0  ;;  %v22281_v10 = vld [vmem:[%s25957_s3 + $0x3d8] sm:$0xff]  }
 0x649   : > { %v20154_v63 = vpop.f32.mrb[158].mxu1  ;;  %v20902_v48 = vpop.f32.mrb[10].mxu0 }
 0x64a   : > { %v7470_v61 = vpop.f32.mrb[159].mxu1  ;;  %v11614_v28 = vpop.f32.mrb[11].mxu0  ;;  %21406 = vmatpush3.bf16.msra.mxu0 %v22278_v54 }
 0x64b   : > { %21407 = vmatprep.subr.bf16.mxu0 %v22279_v47 }
 0x64c   : > { %20292 = vmatmul.mubr.bf16.gmra.mrb[8].mxu1 %v26161_v37  ;;  %21232 = vmatmul.mubr.bf16.gmra.mrb[116].mxu0 %v23618_v21 }
 0x64d   : > { %20295 = vmatprep.mubr.bf16.mxu1 %v23532_v12  ;;  %21235 = vmatprep.mubr.bf16.mxu0 %v23616_v20 }
 0x64e   : > { %21408 = vmatpush3.bf16.msra.mxu0 %v22279_v47  ;;  %v22282_v47 = vld [vmem:[%s25957_s3 + $0x3e0] sm:$0xff]  }
 0x64f   : > { %v20173_v18 = vpop.f32.mrb[160].mxu1  ;;  %v20905_v6 = vpop.f32.mrb[12].mxu0  ;;  %21409 = vmatprep.subr.bf16.mxu0 %v22281_v10 }
 0x650   : > { %v7621_v54 = vpop.f32.mrb[161].mxu1  ;;  %v11627_v50 = vpop.f32.mrb[13].mxu0  ;;  %v26162_v18 = vld [vmem:[#allocation18_spill] sm:$0xff] }
 0x651   : > { %v24272_v13 = vadd.f32 %v7621_v54, %v24050_v46  ;;  %v20174_v63 = vpop.f32.mrb[162].mxu1  ;;  %v20906_v48 = vpop.f32.mrb[14].mxu0 }
 0x652   : > { %v7624_v61 = vpop.f32.mrb[163].mxu1  ;;  %v11630_v28 = vpop.f32.mrb[15].mxu0  ;;  %21410 = vmatpush3.bf16.msra.mxu0 %v22281_v10 }
 0x653   : > { %v24275_v12 = vadd.f32 %v7624_v61, %v24053_v24  ;;  %21411 = vmatprep.subr.bf16.mxu0 %v22282_v47  ;;  %v22283_v24 = vld [vmem:[%s25957_s3 + $0x3e8] sm:$0xff]  }
 0x654   : > { %20296 = vmatmul.mubr.bf16.gmra.mrb[12].mxu1 %v26162_v18  ;;  %21236 = vmatmul.mubr.bf16.gmra.mrb[120].mxu0 %v23630_v44 }
 0x655   : > { %20299 = vmatprep.mubr.bf16.mxu1 %v23550_v31  ;;  %21239 = vmatprep.mubr.bf16.mxu0 %v23628_v43 }
 0x656   : > { %21412 = vmatpush3.bf16.msra.mxu0 %v22282_v47  ;;  %v22284_v47 = vld [vmem:[%s25957_s3 + $0x3f0] sm:$0xff]  }
 0x657   : > { %v20177_v46 = vpop.f32.mrb[164].mxu1  ;;  %v20909_v6 = vpop.f32.mrb[16].mxu0  ;;  %21413 = vmatprep.subr.bf16.mxu0 %v22283_v24 }
 0x658   : > { %v7637_v10 = vpop.f32.mrb[165].mxu1  ;;  %v24287_v54 = vpop.f32.mrb[17].mxu0  ;;  %v26166_v6 = vld [vmem:[#allocation19_spill] sm:$0xff] }
 0x659   : > { %26163 = vst [vmem:[#allocation62_spill] sm:$0xff] %v24287_v54  ;;  %v24290_v50 = vadd.f32 %v7637_v10, %v24068_v58  ;;  %v20178_v63 = vpop.f32.mrb[166].mxu1  ;;  %v20910_v48 = vpop.f32.mrb[18].mxu0 }
 0x65a   : > { %v7640_v61 = vpop.f32.mrb[167].mxu1  ;;  %v24292_v28 = vpop.f32.mrb[19].mxu0  ;;  %21414 = vmatpush3.bf16.msra.mxu0 %v22283_v24 }
 0x65b   : > { %26164 = vst [vmem:[#allocation76_spill] sm:$0xff] %v24292_v28  ;;  %v24295_v46 = vadd.f32 %v7640_v61, %v24073_v45  ;;  %21415 = vmatprep.subr.bf16.mxu0 %v22284_v47  ;;  %v22285_v45 = vld [vmem:[%s25957_s3 + $0x3f8] sm:$0xff]  }
 0x65c   : > { %20300 = vmatmul.mubr.bf16.gmra.mrb[16].mxu1 %v26166_v6  ;;  %21240 = vmatmul.mubr.bf16.gmra.mrb[124].mxu0 %v23642_v7 }
 0x65d   : > { %26165 = vst [vmem:[#allocation77_spill] sm:$0xff] %v24295_v46  ;;  %20303 = vmatprep.mubr.bf16.mxu1 %v23568_v55  ;;  %21243 = vmatprep.mubr.bf16.mxu0 %v23640_v5 }
 0x65e   : > { %21416 = vmatpush3.bf16.msra.mxu0 %v22284_v47 }
 0x65f   : > { %v20181_v58 = vpop.f32.mrb[168].mxu1  ;;  %v20913_v10 = vpop.f32.mrb[20].mxu0  ;;  %21417 = vmatprep.subr.bf16.mxu0 %v22285_v45 }
 0x660   : > { %v7653_v24 = vpop.f32.mrb[169].mxu1  ;;  %v24307_v63 = vpop.f32.mrb[21].mxu0 }
 0x661   : > { %26167 = vst [vmem:[#allocation78_spill] sm:$0xff] %v24307_v63  ;;  %v24310_v48 = vadd.f32 %v7653_v24, %v24088_v41  ;;  %v20182_v61 = vpop.f32.mrb[170].mxu1  ;;  %v20914_v28 = vpop.f32.mrb[22].mxu0 }
 0x662   : > { %v7656_v54 = vpop.f32.mrb[171].mxu1  ;;  %v24312_v46 = vpop.f32.mrb[23].mxu0  ;;  %21418 = vmatpush3.bf16.msra.mxu0 %v22285_v45 }
 0x663   : > { %26168 = vst [vmem:[#allocation79_spill] sm:$0xff] %v24310_v48  ;;  %26169 = vst [vmem:[#allocation80_spill] sm:$0xff] %v24312_v46  ;;  %v24315_v58 = vadd.f32 %v7656_v54, %v24093_v2  ;;  %v26173_v2 = vld [vmem:[#allocation20_spill] sm:$0xff] }
 0x664   : > { %20304 = vmatmul.mubr.bf16.gmra.mrb[20].mxu1 %v23582_v15  ;;  %21244 = vmatmul.mubr.bf16.gmra.mrb[128].mxu0 %v23654_v39 }
 0x665   : > { %26170 = vst [vmem:[#allocation81_spill] sm:$0xff] %v24315_v58  ;;  %20307 = vmatprep.mubr.bf16.mxu1 %v23580_v14  ;;  %21247 = vmatprep.mubr.bf16.mxu0 %v23652_v38 }
 0x667   : > { %v20185_v41 = vpop.f32.mrb[172].mxu1  ;;  %v20917_v47 = vpop.f32.mrb[24].mxu0 }
 0x668   : > { %v7669_v10 = vpop.f32.mrb[173].mxu1  ;;  %v24321_v28 = vpop.f32.mrb[25].mxu0 }
 0x669   : > { %26171 = vst [vmem:[#allocation82_spill] sm:$0xff] %v24321_v28  ;;  %v20186_v24 = vpop.f32.mrb[174].mxu1  ;;  %v20918_v61 = vpop.f32.mrb[26].mxu0 }
 0x66a   : > { %v7672_v46 = vpop.f32.mrb[175].mxu1  ;;  %v24323_v63 = vpop.f32.mrb[27].mxu0 }
 0x66b   : > { %26172 = vst [vmem:[#allocation83_spill] sm:$0xff] %v24323_v63 }
 0x66c   : > { %20308 = vmatmul.mubr.bf16.gmra.mrb[24].mxu1 %v26173_v2  ;;  %21248 = vmatmul.mubr.bf16.gmra.mrb[132].mxu0 %v23666_v4 }
 0x66d   : > { %20311 = vmatprep.mubr.bf16.mxu1 %v23592_v36  ;;  %21251 = vmatprep.mubr.bf16.mxu0 %v23664_v3 }
 0x66f   : > { %v20189_v54 = vpop.f32.mrb[176].mxu1  ;;  %v20921_v45 = vpop.f32.mrb[28].mxu0 }
 0x670   : > { %v7685_v41 = vpop.f32.mrb[177].mxu1  ;;  %v11691_v47 = vpop.f32.mrb[29].mxu0 }
 0x671   : > { %v20190_v10 = vpop.f32.mrb[178].mxu1  ;;  %v20922_v58 = vpop.f32.mrb[30].mxu0 }
 0x672   : > { %v7688_v28 = vpop.f32.mrb[179].mxu1  ;;  %v11694_v24 = vpop.f32.mrb[31].mxu0 }
 0x674   : > { %20312 = vmatmul.mubr.bf16.gmra.mrb[28].mxu1 %v23606_v60  ;;  %21252 = vmatmul.mubr.bf16.gmra.mrb[136].mxu0 %v23678_v42 }
 0x675   : > { %20315 = vmatprep.mubr.bf16.mxu1 %v23604_v59  ;;  %21255 = vmatprep.mubr.bf16.mxu0 %v23676_v40 }
 0x677   : > { %v20193_v46 = vpop.f32.mrb[180].mxu1  ;;  %v21037_v61 = vpop.f32.mrb[32].mxu0 }
 0x678   : > { %v7701_v63 = vpop.f32.mrb[181].mxu1  ;;  %v24333_v48 = vpop.f32.mrb[33].mxu0 }
 0x679   : > { %26174 = vst [vmem:[#allocation20_spill] sm:$0xff] %v24333_v48  ;;  %v20194_v54 = vpop.f32.mrb[182].mxu1  ;;  %v21038_v45 = vpop.f32.mrb[34].mxu0 }
 0x67a   : > { %v7704_v41 = vpop.f32.mrb[183].mxu1  ;;  %v24335_v47 = vpop.f32.mrb[35].mxu0 }
 0x67b   : > { %26175 = vst [vmem:[#allocation84_spill] sm:$0xff] %v24335_v47 }
 0x67c   : > { %20316 = vmatmul.mubr.bf16.gmra.mrb[32].mxu1 %v23618_v21  ;;  %21256 = vmatmul.mubr.bf16.gmra.mrb[140].mxu0 %v23690_v17 }
 0x67d   : > { %20319 = vmatprep.mubr.bf16.mxu1 %v23616_v20  ;;  %21259 = vmatprep.mubr.bf16.mxu0 %v23688_v16 }
 0x67f   : > { %v20197_v58 = vpop.f32.mrb[184].mxu1  ;;  %v21041_v28 = vpop.f32.mrb[36].mxu0 }
 0x680   : > { %v7717_v10 = vpop.f32.mrb[185].mxu1  ;;  %v24341_v24 = vpop.f32.mrb[37].mxu0 }
 0x681   : > { %26176 = vst [vmem:[#allocation85_spill] sm:$0xff] %v24341_v24  ;;  %v20198_v63 = vpop.f32.mrb[186].mxu1  ;;  %v21042_v46 = vpop.f32.mrb[38].mxu0 }
 0x682   : > { %v7720_v61 = vpop.f32.mrb[187].mxu1  ;;  %v24343_v54 = vpop.f32.mrb[39].mxu0 }
 0x683   : > { %26177 = vst [vmem:[#allocation86_spill] sm:$0xff] %v24343_v54 }
 0x684   : > { %20320 = vmatmul.mubr.bf16.gmra.mrb[36].mxu1 %v23630_v44  ;;  %21260 = vmatmul.mubr.bf16.gmra.mrb[144].mxu0 %v23702_v52 }
 0x685   : > { %20323 = vmatprep.mubr.bf16.mxu1 %v23628_v43  ;;  %21263 = vmatprep.mubr.bf16.mxu0 %v23700_v51 }
 0x687   : > { %v20201_v45 = vpop.f32.mrb[188].mxu1  ;;  %v21045_v41 = vpop.f32.mrb[40].mxu0 }
 0x688   : > { %v7733_v58 = vpop.f32.mrb[189].mxu1  ;;  %v24349_v28 = vpop.f32.mrb[41].mxu0 }
 0x689   : > { %26178 = vst [vmem:[#allocation87_spill] sm:$0xff] %v24349_v28  ;;  %v20202_v10 = vpop.f32.mrb[190].mxu1  ;;  %v21046_v24 = vpop.f32.mrb[42].mxu0 }
 0x68a   : > { %v7736_v63 = vpop.f32.mrb[191].mxu1  ;;  %v24351_v46 = vpop.f32.mrb[43].mxu0 }
 0x68b   : > { %26179 = vst [vmem:[#allocation88_spill] sm:$0xff] %v24351_v46 }
 0x68c   : > { %20324 = vmatmul.mubr.bf16.gmra.mrb[40].mxu1 %v23642_v7  ;;  %21264 = vmatmul.mubr.bf16.gmra.mrb[148].mxu0 %v23721_v30 }
 0x68d   : > { %20327 = vmatprep.mubr.bf16.mxu1 %v23640_v5  ;;  %21267 = vmatprep.mubr.bf16.mxu0 %v23719_v29 }
 0x68f   : > { %v20205_v61 = vpop.f32.mrb[192].mxu1  ;;  %v21049_v54 = vpop.f32.mrb[44].mxu0 }
 0x690   : > { %v7749_v45 = vpop.f32.mrb[193].mxu1  ;;  %v12511_v41 = vpop.f32.mrb[45].mxu0 }
 0x691   : > { %v24358_v58 = vadd.f32 %v7749_v45, %v24136_v53  ;;  %v20206_v10 = vpop.f32.mrb[194].mxu1  ;;  %v21050_v24 = vpop.f32.mrb[46].mxu0 }
 0x692   : > { %v7752_v63 = vpop.f32.mrb[195].mxu1  ;;  %v12514_v28 = vpop.f32.mrb[47].mxu0 }
 0x693   : > { %v24361_v46 = vadd.f32 %v7752_v63, %v24139_v0 }
 0x694   : > { %20328 = vmatmul.mubr.bf16.gmra.mrb[44].mxu1 %v23654_v39  ;;  %21268 = vmatmul.mubr.bf16.gmra.mrb[152].mxu0 %v23739_v56 }
 0x695   : > { %20331 = vmatprep.mubr.bf16.mxu1 %v23652_v38  ;;  %21271 = vmatprep.mubr.bf16.mxu0 %v23737_v25 }
 0x697   : > { %v20209_v54 = vpop.f32.mrb[196].mxu1  ;;  %v21053_v61 = vpop.f32.mrb[48].mxu0 }
 0x698   : > { %v7765_v41 = vpop.f32.mrb[197].mxu1  ;;  %v12527_v53 = vpop.f32.mrb[49].mxu0 }
 0x699   : > { %v24368_v45 = vadd.f32 %v7765_v41, %v24146_v11  ;;  %v20210_v10 = vpop.f32.mrb[198].mxu1  ;;  %v21054_v28 = vpop.f32.mrb[50].mxu0 }
 0x69a   : > { %v7768_v24 = vpop.f32.mrb[199].mxu1  ;;  %v12530_v0 = vpop.f32.mrb[51].mxu0 }
 0x69b   : > { %v24371_v63 = vadd.f32 %v7768_v24, %v24149_v33  ;;  %v26180_v24 = vld [vmem:[#allocation52_spill] sm:$0xff] }
 0x69c   : > { %20332 = vmatmul.mubr.bf16.gmra.mrb[48].mxu1 %v23666_v4  ;;  %21272 = vmatmul.mubr.bf16.gmra.mrb[156].mxu0 %v23757_v23 }
 0x69d   : > { %20335 = vmatprep.mubr.bf16.mxu1 %v23664_v3  ;;  %21275 = vmatprep.mubr.bf16.mxu0 %v23755_v22 }
 0x69f   : > { %v20213_v54 = vpop.f32.mrb[200].mxu1  ;;  %v21057_v61 = vpop.f32.mrb[52].mxu0 }
 0x6a0   : > { %v7781_v53 = vpop.f32.mrb[201].mxu1  ;;  %v12543_v11 = vpop.f32.mrb[53].mxu0 }
 0x6a1   : > { %v24378_v41 = vadd.f32 %v7781_v53, %v24156_v32  ;;  %v20214_v10 = vpop.f32.mrb[202].mxu1  ;;  %v21058_v28 = vpop.f32.mrb[54].mxu0 }
 0x6a2   : > { %v7784_v0 = vpop.f32.mrb[203].mxu1  ;;  %v12546_v33 = vpop.f32.mrb[55].mxu0 }
 0x6a3   : > { %v24381_v47 = vadd.f32 %v7784_v0, %v26180_v24 }
 0x6a4   : > { %20336 = vmatmul.mubr.bf16.gmra.mrb[52].mxu1 %v23678_v42  ;;  %21276 = vmatmul.mubr.bf16.gmra.mrb[160].mxu0 %v23777_v26 }
 0x6a5   : > { %26181 = vst [vmem:[#allocation52_spill] sm:$0xff] %v24381_v47  ;;  %20339 = vmatprep.mubr.bf16.mxu1 %v23676_v40  ;;  %21279 = vmatprep.mubr.bf16.mxu0 %v23775_v8 }
 0x6a7   : > { %v20217_v54 = vpop.f32.mrb[204].mxu1  ;;  %v21061_v61 = vpop.f32.mrb[56].mxu0 }
 0x6a8   : > { %v7797_v11 = vpop.f32.mrb[205].mxu1  ;;  %v12559_v32 = vpop.f32.mrb[57].mxu0 }
 0x6a9   : > { %v20218_v53 = vpop.f32.mrb[206].mxu1  ;;  %v21062_v10 = vpop.f32.mrb[58].mxu0 }
 0x6aa   : > { %v7800_v28 = vpop.f32.mrb[207].mxu1  ;;  %v12562_v48 = vpop.f32.mrb[59].mxu0 }
 0x6ac   : > { %20340 = vmatmul.mubr.bf16.gmra.mrb[56].mxu1 %v23690_v17  ;;  %21280 = vmatmul.mubr.bf16.gmra.mrb[164].mxu0 %v23795_v62 }
 0x6ad   : > { %20343 = vmatprep.mubr.bf16.mxu1 %v23688_v16  ;;  %21283 = vmatprep.mubr.bf16.mxu0 %v23793_v49 }
 0x6af   : > { %v20221_v0 = vpop.f32.mrb[208].mxu1  ;;  %v21065_v33 = vpop.f32.mrb[60].mxu0 }
 0x6b0   : > { %v7813_v24 = vpop.f32.mrb[209].mxu1  ;;  %v12575_v47 = vpop.f32.mrb[61].mxu0 }
 0x6b1   : > { %v20222_v54 = vpop.f32.mrb[210].mxu1  ;;  %v21066_v61 = vpop.f32.mrb[62].mxu0 }
 0x6b2   : > { %v7816_v11 = vpop.f32.mrb[211].mxu1  ;;  %v12578_v32 = vpop.f32.mrb[63].mxu0  ;;  %v22280_v54 = vld [vmem:[%s25957_s3 + $0x148] sm:$0xff]   ;;  %v26184_v61 = vld [vmem:[#allocation7_spill] sm:$0xff] }
 0x6b3   : > { %v26185_v11 = vld [vmem:[#allocation35_spill] sm:$0xff]  ;;  %v26187_v32 = vld [vmem:[#allocation34_spill] sm:$0xff] }
 0x6b4   : > { %20344 = vmatmul.mubr.bf16.gmra.mrb[60].mxu1 %v23702_v52  ;;  %21284 = vmatmul.mubr.bf16.gmra.mrb[168].mxu0 %v23813_v19 }
 0x6b5   : > { %20363 = vmatprep.mubr.bf16.mxu1 %v26137_v9  ;;  %21287 = vmatprep.mubr.bf16.mxu0 %v26139_v1  ;;  %v26186_v9 = vld [vmem:[#allocation10_spill] sm:$0xff] }
 0x6b7   : > { %v20225_v48 = vpop.f32.mrb[212].mxu1  ;;  %v21069_v53 = vpop.f32.mrb[64].mxu0 }
 0x6b8   : > { %v7829_v10 = vpop.f32.mrb[213].mxu1  ;;  %v24395_v28 = vpop.f32.mrb[65].mxu0  ;;  %v22286_v48 = vld [vmem:[%s25957_s3 + $0x150] sm:$0xff]  }
 0x6b9   : > { %26182 = vst [vmem:[#allocation89_spill] sm:$0xff] %v24395_v28  ;;  %v20226_v0 = vpop.f32.mrb[214].mxu1  ;;  %v21070_v33 = vpop.f32.mrb[66].mxu0 }
 0x6ba   : > { %v7832_v47 = vpop.f32.mrb[215].mxu1  ;;  %v24397_v24 = vpop.f32.mrb[67].mxu0 }
 0x6bb   : > { %26183 = vst [vmem:[#allocation90_spill] sm:$0xff] %v24397_v24 }
 0x6bc   : > { %20364 = vmatmul.mubr.bf16.vlgmr.msra.gmra.mrb[64].mxu1 %v26184_v61  ;;  %21288 = vmatmul.mubr.bf16.gmra.mrb[172].mxu0 %v26185_v11 }
 0x6bd   : > { %20367 = vmatprep.mubr.bf16.mxu1 %v26186_v9  ;;  %20444 = vmatpush3.bf16.msra.mxu1 %v24240_v27  ;;  %v22287_v27 = vld [vmem:[%s25957_s3 + $0x158] sm:$0xff]   ;;  %v26190_v9 = vld [vmem:[#allocation9_spill] sm:$0xff] }
 0x6be   : > { %21291 = vmatprep.mubr.bf16.mxu0 %v26187_v32  ;;  %20445 = vmatprep.subr.bf16.mxu1 %v22280_v54 }
 0x6bf   : > { %v20229_v53 = vpop.f32.mrb[216].mxu1  ;;  %v21073_v10 = vpop.f32.mrb[68].mxu0 }
 0x6c0   : > { %v7845_v0 = vpop.f32.mrb[217].mxu1  ;;  %v24410_v33 = vpop.f32.mrb[69].mxu0  ;;  %v26191_v53 = vld [vmem:[#allocation12_spill] sm:$0xff]  ;;  %v26192_v10 = vld [vmem:[#allocation38_spill] sm:$0xff] }
 0x6c1   : > { %26188 = vst [vmem:[#allocation91_spill] sm:$0xff] %v24410_v33  ;;  %v20230_v47 = vpop.f32.mrb[218].mxu1  ;;  %v21074_v24 = vpop.f32.mrb[70].mxu0  ;;  %20446 = vmatpush3.bf16.msra.mxu1 %v22280_v54 }
 0x6c2   : > { %v7848_v28 = vpop.f32.mrb[219].mxu1  ;;  %v24412_v61 = vpop.f32.mrb[71].mxu0  ;;  %20447 = vmatprep.subr.bf16.mxu1 %v22286_v48 }
 0x6c3   : > { %26189 = vst [vmem:[#allocation92_spill] sm:$0xff] %v24412_v61  ;;  %v22288_v28 = vld [vmem:[%s25957_s3 + $0x160] sm:$0xff]  }
 0x6c4   : > { %20368 = vmatmul.mubr.bf16.gmra.mrb[68].mxu1 %v26190_v9  ;;  %21292 = vmatmul.mubr.bf16.gmra.mrb[176].mxu0 %v26153_v57 }
 0x6c5   : > { %20371 = vmatprep.mubr.bf16.mxu1 %v26191_v53  ;;  %21295 = vmatprep.mubr.bf16.mxu0 %v26192_v10 }
 0x6c6   : > { %20448 = vmatpush3.bf16.msra.mxu1 %v22286_v48  ;;  %v22289_v48 = vld [vmem:[%s25957_s3 + $0x168] sm:$0xff]  }
 0x6c7   : > { %v20233_v0 = vpop.f32.mrb[220].mxu1  ;;  %v21077_v24 = vpop.f32.mrb[72].mxu0  ;;  %20449 = vmatprep.subr.bf16.mxu1 %v22287_v27 }
 0x6c8   : > { %v7861_v54 = vpop.f32.mrb[221].mxu1  ;;  %v24424_v47 = vpop.f32.mrb[73].mxu0  ;;  %v26195_v0 = vld [vmem:[#allocation11_spill] sm:$0xff]  ;;  %v26196_v24 = vld [vmem:[#allocation42_spill] sm:$0xff] }
 0x6c9   : > { %26193 = vst [vmem:[#allocation93_spill] sm:$0xff] %v24424_v47  ;;  %v20234_v61 = vpop.f32.mrb[222].mxu1  ;;  %v21078_v33 = vpop.f32.mrb[74].mxu0  ;;  %v26197_v54 = vld [vmem:[#allocation41_spill] sm:$0xff]  ;;  %v26198_v47 = vld [vmem:[#allocation8_spill] sm:$0xff] }
 0x6ca   : > { %v7864_v9 = vpop.f32.mrb[223].mxu1  ;;  %v24426_v32 = vpop.f32.mrb[75].mxu0  ;;  %20450 = vmatpush3.bf16.msra.mxu1 %v22287_v27 }
 0x6cb   : > { %26194 = vst [vmem:[#allocation94_spill] sm:$0xff] %v24426_v32  ;;  %20451 = vmatprep.subr.bf16.mxu1 %v22288_v28  ;;  %v22290_v9 = vld [vmem:[%s25957_s3 + $0x170] sm:$0xff]  }
 0x6cc   : > { %20372 = vmatmul.mubr.bf16.gmra.mrb[72].mxu1 %v26195_v0  ;;  %21296 = vmatmul.mubr.bf16.gmra.mrb[180].mxu0 %v26196_v24 }
 0x6cd   : > { %20375 = vmatprep.mubr.bf16.mxu1 %v26159_v35  ;;  %21299 = vmatprep.mubr.bf16.mxu0 %v26197_v54  ;;  %v26200_v35 = vld [vmem:[#allocation5_spill] sm:$0xff] }
 0x6ce   : > { %20452 = vmatpush3.bf16.msra.mxu1 %v22288_v28  ;;  %v22291_v28 = vld [vmem:[%s25957_s3 + $0x178] sm:$0xff]  }
 0x6cf   : > { %v20237_v61 = vpop.f32.mrb[224].mxu1  ;;  %v21081_v33 = vpop.f32.mrb[76].mxu0  ;;  %20453 = vmatprep.subr.bf16.mxu1 %v22289_v48 }
 0x6d0   : > { %v7877_v27 = vpop.f32.mrb[225].mxu1  ;;  %v12639_v32 = vpop.f32.mrb[77].mxu0  ;;  %v26202_v61 = vld [vmem:[#allocation45_spill] sm:$0xff] }
 0x6d1   : > { %v24439_v53 = vadd.f32 %v7877_v27, %v26198_v47  ;;  %v20238_v0 = vpop.f32.mrb[226].mxu1  ;;  %v21082_v10 = vpop.f32.mrb[78].mxu0  ;;  %v26203_v32 = vld [vmem:[#allocation44_spill] sm:$0xff] }
 0x6d2   : > { %v7880_v24 = vpop.f32.mrb[227].mxu1  ;;  %v12642_v57 = vpop.f32.mrb[79].mxu0  ;;  %20454 = vmatpush3.bf16.msra.mxu1 %v22289_v48  ;;  %v26204_v48 = vld [vmem:[#allocation58_spill] sm:$0xff] }
 0x6d3   : > { %26199 = vst [vmem:[#allocation8_spill] sm:$0xff] %v24439_v53  ;;  %v24442_v54 = vadd.f32 %v7880_v24, %v26200_v35  ;;  %20455 = vmatprep.subr.bf16.mxu1 %v22290_v9  ;;  %v26205_v53 = vld [vmem:[#allocation59_spill] sm:$0xff] }
 0x6d4   : > { %20376 = vmatmul.mubr.bf16.gmra.mrb[76].mxu1 %v26160_v34  ;;  %21300 = vmatmul.mubr.bf16.gmra.mrb[184].mxu0 %v26202_v61 }
 0x6d5   : > { %26201 = vst [vmem:[#allocation5_spill] sm:$0xff] %v24442_v54  ;;  %20379 = vmatprep.mubr.bf16.mxu1 %v26161_v37  ;;  %21303 = vmatprep.mubr.bf16.mxu0 %v26203_v32  ;;  %v26206_v37 = vld [vmem:[#allocation15_spill] sm:$0xff]  ;;  %v26010_v32 = vmov 0  }
 0x6d6   : > { %20456 = vmatpush3.bf16.msra.mxu1 %v22290_v9  ;;  %v24462_v9 = vld [vmem:[%s25957_s3 + $0x180] sm:$0xff]  }
 0x6d7   : > { %v20241_v10 = vpop.f32.mrb[228].mxu1  ;;  %v21085_v57 = vpop.f32.mrb[80].mxu0  ;;  %20457 = vmatprep.subr.bf16.mxu1 %v22291_v28 }
 0x6d8   : > { %v7893_v47 = vpop.f32.mrb[229].mxu1  ;;  %v12655_v35 = vpop.f32.mrb[81].mxu0  ;;  %v26207_v57 = vld [vmem:[#allocation60_spill] sm:$0xff] }
 0x6d9   : > { %v24452_v0 = vadd.f32 %v7893_v47, %v26204_v48  ;;  %v20242_v24 = vpop.f32.mrb[230].mxu1  ;;  %v21086_v33 = vpop.f32.mrb[82].mxu0 }
 0x6da   : > { %v7896_v27 = vpop.f32.mrb[231].mxu1  ;;  %v12658_v54 = vpop.f32.mrb[83].mxu0  ;;  %20458 = vmatpush3.bf16.msra.mxu1 %v22291_v28 }
 0x6db   : > { %v24455_v34 = vadd.f32 %v7896_v27, %v26205_v53  ;;  %20539 = vmatprep.subr.bf16.mxu1 %v24462_v9  ;;  %v26209_v27 = vld [vmem:[#allocation61_spill] sm:$0xff] }
 0x6dc   : > { %20380 = vmatmul.mubr.bf16.gmra.mrb[80].mxu1 %v26206_v37  ;;  %21304 = vmatmul.mubr.bf16.gmra.mrb[188].mxu0 %v26010_v32 }
 0x6dd   : > { %20383 = vmatprep.mubr.bf16.mxu1 %v26162_v18  ;;  %21419 = vmatprep.mubr.bf16.mxu0 %v23604_v59 }
 0x6df   : > { %v20245_v54 = vpop.f32.mrb[232].mxu1  ;;  %v21089_v28 = vpop.f32.mrb[84].mxu0 }
 0x6e0   : > { %v7909_v53 = vpop.f32.mrb[233].mxu1  ;;  %v12671_v10 = vpop.f32.mrb[85].mxu0 }
 0x6e1   : > { %v24468_v47 = vadd.f32 %v7909_v53, %v26207_v57  ;;  %v20246_v35 = vpop.f32.mrb[234].mxu1  ;;  %v21090_v48 = vpop.f32.mrb[86].mxu0 }
 0x6e2   : > { %v7912_v24 = vpop.f32.mrb[235].mxu1  ;;  %v12674_v33 = vpop.f32.mrb[87].mxu0 }
 0x6e3   : > { %26208 = vst [vmem:[#allocation58_spill] sm:$0xff] %v24468_v47  ;;  %v24471_v32 = vadd.f32 %v7912_v24, %v26209_v27 }
 0x6e4   : > { %20384 = vmatmul.mubr.bf16.gmra.mrb[84].mxu1 %v23550_v31  ;;  %21420 = vmatmul.mubr.bf16.vlgmr.msra.gmra.mrb[192].mxu0 %v23618_v21 }
 0x6e5   : > { %20387 = vmatprep.mubr.bf16.mxu1 %v26166_v6  ;;  %21423 = vmatprep.mubr.bf16.mxu0 %v23616_v20 }
 0x6e7   : > { %v20249_v54 = vpop.f32.mrb[236].mxu1  ;;  %v21093_v28 = vpop.f32.mrb[88].mxu0 }
 0x6e8   : > { %v7925_v10 = vpop.f32.mrb[237].mxu1  ;;  %v12687_v53 = vpop.f32.mrb[89].mxu0 }
 0x6e9   : > { %v20250_v57 = vpop.f32.mrb[238].mxu1  ;;  %v21094_v35 = vpop.f32.mrb[90].mxu0 }
 0x6ea   : > { %v7928_v48 = vpop.f32.mrb[239].mxu1  ;;  %v12690_v47 = vpop.f32.mrb[91].mxu0 }
 0x6ec   : > { %20388 = vmatmul.mubr.bf16.gmra.mrb[88].mxu1 %v23568_v55  ;;  %21424 = vmatmul.mubr.bf16.gmra.mrb[196].mxu0 %v23630_v44 }
 0x6ed   : > { %20391 = vmatprep.mubr.bf16.mxu1 %v23582_v15  ;;  %21427 = vmatprep.mubr.bf16.mxu0 %v23628_v43 }
 0x6ef   : > { %v20269_v24 = vpop.f32.mrb[240].mxu1  ;;  %v21097_v33 = vpop.f32.mrb[92].mxu0 }
 0x6f0   : > { %v8159_v27 = vpop.f32.mrb[241].mxu1  ;;  %v12703_v6 = vpop.f32.mrb[93].mxu0 }
 0x6f1   : > { %v24482_v54 = vadd.f32 %v8159_v27, %v24272_v13  ;;  %v20270_v28 = vpop.f32.mrb[242].mxu1  ;;  %v21098_v10 = vpop.f32.mrb[94].mxu0 }
 0x6f2   : > { %v8162_v53 = vpop.f32.mrb[243].mxu1  ;;  %v12706_v57 = vpop.f32.mrb[95].mxu0  ;;  %v26212_v10 = vld [vmem:[#allocation77_spill] sm:$0xff] }
 0x6f3   : > { %v24485_v47 = vadd.f32 %v8162_v53, %v24275_v12 }
 0x6f4   : > { %20392 = vmatmul.mubr.bf16.gmra.mrb[92].mxu1 %v23580_v14  ;;  %21428 = vmatmul.mubr.bf16.gmra.mrb[200].mxu0 %v23642_v7 }
 0x6f5   : > { %20395 = vmatprep.mubr.bf16.mxu1 %v26173_v2  ;;  %21431 = vmatprep.mubr.bf16.mxu0 %v23640_v5 }
 0x6f7   : > { %v20273_v35 = vpop.f32.mrb[244].mxu1  ;;  %v21101_v6 = vpop.f32.mrb[96].mxu0 }
 0x6f8   : > { %v8175_v48 = vpop.f32.mrb[245].mxu1  ;;  %v24491_v13 = vpop.f32.mrb[97].mxu0 }
 0x6f9   : > { %26210 = vst [vmem:[#allocation59_spill] sm:$0xff] %v24491_v13  ;;  %v24494_v24 = vadd.f32 %v8175_v48, %v24290_v50  ;;  %v20274_v33 = vpop.f32.mrb[246].mxu1  ;;  %v21102_v27 = vpop.f32.mrb[98].mxu0  ;;  %v26215_v48 = vld [vmem:[#allocation79_spill] sm:$0xff]  ;;  %v26217_v13 = vld [vmem:[#allocation81_spill] sm:$0xff] }
 0x6fa   : > { %v8178_v12 = vpop.f32.mrb[247].mxu1  ;;  %v24496_v28 = vpop.f32.mrb[99].mxu0 }
 0x6fb   : > { %26211 = vst [vmem:[#allocation15_spill] sm:$0xff] %v24496_v28  ;;  %v24499_v53 = vadd.f32 %v8178_v12, %v26212_v10 }
 0x6fc   : > { %20396 = vmatmul.mubr.bf16.gmra.mrb[96].mxu1 %v23592_v36  ;;  %21432 = vmatmul.mubr.bf16.gmra.mrb[204].mxu0 %v23654_v39 }
 0x6fd   : > { %26213 = vst [vmem:[#allocation60_spill] sm:$0xff] %v24499_v53  ;;  %20399 = vmatprep.mubr.bf16.mxu1 %v23606_v60  ;;  %21435 = vmatprep.mubr.bf16.mxu0 %v23652_v38 }
 0x6ff   : > { %v20277_v57 = vpop.f32.mrb[248].mxu1  ;;  %v21105_v35 = vpop.f32.mrb[100].mxu0 }
 0x700   : > { %v8191_v50 = vpop.f32.mrb[249].mxu1  ;;  %v24505_v6 = vpop.f32.mrb[101].mxu0 }
 0x701   : > { %26214 = vst [vmem:[#allocation61_spill] sm:$0xff] %v24505_v6  ;;  %v24508_v33 = vadd.f32 %v8191_v50, %v26215_v48  ;;  %v20278_v27 = vpop.f32.mrb[250].mxu1  ;;  %v21106_v28 = vpop.f32.mrb[102].mxu0 }
 0x702   : > { %v8194_v12 = vpop.f32.mrb[251].mxu1  ;;  %v24510_v10 = vpop.f32.mrb[103].mxu0 }
 0x703   : > { %26216 = vst [vmem:[#allocation77_spill] sm:$0xff] %v24510_v10  ;;  %v24513_v53 = vadd.f32 %v8194_v12, %v26217_v13 }
 0x704   : > { %20400 = vmatmul.mubr.bf16.gmra.mrb[100].mxu1 %v23604_v59  ;;  %21436 = vmatmul.mubr.bf16.gmra.mrb[208].mxu0 %v23666_v4 }
 0x705   : > { %20403 = vmatprep.mubr.bf16.mxu1 %v23618_v21  ;;  %21439 = vmatprep.mubr.bf16.mxu0 %v23664_v3 }
 0x707   : > { %v20281_v57 = vpop.f32.mrb[252].mxu1  ;;  %v21109_v35 = vpop.f32.mrb[104].mxu0 }
 0x708   : > { %v8207_v50 = vpop.f32.mrb[253].mxu1  ;;  %v24519_v48 = vpop.f32.mrb[105].mxu0 }
 0x709   : > { %26218 = vst [vmem:[#allocation79_spill] sm:$0xff] %v24519_v48  ;;  %v20282_v28 = vpop.f32.mrb[254].mxu1  ;;  %v21110_v27 = vpop.f32.mrb[106].mxu0 }
 0x70a   : > { %v8210_v6 = vpop.f32.mrb[255].mxu1  ;;  %v24521_v10 = vpop.f32.mrb[107].mxu0 }
 0x70b   : > { %26219 = vst [vmem:[#allocation81_spill] sm:$0xff] %v24521_v10 }
 0x70c   : > { %20404 = vmatmul.mubr.bf16.gmra.mrb[104].mxu1 %v23616_v20  ;;  %21440 = vmatmul.mubr.bf16.gmra.mrb[212].mxu0 %v23678_v42 }
 0x70d   : > { %20407 = vmatprep.mubr.bf16.mxu1 %v23630_v44  ;;  %21443 = vmatprep.mubr.bf16.mxu0 %v23676_v40 }
 0x70f   : > { %v20285_v13 = vpop.f32.mrb[0].mxu1  ;;  %v21113_v12 = vpop.f32.mrb[108].mxu0 }
 0x710   : > { %v8223_v57 = vpop.f32.mrb[1].mxu1  ;;  %v12767_v35 = vpop.f32.mrb[109].mxu0 }
 0x711   : > { %v20286_v50 = vpop.f32.mrb[2].mxu1  ;;  %v21114_v21 = vpop.f32.mrb[110].mxu0 }
 0x712   : > { %v8226_v48 = vpop.f32.mrb[3].mxu1  ;;  %v12770_v28 = vpop.f32.mrb[111].mxu0 }
 0x714   : > { %20408 = vmatmul.mubr.bf16.gmra.mrb[108].mxu1 %v23628_v43  ;;  %21444 = vmatmul.mubr.bf16.gmra.mrb[216].mxu0 %v23690_v17 }
 0x715   : > { %20411 = vmatprep.mubr.bf16.mxu1 %v23642_v7  ;;  %21447 = vmatprep.mubr.bf16.mxu0 %v23688_v16 }
 0x717   : > { %v20289_v6 = vpop.f32.mrb[4].mxu1  ;;  %v21229_v27 = vpop.f32.mrb[112].mxu0 }
 0x718   : > { %v8239_v10 = vpop.f32.mrb[5].mxu1  ;;  %v24531_v44 = vpop.f32.mrb[113].mxu0 }
 0x719   : > { %26220 = vst [vmem:[#allocation95_spill] sm:$0xff] %v24531_v44  ;;  %v20290_v13 = vpop.f32.mrb[6].mxu1  ;;  %v21230_v12 = vpop.f32.mrb[114].mxu0 }
 0x71a   : > { %v8242_v57 = vpop.f32.mrb[7].mxu1  ;;  %v24533_v35 = vpop.f32.mrb[115].mxu0 }
 0x71b   : > { %26221 = vst [vmem:[#allocation96_spill] sm:$0xff] %v24533_v35 }
 0x71c   : > { %20412 = vmatmul.mubr.bf16.gmra.mrb[112].mxu1 %v23640_v5  ;;  %21448 = vmatmul.mubr.bf16.gmra.mrb[220].mxu0 %v23702_v52 }
 0x71d   : > { %20415 = vmatprep.mubr.bf16.mxu1 %v23654_v39  ;;  %21451 = vmatprep.mubr.bf16.mxu0 %v23700_v51 }
 0x71f   : > { %v20293_v21 = vpop.f32.mrb[8].mxu1  ;;  %v21233_v48 = vpop.f32.mrb[116].mxu0 }
 0x720   : > { %v8255_v50 = vpop.f32.mrb[9].mxu1  ;;  %v24539_v28 = vpop.f32.mrb[117].mxu0 }
 0x721   : > { %26222 = vst [vmem:[#allocation97_spill] sm:$0xff] %v24539_v28  ;;  %v20294_v10 = vpop.f32.mrb[10].mxu1  ;;  %v21234_v6 = vpop.f32.mrb[118].mxu0 }
 0x722   : > { %v8258_v27 = vpop.f32.mrb[11].mxu1  ;;  %v24541_v13 = vpop.f32.mrb[119].mxu0 }
 0x723   : > { %26223 = vst [vmem:[#allocation98_spill] sm:$0xff] %v24541_v13 }
 0x724   : > { %20416 = vmatmul.mubr.bf16.gmra.mrb[116].mxu1 %v23652_v38  ;;  %21452 = vmatmul.mubr.bf16.gmra.mrb[224].mxu0 %v23721_v30 }
 0x725   : > { %20419 = vmatprep.mubr.bf16.mxu1 %v23666_v4  ;;  %21455 = vmatprep.mubr.bf16.mxu0 %v23719_v29 }
 0x727   : > { %v20297_v12 = vpop.f32.mrb[12].mxu1  ;;  %v21237_v57 = vpop.f32.mrb[120].mxu0 }
 0x728   : > { %v8271_v21 = vpop.f32.mrb[13].mxu1  ;;  %v24547_v48 = vpop.f32.mrb[121].mxu0 }
 0x729   : > { %26224 = vst [vmem:[#allocation99_spill] sm:$0xff] %v24547_v48  ;;  %v20298_v50 = vpop.f32.mrb[14].mxu1  ;;  %v21238_v28 = vpop.f32.mrb[122].mxu0 }
 0x72a   : > { %v8274_v10 = vpop.f32.mrb[15].mxu1  ;;  %v24549_v6 = vpop.f32.mrb[123].mxu0 }
 0x72b   : > { %26225 = vst [vmem:[#allocation100_spill] sm:$0xff] %v24549_v6 }
 0x72c   : > { %20420 = vmatmul.mubr.bf16.gmra.mrb[120].mxu1 %v23664_v3  ;;  %21456 = vmatmul.mubr.bf16.gmra.mrb[228].mxu0 %v23739_v56 }
 0x72d   : > { %20423 = vmatprep.mubr.bf16.mxu1 %v23678_v42  ;;  %21459 = vmatprep.mubr.bf16.mxu0 %v23737_v25 }
 0x72f   : > { %v20301_v27 = vpop.f32.mrb[16].mxu1  ;;  %v21241_v13 = vpop.f32.mrb[124].mxu0 }
 0x730   : > { %v8287_v12 = vpop.f32.mrb[17].mxu1  ;;  %v13587_v57 = vpop.f32.mrb[125].mxu0 }
 0x731   : > { %v24556_v21 = vadd.f32 %v8287_v12, %v24358_v58  ;;  %v20302_v50 = vpop.f32.mrb[18].mxu1  ;;  %v21242_v28 = vpop.f32.mrb[126].mxu0 }
 0x732   : > { %v8290_v10 = vpop.f32.mrb[19].mxu1  ;;  %v13590_v48 = vpop.f32.mrb[127].mxu0 }
 0x733   : > { %v24559_v6 = vadd.f32 %v8290_v10, %v24361_v46 }
 0x734   : > { %20424 = vmatmul.mubr.bf16.gmra.mrb[124].mxu1 %v23676_v40  ;;  %21460 = vmatmul.mubr.bf16.gmra.mrb[232].mxu0 %v23757_v23 }
 0x735   : > { %20427 = vmatprep.mubr.bf16.mxu1 %v23690_v17  ;;  %21463 = vmatprep.mubr.bf16.mxu0 %v23755_v22  ;;  %v26247_v22 = vld [vmem:[#allocation5_spill] sm:$0xff] }
 0x737   : > { %v20305_v13 = vpop.f32.mrb[20].mxu1  ;;  %v21245_v27 = vpop.f32.mrb[128].mxu0 }
 0x738   : > { %v8303_v57 = vpop.f32.mrb[21].mxu1  ;;  %v13603_v58 = vpop.f32.mrb[129].mxu0 }
 0x739   : > { %v24566_v12 = vadd.f32 %v8303_v57, %v24368_v45  ;;  %v20306_v50 = vpop.f32.mrb[22].mxu1  ;;  %v21246_v48 = vpop.f32.mrb[130].mxu0 }
 0x73a   : > { %v8306_v28 = vpop.f32.mrb[23].mxu1  ;;  %v13606_v46 = vpop.f32.mrb[131].mxu0 }
 0x73b   : > { %v24569_v10 = vadd.f32 %v8306_v28, %v24371_v63  ;;  %v26226_v28 = vld [vmem:[#allocation52_spill] sm:$0xff] }
 0x73c   : > { %20428 = vmatmul.mubr.bf16.gmra.mrb[128].mxu1 %v23688_v16  ;;  %21464 = vmatmul.mubr.bf16.gmra.mrb[236].mxu0 %v23777_v26 }
 0x73d   : > { %20431 = vmatprep.mubr.bf16.mxu1 %v23702_v52  ;;  %21467 = vmatprep.mubr.bf16.mxu0 %v23775_v8 }
 0x73f   : > { %v20309_v13 = vpop.f32.mrb[24].mxu1  ;;  %v21249_v27 = vpop.f32.mrb[132].mxu0 }
 0x740   : > { %v8319_v58 = vpop.f32.mrb[25].mxu1  ;;  %v13619_v45 = vpop.f32.mrb[133].mxu0 }
 0x741   : > { %v24576_v57 = vadd.f32 %v8319_v58, %v24378_v41  ;;  %v20310_v50 = vpop.f32.mrb[26].mxu1  ;;  %v21250_v48 = vpop.f32.mrb[134].mxu0 }
 0x742   : > { %v8322_v46 = vpop.f32.mrb[27].mxu1  ;;  %v13622_v63 = vpop.f32.mrb[135].mxu0 }
 0x743   : > { %v24579_v35 = vadd.f32 %v8322_v46, %v26226_v28 }
 0x744   : > { %20432 = vmatmul.mubr.bf16.gmra.mrb[132].mxu1 %v23700_v51  ;;  %21468 = vmatmul.mubr.bf16.gmra.mrb[240].mxu0 %v23795_v62 }
 0x745   : > { %20435 = vmatprep.mubr.bf16.mxu1 %v23721_v30  ;;  %21471 = vmatprep.mubr.bf16.mxu0 %v23793_v49 }
 0x747   : > { %v20313_v13 = vpop.f32.mrb[28].mxu1  ;;  %v21253_v27 = vpop.f32.mrb[136].mxu0 }
 0x748   : > { %v8335_v45 = vpop.f32.mrb[29].mxu1  ;;  %v13635_v41 = vpop.f32.mrb[137].mxu0 }
 0x749   : > { %v20314_v58 = vpop.f32.mrb[30].mxu1  ;;  %v21254_v50 = vpop.f32.mrb[138].mxu0 }
 0x74a   : > { %v8338_v48 = vpop.f32.mrb[31].mxu1  ;;  %v13638_v44 = vpop.f32.mrb[139].mxu0  ;;  %v26228_v58 = vld [vmem:[#allocation34_spill] sm:$0xff] }
 0x74b   : > { %v26227_v44 = vld [vmem:[#allocation7_spill] sm:$0xff] }
 0x74c   : > { %20436 = vmatmul.mubr.bf16.gmra.mrb[136].mxu1 %v23719_v29  ;;  %21472 = vmatmul.mubr.bf16.gmra.mrb[244].mxu0 %v23813_v19 }
 0x74d   : > { %20439 = vmatprep.mubr.bf16.mxu1 %v23739_v56  ;;  %21475 = vmatprep.mubr.bf16.mxu0 %v26139_v1 }
 0x74f   : > { %v20317_v46 = vpop.f32.mrb[32].mxu1  ;;  %v21257_v63 = vpop.f32.mrb[140].mxu0 }
 0x750   : > { %v8351_v28 = vpop.f32.mrb[33].mxu1  ;;  %v13651_v49 = vpop.f32.mrb[141].mxu0 }
 0x751   : > { %v20318_v13 = vpop.f32.mrb[34].mxu1  ;;  %v21258_v27 = vpop.f32.mrb[142].mxu0 }
 0x752   : > { %v8354_v45 = vpop.f32.mrb[35].mxu1  ;;  %v13654_v41 = vpop.f32.mrb[143].mxu0  ;;  %v22293_v13 = vld [vmem:[%s25957_s3 + $0x188] sm:$0xff]   ;;  %v26231_v27 = vld [vmem:[#allocation10_spill] sm:$0xff] }
 0x753   : > { %v26232_v45 = vld [vmem:[#allocation39_spill] sm:$0xff]  ;;  %v26233_v41 = vld [vmem:[#allocation9_spill] sm:$0xff] }
 0x754   : > { %20440 = vmatmul.mubr.bf16.gmra.mrb[140].mxu1 %v23737_v25  ;;  %21476 = vmatmul.mubr.bf16.gmra.mrb[248].mxu0 %v26185_v11 }
 0x755   : > { %20459 = vmatprep.mubr.bf16.mxu1 %v26227_v44  ;;  %21479 = vmatprep.mubr.bf16.mxu0 %v26228_v58  ;;  %v22294_v44 = vld [vmem:[%s25957_s3 + $0x190] sm:$0xff]   ;;  %v26238_v58 = vld [vmem:[#allocation42_spill] sm:$0xff] }
 0x757   : > { %v20321_v50 = vpop.f32.mrb[36].mxu1  ;;  %v21261_v48 = vpop.f32.mrb[144].mxu0 }
 0x758   : > { %v8367_v19 = vpop.f32.mrb[37].mxu1  ;;  %v24593_v1 = vpop.f32.mrb[145].mxu0 }
 0x759   : > { %26229 = vst [vmem:[#allocation52_spill] sm:$0xff] %v24593_v1  ;;  %v20322_v46 = vpop.f32.mrb[38].mxu1  ;;  %v21262_v63 = vpop.f32.mrb[146].mxu0  ;;  %v26234_v19 = vld [vmem:[#allocation38_spill] sm:$0xff] }
 0x75a   : > { %v8370_v49 = vpop.f32.mrb[39].mxu1  ;;  %v24595_v28 = vpop.f32.mrb[147].mxu0 }
 0x75b   : > { %26230 = vst [vmem:[#allocation7_spill] sm:$0xff] %v24595_v28 }
 0x75c   : > { %20460 = vmatmul.mubr.bf16.vlgmr.msra.gmra.mrb[144].mxu1 %v26231_v27  ;;  %21480 = vmatmul.mubr.bf16.gmra.mrb[252].mxu0 %v26232_v45 }
 0x75d   : > { %20463 = vmatprep.mubr.bf16.mxu1 %v26233_v41  ;;  %20540 = vmatpush3.bf16.msra.mxu1 %v24462_v9  ;;  %v22295_v9 = vld [vmem:[%s25957_s3 + $0x198] sm:$0xff]  }
 0x75e   : > { %21483 = vmatprep.mubr.bf16.mxu0 %v26234_v19  ;;  %20541 = vmatprep.subr.bf16.mxu1 %v22293_v13  ;;  %v26237_v19 = vld [vmem:[#allocation12_spill] sm:$0xff] }
 0x75f   : > { %v20325_v50 = vpop.f32.mrb[40].mxu1  ;;  %v21265_v48 = vpop.f32.mrb[148].mxu0 }
 0x760   : > { %v8383_v46 = vpop.f32.mrb[41].mxu1  ;;  %v24608_v63 = vpop.f32.mrb[149].mxu0  ;;  %v26239_v50 = vld [vmem:[#allocation11_spill] sm:$0xff]  ;;  %v26240_v48 = vld [vmem:[#allocation41_spill] sm:$0xff] }
 0x761   : > { %26235 = vst [vmem:[#allocation10_spill] sm:$0xff] %v24608_v63  ;;  %v20326_v49 = vpop.f32.mrb[42].mxu1  ;;  %v21266_v28 = vpop.f32.mrb[150].mxu0  ;;  %20542 = vmatpush3.bf16.msra.mxu1 %v22293_v13 }
 0x762   : > { %v8386_v1 = vpop.f32.mrb[43].mxu1  ;;  %v24610_v45 = vpop.f32.mrb[151].mxu0  ;;  %20543 = vmatprep.subr.bf16.mxu1 %v22294_v44 }
 0x763   : > { %26236 = vst [vmem:[#allocation9_spill] sm:$0xff] %v24610_v45  ;;  %v22296_v1 = vld [vmem:[%s25957_s3 + $0x1a0] sm:$0xff]  }
 0x764   : > { %20464 = vmatmul.mubr.bf16.gmra.mrb[148].mxu1 %v26237_v19  ;;  %21484 = vmatmul.mubr.bf16.gmra.mrb[0].mxu0 %v26238_v58 }
 0x765   : > { %20467 = vmatprep.mubr.bf16.mxu1 %v26239_v50  ;;  %21487 = vmatprep.mubr.bf16.mxu0 %v26240_v48 }
 0x766   : > { %20544 = vmatpush3.bf16.msra.mxu1 %v22294_v44  ;;  %v22297_v44 = vld [vmem:[%s25957_s3 + $0x1a8] sm:$0xff]  }
 0x767   : > { %v20329_v46 = vpop.f32.mrb[44].mxu1  ;;  %v21269_v28 = vpop.f32.mrb[152].mxu0  ;;  %20545 = vmatprep.subr.bf16.mxu1 %v22295_v9 }
 0x768   : > { %v8399_v13 = vpop.f32.mrb[45].mxu1  ;;  %v24622_v49 = vpop.f32.mrb[153].mxu0  ;;  %v26243_v46 = vld [vmem:[#allocation14_spill] sm:$0xff]  ;;  %v26244_v28 = vld [vmem:[#allocation13_spill] sm:$0xff] }
 0x769   : > { %26241 = vst [vmem:[#allocation12_spill] sm:$0xff] %v24622_v49  ;;  %v20330_v45 = vpop.f32.mrb[46].mxu1  ;;  %v21270_v63 = vpop.f32.mrb[154].mxu0  ;;  %v26245_v13 = vld [vmem:[#allocation44_spill] sm:$0xff] }
 0x76a   : > { %v8402_v11 = vpop.f32.mrb[47].mxu1  ;;  %v24624_v62 = vpop.f32.mrb[155].mxu0  ;;  %20546 = vmatpush3.bf16.msra.mxu1 %v22295_v9  ;;  %v26246_v49 = vld [vmem:[#allocation8_spill] sm:$0xff] }
 0x76b   : > { %26242 = vst [vmem:[#allocation11_spill] sm:$0xff] %v24624_v62  ;;  %20547 = vmatprep.subr.bf16.mxu1 %v22296_v1  ;;  %v22298_v11 = vld [vmem:[%s25957_s3 + $0x1b0] sm:$0xff]  }
 0x76c   : > { %20468 = vmatmul.mubr.bf16.gmra.mrb[152].mxu1 %v26243_v46  ;;  %21488 = vmatmul.mubr.bf16.gmra.mrb[4].mxu0 %v26202_v61 }
 0x76d   : > { %20471 = vmatprep.mubr.bf16.mxu1 %v26244_v28  ;;  %21491 = vmatprep.mubr.bf16.mxu0 %v26245_v13 }
 0x76e   : > { %20548 = vmatpush3.bf16.msra.mxu1 %v22296_v1  ;;  %v22299_v1 = vld [vmem:[%s25957_s3 + $0x1b8] sm:$0xff]  }
 0x76f   : > { %v20333_v45 = vpop.f32.mrb[48].mxu1  ;;  %v21273_v63 = vpop.f32.mrb[156].mxu0  ;;  %20549 = vmatprep.subr.bf16.mxu1 %v22297_v44 }
 0x770   : > { %v8415_v9 = vpop.f32.mrb[49].mxu1  ;;  %v13715_v62 = vpop.f32.mrb[157].mxu0  ;;  %v26249_v45 = vld [vmem:[#allocation16_spill] sm:$0xff]  ;;  %v26250_v63 = vmov 0  }
 0x771   : > { %v24637_v48 = vadd.f32 %v8415_v9, %v26246_v49  ;;  %v20334_v58 = vpop.f32.mrb[50].mxu1  ;;  %v21274_v8 = vpop.f32.mrb[158].mxu0 }
 0x772   : > { %v8418_v61 = vpop.f32.mrb[51].mxu1  ;;  %v13718_v26 = vpop.f32.mrb[159].mxu0  ;;  %20550 = vmatpush3.bf16.msra.mxu1 %v22297_v44 }
 0x773   : > { %v24640_v13 = vadd.f32 %v8418_v61, %v26247_v22  ;;  %20551 = vmatprep.subr.bf16.mxu1 %v22298_v11 }
 0x774   : > { %20472 = vmatmul.mubr.bf16.gmra.mrb[156].mxu1 %v26249_v45  ;;  %21492 = vmatmul.mubr.bf16.gmra.mrb[8].mxu0 %v26250_v63 }
 0x775   : > { %26248 = vst [vmem:[#allocation14_spill] sm:$0xff] %v24640_v13  ;;  %20475 = vmatprep.mubr.bf16.mxu1 %v26206_v37  ;;  %21495 = vmatprep.mubr.bf16.mxu0 %v26250_v63 }
 0x776   : > { %20552 = vmatpush3.bf16.msra.mxu1 %v22298_v11  ;;  %v24659_v11 = vld [vmem:[%s25957_s3 + $0x200] sm:$0xff]  }
 0x777   : > { %v20337_v8 = vpop.f32.mrb[52].mxu1  ;;  %v21277_v26 = vpop.f32.mrb[160].mxu0  ;;  %20553 = vmatprep.subr.bf16.mxu1 %v22299_v1 }
 0x778   : > { %v8431_v62 = vpop.f32.mrb[53].mxu1  ;;  %v13731_v22 = vpop.f32.mrb[161].mxu0 }
 0x779   : > { %v24650_v61 = vadd.f32 %v8431_v62, %v24452_v0  ;;  %v20338_v58 = vpop.f32.mrb[54].mxu1  ;;  %v21278_v49 = vpop.f32.mrb[162].mxu0  ;;  %v26253_v62 = vld [vmem:[#allocation58_spill] sm:$0xff] }
 0x77a   : > { %v8434_v44 = vpop.f32.mrb[55].mxu1  ;;  %v13734_v9 = vpop.f32.mrb[163].mxu0  ;;  %20554 = vmatpush3.bf16.msra.mxu1 %v22299_v1 }
 0x77b   : > { %26251 = vst [vmem:[#allocation13_spill] sm:$0xff] %v24650_v61  ;;  %v24653_v13 = vadd.f32 %v8434_v44, %v24455_v34  ;;  %20731 = vmatprep.subr.bf16.mxu1 %v24659_v11 }
 0x77c   : > { %20476 = vmatmul.mubr.bf16.gmra.mrb[160].mxu1 %v26162_v18  ;;  %21496 = vmatmul.mubr.bf16.gmra.mrb[12].mxu0 %v26250_v63 }
 0x77d   : > { %26252 = vst [vmem:[#allocation8_spill] sm:$0xff] %v24653_v13  ;;  %20479 = vmatprep.mubr.bf16.mxu1 %v23550_v31  ;;  %v26254_v13 = vld [vmem:[#allocation19_spill] sm:$0xff] }
 0x77f   : > { %v20341_v0 = vpop.f32.mrb[56].mxu1  ;;  %v21281_v8 = vpop.f32.mrb[164].mxu0 }
 0x780   : > { %v8447_v26 = vpop.f32.mrb[57].mxu1  ;;  %v13747_v1 = vpop.f32.mrb[165].mxu0 }
 0x781   : > { %v24665_v34 = vadd.f32 %v8447_v26, %v26253_v62  ;;  %v20342_v22 = vpop.f32.mrb[58].mxu1  ;;  %v21282_v58 = vpop.f32.mrb[166].mxu0 }
 0x782   : > { %v8450_v49 = vpop.f32.mrb[59].mxu1  ;;  %v13750_v44 = vpop.f32.mrb[167].mxu0 }
 0x783   : > { %v24668_v9 = vadd.f32 %v8450_v49, %v24471_v32 }
 0x784   : > { %20480 = vmatmul.mubr.bf16.gmra.mrb[164].mxu1 %v26254_v13 }
 0x785   : > { %20483 = vmatprep.mubr.bf16.mxu1 %v23568_v55 }
 0x787   : > { %v20345_v63 = vpop.f32.mrb[60].mxu1  ;;  %v21285_v31 = vpop.f32.mrb[168].mxu0 }
 0x788   : > { %v8463_v0 = vpop.f32.mrb[61].mxu1  ;;  %v13763_v8 = vpop.f32.mrb[169].mxu0 }
 0x789   : > { %v20346_v61 = vpop.f32.mrb[62].mxu1  ;;  %v21286_v1 = vpop.f32.mrb[170].mxu0 }
 0x78a   : > { %v8466_v18 = vpop.f32.mrb[63].mxu1  ;;  %v13766_v26 = vpop.f32.mrb[171].mxu0 }
 0x78c   : > { %20484 = vmatmul.mubr.bf16.gmra.mrb[168].mxu1 %v23582_v15 }
 0x78d   : > { %20487 = vmatprep.mubr.bf16.mxu1 %v23580_v14 }
 0x78f   : > { %v20365_v62 = vpop.f32.mrb[64].mxu1  ;;  %v21289_v22 = vpop.f32.mrb[172].mxu0 }
 0x790   : > { %v8697_v32 = vpop.f32.mrb[65].mxu1  ;;  %v13779_v58 = vpop.f32.mrb[173].mxu0 }
 0x791   : > { %v24675_v49 = vadd.f32 %v8697_v32, %v24482_v54  ;;  %v20366_v44 = vpop.f32.mrb[66].mxu1  ;;  %v21290_v63 = vpop.f32.mrb[174].mxu0 }
 0x792   : > { %v8700_v31 = vpop.f32.mrb[67].mxu1  ;;  %v13782_v0 = vpop.f32.mrb[175].mxu0  ;;  %v26257_v44 = vld [vmem:[#allocation60_spill] sm:$0xff] }
 0x793   : > { %v24678_v61 = vadd.f32 %v8700_v31, %v24485_v47 }
 0x794   : > { %20488 = vmatmul.mubr.bf16.gmra.mrb[172].mxu1 %v26173_v2 }
 0x795   : > { %20491 = vmatprep.mubr.bf16.mxu1 %v23592_v36 }
 0x797   : > { %v20369_v18 = vpop.f32.mrb[68].mxu1  ;;  %v21293_v8 = vpop.f32.mrb[176].mxu0 }
 0x798   : > { %v8713_v1 = vpop.f32.mrb[69].mxu1  ;;  %v24682_v26 = vpop.f32.mrb[177].mxu0 }
 0x799   : > { %26255 = vst [vmem:[#allocation5_spill] sm:$0xff] %v24682_v26  ;;  %v24685_v62 = vadd.f32 %v8713_v1, %v24494_v24  ;;  %v20370_v54 = vpop.f32.mrb[70].mxu1  ;;  %v21294_v22 = vpop.f32.mrb[178].mxu0 }
 0x79a   : > { %v8716_v32 = vpop.f32.mrb[71].mxu1  ;;  %v24687_v58 = vpop.f32.mrb[179].mxu0 }
 0x79b   : > { %26256 = vst [vmem:[#allocation16_spill] sm:$0xff] %v24687_v58  ;;  %v24690_v47 = vadd.f32 %v8716_v32, %v26257_v44  ;;  %v26262_v44 = vld [vmem:[#allocation22_spill] sm:$0xff] }
 0x79c   : > { %20492 = vmatmul.mubr.bf16.gmra.mrb[176].mxu1 %v23606_v60 }
 0x79d   : > { %20495 = vmatprep.mubr.bf16.mxu1 %v23604_v59 }
 0x79f   : > { %v20373_v63 = vpop.f32.mrb[72].mxu1  ;;  %v21297_v31 = vpop.f32.mrb[180].mxu0 }
 0x7a0   : > { %v8729_v0 = vpop.f32.mrb[73].mxu1  ;;  %v24694_v18 = vpop.f32.mrb[181].mxu0 }
 0x7a1   : > { %26258 = vst [vmem:[#allocation58_spill] sm:$0xff] %v24694_v18  ;;  %v24697_v24 = vadd.f32 %v8729_v0, %v24508_v33  ;;  %v20374_v8 = vpop.f32.mrb[74].mxu1  ;;  %v21298_v1 = vpop.f32.mrb[182].mxu0 }
 0x7a2   : > { %v8732_v54 = vpop.f32.mrb[75].mxu1  ;;  %v24699_v22 = vpop.f32.mrb[183].mxu0  ;;  %v26265_v1 = vld [vmem:[#allocation24_spill] sm:$0xff] }
 0x7a3   : > { %26259 = vst [vmem:[#allocation19_spill] sm:$0xff] %v24697_v24  ;;  %26260 = vst [vmem:[#allocation60_spill] sm:$0xff] %v24699_v22  ;;  %v24702_v32 = vadd.f32 %v8732_v54, %v24513_v53 }
 0x7a4   : > { %20496 = vmatmul.mubr.bf16.gmra.mrb[180].mxu1 %v26262_v44 }
 0x7a5   : > { %26261 = vst [vmem:[#allocation101_spill] sm:$0xff] %v24702_v32  ;;  %20499 = vmatprep.mubr.bf16.mxu1 %v23616_v20 }
 0x7a7   : > { %v20377_v63 = vpop.f32.mrb[76].mxu1  ;;  %v21301_v31 = vpop.f32.mrb[184].mxu0 }
 0x7a8   : > { %v8745_v58 = vpop.f32.mrb[77].mxu1  ;;  %v24706_v26 = vpop.f32.mrb[185].mxu0 }
 0x7a9   : > { %26263 = vst [vmem:[#allocation22_spill] sm:$0xff] %v24706_v26  ;;  %v20378_v18 = vpop.f32.mrb[78].mxu1  ;;  %v21302_v33 = vpop.f32.mrb[186].mxu0 }
 0x7aa   : > { %v8748_v0 = vpop.f32.mrb[79].mxu1  ;;  %v24708_v8 = vpop.f32.mrb[187].mxu0 }
 0x7ab   : > { %26264 = vst [vmem:[#allocation102_spill] sm:$0xff] %v24708_v8 }
 0x7ac   : > { %20500 = vmatmul.mubr.bf16.gmra.mrb[184].mxu1 %v26265_v1 }
 0x7ad   : > { %20503 = vmatprep.mubr.bf16.mxu1 %v23628_v43 }
 0x7af   : > { %v20381_v53 = vpop.f32.mrb[80].mxu1  ;;  %v21305_v54 = vpop.f32.mrb[188].mxu0 }
 0x7b0   : > { %v8761_v22 = vpop.f32.mrb[81].mxu1  ;;  %v13843_v32 = vpop.f32.mrb[189].mxu0 }
 0x7b1   : > { %v20382_v24 = vpop.f32.mrb[82].mxu1  ;;  %v21306_v20 = vpop.f32.mrb[190].mxu0 }
 0x7b2   : > { %v8764_v63 = vpop.f32.mrb[83].mxu1  ;;  %v13846_v31 = vpop.f32.mrb[191].mxu0 }
 0x7b4   : > { %20504 = vmatmul.mubr.bf16.gmra.mrb[188].mxu1 %v23642_v7 }
 0x7b5   : > { %20507 = vmatprep.mubr.bf16.mxu1 %v23640_v5 }
 0x7b7   : > { %v20385_v58 = vpop.f32.mrb[84].mxu1  ;;  %v21421_v18 = vpop.f32.mrb[192].mxu0 }
 0x7b8   : > { %v8777_v33 = vpop.f32.mrb[85].mxu1  ;;  %v24714_v0 = vpop.f32.mrb[193].mxu0 }
 0x7b9   : > { %26266 = vst [vmem:[#allocation24_spill] sm:$0xff] %v24714_v0  ;;  %v20386_v8 = vpop.f32.mrb[86].mxu1  ;;  %v21422_v26 = vpop.f32.mrb[194].mxu0 }
 0x7ba   : > { %v8780_v43 = vpop.f32.mrb[87].mxu1  ;;  %v24716_v53 = vpop.f32.mrb[195].mxu0 }
 0x7bb   : > { %26267 = vst [vmem:[#allocation103_spill] sm:$0xff] %v24716_v53 }
 0x7bc   : > { %20508 = vmatmul.mubr.bf16.gmra.mrb[192].mxu1 %v23654_v39 }
 0x7bd   : > { %20511 = vmatprep.mubr.bf16.mxu1 %v23652_v38 }
 0x7bf   : > { %v20389_v20 = vpop.f32.mrb[88].mxu1  ;;  %v21425_v24 = vpop.f32.mrb[196].mxu0 }
 0x7c0   : > { %v8793_v22 = vpop.f32.mrb[89].mxu1  ;;  %v24720_v32 = vpop.f32.mrb[197].mxu0 }
 0x7c1   : > { %26268 = vst [vmem:[#allocation104_spill] sm:$0xff] %v24720_v32  ;;  %v20390_v54 = vpop.f32.mrb[90].mxu1  ;;  %v21426_v63 = vpop.f32.mrb[198].mxu0 }
 0x7c2   : > { %v8796_v31 = vpop.f32.mrb[91].mxu1  ;;  %v24722_v58 = vpop.f32.mrb[199].mxu0 }
 0x7c3   : > { %26269 = vst [vmem:[#allocation105_spill] sm:$0xff] %v24722_v58 }
 0x7c4   : > { %20512 = vmatmul.mubr.bf16.gmra.mrb[196].mxu1 %v23666_v4 }
 0x7c5   : > { %20515 = vmatprep.mubr.bf16.mxu1 %v23664_v3 }
 0x7c7   : > { %v20393_v43 = vpop.f32.mrb[92].mxu1  ;;  %v21429_v26 = vpop.f32.mrb[200].mxu0 }
 0x7c8   : > { %v8809_v8 = vpop.f32.mrb[93].mxu1  ;;  %v24726_v18 = vpop.f32.mrb[201].mxu0 }
 0x7c9   : > { %26270 = vst [vmem:[#allocation106_spill] sm:$0xff] %v24726_v18  ;;  %v20394_v33 = vpop.f32.mrb[94].mxu1  ;;  %v21430_v20 = vpop.f32.mrb[202].mxu0 }
 0x7ca   : > { %v8812_v24 = vpop.f32.mrb[95].mxu1  ;;  %v24728_v22 = vpop.f32.mrb[203].mxu0 }
 0x7cb   : > { %26271 = vst [vmem:[#allocation107_spill] sm:$0xff] %v24728_v22 }
 0x7cc   : > { %20516 = vmatmul.mubr.bf16.gmra.mrb[200].mxu1 %v23678_v42 }
 0x7cd   : > { %20519 = vmatprep.mubr.bf16.mxu1 %v23676_v40 }
 0x7cf   : > { %v20397_v54 = vpop.f32.mrb[96].mxu1  ;;  %v21433_v63 = vpop.f32.mrb[204].mxu0 }
 0x7d0   : > { %v8825_v31 = vpop.f32.mrb[97].mxu1  ;;  %v14663_v58 = vpop.f32.mrb[205].mxu0 }
 0x7d1   : > { %v24733_v32 = vadd.f32 %v8825_v31, %v24556_v21  ;;  %v20398_v43 = vpop.f32.mrb[98].mxu1  ;;  %v21434_v26 = vpop.f32.mrb[206].mxu0 }
 0x7d2   : > { %v8828_v8 = vpop.f32.mrb[99].mxu1  ;;  %v14666_v18 = vpop.f32.mrb[207].mxu0 }
 0x7d3   : > { %v24736_v33 = vadd.f32 %v8828_v8, %v24559_v6 }
 0x7d4   : > { %20520 = vmatmul.mubr.bf16.gmra.mrb[204].mxu1 %v23690_v17 }
 0x7d5   : > { %20523 = vmatprep.mubr.bf16.mxu1 %v23688_v16 }
 0x7d7   : > { %v20401_v20 = vpop.f32.mrb[100].mxu1  ;;  %v21437_v24 = vpop.f32.mrb[208].mxu0 }
 0x7d8   : > { %v8841_v54 = vpop.f32.mrb[101].mxu1  ;;  %v14679_v63 = vpop.f32.mrb[209].mxu0 }
 0x7d9   : > { %v24741_v58 = vadd.f32 %v8841_v54, %v24566_v12  ;;  %v20402_v21 = vpop.f32.mrb[102].mxu1  ;;  %v21438_v31 = vpop.f32.mrb[210].mxu0 }
 0x7da   : > { %v8844_v43 = vpop.f32.mrb[103].mxu1  ;;  %v14682_v26 = vpop.f32.mrb[211].mxu0 }
 0x7db   : > { %v24744_v18 = vadd.f32 %v8844_v43, %v24569_v10 }
 0x7dc   : > { %20524 = vmatmul.mubr.bf16.gmra.mrb[208].mxu1 %v23702_v52 }
 0x7dd   : > { %20527 = vmatprep.mubr.bf16.mxu1 %v23700_v51 }
 0x7df   : > { %v20405_v6 = vpop.f32.mrb[104].mxu1  ;;  %v21441_v8 = vpop.f32.mrb[212].mxu0 }
 0x7e0   : > { %v8857_v20 = vpop.f32.mrb[105].mxu1  ;;  %v14695_v24 = vpop.f32.mrb[213].mxu0 }
 0x7e1   : > { %v24749_v63 = vadd.f32 %v8857_v20, %v24576_v57  ;;  %v20406_v12 = vpop.f32.mrb[106].mxu1  ;;  %v21442_v54 = vpop.f32.mrb[214].mxu0 }
 0x7e2   : > { %v8860_v21 = vpop.f32.mrb[107].mxu1  ;;  %v14698_v31 = vpop.f32.mrb[215].mxu0 }
 0x7e3   : > { %v24752_v26 = vadd.f32 %v8860_v21, %v24579_v35 }
 0x7e4   : > { %20528 = vmatmul.mubr.bf16.gmra.mrb[212].mxu1 %v23721_v30 }
 0x7e5   : > { %20531 = vmatprep.mubr.bf16.mxu1 %v23719_v29 }
 0x7e7   : > { %v20409_v10 = vpop.f32.mrb[108].mxu1  ;;  %v21445_v43 = vpop.f32.mrb[216].mxu0 }
 0x7e8   : > { %v8873_v6 = vpop.f32.mrb[109].mxu1  ;;  %v14711_v8 = vpop.f32.mrb[217].mxu0 }
 0x7e9   : > { %v20410_v22 = vpop.f32.mrb[110].mxu1  ;;  %v21446_v24 = vpop.f32.mrb[218].mxu0 }
 0x7ea   : > { %v8876_v53 = vpop.f32.mrb[111].mxu1  ;;  %v14714_v57 = vpop.f32.mrb[219].mxu0 }
 0x7ec   : > { %20532 = vmatmul.mubr.bf16.gmra.mrb[216].mxu1 %v23739_v56 }
 0x7ed   : > { %20535 = vmatprep.mubr.bf16.mxu1 %v23737_v25 }
 0x7ef   : > { %v20413_v20 = vpop.f32.mrb[112].mxu1  ;;  %v21449_v12 = vpop.f32.mrb[220].mxu0 }
 0x7f0   : > { %v8889_v35 = vpop.f32.mrb[113].mxu1  ;;  %v14727_v54 = vpop.f32.mrb[221].mxu0  ;;  %v22301_v20 = vld [vmem:[%s25957_s3 + $0x208] sm:$0xff]  }
 0x7f1   : > { %v20414_v21 = vpop.f32.mrb[114].mxu1  ;;  %v21450_v31 = vpop.f32.mrb[222].mxu0 }
 0x7f2   : > { %v8892_v0 = vpop.f32.mrb[115].mxu1  ;;  %v14730_v29 = vpop.f32.mrb[223].mxu0 }
 0x7f3   : > { %v22302_v29 = vld [vmem:[%s25957_s3 + $0x210] sm:$0xff]  }
 0x7f4   : > { %20536 = vmatmul.mubr.bf16.gmra.mrb[220].mxu1 %v23757_v23 }
 0x7f5   : > { %20555 = vmatprep.mubr.bf16.mxu1 %v26231_v27 }
 0x7f7   : > { %v20417_v22 = vpop.f32.mrb[116].mxu1  ;;  %v21453_v10 = vpop.f32.mrb[224].mxu0 }
 0x7f8   : > { %v8905_v53 = vpop.f32.mrb[117].mxu1  ;;  %v24760_v43 = vpop.f32.mrb[225].mxu0 }
 0x7f9   : > { %26272 = vst [vmem:[#allocation108_spill] sm:$0xff] %v24760_v43  ;;  %v20418_v6 = vpop.f32.mrb[118].mxu1  ;;  %v21454_v8 = vpop.f32.mrb[226].mxu0 }
 0x7fa   : > { %v8908_v24 = vpop.f32.mrb[119].mxu1  ;;  %v24762_v57 = vpop.f32.mrb[227].mxu0 }
 0x7fb   : > { %26273 = vst [vmem:[#allocation109_spill] sm:$0xff] %v24762_v57  ;;  %v26290_v57 = vld [vmem:[#allocation23_spill] sm:$0xff] }
 0x7fc   : > { %20556 = vmatmul.mubr.bf16.vlgmr.msra.gmra.mrb[224].mxu1 %v26233_v41  ;;  %v22303_v41 = vld [vmem:[%s25957_s3 + $0x218] sm:$0xff]  }
 0x7fd   : > { %20559 = vmatprep.mubr.bf16.mxu1 %v26237_v19  ;;  %20732 = vmatpush3.bf16.msra.mxu1 %v24659_v11  ;;  %v22304_v19 = vld [vmem:[%s25957_s3 + $0x220] sm:$0xff]  }
 0x7fe   : > { %20733 = vmatprep.subr.bf16.mxu1 %v22301_v20 }
 0x7ff   : > { %v20421_v27 = vpop.f32.mrb[120].mxu1  ;;  %v21457_v0 = vpop.f32.mrb[228].mxu0 }
 0x800   : > { %v8921_v12 = vpop.f32.mrb[121].mxu1  ;;  %v24773_v35 = vpop.f32.mrb[229].mxu0 }
 0x801   : > { %26274 = vst [vmem:[#allocation110_spill] sm:$0xff] %v24773_v35  ;;  %v20422_v54 = vpop.f32.mrb[122].mxu1  ;;  %v21458_v21 = vpop.f32.mrb[230].mxu0  ;;  %20734 = vmatpush3.bf16.msra.mxu1 %v22301_v20 }
 0x802   : > { %v8924_v31 = vpop.f32.mrb[123].mxu1  ;;  %v24775_v22 = vpop.f32.mrb[231].mxu0  ;;  %20735 = vmatprep.subr.bf16.mxu1 %v22302_v29 }
 0x803   : > { %26275 = vst [vmem:[#allocation111_spill] sm:$0xff] %v24775_v22 }
 0x804   : > { %20560 = vmatmul.mubr.bf16.gmra.mrb[228].mxu1 %v26239_v50  ;;  %v22305_v50 = vld [vmem:[%s25957_s3 + $0x228] sm:$0xff]  }
 0x805   : > { %20563 = vmatprep.mubr.bf16.mxu1 %v26243_v46  ;;  %20736 = vmatpush3.bf16.msra.mxu1 %v22302_v29  ;;  %v22306_v46 = vld [vmem:[%s25957_s3 + $0x230] sm:$0xff]  }
 0x806   : > { %20737 = vmatprep.subr.bf16.mxu1 %v22303_v41 }
 0x807   : > { %v20425_v11 = vpop.f32.mrb[124].mxu1  ;;  %v21461_v10 = vpop.f32.mrb[232].mxu0 }
 0x808   : > { %v8937_v53 = vpop.f32.mrb[125].mxu1  ;;  %v24785_v6 = vpop.f32.mrb[233].mxu0  ;;  %v26278_v10 = vld [vmem:[#allocation14_spill] sm:$0xff] }
 0x809   : > { %26276 = vst [vmem:[#allocation112_spill] sm:$0xff] %v24785_v6  ;;  %v20426_v8 = vpop.f32.mrb[126].mxu1  ;;  %v21462_v24 = vpop.f32.mrb[234].mxu0  ;;  %20738 = vmatpush3.bf16.msra.mxu1 %v22303_v41 }
 0x80a   : > { %v8940_v20 = vpop.f32.mrb[127].mxu1  ;;  %v24787_v27 = vpop.f32.mrb[235].mxu0  ;;  %20739 = vmatprep.subr.bf16.mxu1 %v22304_v19  ;;  %v26279_v8 = vld [vmem:[#allocation18_spill] sm:$0xff] }
 0x80b   : > { %26277 = vst [vmem:[#allocation113_spill] sm:$0xff] %v24787_v27 }
 0x80c   : > { %20564 = vmatmul.mubr.bf16.gmra.mrb[232].mxu1 %v26244_v28 }
 0x80d   : > { %20567 = vmatprep.mubr.bf16.mxu1 %v26249_v45  ;;  %20740 = vmatpush3.bf16.msra.mxu1 %v22304_v19  ;;  %v22307_v19 = vld [vmem:[%s25957_s3 + $0x238] sm:$0xff]  }
 0x80e   : > { %20741 = vmatprep.subr.bf16.mxu1 %v22305_v50 }
 0x80f   : > { %v20429_v29 = vpop.f32.mrb[128].mxu1  ;;  %v21465_v0 = vpop.f32.mrb[236].mxu0 }
 0x810   : > { %v8953_v12 = vpop.f32.mrb[129].mxu1  ;;  %v14791_v54 = vpop.f32.mrb[237].mxu0  ;;  %v26280_v29 = vld [vmem:[#allocation13_spill] sm:$0xff] }
 0x811   : > { %v24798_v21 = vadd.f32 %v8953_v12, %v24637_v48  ;;  %v20430_v31 = vpop.f32.mrb[130].mxu1  ;;  %v21466_v41 = vpop.f32.mrb[238].mxu0  ;;  %20742 = vmatpush3.bf16.msra.mxu1 %v22305_v50 }
 0x812   : > { %v8956_v11 = vpop.f32.mrb[131].mxu1  ;;  %v14794_v28 = vpop.f32.mrb[239].mxu0  ;;  %20743 = vmatprep.subr.bf16.mxu1 %v22306_v46 }
 0x813   : > { %v24804_v53 = vadd.f32 %v8956_v11, %v26278_v10  ;;  %v26281_v11 = vld [vmem:[#allocation8_spill] sm:$0xff]  ;;  %v26282_v10 = vld [vmem:[#allocation17_spill] sm:$0xff] }
 0x814   : > { %20568 = vmatmul.mubr.bf16.gmra.mrb[236].mxu1 %v26206_v37 }
 0x815   : > { %20571 = vmatprep.mubr.bf16.mxu1 %v26279_v8  ;;  %20744 = vmatpush3.bf16.msra.mxu1 %v22306_v46  ;;  %v24818_v46 = vld [vmem:[%s25957_s3 + $0x280] sm:$0xff]  }
 0x816   : > { %20745 = vmatprep.subr.bf16.mxu1 %v22307_v19 }
 0x817   : > { %v20433_v48 = vpop.f32.mrb[132].mxu1  ;;  %v21469_v24 = vpop.f32.mrb[240].mxu0 }
 0x818   : > { %v8969_v20 = vpop.f32.mrb[133].mxu1  ;;  %v14807_v50 = vpop.f32.mrb[241].mxu0 }
 0x819   : > { %v24809_v0 = vadd.f32 %v8969_v20, %v26280_v29  ;;  %v20434_v12 = vpop.f32.mrb[134].mxu1  ;;  %v21470_v54 = vpop.f32.mrb[242].mxu0  ;;  %20746 = vmatpush3.bf16.msra.mxu1 %v22307_v19 }
 0x81a   : > { %v8972_v31 = vpop.f32.mrb[135].mxu1  ;;  %v14810_v41 = vpop.f32.mrb[243].mxu0  ;;  %20923 = vmatprep.subr.bf16.mxu1 %v24818_v46 }
 0x81b   : > { %v24812_v28 = vadd.f32 %v8972_v31, %v26281_v11 }
 0x81c   : > { %20572 = vmatmul.mubr.bf16.gmra.mrb[240].mxu1 %v26282_v10 }
 0x81d   : > { %20575 = vmatprep.mubr.bf16.mxu1 %v26254_v13 }
 0x81f   : > { %v20437_v48 = vpop.f32.mrb[136].mxu1  ;;  %v21473_v24 = vpop.f32.mrb[244].mxu0 }
 0x820   : > { %v8985_v20 = vpop.f32.mrb[137].mxu1  ;;  %v14823_v19 = vpop.f32.mrb[245].mxu0 }
 0x821   : > { %v24823_v50 = vadd.f32 %v8985_v20, %v24665_v34  ;;  %v20438_v29 = vpop.f32.mrb[138].mxu1  ;;  %v21474_v12 = vpop.f32.mrb[246].mxu0 }
 0x822   : > { %v8988_v54 = vpop.f32.mrb[139].mxu1  ;;  %v14826_v31 = vpop.f32.mrb[247].mxu0 }
 0x823   : > { %v24826_v41 = vadd.f32 %v8988_v54, %v24668_v9 }
 0x824   : > { %20576 = vmatmul.mubr.bf16.gmra.mrb[244].mxu1 %v23568_v55 }
 0x825   : > { %20579 = vmatprep.mubr.bf16.mxu1 %v23582_v15 }
 0x827   : > { %v20441_v11 = vpop.f32.mrb[140].mxu1  ;;  %v21477_v27 = vpop.f32.mrb[248].mxu0 }
 0x828   : > { %v9001_v48 = vpop.f32.mrb[141].mxu1  ;;  %v14839_v24 = vpop.f32.mrb[249].mxu0 }
 0x829   : > { %v20442_v6 = vpop.f32.mrb[142].mxu1  ;;  %v21478_v19 = vpop.f32.mrb[250].mxu0 }
 0x82a   : > { %v9004_v22 = vpop.f32.mrb[143].mxu1  ;;  %v14842_v34 = vpop.f32.mrb[251].mxu0 }
 0x82c   : > { %20580 = vmatmul.mubr.bf16.gmra.mrb[248].mxu1 %v23580_v14 }
 0x82d   : > { %20583 = vmatprep.mubr.bf16.mxu1 %v26173_v2 }
 0x82f   : > { %v20461_v20 = vpop.f32.mrb[144].mxu1  ;;  %v21481_v29 = vpop.f32.mrb[252].mxu0 }
 0x830   : > { %v9235_v9 = vpop.f32.mrb[145].mxu1  ;;  %v14855_v12 = vpop.f32.mrb[253].mxu0 }
 0x831   : > { %v24833_v54 = vadd.f32 %v9235_v9, %v24675_v49  ;;  %v20462_v31 = vpop.f32.mrb[146].mxu1  ;;  %v21482_v11 = vpop.f32.mrb[254].mxu0 }
 0x832   : > { %v9238_v27 = vpop.f32.mrb[147].mxu1  ;;  %v14858_v48 = vpop.f32.mrb[255].mxu0 }
 0x833   : > { %v24836_v6 = vadd.f32 %v9238_v27, %v24678_v61 }
 0x834   : > { %20584 = vmatmul.mubr.bf16.gmra.mrb[252].mxu1 %v23592_v36 }
 0x835   : > { %20587 = vmatprep.mubr.bf16.mxu1 %v23606_v60 }
 0x837   : > { %v20465_v22 = vpop.f32.mrb[148].mxu1  ;;  %v21485_v24 = vpop.f32.mrb[0].mxu0 }
 0x838   : > { %v9251_v19 = vpop.f32.mrb[149].mxu1  ;;  %v24840_v34 = vpop.f32.mrb[1].mxu0  ;;  %v26286_v22 = vld [vmem:[#allocation19_spill] sm:$0xff] }
 0x839   : > { %26283 = vst [vmem:[#allocation14_spill] sm:$0xff] %v24840_v34  ;;  %v24843_v20 = vadd.f32 %v9251_v19, %v24685_v62  ;;  %v20466_v49 = vpop.f32.mrb[150].mxu1  ;;  %v21486_v29 = vpop.f32.mrb[2].mxu0 }
 0x83a   : > { %v9254_v9 = vpop.f32.mrb[151].mxu1  ;;  %v24845_v12 = vpop.f32.mrb[3].mxu0 }
 0x83b   : > { %26284 = vst [vmem:[#allocation18_spill] sm:$0xff] %v24845_v12  ;;  %v24848_v61 = vadd.f32 %v9254_v9, %v24690_v47  ;;  %v26288_v12 = vld [vmem:[#allocation101_spill] sm:$0xff] }
 0x83c   : > { %20588 = vmatmul.mubr.bf16.gmra.mrb[0].mxu1 %v23604_v59  ;;  %v26289_v9 = vld [vmem:[#allocation21_spill] sm:$0xff] }
 0x83d   : > { %20591 = vmatprep.mubr.bf16.mxu1 %v26262_v44 }
 0x83f   : > { %v20469_v31 = vpop.f32.mrb[152].mxu1  ;;  %v21489_v11 = vpop.f32.mrb[4].mxu0 }
 0x840   : > { %v9267_v27 = vpop.f32.mrb[153].mxu1  ;;  %v24852_v48 = vpop.f32.mrb[5].mxu0 }
 0x841   : > { %26285 = vst [vmem:[#allocation13_spill] sm:$0xff] %v24852_v48  ;;  %v24855_v62 = vadd.f32 %v9267_v27, %v26286_v22  ;;  %v20470_v24 = vpop.f32.mrb[154].mxu1  ;;  %v21490_v19 = vpop.f32.mrb[6].mxu0 }
 0x842   : > { %v9270_v49 = vpop.f32.mrb[155].mxu1  ;;  %v24857_v29 = vpop.f32.mrb[7].mxu0 }
 0x843   : > { %26287 = vst [vmem:[#allocation8_spill] sm:$0xff] %v24857_v29  ;;  %v24860_v47 = vadd.f32 %v9270_v49, %v26288_v12 }
 0x844   : > { %20592 = vmatmul.mubr.bf16.gmra.mrb[4].mxu1 %v26289_v9 }
 0x845   : > { %20595 = vmatprep.mubr.bf16.mxu1 %v26265_v1 }
 0x847   : > { %v20473_v31 = vpop.f32.mrb[156].mxu1  ;;  %v21493_v11 = vpop.f32.mrb[8].mxu0 }
 0x848   : > { %v9283_v34 = vpop.f32.mrb[157].mxu1 }
 0x849   : > { %v20474_v35 = vpop.f32.mrb[158].mxu1 }
 0x84a   : > { %v9286_v48 = vpop.f32.mrb[159].mxu1 }
 0x84c   : > { %20596 = vmatmul.mubr.bf16.gmra.mrb[8].mxu1 %v26290_v57 }
 0x84d   : > { %20599 = vmatprep.mubr.bf16.mxu1 %v23642_v7 }
 0x84f   : > { %v20477_v27 = vpop.f32.mrb[160].mxu1 }
 0x850   : > { %v9299_v22 = vpop.f32.mrb[161].mxu1 }
 0x851   : > { %v20478_v24 = vpop.f32.mrb[162].mxu1 }
 0x852   : > { %v9302_v19 = vpop.f32.mrb[163].mxu1 }
 0x854   : > { %20600 = vmatmul.mubr.bf16.gmra.mrb[12].mxu1 %v23640_v5 }
 0x855   : > { %20603 = vmatprep.mubr.bf16.mxu1 %v23654_v39 }
 0x857   : > { %v20481_v12 = vpop.f32.mrb[164].mxu1 }
 0x858   : > { %v9315_v49 = vpop.f32.mrb[165].mxu1 }
 0x859   : > { %v20482_v29 = vpop.f32.mrb[166].mxu1 }
 0x85a   : > { %v9318_v31 = vpop.f32.mrb[167].mxu1 }
 0x85c   : > { %20604 = vmatmul.mubr.bf16.gmra.mrb[16].mxu1 %v23652_v38 }
 0x85d   : > { %20607 = vmatprep.mubr.bf16.mxu1 %v23666_v4 }
 0x85f   : > { %v20485_v35 = vpop.f32.mrb[168].mxu1 }
 0x860   : > { %v9331_v34 = vpop.f32.mrb[169].mxu1 }
 0x861   : > { %v20486_v48 = vpop.f32.mrb[170].mxu1 }
 0x862   : > { %v9334_v11 = vpop.f32.mrb[171].mxu1 }
 0x864   : > { %20608 = vmatmul.mubr.bf16.gmra.mrb[20].mxu1 %v23664_v3 }
 0x865   : > { %20611 = vmatprep.mubr.bf16.mxu1 %v23678_v42 }
 0x867   : > { %v20489_v27 = vpop.f32.mrb[172].mxu1 }
 0x868   : > { %v9347_v22 = vpop.f32.mrb[173].mxu1 }
 0x869   : > { %v20490_v24 = vpop.f32.mrb[174].mxu1 }
 0x86a   : > { %v9350_v19 = vpop.f32.mrb[175].mxu1 }
 0x86c   : > { %20612 = vmatmul.mubr.bf16.gmra.mrb[24].mxu1 %v23676_v40 }
 0x86d   : > { %20615 = vmatprep.mubr.bf16.mxu1 %v23690_v17 }
 0x86f   : > { %v20493_v29 = vpop.f32.mrb[176].mxu1 }
 0x870   : > { %v9363_v12 = vpop.f32.mrb[177].mxu1 }
 0x871   : > { %v24875_v49 = vadd.f32 %v9363_v12, %v24733_v32  ;;  %v20494_v31 = vpop.f32.mrb[178].mxu1 }
 0x872   : > { %v9366_v35 = vpop.f32.mrb[179].mxu1 }
 0x873   : > { %v24878_v34 = vadd.f32 %v9366_v35, %v24736_v33 }
 0x874   : > { %20616 = vmatmul.mubr.bf16.gmra.mrb[28].mxu1 %v23688_v16 }
 0x875   : > { %20619 = vmatprep.mubr.bf16.mxu1 %v23702_v52 }
 0x877   : > { %v20497_v48 = vpop.f32.mrb[180].mxu1 }
 0x878   : > { %v9379_v11 = vpop.f32.mrb[181].mxu1 }
 0x879   : > { %v24883_v27 = vadd.f32 %v9379_v11, %v24741_v58  ;;  %v20498_v22 = vpop.f32.mrb[182].mxu1  ;;  %v26292_v58 = vld [vmem:[#allocation25_spill] sm:$0xff] }
 0x87a   : > { %v9382_v24 = vpop.f32.mrb[183].mxu1 }
 0x87b   : > { %v24886_v19 = vadd.f32 %v9382_v24, %v24744_v18 }
 0x87c   : > { %20620 = vmatmul.mubr.bf16.gmra.mrb[32].mxu1 %v23700_v51 }
 0x87d   : > { %20623 = vmatprep.mubr.bf16.mxu1 %v23721_v30 }
 0x87f   : > { %v20501_v32 = vpop.f32.mrb[184].mxu1 }
 0x880   : > { %v9395_v33 = vpop.f32.mrb[185].mxu1 }
 0x881   : > { %v24891_v29 = vadd.f32 %v9395_v33, %v24749_v63  ;;  %v20502_v12 = vpop.f32.mrb[186].mxu1 }
 0x882   : > { %v9398_v31 = vpop.f32.mrb[187].mxu1  ;;  %v26293_v12 = vld [vmem:[#allocation26_spill] sm:$0xff] }
 0x883   : > { %v24894_v35 = vadd.f32 %v9398_v31, %v24752_v26 }
 0x884   : > { %20624 = vmatmul.mubr.bf16.gmra.mrb[36].mxu1 %v26292_v58 }
 0x885   : > { %26291 = vst [vmem:[#allocation17_spill] sm:$0xff] %v24894_v35  ;;  %20627 = vmatprep.mubr.bf16.mxu1 %v23739_v56 }
 0x887   : > { %v20505_v18 = vpop.f32.mrb[188].mxu1 }
 0x888   : > { %v9411_v48 = vpop.f32.mrb[189].mxu1  ;;  %v22309_v18 = vld [vmem:[%s25957_s3 + $0x288] sm:$0xff]  }
 0x889   : > { %v20506_v11 = vpop.f32.mrb[190].mxu1  ;;  %v22310_v48 = vld [vmem:[%s25957_s3 + $0x290] sm:$0xff]  }
 0x88a   : > { %v9414_v22 = vpop.f32.mrb[191].mxu1 }
 0x88c   : > { %20628 = vmatmul.mubr.bf16.gmra.mrb[40].mxu1 %v23737_v25 }
 0x88d   : > { %20631 = vmatprep.mubr.bf16.mxu1 %v23757_v23 }
 0x88f   : > { %v20509_v24 = vpop.f32.mrb[192].mxu1 }
 0x890   : > { %v9427_v63 = vpop.f32.mrb[193].mxu1 }
 0x891   : > { %v20510_v32 = vpop.f32.mrb[194].mxu1 }
 0x892   : > { %v9430_v33 = vpop.f32.mrb[195].mxu1 }
 0x893   : > { %v22313_v33 = vld [vmem:[%s25957_s3 + $0x2a8] sm:$0xff]  }
 0x894   : > { %20632 = vmatmul.mubr.bf16.gmra.mrb[44].mxu1 %v26293_v12 }
 0x895   : > { %20747 = vmatprep.mubr.bf16.mxu1 %v26249_v45 }
 0x897   : > { %v20513_v26 = vpop.f32.mrb[196].mxu1 }
 0x898   : > { %v9443_v31 = vpop.f32.mrb[197].mxu1  ;;  %v22314_v26 = vld [vmem:[%s25957_s3 + $0x2b0] sm:$0xff]  }
 0x899   : > { %v20514_v43 = vpop.f32.mrb[198].mxu1 }
 0x89a   : > { %v9446_v35 = vpop.f32.mrb[199].mxu1 }
 0x89b   : > { %v22311_v35 = vld [vmem:[%s25957_s3 + $0x298] sm:$0xff]  }
 0x89c   : > { %20748 = vmatmul.mubr.bf16.vlgmr.msra.gmra.mrb[48].mxu1 %v26206_v37  ;;  %v22312_v37 = vld [vmem:[%s25957_s3 + $0x2a0] sm:$0xff]  }
 0x89d   : > { %20751 = vmatprep.mubr.bf16.mxu1 %v26279_v8  ;;  %20924 = vmatpush3.bf16.msra.mxu1 %v24818_v46 }
 0x89e   : > { %20925 = vmatprep.subr.bf16.mxu1 %v22309_v18 }
 0x89f   : > { %v20517_v45 = vpop.f32.mrb[200].mxu1 }
 0x8a0   : > { %v9459_v11 = vpop.f32.mrb[201].mxu1 }
 0x8a1   : > { %v20518_v22 = vpop.f32.mrb[202].mxu1  ;;  %20926 = vmatpush3.bf16.msra.mxu1 %v22309_v18 }
 0x8a2   : > { %v9462_v43 = vpop.f32.mrb[203].mxu1  ;;  %20927 = vmatprep.subr.bf16.mxu1 %v22310_v48  ;;  %v22315_v22 = vld [vmem:[%s25957_s3 + $0x2b8] sm:$0xff]  }
 0x8a4   : > { %20752 = vmatmul.mubr.bf16.gmra.mrb[52].mxu1 %v26282_v10 }
 0x8a5   : > { %20755 = vmatprep.mubr.bf16.mxu1 %v26254_v13  ;;  %20928 = vmatpush3.bf16.msra.mxu1 %v22310_v48 }
 0x8a6   : > { %20929 = vmatprep.subr.bf16.mxu1 %v22311_v35 }
 0x8a7   : > { %v20521_v46 = vpop.f32.mrb[204].mxu1 }
 0x8a8   : > { %v9475_v24 = vpop.f32.mrb[205].mxu1 }
 0x8a9   : > { %v20522_v63 = vpop.f32.mrb[206].mxu1  ;;  %20930 = vmatpush3.bf16.msra.mxu1 %v22311_v35 }
 0x8aa   : > { %v9478_v32 = vpop.f32.mrb[207].mxu1  ;;  %20931 = vmatprep.subr.bf16.mxu1 %v22312_v37 }
 0x8ac   : > { %20756 = vmatmul.mubr.bf16.gmra.mrb[56].mxu1 %v23568_v55 }
 0x8ad   : > { %20759 = vmatprep.mubr.bf16.mxu1 %v23582_v15  ;;  %20932 = vmatpush3.bf16.msra.mxu1 %v22312_v37 }
 0x8ae   : > { %20933 = vmatprep.subr.bf16.mxu1 %v22313_v33 }
 0x8af   : > { %v20525_v31 = vpop.f32.mrb[208].mxu1 }
 0x8b0   : > { %v9491_v18 = vpop.f32.mrb[209].mxu1 }
 0x8b1   : > { %v24928_v48 = vadd.f32 %v9491_v18, %v24798_v21  ;;  %v20526_v45 = vpop.f32.mrb[210].mxu1  ;;  %20934 = vmatpush3.bf16.msra.mxu1 %v22313_v33 }
 0x8b2   : > { %v9494_v11 = vpop.f32.mrb[211].mxu1  ;;  %20935 = vmatprep.subr.bf16.mxu1 %v22314_v26 }
 0x8b3   : > { %v24934_v43 = vadd.f32 %v9494_v11, %v24804_v53  ;;  %v24948_v53 = vld [vmem:[%s25957_s3 + $0x300] sm:$0xff]  }
 0x8b4   : > { %20760 = vmatmul.mubr.bf16.gmra.mrb[60].mxu1 %v23580_v14 }
 0x8b5   : > { %20763 = vmatprep.mubr.bf16.mxu1 %v26173_v2  ;;  %20936 = vmatpush3.bf16.msra.mxu1 %v22314_v26 }
 0x8b6   : > { %20937 = vmatprep.subr.bf16.mxu1 %v22315_v22 }
 0x8b7   : > { %v20529_v35 = vpop.f32.mrb[212].mxu1 }
 0x8b8   : > { %v9507_v21 = vpop.f32.mrb[213].mxu1 }
 0x8b9   : > { %v24939_v37 = vadd.f32 %v9507_v21, %v24809_v0  ;;  %v20530_v46 = vpop.f32.mrb[214].mxu1  ;;  %20938 = vmatpush3.bf16.msra.mxu1 %v22315_v22 }
 0x8ba   : > { %v9510_v24 = vpop.f32.mrb[215].mxu1  ;;  %21115 = vmatprep.subr.bf16.mxu1 %v24948_v53 }
 0x8bb   : > { %v24942_v63 = vadd.f32 %v9510_v24, %v24812_v28 }
 0x8bc   : > { %20764 = vmatmul.mubr.bf16.gmra.mrb[64].mxu1 %v23592_v36 }
 0x8bd   : > { %20767 = vmatprep.mubr.bf16.mxu1 %v23606_v60 }
 0x8bf   : > { %v20533_v32 = vpop.f32.mrb[216].mxu1 }
 0x8c0   : > { %v9523_v0 = vpop.f32.mrb[217].mxu1  ;;  %v26294_v32 = vld [vmem:[#allocation46_spill] sm:$0xff] }
 0x8c1   : > { %v24953_v33 = vadd.f32 %v9523_v0, %v24823_v50  ;;  %v20534_v26 = vpop.f32.mrb[218].mxu1 }
 0x8c2   : > { %v9526_v31 = vpop.f32.mrb[219].mxu1  ;;  %v26295_v26 = vld [vmem:[#allocation47_spill] sm:$0xff] }
 0x8c3   : > { %v24956_v28 = vadd.f32 %v9526_v31, %v24826_v41 }
 0x8c4   : > { %20768 = vmatmul.mubr.bf16.gmra.mrb[68].mxu1 %v23604_v59 }
 0x8c5   : > { %20771 = vmatprep.mubr.bf16.mxu1 %v26262_v44 }
 0x8c7   : > { %v20537_v18 = vpop.f32.mrb[220].mxu1 }
 0x8c8   : > { %v9539_v45 = vpop.f32.mrb[221].mxu1 }
 0x8c9   : > { %v20538_v11 = vpop.f32.mrb[222].mxu1 }
 0x8ca   : > { %v9542_v22 = vpop.f32.mrb[223].mxu1 }
 0x8cc   : > { %20772 = vmatmul.mubr.bf16.gmra.mrb[72].mxu1 %v26289_v9 }
 0x8cd   : > { %20775 = vmatprep.mubr.bf16.mxu1 %v26265_v1 }
 0x8cf   : > { %v20557_v35 = vpop.f32.mrb[224].mxu1 }
 0x8d0   : > { %v9773_v50 = vpop.f32.mrb[225].mxu1 }
 0x8d1   : > { %v10092_v21 = vadd.f32 %v9773_v50, %v24833_v54  ;;  %v20558_v46 = vpop.f32.mrb[226].mxu1  ;;  %v26296_v50 = vld [vmem:[#allocation48_spill] sm:$0xff] }
 0x8d2   : > { %v9776_v24 = vpop.f32.mrb[227].mxu1 }
 0x8d3   : > { %v10093_v41 = vadd.f32 %v9776_v24, %v24836_v6  ;;  %v24965_v0 = vadd.f32 %v26294_v32, %v10092_v21  ;;  %v26297_v21 = vld [vmem:[#allocation49_spill] sm:$0xff] }
 0x8d4   : > { %20776 = vmatmul.mubr.bf16.gmra.mrb[76].mxu1 %v26290_v57 }
 0x8d5   : > { %20779 = vmatprep.mubr.bf16.mxu1 %v23642_v7  ;;  %v24970_v31 = vadd.f32 %v26295_v26, %v10093_v41 }
 0x8d7   : > { %v20561_v18 = vpop.f32.mrb[228].mxu1 }
 0x8d8   : > { %v9789_v45 = vpop.f32.mrb[229].mxu1 }
 0x8d9   : > { %v10096_v11 = vadd.f32 %v9789_v45, %v24843_v20  ;;  %v20562_v22 = vpop.f32.mrb[230].mxu1  ;;  %v26298_v45 = vld [vmem:[#allocation50_spill] sm:$0xff] }
 0x8da   : > { %v9792_v54 = vpop.f32.mrb[231].mxu1 }
 0x8db   : > { %v10097_v35 = vadd.f32 %v9792_v54, %v24848_v61  ;;  %v24975_v6 = vadd.f32 %v26296_v50, %v10096_v11  ;;  %v26299_v11 = vld [vmem:[#allocation51_spill] sm:$0xff] }
 0x8dc   : > { %20780 = vmatmul.mubr.bf16.gmra.mrb[80].mxu1 %v23640_v5 }
 0x8dd   : > { %20783 = vmatprep.mubr.bf16.mxu1 %v23654_v39  ;;  %v24980_v46 = vadd.f32 %v26297_v21, %v10097_v35 }
 0x8df   : > { %v20565_v24 = vpop.f32.mrb[232].mxu1 }
 0x8e0   : > { %v9805_v41 = vpop.f32.mrb[233].mxu1 }
 0x8e1   : > { %v10100_v32 = vadd.f32 %v9805_v41, %v24855_v62  ;;  %v20566_v26 = vpop.f32.mrb[234].mxu1 }
 0x8e2   : > { %v9808_v20 = vpop.f32.mrb[235].mxu1 }
 0x8e3   : > { %v10101_v18 = vadd.f32 %v9808_v20, %v24860_v47  ;;  %v24985_v61 = vadd.f32 %v26298_v45, %v10100_v32 }
 0x8e4   : > { %20784 = vmatmul.mubr.bf16.gmra.mrb[84].mxu1 %v23652_v38 }
 0x8e5   : > { %20787 = vmatprep.mubr.bf16.mxu1 %v23666_v4  ;;  %v24990_v22 = vadd.f32 %v26299_v11, %v10101_v18 }
 0x8e7   : > { %v20569_v54 = vpop.f32.mrb[236].mxu1 }
 0x8e8   : > { %v9821_v35 = vpop.f32.mrb[237].mxu1 }
 0x8e9   : > { %v20570_v50 = vpop.f32.mrb[238].mxu1 }
 0x8ea   : > { %v9824_v21 = vpop.f32.mrb[239].mxu1 }
 0x8ec   : > { %20788 = vmatmul.mubr.bf16.gmra.mrb[88].mxu1 %v23664_v3 }
 0x8ed   : > { %20791 = vmatprep.mubr.bf16.mxu1 %v23678_v42 }
 0x8ef   : > { %v20573_v62 = vpop.f32.mrb[240].mxu1 }
 0x8f0   : > { %v9837_v47 = vpop.f32.mrb[241].mxu1 }
 0x8f1   : > { %v20574_v24 = vpop.f32.mrb[242].mxu1 }
 0x8f2   : > { %v9840_v41 = vpop.f32.mrb[243].mxu1 }
 0x8f4   : > { %20792 = vmatmul.mubr.bf16.gmra.mrb[92].mxu1 %v23676_v40 }
 0x8f5   : > { %20795 = vmatprep.mubr.bf16.mxu1 %v23690_v17 }
 0x8f7   : > { %v20577_v32 = vpop.f32.mrb[244].mxu1 }
 0x8f8   : > { %v9853_v26 = vpop.f32.mrb[245].mxu1 }
 0x8f9   : > { %v20578_v20 = vpop.f32.mrb[246].mxu1 }
 0x8fa   : > { %v9856_v18 = vpop.f32.mrb[247].mxu1 }
 0x8fc   : > { %20796 = vmatmul.mubr.bf16.gmra.mrb[96].mxu1 %v23688_v16 }
 0x8fd   : > { %20799 = vmatprep.mubr.bf16.mxu1 %v23702_v52 }
 0x8ff   : > { %v20581_v45 = vpop.f32.mrb[248].mxu1 }
 0x900   : > { %v9869_v11 = vpop.f32.mrb[249].mxu1  ;;  %v26300_v45 = vld [vmem:[#allocation53_spill] sm:$0xff] }
 0x901   : > { %v20582_v54 = vpop.f32.mrb[250].mxu1 }
 0x902   : > { %v9872_v35 = vpop.f32.mrb[251].mxu1  ;;  %v26301_v54 = vld [vmem:[#allocation54_spill] sm:$0xff] }
 0x904   : > { %20800 = vmatmul.mubr.bf16.gmra.mrb[100].mxu1 %v23700_v51 }
 0x905   : > { %20803 = vmatprep.mubr.bf16.mxu1 %v23721_v30 }
 0x907   : > { %v20585_v50 = vpop.f32.mrb[252].mxu1 }
 0x908   : > { %v9885_v21 = vpop.f32.mrb[253].mxu1 }
 0x909   : > { %v20586_v62 = vpop.f32.mrb[254].mxu1 }
 0x90a   : > { %v9888_v47 = vpop.f32.mrb[255].mxu1 }
 0x90c   : > { %20804 = vmatmul.mubr.bf16.gmra.mrb[104].mxu1 %v26292_v58 }
 0x90d   : > { %20807 = vmatprep.mubr.bf16.mxu1 %v23739_v56 }
 0x90f   : > { %v20589_v24 = vpop.f32.mrb[0].mxu1 }
 0x910   : > { %v9901_v41 = vpop.f32.mrb[1].mxu1 }
 0x911   : > { %v10124_v32 = vadd.f32 %v9901_v41, %v24875_v49  ;;  %v20590_v26 = vpop.f32.mrb[2].mxu1  ;;  %v26303_v41 = vld [vmem:[#allocation55_spill] sm:$0xff] }
 0x912   : > { %v9904_v20 = vpop.f32.mrb[3].mxu1  ;;  %v26306_v26 = vld [vmem:[#allocation56_spill] sm:$0xff] }
 0x913   : > { %v10125_v18 = vadd.f32 %v9904_v20, %v24878_v34  ;;  %v25005_v11 = vadd.f32 %v26300_v45, %v10124_v32  ;;  %v26305_v32 = vld [vmem:[#allocation28_spill] sm:$0xff] }
 0x914   : > { %20808 = vmatmul.mubr.bf16.gmra.mrb[108].mxu1 %v23737_v25 }
 0x915   : > { %20811 = vmatprep.mubr.bf16.mxu1 %v23757_v23  ;;  %v25010_v35 = vadd.f32 %v26301_v54, %v10125_v18 }
 0x917   : > { %26302 = vst [vmem:[#allocation19_spill] sm:$0xff] %v25010_v35  ;;  %v20593_v50 = vpop.f32.mrb[4].mxu1  ;;  %v26309_v35 = vld [vmem:[#allocation6_spill] sm:$0xff] }
 0x918   : > { %v9917_v21 = vpop.f32.mrb[5].mxu1 }
 0x919   : > { %v10128_v62 = vadd.f32 %v9917_v21, %v24883_v27  ;;  %v20594_v47 = vpop.f32.mrb[6].mxu1  ;;  %v26308_v21 = vld [vmem:[#allocation17_spill] sm:$0xff] }
 0x91a   : > { %v9920_v49 = vpop.f32.mrb[7].mxu1 }
 0x91b   : > { %v10129_v24 = vadd.f32 %v9920_v49, %v24886_v19  ;;  %v25015_v34 = vadd.f32 %v26303_v41, %v10128_v62  ;;  %v26311_v62 = vld [vmem:[#allocation27_spill] sm:$0xff]  ;;  %v26312_v49 = vld [vmem:[#allocation30_spill] sm:$0xff]  ;;  %v26313_v41 = vld [vmem:[#allocation57_spill] sm:$0xff] }
 0x91c   : > { %20812 = vmatmul.mubr.bf16.gmra.mrb[112].mxu1 %v26293_v12 }
 0x91d   : > { %26304 = vst [vmem:[#allocation101_spill] sm:$0xff] %v25015_v34  ;;  %20815 = vmatprep.mubr.bf16.mxu1 %v26305_v32  ;;  %v25020_v20 = vadd.f32 %v26306_v26, %v10129_v24  ;;  %v26314_v32 = vld [vmem:[#allocation29_spill] sm:$0xff] }
 0x91f   : > { %26307 = vst [vmem:[#allocation21_spill] sm:$0xff] %v25020_v20  ;;  %v20597_v18 = vpop.f32.mrb[8].mxu1 }
 0x920   : > { %v9933_v45 = vpop.f32.mrb[9].mxu1 }
 0x921   : > { %v10132_v54 = vadd.f32 %v9933_v45, %v24891_v29  ;;  %v20598_v50 = vpop.f32.mrb[10].mxu1  ;;  %v26315_v29 = vld [vmem:[#allocation32_spill] sm:$0xff] }
 0x922   : > { %v9936_v27 = vpop.f32.mrb[11].mxu1 }
 0x923   : > { %v10133_v47 = vadd.f32 %v9936_v27, %v26308_v21  ;;  %v25025_v19 = vadd.f32 %v26309_v35, %v10132_v54  ;;  %v26316_v54 = vld [vmem:[#allocation31_spill] sm:$0xff] }
 0x924   : > { %20816 = vmatmul.mubr.bf16.gmra.mrb[116].mxu1 %v26311_v62 }
 0x925   : > { %26310 = vst [vmem:[#allocation23_spill] sm:$0xff] %v25025_v19  ;;  %20819 = vmatprep.mubr.bf16.mxu1 %v26312_v49  ;;  %v25030_v34 = vadd.f32 %v26313_v41, %v10133_v47 }
 0x927   : > { %v20601_v24 = vpop.f32.mrb[12].mxu1 }
 0x928   : > { %v9949_v26 = vpop.f32.mrb[13].mxu1  ;;  %v22318_v24 = vld [vmem:[%s25957_s3 + $0x310] sm:$0xff]  }
 0x929   : > { %v20602_v18 = vpop.f32.mrb[14].mxu1 }
 0x92a   : > { %v9952_v20 = vpop.f32.mrb[15].mxu1 }
 0x92b   : > { %v22317_v20 = vld [vmem:[%s25957_s3 + $0x308] sm:$0xff]  }
 0x92c   : > { %20820 = vmatmul.mubr.bf16.gmra.mrb[120].mxu1 %v26314_v32 }
 0x92d   : > { %20823 = vmatprep.mubr.bf16.mxu1 %v26315_v29 }
 0x92f   : > { %v20605_v45 = vpop.f32.mrb[16].mxu1 }
 0x930   : > { %v9965_v50 = vpop.f32.mrb[17].mxu1  ;;  %v22319_v45 = vld [vmem:[%s25957_s3 + $0x318] sm:$0xff]  }
 0x931   : > { %v20606_v27 = vpop.f32.mrb[18].mxu1 }
 0x932   : > { %v9968_v35 = vpop.f32.mrb[19].mxu1 }
 0x933   : > { %v22321_v35 = vld [vmem:[%s25957_s3 + $0x328] sm:$0xff]  }
 0x934   : > { %20824 = vmatmul.mubr.bf16.gmra.mrb[124].mxu1 %v26316_v54 }
 0x935   : > { %20939 = vmatprep.mubr.bf16.mxu1 %v26279_v8 }
 0x937   : > { %v20609_v21 = vpop.f32.mrb[20].mxu1 }
 0x938   : > { %v9981_v19 = vpop.f32.mrb[21].mxu1 }
 0x939   : > { %v20610_v47 = vpop.f32.mrb[22].mxu1 }
 0x93a   : > { %v9984_v41 = vpop.f32.mrb[23].mxu1 }
 0x93c   : > { %20940 = vmatmul.mubr.bf16.vlgmr.msra.gmra.mrb[128].mxu1 %v26282_v10 }
 0x93d   : > { %20943 = vmatprep.mubr.bf16.mxu1 %v26254_v13  ;;  %21116 = vmatpush3.bf16.msra.mxu1 %v24948_v53  ;;  %v22320_v13 = vld [vmem:[%s25957_s3 + $0x320] sm:$0xff]  }
 0x93e   : > { %21117 = vmatprep.subr.bf16.mxu1 %v22317_v20 }
 0x93f   : > { %v20613_v8 = vpop.f32.mrb[24].mxu1 }
 0x940   : > { %v9997_v26 = vpop.f32.mrb[25].mxu1  ;;  %v26317_v8 = vld [vmem:[#allocation33_spill] sm:$0xff] }
 0x941   : > { %v20614_v19 = vpop.f32.mrb[26].mxu1  ;;  %21118 = vmatpush3.bf16.msra.mxu1 %v22317_v20 }
 0x942   : > { %v10000_v18 = vpop.f32.mrb[27].mxu1  ;;  %21119 = vmatprep.subr.bf16.mxu1 %v22318_v24  ;;  %v26318_v19 = vld [vmem:[#allocation36_spill] sm:$0xff] }
 0x944   : > { %20944 = vmatmul.mubr.bf16.gmra.mrb[132].mxu1 %v23568_v55  ;;  %v22322_v55 = vld [vmem:[%s25957_s3 + $0x330] sm:$0xff]  }
 0x945   : > { %20947 = vmatprep.mubr.bf16.mxu1 %v23582_v15  ;;  %21120 = vmatpush3.bf16.msra.mxu1 %v22318_v24 }
 0x946   : > { %21121 = vmatprep.subr.bf16.mxu1 %v22319_v45 }
 0x947   : > { %v20617_v10 = vpop.f32.mrb[28].mxu1 }
 0x948   : > { %v10013_v53 = vpop.f32.mrb[29].mxu1 }
 0x949   : > { %v20618_v50 = vpop.f32.mrb[30].mxu1  ;;  %21122 = vmatpush3.bf16.msra.mxu1 %v22319_v45 }
 0x94a   : > { %v10016_v27 = vpop.f32.mrb[31].mxu1  ;;  %21123 = vmatprep.subr.bf16.mxu1 %v22320_v13  ;;  %v26319_v50 = vld [vmem:[#allocation37_spill] sm:$0xff] }
 0x94c   : > { %20948 = vmatmul.mubr.bf16.gmra.mrb[136].mxu1 %v23580_v14  ;;  %v22323_v14 = vld [vmem:[%s25957_s3 + $0x338] sm:$0xff]  }
 0x94d   : > { %20951 = vmatprep.mubr.bf16.mxu1 %v26173_v2  ;;  %21124 = vmatpush3.bf16.msra.mxu1 %v22320_v13 }
 0x94e   : > { %21125 = vmatprep.subr.bf16.mxu1 %v22321_v35 }
 0x94f   : > { %v20621_v15 = vpop.f32.mrb[32].mxu1 }
 0x950   : > { %v10029_v21 = vpop.f32.mrb[33].mxu1 }
 0x951   : > { %v10156_v47 = vadd.f32 %v10029_v21, %v24928_v48  ;;  %v20622_v41 = vpop.f32.mrb[34].mxu1  ;;  %21126 = vmatpush3.bf16.msra.mxu1 %v22321_v35  ;;  %v25083_v35 = vld [vmem:[%s25957_s3 + $0x380] sm:$0xff]  }
 0x952   : > { %v10032_v20 = vpop.f32.mrb[35].mxu1  ;;  %21127 = vmatprep.subr.bf16.mxu1 %v22322_v55 }
 0x953   : > { %v10157_v24 = vadd.f32 %v10032_v20, %v24934_v43  ;;  %v25067_v26 = vadd.f32 %v26317_v8, %v10156_v47  ;;  %v26322_v8 = vld [vmem:[#allocation63_spill] sm:$0xff] }
 0x954   : > { %20952 = vmatmul.mubr.bf16.gmra.mrb[140].mxu1 %v23592_v36 }
 0x955   : > { %20955 = vmatprep.mubr.bf16.mxu1 %v23606_v60  ;;  %21128 = vmatpush3.bf16.msra.mxu1 %v22322_v55  ;;  %v25072_v48 = vadd.f32 %v26318_v19, %v10157_v24  ;;  %v26320_v55 = vld [vmem:[#allocation40_spill] sm:$0xff] }
 0x956   : > { %21129 = vmatprep.subr.bf16.mxu1 %v22323_v14 }
 0x957   : > { %v20625_v18 = vpop.f32.mrb[36].mxu1 }
 0x958   : > { %v10045_v45 = vpop.f32.mrb[37].mxu1 }
 0x959   : > { %v10160_v13 = vadd.f32 %v10045_v45, %v24939_v37  ;;  %v20626_v10 = vpop.f32.mrb[38].mxu1  ;;  %21130 = vmatpush3.bf16.msra.mxu1 %v22323_v14  ;;  %v26321_v14 = vld [vmem:[#allocation43_spill] sm:$0xff] }
 0x95a   : > { %v10048_v53 = vpop.f32.mrb[39].mxu1  ;;  %21307 = vmatprep.subr.bf16.mxu1 %v25083_v35 }
 0x95b   : > { %v10161_v43 = vadd.f32 %v10048_v53, %v24942_v63  ;;  %v25077_v27 = vadd.f32 %v26319_v50, %v10160_v13 }
 0x95c   : > { %20956 = vmatmul.mubr.bf16.gmra.mrb[144].mxu1 %v23604_v59 }
 0x95d   : > { %20959 = vmatprep.mubr.bf16.mxu1 %v26262_v44  ;;  %v25087_v15 = vadd.f32 %v26320_v55, %v10161_v43 }
 0x95f   : > { %v20629_v37 = vpop.f32.mrb[40].mxu1 }
 0x960   : > { %v10061_v21 = vpop.f32.mrb[41].mxu1  ;;  %v26323_v37 = vld [vmem:[#allocation64_spill] sm:$0xff] }
 0x961   : > { %v10164_v63 = vadd.f32 %v10061_v21, %v24953_v33  ;;  %v20630_v47 = vpop.f32.mrb[42].mxu1 }
 0x962   : > { %v10064_v41 = vpop.f32.mrb[43].mxu1 }
 0x963   : > { %v10165_v20 = vadd.f32 %v10064_v41, %v24956_v28  ;;  %v25093_v24 = vadd.f32 %v26321_v14, %v10164_v63  ;;  %v26324_v63 = vld [vmem:[#allocation65_spill] sm:$0xff] }
 0x964   : > { %20960 = vmatmul.mubr.bf16.gmra.mrb[148].mxu1 %v26289_v9 }
 0x965   : > { %20963 = vmatprep.mubr.bf16.mxu1 %v26265_v1  ;;  %v25098_v19 = vadd.f32 %v26322_v8, %v10165_v20 }
 0x967   : > { %v20633_v18 = vpop.f32.mrb[44].mxu1 }
 0x968   : > { %v10077_v45 = vpop.f32.mrb[45].mxu1 }
 0x969   : > { %v20634_v13 = vpop.f32.mrb[46].mxu1  ;;  %v26325_v45 = vld [vmem:[#allocation66_spill] sm:$0xff] }
 0x96a   : > { %v10080_v10 = vpop.f32.mrb[47].mxu1  ;;  %v26326_v13 = vld [vmem:[#allocation67_spill] sm:$0xff] }
 0x96c   : > { %20964 = vmatmul.mubr.bf16.gmra.mrb[152].mxu1 %v26290_v57 }
 0x96d   : > { %20967 = vmatprep.mubr.bf16.mxu1 %v23642_v7 }
 0x96f   : > { %v20749_v33 = vpop.f32.mrb[48].mxu1 }
 0x970   : > { %v10849_v28 = vpop.f32.mrb[49].mxu1 }
 0x971   : > { %v11168_v53 = vadd.f32 %v10849_v28, %v24965_v0  ;;  %v20750_v43 = vpop.f32.mrb[50].mxu1 }
 0x972   : > { %v10852_v50 = vpop.f32.mrb[51].mxu1 }
 0x973   : > { %v11169_v55 = vadd.f32 %v10852_v50, %v24970_v31  ;;  %v25105_v21 = vadd.f32 %v26323_v37, %v11168_v53  ;;  %v26328_v37 = vld [vmem:[#allocation69_spill] sm:$0xff] }
 0x974   : > { %20968 = vmatmul.mubr.bf16.gmra.mrb[156].mxu1 %v23640_v5 }
 0x975   : > { %20971 = vmatprep.mubr.bf16.mxu1 %v23654_v39  ;;  %v25110_v47 = vadd.f32 %v26324_v63, %v11169_v55  ;;  %v26327_v55 = vld [vmem:[#allocation68_spill] sm:$0xff] }
 0x977   : > { %v20753_v41 = vpop.f32.mrb[52].mxu1 }
 0x978   : > { %v10865_v20 = vpop.f32.mrb[53].mxu1 }
 0x979   : > { %v11172_v14 = vadd.f32 %v10865_v20, %v24975_v6  ;;  %v20754_v8 = vpop.f32.mrb[54].mxu1 }
 0x97a   : > { %v10868_v0 = vpop.f32.mrb[55].mxu1 }
 0x97b   : > { %v11173_v18 = vadd.f32 %v10868_v0, %v24980_v46  ;;  %v25115_v31 = vadd.f32 %v26325_v45, %v11172_v14 }
 0x97c   : > { %20972 = vmatmul.mubr.bf16.gmra.mrb[160].mxu1 %v23652_v38 }
 0x97d   : > { %20975 = vmatprep.mubr.bf16.mxu1 %v23666_v4  ;;  %v25120_v10 = vadd.f32 %v26326_v13, %v11173_v18 }
 0x97f   : > { %v20757_v33 = vpop.f32.mrb[56].mxu1 }
 0x980   : > { %v10881_v28 = vpop.f32.mrb[57].mxu1 }
 0x981   : > { %v11176_v53 = vadd.f32 %v10881_v28, %v24985_v61  ;;  %v20758_v43 = vpop.f32.mrb[58].mxu1 }
 0x982   : > { %v10884_v6 = vpop.f32.mrb[59].mxu1 }
 0x983   : > { %v11177_v50 = vadd.f32 %v10884_v6, %v24990_v22  ;;  %v25125_v46 = vadd.f32 %v26327_v55, %v11176_v53 }
 0x984   : > { %20976 = vmatmul.mubr.bf16.gmra.mrb[164].mxu1 %v23664_v3 }
 0x985   : > { %20979 = vmatprep.mubr.bf16.mxu1 %v23678_v42  ;;  %v25130_v63 = vadd.f32 %v26328_v37, %v11177_v50 }
 0x987   : > { %v20761_v41 = vpop.f32.mrb[60].mxu1 }
 0x988   : > { %v10897_v20 = vpop.f32.mrb[61].mxu1 }
 0x989   : > { %v20762_v14 = vpop.f32.mrb[62].mxu1 }
 0x98a   : > { %v10900_v8 = vpop.f32.mrb[63].mxu1 }
 0x98c   : > { %20980 = vmatmul.mubr.bf16.gmra.mrb[168].mxu1 %v23676_v40 }
 0x98d   : > { %20983 = vmatprep.mubr.bf16.mxu1 %v23690_v17 }
 0x98f   : > { %v20765_v61 = vpop.f32.mrb[64].mxu1 }
 0x990   : > { %v10913_v22 = vpop.f32.mrb[65].mxu1 }
 0x991   : > { %v20766_v0 = vpop.f32.mrb[66].mxu1 }
 0x992   : > { %v10916_v18 = vpop.f32.mrb[67].mxu1 }
 0x993   : > { %v26329_v18 = vld [vmem:[#allocation19_spill] sm:$0xff] }
 0x994   : > { %20984 = vmatmul.mubr.bf16.gmra.mrb[172].mxu1 %v23688_v16 }
 0x995   : > { %20987 = vmatprep.mubr.bf16.mxu1 %v23702_v52 }
 0x997   : > { %v20769_v45 = vpop.f32.mrb[68].mxu1 }
 0x998   : > { %v10929_v13 = vpop.f32.mrb[69].mxu1 }
 0x999   : > { %v20770_v33 = vpop.f32.mrb[70].mxu1  ;;  %v26330_v13 = vld [vmem:[#allocation70_spill] sm:$0xff] }
 0x99a   : > { %v10932_v28 = vpop.f32.mrb[71].mxu1 }
 0x99b   : > { %v26331_v28 = vld [vmem:[#allocation28_spill] sm:$0xff] }
 0x99c   : > { %20988 = vmatmul.mubr.bf16.gmra.mrb[176].mxu1 %v23700_v51 }
 0x99d   : > { %20991 = vmatprep.mubr.bf16.mxu1 %v23721_v30 }
 0x99f   : > { %v20773_v53 = vpop.f32.mrb[72].mxu1 }
 0x9a0   : > { %v10945_v43 = vpop.f32.mrb[73].mxu1  ;;  %v26332_v53 = vld [vmem:[#allocation71_spill] sm:$0xff] }
 0x9a1   : > { %v20774_v6 = vpop.f32.mrb[74].mxu1 }
 0x9a2   : > { %v10948_v50 = vpop.f32.mrb[75].mxu1 }
 0x9a4   : > { %20992 = vmatmul.mubr.bf16.gmra.mrb[180].mxu1 %v26292_v58 }
 0x9a5   : > { %20995 = vmatprep.mubr.bf16.mxu1 %v23739_v56 }
 0x9a7   : > { %v20777_v55 = vpop.f32.mrb[76].mxu1 }
 0x9a8   : > { %v10961_v37 = vpop.f32.mrb[77].mxu1  ;;  %v26333_v55 = vld [vmem:[#allocation101_spill] sm:$0xff] }
 0x9a9   : > { %v20778_v41 = vpop.f32.mrb[78].mxu1 }
 0x9aa   : > { %v10964_v20 = vpop.f32.mrb[79].mxu1 }
 0x9ab   : > { %v26334_v20 = vld [vmem:[#allocation21_spill] sm:$0xff] }
 0x9ac   : > { %20996 = vmatmul.mubr.bf16.gmra.mrb[184].mxu1 %v23737_v25 }
 0x9ad   : > { %20999 = vmatprep.mubr.bf16.mxu1 %v23757_v23 }
 0x9af   : > { %v20781_v14 = vpop.f32.mrb[80].mxu1 }
 0x9b0   : > { %v10977_v8 = vpop.f32.mrb[81].mxu1 }
 0x9b1   : > { %v11200_v61 = vadd.f32 %v10977_v8, %v25005_v11  ;;  %v20782_v22 = vpop.f32.mrb[82].mxu1  ;;  %v26335_v8 = vld [vmem:[#allocation72_spill] sm:$0xff] }
 0x9b2   : > { %v10980_v0 = vpop.f32.mrb[83].mxu1 }
 0x9b3   : > { %v11201_v45 = vadd.f32 %v10980_v0, %v26329_v18  ;;  %v25145_v33 = vadd.f32 %v26330_v13, %v11200_v61  ;;  %v26336_v61 = vld [vmem:[#allocation73_spill] sm:$0xff]  ;;  %v26337_v13 = vld [vmem:[#allocation23_spill] sm:$0xff] }
 0x9b4   : > { %21000 = vmatmul.mubr.bf16.gmra.mrb[188].mxu1 %v26293_v12 }
 0x9b5   : > { %21003 = vmatprep.mubr.bf16.mxu1 %v26331_v28  ;;  %v25150_v43 = vadd.f32 %v26332_v53, %v11201_v45 }
 0x9b7   : > { %v20785_v6 = vpop.f32.mrb[84].mxu1 }
 0x9b8   : > { %v10993_v50 = vpop.f32.mrb[85].mxu1 }
 0x9b9   : > { %v11204_v37 = vadd.f32 %v10993_v50, %v26333_v55  ;;  %v20786_v41 = vpop.f32.mrb[86].mxu1 }
 0x9ba   : > { %v10996_v11 = vpop.f32.mrb[87].mxu1  ;;  %v26338_v41 = vld [vmem:[#allocation74_spill] sm:$0xff] }
 0x9bb   : > { %v11205_v14 = vadd.f32 %v10996_v11, %v26334_v20  ;;  %v25155_v22 = vadd.f32 %v26335_v8, %v11204_v37  ;;  %v26340_v37 = vld [vmem:[#allocation75_spill] sm:$0xff] }
 0x9bc   : > { %21004 = vmatmul.mubr.bf16.gmra.mrb[192].mxu1 %v26311_v62 }
 0x9bd   : > { %21007 = vmatprep.mubr.bf16.mxu1 %v26312_v49  ;;  %v25160_v0 = vadd.f32 %v26336_v61, %v11205_v14 }
 0x9bf   : > { %v20789_v18 = vpop.f32.mrb[88].mxu1 }
 0x9c0   : > { %v11009_v45 = vpop.f32.mrb[89].mxu1 }
 0x9c1   : > { %v11208_v53 = vadd.f32 %v11009_v45, %v26337_v13  ;;  %v20790_v6 = vpop.f32.mrb[90].mxu1  ;;  %v26341_v45 = vld [vmem:[#allocation35_spill] sm:$0xff] }
 0x9c2   : > { %v11012_v50 = vpop.f32.mrb[91].mxu1 }
 0x9c3   : > { %v11209_v55 = vadd.f32 %v11012_v50, %v25030_v34  ;;  %v25165_v11 = vadd.f32 %v26338_v41, %v11208_v53  ;;  %v26342_v50 = vld [vmem:[#allocation34_spill] sm:$0xff] }
 0x9c4   : > { %21008 = vmatmul.mubr.bf16.gmra.mrb[196].mxu1 %v26314_v32 }
 0x9c5   : > { %26339 = vst [vmem:[#allocation25_spill] sm:$0xff] %v25165_v11  ;;  %21011 = vmatprep.mubr.bf16.mxu1 %v26315_v29  ;;  %v25170_v20 = vadd.f32 %v26340_v37, %v11209_v55 }
 0x9c7   : > { %v20793_v14 = vpop.f32.mrb[92].mxu1 }
 0x9c8   : > { %v11025_v8 = vpop.f32.mrb[93].mxu1  ;;  %v22325_v14 = vld [vmem:[%s25957_s3 + $0x388] sm:$0xff]  }
 0x9c9   : > { %v20794_v61 = vpop.f32.mrb[94].mxu1  ;;  %v22326_v8 = vld [vmem:[%s25957_s3 + $0x390] sm:$0xff]  }
 0x9ca   : > { %v11028_v18 = vpop.f32.mrb[95].mxu1 }
 0x9cc   : > { %21012 = vmatmul.mubr.bf16.gmra.mrb[200].mxu1 %v26316_v54 }
 0x9cd   : > { %21015 = vmatprep.mubr.bf16.mxu1 %v26341_v45 }
 0x9cf   : > { %v20797_v13 = vpop.f32.mrb[96].mxu1 }
 0x9d0   : > { %v11041_v34 = vpop.f32.mrb[97].mxu1  ;;  %v22327_v13 = vld [vmem:[%s25957_s3 + $0x398] sm:$0xff]  }
 0x9d1   : > { %v20798_v6 = vpop.f32.mrb[98].mxu1 }
 0x9d2   : > { %v11044_v53 = vpop.f32.mrb[99].mxu1 }
 0x9d4   : > { %21016 = vmatmul.mubr.bf16.gmra.mrb[204].mxu1 %v26342_v50 }
 0x9d5   : > { %21131 = vmatprep.mubr.bf16.mxu1 %v26173_v2 }
 0x9d7   : > { %v20801_v41 = vpop.f32.mrb[100].mxu1 }
 0x9d8   : > { %v11057_v11 = vpop.f32.mrb[101].mxu1  ;;  %v22329_v41 = vld [vmem:[%s25957_s3 + $0x3a8] sm:$0xff]  }
 0x9d9   : > { %v20802_v55 = vpop.f32.mrb[102].mxu1 }
 0x9da   : > { %v11060_v37 = vpop.f32.mrb[103].mxu1  ;;  %v22330_v55 = vld [vmem:[%s25957_s3 + $0x3b0] sm:$0xff]  }
 0x9dc   : > { %21132 = vmatmul.mubr.bf16.vlgmr.msra.gmra.mrb[208].mxu1 %v23592_v36  ;;  %v22328_v36 = vld [vmem:[%s25957_s3 + $0x3a0] sm:$0xff]  }
 0x9dd   : > { %21135 = vmatprep.mubr.bf16.mxu1 %v23606_v60  ;;  %21308 = vmatpush3.bf16.msra.mxu1 %v25083_v35 }
 0x9de   : > { %21309 = vmatprep.subr.bf16.mxu1 %v22325_v14 }
 0x9df   : > { %v20805_v2 = vpop.f32.mrb[104].mxu1 }
 0x9e0   : > { %v11073_v61 = vpop.f32.mrb[105].mxu1 }
 0x9e1   : > { %v20806_v11 = vpop.f32.mrb[106].mxu1  ;;  %21310 = vmatpush3.bf16.msra.mxu1 %v22325_v14 }
 0x9e2   : > { %v11076_v18 = vpop.f32.mrb[107].mxu1  ;;  %21311 = vmatprep.subr.bf16.mxu1 %v22326_v8  ;;  %v22331_v11 = vld [vmem:[%s25957_s3 + $0x3b8] sm:$0xff]  }
 0x9e4   : > { %21136 = vmatmul.mubr.bf16.gmra.mrb[212].mxu1 %v23604_v59 }
 0x9e5   : > { %21139 = vmatprep.mubr.bf16.mxu1 %v26262_v44  ;;  %21312 = vmatpush3.bf16.msra.mxu1 %v22326_v8 }
 0x9e6   : > { %21313 = vmatprep.subr.bf16.mxu1 %v22327_v13 }
 0x9e7   : > { %v20809_v35 = vpop.f32.mrb[108].mxu1 }
 0x9e8   : > { %v11089_v34 = vpop.f32.mrb[109].mxu1  ;;  %v26344_v35 = vld [vmem:[#allocation76_spill] sm:$0xff] }
 0x9e9   : > { %v20810_v6 = vpop.f32.mrb[110].mxu1  ;;  %21314 = vmatpush3.bf16.msra.mxu1 %v22327_v13  ;;  %v26343_v13 = vld [vmem:[#allocation62_spill] sm:$0xff] }
 0x9ea   : > { %v11092_v53 = vpop.f32.mrb[111].mxu1  ;;  %21315 = vmatprep.subr.bf16.mxu1 %v22328_v36 }
 0x9ec   : > { %21140 = vmatmul.mubr.bf16.gmra.mrb[216].mxu1 %v26289_v9 }
 0x9ed   : > { %21143 = vmatprep.mubr.bf16.mxu1 %v26265_v1  ;;  %21316 = vmatpush3.bf16.msra.mxu1 %v22328_v36 }
 0x9ee   : > { %21317 = vmatprep.subr.bf16.mxu1 %v22329_v41 }
 0x9ef   : > { %v20813_v37 = vpop.f32.mrb[112].mxu1 }
 0x9f0   : > { %v11105_v14 = vpop.f32.mrb[113].mxu1 }
 0x9f1   : > { %v11232_v8 = vadd.f32 %v11105_v14, %v25067_v26  ;;  %v20814_v2 = vpop.f32.mrb[114].mxu1  ;;  %21318 = vmatpush3.bf16.msra.mxu1 %v22329_v41  ;;  %v26345_v14 = vld [vmem:[#allocation78_spill] sm:$0xff] }
 0x9f2   : > { %v11108_v61 = vpop.f32.mrb[115].mxu1  ;;  %21319 = vmatprep.subr.bf16.mxu1 %v22330_v55 }
 0x9f3   : > { %v11233_v18 = vadd.f32 %v11108_v61, %v25072_v48  ;;  %v25207_v36 = vadd.f32 %v26343_v13, %v11232_v8 }
 0x9f4   : > { %21144 = vmatmul.mubr.bf16.gmra.mrb[220].mxu1 %v26290_v57 }
 0x9f5   : > { %21147 = vmatprep.mubr.bf16.mxu1 %v23642_v7  ;;  %21320 = vmatpush3.bf16.msra.mxu1 %v22330_v55  ;;  %v25212_v26 = vadd.f32 %v26344_v35, %v11233_v18  ;;  %v26346_v55 = vld [vmem:[#allocation80_spill] sm:$0xff] }
 0x9f6   : > { %21321 = vmatprep.subr.bf16.mxu1 %v22331_v11 }
 0x9f7   : > { %v20817_v34 = vpop.f32.mrb[116].mxu1 }
 0x9f8   : > { %v11121_v6 = vpop.f32.mrb[117].mxu1  ;;  %v26347_v34 = vld [vmem:[#allocation82_spill] sm:$0xff] }
 0x9f9   : > { %v11236_v53 = vadd.f32 %v11121_v6, %v25077_v27  ;;  %v20818_v41 = vpop.f32.mrb[118].mxu1  ;;  %21322 = vmatpush3.bf16.msra.mxu1 %v22331_v11  ;;  %v26348_v6 = vld [vmem:[#allocation83_spill] sm:$0xff] }
 0x9fa   : > { %v11124_v37 = vpop.f32.mrb[119].mxu1 }
 0x9fb   : > { %v11237_v48 = vadd.f32 %v11124_v37, %v25087_v15  ;;  %v25217_v8 = vadd.f32 %v26345_v14, %v11236_v53 }
 0x9fc   : > { %21148 = vmatmul.mubr.bf16.gmra.mrb[224].mxu1 %v23640_v5 }
 0x9fd   : > { %21151 = vmatprep.mubr.bf16.mxu1 %v23654_v39  ;;  %v25222_v2 = vadd.f32 %v26346_v55, %v11237_v48 }
 0x9ff   : > { %v20821_v61 = vpop.f32.mrb[120].mxu1 }
 0xa00   : > { %v11137_v18 = vpop.f32.mrb[121].mxu1 }
 0xa01   : > { %v11240_v13 = vadd.f32 %v11137_v18, %v25093_v24  ;;  %v20822_v27 = vpop.f32.mrb[122].mxu1 }
 0xa02   : > { %v11140_v35 = vpop.f32.mrb[123].mxu1  ;;  %v26349_v27 = vld [vmem:[#allocation20_spill] sm:$0xff] }
 0xa03   : > { %v11241_v11 = vadd.f32 %v11140_v35, %v25098_v19  ;;  %v25227_v15 = vadd.f32 %v26347_v34, %v11240_v13 }
 0xa04   : > { %21152 = vmatmul.mubr.bf16.gmra.mrb[228].mxu1 %v23652_v38 }
 0xa05   : > { %21155 = vmatprep.mubr.bf16.mxu1 %v23666_v4  ;;  %v25232_v53 = vadd.f32 %v26348_v6, %v11241_v11  ;;  %v26350_v11 = vld [vmem:[#allocation84_spill] sm:$0xff] }
 0xa07   : > { %v20825_v41 = vpop.f32.mrb[124].mxu1 }
 0xa08   : > { %v11153_v37 = vpop.f32.mrb[125].mxu1 }
 0xa09   : > { %v20826_v48 = vpop.f32.mrb[126].mxu1 }
 0xa0a   : > { %v11156_v14 = vpop.f32.mrb[127].mxu1 }
 0xa0c   : > { %21156 = vmatmul.mubr.bf16.gmra.mrb[232].mxu1 %v23664_v3 }
 0xa0d   : > { %21159 = vmatprep.mubr.bf16.mxu1 %v23678_v42 }
 0xa0f   : > { %v20941_v24 = vpop.f32.mrb[128].mxu1 }
 0xa10   : > { %v11925_v19 = vpop.f32.mrb[129].mxu1  ;;  %v26351_v24 = vld [vmem:[#allocation85_spill] sm:$0xff] }
 0xa11   : > { %v12244_v55 = vadd.f32 %v11925_v19, %v25105_v21  ;;  %v20942_v61 = vpop.f32.mrb[130].mxu1  ;;  %v26352_v19 = vld [vmem:[#allocation86_spill] sm:$0xff] }
 0xa12   : > { %v11928_v18 = vpop.f32.mrb[131].mxu1 }
 0xa13   : > { %v12245_v13 = vadd.f32 %v11928_v18, %v25110_v47  ;;  %v25239_v35 = vadd.f32 %v26349_v27, %v12244_v55 }
 0xa14   : > { %21160 = vmatmul.mubr.bf16.gmra.mrb[236].mxu1 %v23676_v40 }
 0xa15   : > { %21163 = vmatprep.mubr.bf16.mxu1 %v23690_v17  ;;  %v25244_v34 = vadd.f32 %v26350_v11, %v12245_v13 }
 0xa17   : > { %v20945_v6 = vpop.f32.mrb[132].mxu1 }
 0xa18   : > { %v11941_v41 = vpop.f32.mrb[133].mxu1  ;;  %v26353_v6 = vld [vmem:[#allocation87_spill] sm:$0xff] }
 0xa19   : > { %v12248_v37 = vadd.f32 %v11941_v41, %v25115_v31  ;;  %v20946_v48 = vpop.f32.mrb[134].mxu1  ;;  %v26354_v41 = vld [vmem:[#allocation88_spill] sm:$0xff] }
 0xa1a   : > { %v11944_v21 = vpop.f32.mrb[135].mxu1 }
 0xa1b   : > { %v12249_v14 = vadd.f32 %v11944_v21, %v25120_v10  ;;  %v25249_v47 = vadd.f32 %v26351_v24, %v12248_v37 }
 0xa1c   : > { %21164 = vmatmul.mubr.bf16.gmra.mrb[240].mxu1 %v23688_v16 }
 0xa1d   : > { %21167 = vmatprep.mubr.bf16.mxu1 %v23702_v52  ;;  %v25254_v55 = vadd.f32 %v26352_v19, %v12249_v14 }
 0xa1f   : > { %v20949_v61 = vpop.f32.mrb[136].mxu1 }
 0xa20   : > { %v11957_v18 = vpop.f32.mrb[137].mxu1 }
 0xa21   : > { %v12252_v13 = vadd.f32 %v11957_v18, %v25125_v46  ;;  %v20950_v27 = vpop.f32.mrb[138].mxu1 }
 0xa22   : > { %v11960_v31 = vpop.f32.mrb[139].mxu1 }
 0xa23   : > { %v12253_v11 = vadd.f32 %v11960_v31, %v25130_v63  ;;  %v25259_v10 = vadd.f32 %v26353_v6, %v12252_v13 }
 0xa24   : > { %21168 = vmatmul.mubr.bf16.gmra.mrb[244].mxu1 %v23700_v51 }
 0xa25   : > { %21171 = vmatprep.mubr.bf16.mxu1 %v23721_v30  ;;  %v25264_v37 = vadd.f32 %v26354_v41, %v12253_v11 }
 0xa27   : > { %v20953_v48 = vpop.f32.mrb[140].mxu1 }
 0xa28   : > { %v11973_v21 = vpop.f32.mrb[141].mxu1 }
 0xa29   : > { %v20954_v14 = vpop.f32.mrb[142].mxu1 }
 0xa2a   : > { %v11976_v24 = vpop.f32.mrb[143].mxu1 }
 0xa2c   : > { %21172 = vmatmul.mubr.bf16.gmra.mrb[248].mxu1 %v26292_v58 }
 0xa2d   : > { %21175 = vmatprep.mubr.bf16.mxu1 %v23739_v56 }
 0xa2f   : > { %v20957_v46 = vpop.f32.mrb[144].mxu1 }
 0xa30   : > { %v11989_v63 = vpop.f32.mrb[145].mxu1 }
 0xa31   : > { %v20958_v19 = vpop.f32.mrb[146].mxu1 }
 0xa32   : > { %v11992_v61 = vpop.f32.mrb[147].mxu1 }
 0xa34   : > { %21176 = vmatmul.mubr.bf16.gmra.mrb[252].mxu1 %v23737_v25 }
 0xa35   : > { %21179 = vmatprep.mubr.bf16.mxu1 %v23757_v23 }
 0xa37   : > { %v20961_v18 = vpop.f32.mrb[148].mxu1 }
 0xa38   : > { %v12005_v13 = vpop.f32.mrb[149].mxu1 }
 0xa39   : > { %v20962_v27 = vpop.f32.mrb[150].mxu1 }
 0xa3a   : > { %v12008_v31 = vpop.f32.mrb[151].mxu1 }
 0xa3b   : > { %v26355_v31 = vld [vmem:[#allocation89_spill] sm:$0xff] }
 0xa3c   : > { %21180 = vmatmul.mubr.bf16.gmra.mrb[0].mxu1 %v26293_v12 }
 0xa3d   : > { %21183 = vmatprep.mubr.bf16.mxu1 %v26331_v28 }
 0xa3f   : > { %v20965_v11 = vpop.f32.mrb[152].mxu1 }
 0xa40   : > { %v12021_v6 = vpop.f32.mrb[153].mxu1 }
 0xa41   : > { %v20966_v41 = vpop.f32.mrb[154].mxu1  ;;  %v26356_v6 = vld [vmem:[#allocation90_spill] sm:$0xff] }
 0xa42   : > { %v12024_v48 = vpop.f32.mrb[155].mxu1 }
 0xa44   : > { %21184 = vmatmul.mubr.bf16.gmra.mrb[4].mxu1 %v26311_v62 }
 0xa45   : > { %21187 = vmatprep.mubr.bf16.mxu1 %v26312_v49 }
 0xa47   : > { %v20969_v21 = vpop.f32.mrb[156].mxu1 }
 0xa48   : > { %v12037_v14 = vpop.f32.mrb[157].mxu1 }
 0xa49   : > { %v20970_v24 = vpop.f32.mrb[158].mxu1 }
 0xa4a   : > { %v12040_v46 = vpop.f32.mrb[159].mxu1 }
 0xa4c   : > { %21188 = vmatmul.mubr.bf16.gmra.mrb[8].mxu1 %v26314_v32 }
 0xa4d   : > { %21191 = vmatprep.mubr.bf16.mxu1 %v26315_v29 }
 0xa4f   : > { %v20973_v63 = vpop.f32.mrb[160].mxu1 }
 0xa50   : > { %v12053_v19 = vpop.f32.mrb[161].mxu1  ;;  %v26357_v63 = vld [vmem:[#allocation91_spill] sm:$0xff] }
 0xa51   : > { %v12276_v61 = vadd.f32 %v12053_v19, %v25145_v33  ;;  %v20974_v18 = vpop.f32.mrb[162].mxu1  ;;  %v26359_v19 = vld [vmem:[#allocation39_spill] sm:$0xff] }
 0xa52   : > { %v12056_v13 = vpop.f32.mrb[163].mxu1 }
 0xa53   : > { %v12277_v27 = vadd.f32 %v12056_v13, %v25150_v43  ;;  %v25279_v11 = vadd.f32 %v26355_v31, %v12276_v61  ;;  %v26360_v61 = vld [vmem:[#allocation92_spill] sm:$0xff]  ;;  %v26362_v31 = vld [vmem:[#allocation25_spill] sm:$0xff] }
 0xa54   : > { %21192 = vmatmul.mubr.bf16.gmra.mrb[12].mxu1 %v26316_v54 }
 0xa55   : > { %21195 = vmatprep.mubr.bf16.mxu1 %v26341_v45  ;;  %v25284_v41 = vadd.f32 %v26356_v6, %v12277_v27 }
 0xa57   : > { %v20977_v48 = vpop.f32.mrb[164].mxu1 }
 0xa58   : > { %v12069_v21 = vpop.f32.mrb[165].mxu1 }
 0xa59   : > { %v12280_v14 = vadd.f32 %v12069_v21, %v25155_v22  ;;  %v20978_v24 = vpop.f32.mrb[166].mxu1 }
 0xa5a   : > { %v12072_v33 = vpop.f32.mrb[167].mxu1  ;;  %v26363_v24 = vld [vmem:[#allocation93_spill] sm:$0xff] }
 0xa5b   : > { %v12281_v46 = vadd.f32 %v12072_v33, %v25160_v0  ;;  %v25289_v43 = vadd.f32 %v26357_v63, %v12280_v14  ;;  %v26365_v14 = vld [vmem:[#allocation38_spill] sm:$0xff] }
 0xa5c   : > { %21196 = vmatmul.mubr.bf16.gmra.mrb[16].mxu1 %v26342_v50  ;;  %v26366_v33 = vld [vmem:[#allocation42_spill] sm:$0xff] }
 0xa5d   : > { %26358 = vst [vmem:[#allocation26_spill] sm:$0xff] %v25289_v43  ;;  %21199 = vmatprep.mubr.bf16.mxu1 %v26359_v19  ;;  %v25294_v18 = vadd.f32 %v26360_v61, %v12281_v46  ;;  %v26367_v63 = vld [vmem:[#allocation94_spill] sm:$0xff]  ;;  %v26368_v19 = vld [vmem:[#allocation41_spill] sm:$0xff] }
 0xa5f   : > { %26361 = vst [vmem:[#allocation46_spill] sm:$0xff] %v25294_v18  ;;  %v20981_v13 = vpop.f32.mrb[168].mxu1 }
 0xa60   : > { %v12085_v27 = vpop.f32.mrb[169].mxu1 }
 0xa61   : > { %v12284_v6 = vadd.f32 %v12085_v27, %v26362_v31  ;;  %v20982_v48 = vpop.f32.mrb[170].mxu1  ;;  %v26369_v27 = vld [vmem:[#allocation45_spill] sm:$0xff] }
 0xa62   : > { %v12088_v22 = vpop.f32.mrb[171].mxu1 }
 0xa63   : > { %v12285_v21 = vadd.f32 %v12088_v22, %v25170_v20  ;;  %v25299_v0 = vadd.f32 %v26363_v24, %v12284_v6  ;;  %v26370_v22 = vld [vmem:[#allocation44_spill] sm:$0xff] }
 0xa64   : > { %21200 = vmatmul.mubr.bf16.gmra.mrb[20].mxu1 %v26365_v14 }
 0xa65   : > { %26364 = vst [vmem:[#allocation47_spill] sm:$0xff] %v25299_v0  ;;  %21203 = vmatprep.mubr.bf16.mxu1 %v26366_v33  ;;  %v25304_v43 = vadd.f32 %v26367_v63, %v12285_v21 }
 0xa67   : > { %v20985_v46 = vpop.f32.mrb[172].mxu1 }
 0xa68   : > { %v12101_v61 = vpop.f32.mrb[173].mxu1 }
 0xa69   : > { %v20986_v13 = vpop.f32.mrb[174].mxu1 }
 0xa6a   : > { %v12104_v18 = vpop.f32.mrb[175].mxu1 }
 0xa6c   : > { %21204 = vmatmul.mubr.bf16.gmra.mrb[24].mxu1 %v26368_v19 }
 0xa6d   : > { %21207 = vmatprep.mubr.bf16.mxu1 %v26369_v27 }
 0xa6f   : > { %v20989_v31 = vpop.f32.mrb[176].mxu1 }
 0xa70   : > { %v12117_v20 = vpop.f32.mrb[177].mxu1 }
 0xa71   : > { %v20990_v48 = vpop.f32.mrb[178].mxu1 }
 0xa72   : > { %v12120_v6 = vpop.f32.mrb[179].mxu1 }
 0xa74   : > { %21208 = vmatmul.mubr.bf16.gmra.mrb[28].mxu1 %v26370_v22 }
 0xa75   : > { %21323 = vmatprep.mubr.bf16.mxu1 %v23606_v60  ;;  %v22332_v60 = vld [vmem:[%s25959_s5 + $0x40] sm:$0xff]  }
 0xa76   : > { %19278 = vmatprep.subr.bf16.mxu1 %v22332_v60 }
 0xa77   : > { %v20993_v24 = vpop.f32.mrb[180].mxu1 }
 0xa78   : > { %v12133_v0 = vpop.f32.mrb[181].mxu1 }
 0xa79   : > { %v20994_v21 = vpop.f32.mrb[182].mxu1 }
 0xa7a   : > { %v12136_v63 = vpop.f32.mrb[183].mxu1 }
 0xa7b   : > { %v26371_v63 = vld [vmem:[#allocation59_spill] sm:$0xff] }
 0xa7c   : > { %21324 = vmatmul.mubr.bf16.vlgmr.msra.gmra.mrb[32].mxu1 %v23604_v59  ;;  %v22333_v59 = vld [vmem:[%s25959_s5] sm:$0xff]  }
 0xa7d   : > { %21327 = vmatprep.mubr.bf16.mxu1 %v26262_v44  ;;  %19279 = vmatpush3.bf16.msra.mxu1 %v22333_v59 }
 0xa7f   : > { %v20997_v18 = vpop.f32.mrb[184].mxu1 }
 0xa80   : > { %v12149_v46 = vpop.f32.mrb[185].mxu1 }
 0xa81   : > { %v20998_v61 = vpop.f32.mrb[186].mxu1  ;;  %v26372_v46 = vld [vmem:[#allocation15_spill] sm:$0xff] }
 0xa82   : > { %v12152_v13 = vpop.f32.mrb[187].mxu1 }
 0xa84   : > { %21328 = vmatmul.mubr.bf16.gmra.mrb[36].mxu1 %v26289_v9 }
 0xa85   : > { %21331 = vmatprep.mubr.bf16.mxu1 %v26265_v1 }
 0xa87   : > { %v21001_v31 = vpop.f32.mrb[188].mxu1 }
 0xa88   : > { %v12165_v20 = vpop.f32.mrb[189].mxu1 }
 0xa89   : > { %v21002_v48 = vpop.f32.mrb[190].mxu1  ;;  %v22335_v20 = vld [vmem:[%s25959_s5 + $0x8] sm:$0xff]  }
 0xa8a   : > { %v12168_v0 = vpop.f32.mrb[191].mxu1 }
 0xa8c   : > { %21332 = vmatmul.mubr.bf16.gmra.mrb[40].mxu1 %v26290_v57 }
 0xa8d   : > { %21335 = vmatprep.mubr.bf16.mxu1 %v23642_v7 }
 0xa8f   : > { %v21005_v44 = vpop.f32.mrb[192].mxu1 }
 0xa90   : > { %v12181_v1 = vpop.f32.mrb[193].mxu1 }
 0xa91   : > { %v12308_v9 = vadd.f32 %v12181_v1, %v25207_v36  ;;  %v21006_v6 = vpop.f32.mrb[194].mxu1 }
 0xa92   : > { %v12184_v24 = vpop.f32.mrb[195].mxu1  ;;  %v26375_v6 = vld [vmem:[#allocation79_spill] sm:$0xff] }
 0xa93   : > { %v12309_v21 = vadd.f32 %v12184_v24, %v25212_v26  ;;  %v25325_v18 = vadd.f32 %v26371_v63, %v12308_v9  ;;  %v22334_v26 = vld [vmem:[%s25959_s5 + $0x48] sm:$0xff]  }
 0xa94   : > { %21336 = vmatmul.mubr.bf16.gmra.mrb[44].mxu1 %v23640_v5  ;;  %19280 = vmatprep.subr.bf16.mxu1 %v22334_v26  ;;  %v26377_v26 = vld [vmem:[#allocation95_spill] sm:$0xff] }
 0xa95   : > { %21339 = vmatprep.mubr.bf16.mxu1 %v23654_v39  ;;  %v25330_v57 = vadd.f32 %v26372_v46, %v12309_v21  ;;  %v26373_v39 = vld [vmem:[#allocation61_spill] sm:$0xff]  ;;  %19281 = vmatpush3.bf16.msra.mxu1 %v22335_v20 }
 0xa97   : > { %v21009_v7 = vpop.f32.mrb[196].mxu1 }
 0xa98   : > { %v12197_v61 = vpop.f32.mrb[197].mxu1 }
 0xa99   : > { %v12312_v13 = vadd.f32 %v12197_v61, %v25217_v8  ;;  %v21010_v31 = vpop.f32.mrb[198].mxu1  ;;  %v26374_v8 = vld [vmem:[#allocation77_spill] sm:$0xff] }
 0xa9a   : > { %v12200_v36 = vpop.f32.mrb[199].mxu1  ;;  %v22338_v31 = vld [vmem:[%s25959_s5 + $0x50] sm:$0xff]  }
 0xa9b   : > { %v12313_v5 = vadd.f32 %v12200_v36, %v25222_v2  ;;  %v25341_v48 = vadd.f32 %v26373_v39, %v12312_v13  ;;  %19282 = vmatprep.subr.bf16.mxu1 %v22338_v31 }
 0xa9c   : > { %21340 = vmatmul.mubr.bf16.gmra.mrb[48].mxu1 %v23652_v38  ;;  %v26376_v38 = vld [vmem:[#allocation81_spill] sm:$0xff] }
 0xa9d   : > { %21343 = vmatprep.mubr.bf16.mxu1 %v23666_v4  ;;  %v25346_v60 = vadd.f32 %v26374_v8, %v12313_v5 }
 0xa9f   : > { %v21013_v0 = vpop.f32.mrb[200].mxu1 }
 0xaa0   : > { %v12213_v59 = vpop.f32.mrb[201].mxu1 }
 0xaa1   : > { %v12316_v44 = vadd.f32 %v12213_v59, %v25227_v15  ;;  %v21014_v1 = vpop.f32.mrb[202].mxu1  ;;  %v22336_v15 = vld [vmem:[%s25959_s5 + $0x140] sm:$0xff]  }
 0xaa2   : > { %v12216_v9 = vpop.f32.mrb[203].mxu1  ;;  %19322 = vmatprep.subr.bf16.mxu0 %v22336_v15  ;;  %v26379_v1 = vld [vmem:[#allocation97_spill] sm:$0xff] }
 0xaa3   : > { %v12317_v2 = vadd.f32 %v12216_v9, %v25232_v53  ;;  %v25351_v24 = vadd.f32 %v26375_v6, %v12316_v44 }
 0xaa4   : > { %21344 = vmatmul.mubr.bf16.gmra.mrb[52].mxu1 %v23664_v3  ;;  %v22337_v3 = vld [vmem:[%s25959_s5 + $0x100] sm:$0xff]  }
 0xaa5   : > { %21347 = vmatprep.mubr.bf16.mxu1 %v23678_v42  ;;  %v25356_v4 = vadd.f32 %v26376_v38, %v12317_v2  ;;  %19323 = vmatpush3.bf16.msra.mxu0 %v22337_v3 }
 0xaa7   : > { %v21017_v21 = vpop.f32.mrb[204].mxu1 }
 0xaa8   : > { %v12229_v63 = vpop.f32.mrb[205].mxu1 }
 0xaa9   : > { %v21018_v46 = vpop.f32.mrb[206].mxu1 }
 0xaaa   : > { %v12232_v7 = vpop.f32.mrb[207].mxu1  ;;  %v26381_v46 = vld [vmem:[#allocation99_spill] sm:$0xff] }
 0xaac   : > { %21348 = vmatmul.mubr.bf16.gmra.mrb[56].mxu1 %v23676_v40 }
 0xaad   : > { %21351 = vmatprep.mubr.bf16.mxu1 %v23690_v17  ;;  %v22339_v17 = vld [vmem:[%s25959_s5 + $0x10] sm:$0xff]  }
 0xaae   : > { %19283 = vmatpush3.bf16.msra.mxu1 %v22339_v17 }
 0xaaf   : > { %v21133_v53 = vpop.f32.mrb[208].mxu1 }
 0xab0   : > { %v13001_v42 = vpop.f32.mrb[209].mxu1 }
 0xab1   : > { %v13320_v61 = vadd.f32 %v13001_v42, %v25239_v35  ;;  %v21134_v13 = vpop.f32.mrb[210].mxu1  ;;  %v26378_v35 = vld [vmem:[#allocation96_spill] sm:$0xff] }
 0xab2   : > { %v13004_v36 = vpop.f32.mrb[211].mxu1 }
 0xab3   : > { %v13321_v40 = vadd.f32 %v13004_v36, %v25244_v34  ;;  %v25375_v20 = vadd.f32 %v26377_v26, %v13320_v61  ;;  %v22348_v26 = vld [vmem:[%s25959_s5 + $0x68] sm:$0xff]  }
 0xab4   : > { %21352 = vmatmul.mubr.bf16.gmra.mrb[60].mxu1 %v23688_v16  ;;  %v26380_v16 = vld [vmem:[#allocation98_spill] sm:$0xff] }
 0xab5   : > { %21355 = vmatprep.mubr.bf16.mxu1 %v23702_v52  ;;  %v25380_v5 = vadd.f32 %v26378_v35, %v13321_v40  ;;  %v22346_v40 = vld [vmem:[%s25959_s5 + $0x20] sm:$0xff]   ;;  %v22345_v35 = vld [vmem:[%s25959_s5 + $0x150] sm:$0xff]  }
 0xab7   : > { %v21137_v39 = vpop.f32.mrb[212].mxu1 }
 0xab8   : > { %v13017_v8 = vpop.f32.mrb[213].mxu1  ;;  %v22347_v39 = vld [vmem:[%s25959_s5 + $0x110] sm:$0xff]  }
 0xab9   : > { %v13324_v34 = vadd.f32 %v13017_v8, %v25249_v47  ;;  %v21138_v0 = vpop.f32.mrb[214].mxu1  ;;  %v22350_v8 = vld [vmem:[%s25959_s5 + $0x70] sm:$0xff]  }
 0xaba   : > { %v13020_v59 = vpop.f32.mrb[215].mxu1 }
 0xabb   : > { %v13325_v44 = vadd.f32 %v13020_v59, %v25254_v55  ;;  %v25385_v9 = vadd.f32 %v26379_v1, %v13324_v34  ;;  %v22340_v55 = vld [vmem:[%s25959_s5 + $0x148] sm:$0xff]   ;;  %v22351_v34 = vld [vmem:[%s25959_s5 + $0x30] sm:$0xff]   ;;  %v22353_v1 = vld [vmem:[%s25959_s5 + $0x38] sm:$0xff]  }
 0xabc   : > { %21356 = vmatmul.mubr.bf16.gmra.mrb[64].mxu1 %v23700_v51  ;;  %v22341_v51 = vld [vmem:[%s25959_s5 + $0x108] sm:$0xff]   ;;  %19324 = vmatprep.subr.bf16.mxu0 %v22340_v55 }
 0xabd   : > { %21359 = vmatprep.mubr.bf16.mxu1 %v23721_v30  ;;  %v25390_v52 = vadd.f32 %v26380_v16, %v13325_v44  ;;  %v22342_v30 = vld [vmem:[%s25959_s5 + $0x58] sm:$0xff]   ;;  %19325 = vmatpush3.bf16.msra.mxu0 %v22341_v51 }
 0xabe   : > { %19284 = vmatprep.subr.bf16.mxu1 %v22342_v30  ;;  %19326 = vmatprep.subr.bf16.mxu0 %v22345_v35 }
 0xabf   : > { %v21141_v2 = vpop.f32.mrb[216].mxu1 }
 0xac0   : > { %v13033_v6 = vpop.f32.mrb[217].mxu1 }
 0xac1   : > { %v13328_v38 = vadd.f32 %v13033_v6, %v25259_v10  ;;  %v21142_v21 = vpop.f32.mrb[218].mxu1  ;;  %v22343_v10 = vld [vmem:[%s25959_s5 + $0x18] sm:$0xff]   ;;  %19327 = vmatpush3.bf16.msra.mxu0 %v22347_v39 }
 0xac2   : > { %v13036_v47 = vpop.f32.mrb[219].mxu1  ;;  %19285 = vmatpush3.bf16.msra.mxu1 %v22343_v10  ;;  %v22354_v21 = vld [vmem:[%s25959_s5 + $0x158] sm:$0xff]  }
 0xac3   : > { %v13329_v63 = vadd.f32 %v13036_v47, %v25264_v37  ;;  %v25404_v7 = vadd.f32 %v26381_v46, %v13328_v38  ;;  %v26382_v37 = vld [vmem:[#allocation100_spill] sm:$0xff]  ;;  %v22355_v47 = vld [vmem:[%s25959_s5 + $0x118] sm:$0xff]   ;;  %19328 = vmatprep.subr.bf16.mxu0 %v22354_v21 }
 0xac4   : > { %21360 = vmatmul.mubr.bf16.gmra.mrb[68].mxu1 %v26292_v58  ;;  %v26383_v46 = vld [vmem:[#allocation52_spill] sm:$0xff] }
 0xac5   : > { %21363 = vmatprep.mubr.bf16.mxu1 %v23739_v56  ;;  %v25412_v15 = vadd.f32 %v26382_v37, %v13329_v63  ;;  %v22344_v56 = vld [vmem:[%s25959_s5 + $0x60] sm:$0xff]   ;;  %19329 = vmatpush3.bf16.msra.mxu0 %v22355_v47  ;;  %v22369_v21 = vld [vmem:[%s25959_s5 + $0x168] sm:$0xff]  }
 0xac6   : > { %19286 = vmatprep.subr.bf16.mxu1 %v22344_v56  ;;  %v26384_v37 = vld [vmem:[#allocation39_spill] sm:$0xff]  ;;  %v22371_v47 = vld [vmem:[%s25959_s5 + $0x128] sm:$0xff]  }
 0xac7   : > { %v21145_v53 = vpop.f32.mrb[220].mxu1  ;;  %19287 = vmatpush3.bf16.msra.mxu1 %v22346_v40  ;;  %v26389_v40 = vld [vmem:[#allocation9_spill] sm:$0xff] }
 0xac8   : > { %v13049_v3 = vpop.f32.mrb[221].mxu1  ;;  %19288 = vmatprep.subr.bf16.mxu1 %v22348_v26 }
 0xac9   : > { %v21146_v42 = vpop.f32.mrb[222].mxu1 }
 0xaca   : > { %v13052_v61 = vpop.f32.mrb[223].mxu1  ;;  %v26386_v42 = vld [vmem:[#allocation26_spill] sm:$0xff] }
 0xacc   : > { %21364 = vmatmul.mubr.bf16.gmra.mrb[72].mxu1 %v23737_v25 }
 0xacd   : > { %21367 = vmatprep.mubr.bf16.mxu1 %v23757_v23 }
 0xacf   : > { %v21149_v58 = vpop.f32.mrb[224].mxu1 }
 0xad0   : > { %v13065_v13 = vpop.f32.mrb[225].mxu1 }
 0xad1   : > { %v21150_v31 = vpop.f32.mrb[226].mxu1  ;;  %v22357_v13 = vld [vmem:[%s25959_s5 + $0x160] sm:$0xff]  }
 0xad2   : > { %v13068_v36 = vpop.f32.mrb[227].mxu1  ;;  %19330 = vmatprep.subr.bf16.mxu0 %v22357_v13 }
 0xad3   : > { %v26388_v36 = vld [vmem:[#allocation10_spill] sm:$0xff] }
 0xad4   : > { %21368 = vmatmul.mubr.bf16.gmra.mrb[76].mxu1 %v26293_v12 }
 0xad5   : > { %21371 = vmatprep.mubr.bf16.mxu1 %v26331_v28  ;;  %v22349_v28 = vld [vmem:[%s25959_s5 + $0x28] sm:$0xff]  }
 0xad6   : > { %19289 = vmatpush3.bf16.msra.mxu1 %v22349_v28 }
 0xad7   : > { %v21153_v17 = vpop.f32.mrb[228].mxu1  ;;  %19290 = vmatprep.subr.bf16.mxu1 %v22350_v8  ;;  %v26391_v8 = vld [vmem:[#allocation12_spill] sm:$0xff] }
 0xad8   : > { %v13081_v25 = vpop.f32.mrb[229].mxu1 }
 0xad9   : > { %v21154_v23 = vpop.f32.mrb[230].mxu1 }
 0xada   : > { %v13084_v12 = vpop.f32.mrb[231].mxu1  ;;  %19291 = vmatpush3.bf16.msra.mxu1 %v22351_v34  ;;  %v22359_v23 = vld [vmem:[%s25959_s5 + $0x120] sm:$0xff]  }
 0xadb   : > { %v26390_v12 = vld [vmem:[#allocation47_spill] sm:$0xff]  ;;  %19331 = vmatpush3.bf16.msra.mxu0 %v22359_v23 }
 0xadc   : > { %21372 = vmatmul.mubr.bf16.gmra.mrb[80].mxu1 %v26311_v62  ;;  %v22352_v62 = vld [vmem:[%s25959_s5 + $0x78] sm:$0xff]   ;;  %19332 = vmatprep.subr.bf16.mxu0 %v22369_v21  ;;  %v22510_v21 = vmov 0.0  }
 0xadd   : > { %21375 = vmatprep.mubr.bf16.mxu1 %v26312_v49  ;;  %19292 = vmatprep.subr.bf16.mxu1 %v22352_v62 }
 0xade   : > { %19293 = vmatpush3.bf16.msra.mxu1 %v22353_v1  ;;  %v26393_v1 = vmov 0  }
 0xadf   : > { %v21157_v0 = vpop.f32.mrb[232].mxu1  ;;  %19333 = vmatpush3.bf16.msra.mxu0 %v22371_v47 }
 0xae0   : > { %v13097_v59 = vpop.f32.mrb[233].mxu1 }
 0xae1   : > { %v21158_v44 = vpop.f32.mrb[234].mxu1 }
 0xae2   : > { %v13100_v49 = vpop.f32.mrb[235].mxu1 }
 0xae4   : > { %21376 = vmatmul.mubr.bf16.gmra.mrb[84].mxu1 %v26314_v32 }
 0xae5   : > { %21379 = vmatprep.mubr.bf16.mxu1 %v26315_v29 }
 0xae7   : > { %v21161_v16 = vpop.f32.mrb[236].mxu1 }
 0xae8   : > { %v13113_v2 = vpop.f32.mrb[237].mxu1 }
 0xae9   : > { %v21162_v6 = vpop.f32.mrb[238].mxu1 }
 0xaea   : > { %v13116_v38 = vpop.f32.mrb[239].mxu1 }
 0xaec   : > { %21380 = vmatmul.mubr.bf16.gmra.mrb[88].mxu1 %v26316_v54  ;;  %v26385_v54 = vld [vmem:[#allocation7_spill] sm:$0xff] }
 0xaed   : > { %21383 = vmatprep.mubr.bf16.mxu1 %v26341_v45 }
 0xaef   : > { %v21165_v32 = vpop.f32.mrb[240].mxu1 }
 0xaf0   : > { %v13129_v29 = vpop.f32.mrb[241].mxu1 }
 0xaf1   : > { %v13352_v63 = vadd.f32 %v13129_v29, %v25279_v11  ;;  %v21166_v55 = vpop.f32.mrb[242].mxu1 }
 0xaf2   : > { %v13132_v51 = vpop.f32.mrb[243].mxu1 }
 0xaf3   : > { %v13353_v30 = vadd.f32 %v13132_v51, %v25284_v41  ;;  %v25463_v10 = vadd.f32 %v26383_v46, %v13352_v63  ;;  %v22356_v41 = vld [vmem:[%s25959_s5 + $0xc0] sm:$0xff]   ;;  %v22376_v51 = vld [vmem:[%s25959_s5 + $0x170] sm:$0xff]  }
 0xaf4   : > { %21384 = vmatmul.mubr.bf16.gmra.mrb[92].mxu1 %v26342_v50  ;;  %v26387_v50 = vld [vmem:[#allocation46_spill] sm:$0xff]  ;;  %19300 = vmatprep.subr.bf16.mxu1 %v22356_v41 }
 0xaf5   : > { %21387 = vmatprep.mubr.bf16.mxu1 %v26384_v37  ;;  %v25468_v53 = vadd.f32 %v26385_v54, %v13353_v30  ;;  %v22377_v30 = vld [vmem:[%s25959_s5 + $0x130] sm:$0xff]   ;;  %19334 = vmatprep.subr.bf16.mxu0 %v22376_v51 }
 0xaf6   : > { %19335 = vmatpush3.bf16.msra.mxu0 %v22377_v30 }
 0xaf7   : > { %v21169_v45 = vpop.f32.mrb[244].mxu1 }
 0xaf8   : > { %v13145_v3 = vpop.f32.mrb[245].mxu1  ;;  %v22378_v45 = vld [vmem:[%s25959_s5 + $0x178] sm:$0xff]  }
 0xaf9   : > { %v13356_v61 = vadd.f32 %v13145_v3, %v26386_v42  ;;  %v21170_v58 = vpop.f32.mrb[246].mxu1  ;;  %v22379_v42 = vld [vmem:[%s25959_s5 + $0x138] sm:$0xff]   ;;  %19336 = vmatprep.subr.bf16.mxu0 %v22378_v45 }
 0xafa   : > { %v13148_v11 = vpop.f32.mrb[247].mxu1  ;;  %19337 = vmatpush3.bf16.msra.mxu0 %v22379_v42 }
 0xafb   : > { %v13357_v31 = vadd.f32 %v13148_v11, %v26387_v50  ;;  %v25479_v56 = vadd.f32 %v26388_v36, %v13356_v61  ;;  %21499 = vmatprep.subr.bf16.mxu0 %v22510_v21 }
 0xafc   : > { %21388 = vmatmul.mubr.bf16.gmra.mrb[96].mxu1 %v26365_v14 }
 0xafd   : > { %21391 = vmatprep.mubr.bf16.mxu1 %v26366_v33  ;;  %v25484_v17 = vadd.f32 %v26389_v40, %v13357_v31  ;;  %v26392_v33 = vld [vmem:[#allocation11_spill] sm:$0xff]  ;;  %v26394_v31 = vld [vmem:[#allocation5_spill] sm:$0xff]  ;;  %v26395_v40 = vld [vmem:[#allocation16_spill] sm:$0xff] }
 0xaff   : > { %v21173_v25 = vpop.f32.mrb[248].mxu1 }
 0xb00   : > { %v13161_v26 = vpop.f32.mrb[249].mxu1 }
 0xb01   : > { %v13360_v28 = vadd.f32 %v13161_v26, %v26390_v12  ;;  %v21174_v35 = vpop.f32.mrb[250].mxu1 }
 0xb02   : > { %v13164_v39 = vpop.f32.mrb[251].mxu1 }
 0xb03   : > { %v13361_v14 = vadd.f32 %v13164_v39, %v25304_v43  ;;  %v25492_v34 = vadd.f32 %v26391_v8, %v13360_v28  ;;  %v26397_v8 = vld [vmem:[#allocation60_spill] sm:$0xff] }
 0xb04   : > { %21392 = vmatmul.mubr.bf16.gmra.mrb[100].mxu1 %v26368_v19 }
 0xb05   : > { %21395 = vmatprep.mubr.bf16.mxu1 %v26369_v27  ;;  %v25497_v0 = vadd.f32 %v26392_v33, %v13361_v14  ;;  %v26396_v14 = vld [vmem:[#allocation58_spill] sm:$0xff] }
 0xb07   : > { %v21177_v59 = vpop.f32.mrb[252].mxu1 }
 0xb08   : > { %v13177_v44 = vpop.f32.mrb[253].mxu1 }
 0xb09   : > { %v21178_v62 = vpop.f32.mrb[254].mxu1 }
 0xb0a   : > { %v13180_v49 = vpop.f32.mrb[255].mxu1 }
 0xb0c   : > { %21396 = vmatmul.mubr.bf16.gmra.mrb[104].mxu1 %v26370_v22 }
 0xb0d   : > { %21399 = vmatprep.mubr.bf16.mxu1 %v26393_v1 }
 0xb0f   : > { %v21181_v16 = vpop.f32.mrb[0].mxu1 }
 0xb10   : > { %v13193_v43 = vpop.f32.mrb[1].mxu1 }
 0xb11   : > { %v21182_v2 = vpop.f32.mrb[2].mxu1  ;;  %v26398_v43 = vld [vmem:[#allocation22_spill] sm:$0xff] }
 0xb12   : > { %v13196_v6 = vpop.f32.mrb[3].mxu1  ;;  %v26399_v2 = vld [vmem:[#allocation102_spill] sm:$0xff] }
 0xb14   : > { %21400 = vmatmul.mubr.bf16.gmra.mrb[108].mxu1 %v26393_v1 }
 0xb17   : > { %v21185_v19 = vpop.f32.mrb[4].mxu1 }
 0xb18   : > { %v13209_v38 = vpop.f32.mrb[5].mxu1 }
 0xb19   : > { %v21186_v27 = vpop.f32.mrb[6].mxu1 }
 0xb1a   : > { %v13212_v22 = vpop.f32.mrb[7].mxu1 }
 0xb1f   : > { %v21189_v32 = vpop.f32.mrb[8].mxu1 }
 0xb20   : > { %v13225_v29 = vpop.f32.mrb[9].mxu1 }
 0xb21   : > { %v21190_v63 = vpop.f32.mrb[10].mxu1 }
 0xb22   : > { %v13228_v55 = vpop.f32.mrb[11].mxu1  ;;  %v26400_v63 = vld [vmem:[#allocation24_spill] sm:$0xff] }
 0xb27   : > { %v21193_v46 = vpop.f32.mrb[12].mxu1 }
 0xb28   : > { %v13241_v37 = vpop.f32.mrb[13].mxu1  ;;  %v26401_v46 = vld [vmem:[#allocation103_spill] sm:$0xff] }
 0xb29   : > { %v21194_v54 = vpop.f32.mrb[14].mxu1 }
 0xb2a   : > { %v13244_v3 = vpop.f32.mrb[15].mxu1 }
 0xb2f   : > { %v21197_v61 = vpop.f32.mrb[16].mxu1 }
 0xb30   : > { %v13257_v58 = vpop.f32.mrb[17].mxu1 }
 0xb31   : > { %v13384_v11 = vadd.f32 %v13257_v58, %v25325_v18  ;;  %v21198_v41 = vpop.f32.mrb[18].mxu1 }
 0xb32   : > { %v13260_v13 = vpop.f32.mrb[19].mxu1 }
 0xb33   : > { %v13385_v50 = vadd.f32 %v13260_v13, %v25330_v57  ;;  %v25523_v36 = vadd.f32 %v26394_v31, %v13384_v11  ;;  %v26402_v13 = vld [vmem:[#allocation104_spill] sm:$0xff] }
 0xb35   : > { %v25526_v25 = vadd.f32 %v26395_v40, %v13385_v50  ;;  %v26403_v40 = vld [vmem:[#allocation105_spill] sm:$0xff] }
 0xb37   : > { %v21201_v23 = vpop.f32.mrb[20].mxu1 }
 0xb38   : > { %v13273_v26 = vpop.f32.mrb[21].mxu1 }
 0xb39   : > { %v13388_v12 = vadd.f32 %v13273_v26, %v25341_v48  ;;  %v21202_v28 = vpop.f32.mrb[22].mxu1 }
 0xb3a   : > { %v13276_v35 = vpop.f32.mrb[23].mxu1 }
 0xb3b   : > { %v13389_v39 = vadd.f32 %v13276_v35, %v25346_v60  ;;  %v25531_v18 = vadd.f32 %v26396_v14, %v13388_v12  ;;  %v25562_v35 = vpop.f32.mrb[9].mxu0 }
 0xb3d   : > { %v25534_v33 = vadd.f32 %v26397_v8, %v13389_v39 }
 0xb3f   : > { %v21205_v57 = vpop.f32.mrb[24].mxu1 }
 0xb40   : > { %v13289_v59 = vpop.f32.mrb[25].mxu1  ;;  %v21494_v57 = vpop.f32.mrb[10].mxu0 }
 0xb41   : > { %v13392_v44 = vadd.f32 %v13289_v59, %v25351_v24  ;;  %v21206_v62 = vpop.f32.mrb[26].mxu1 }
 0xb42   : > { %v13292_v49 = vpop.f32.mrb[27].mxu1 }
 0xb43   : > { %v13393_v16 = vadd.f32 %v13292_v49, %v25356_v4  ;;  %v25539_v48 = vadd.f32 %v26398_v43, %v13392_v44  ;;  %v25549_v4 = vld [vmem:[%s25958_s4] ss:$0 sm:$0xff]  ;;  %v25565_v44 = vpop.f32.mrb[11].mxu0 }
 0xb44   : > { %v22358_v43 = vld [vmem:[%s25959_s5 + $0x80] sm:$0xff]  }
 0xb45   : > { %v25542_v6 = vadd.f32 %v26399_v2, %v13393_v16  ;;  %v21497_v2 = vpop.f32.mrb[12].mxu0 }
 0xb47   : > { %v21209_v60 = vpop.f32.mrb[28].mxu1 }
 0xb48   : > { %v13305_v19 = vpop.f32.mrb[29].mxu1  ;;  %v22360_v60 = vld [vmem:[%s25959_s5 + $0xc8] sm:$0xff]  }
 0xb49   : > { %v21210_v38 = vpop.f32.mrb[30].mxu1 }
 0xb4a   : > { %v13308_v27 = vpop.f32.mrb[31].mxu1  ;;  %v26405_v38 = vld [vmem:[#allocation107_spill] sm:$0xff] }
 0xb4f   : > { %v21325_v47 = vpop.f32.mrb[32].mxu1 }
 0xb50   : > { %v14077_v22 = vpop.f32.mrb[33].mxu1 }
 0xb51   : > { %v14396_v24 = vadd.f32 %v14077_v22, %v25375_v20  ;;  %v21326_v32 = vpop.f32.mrb[34].mxu1 }
 0xb52   : > { %v14080_v29 = vpop.f32.mrb[35].mxu1  ;;  %v22361_v32 = vld [vmem:[%s25959_s5 + $0x88] sm:$0xff]  }
 0xb53   : > { %v14934_v55 = vadd.f32 %v26400_v63, %v14396_v24  ;;  %v14397_v51 = vadd.f32 %v14080_v29, %v25380_v5  ;;  %v22362_v63 = vld [vmem:[%s25959_s5 + $0xd0] sm:$0xff]  }
 0xb55   : > { %v15021_v30 = vadd.f32 %v25549_v4, %v14934_v55  ;;  %v14935_v37 = vadd.f32 %v26401_v46, %v14397_v51 }
 0xb57   : > { %v15022_v54 = vadd.f32 %v25549_v4, %v14935_v37  ;;  %v21329_v45 = vpop.f32.mrb[36].mxu1  ;;  %v15101_v20 = vmax.f32 %v15021_v30, 0.0 }
 0xb58   : > { %v14093_v3 = vpop.f32.mrb[37].mxu1  ;;  %v22364_v45 = vld [vmem:[%s25959_s5 + $0xd8] sm:$0xff]  }
 0xb59   : > { %v15102_v42 = vmax.f32 %v15022_v54, 0.0  ;;  %v14400_v61 = vadd.f32 %v14093_v3, %v25385_v9  ;;  %v21330_v58 = vpop.f32.mrb[38].mxu1  ;;  %v22363_v54 = vld [vmem:[%s25959_s5 + $0x90] sm:$0xff]  }
 0xb5a   : > { %v14096_v11 = vpop.f32.mrb[39].mxu1 }
 0xb5b   : > { %v15181_v41 = vpack.c.bf16 %v15102_v42, %v15101_v20  ;;  %v14938_v50 = vadd.f32 %v26402_v13, %v14400_v61  ;;  %v14401_v31 = vadd.f32 %v14096_v11, %v25390_v52  ;;  %v26404_v52 = vld [vmem:[#allocation106_spill] sm:$0xff]  ;;  %v22366_v61 = vld [vmem:[%s25959_s5 + $0xe0] sm:$0xff]   ;;  %v22368_v13 = vld [vmem:[%s25959_s5 + $0xe8] sm:$0xff]  }
 0xb5c   : > { %v22365_v20 = vld [vmem:[%s25959_s5 + $0x98] sm:$0xff]  }
 0xb5d   : > { %v15025_v5 = vadd.f32 %v25549_v4, %v14938_v50  ;;  %v14939_v23 = vadd.f32 %v26403_v40, %v14401_v31  ;;  %v22370_v31 = vld [vmem:[%s25959_s5 + $0xa8] sm:$0xff]   ;;  %v22372_v40 = vld [vmem:[%s25959_s5 + $0xf0] sm:$0xff]  }
 0xb5f   : > { %v15026_v26 = vadd.f32 %v25549_v4, %v14939_v23  ;;  %v21333_v12 = vpop.f32.mrb[40].mxu1  ;;  %v15105_v39 = vmax.f32 %v15025_v5, 0.0 }
 0xb60   : > { %v14109_v28 = vpop.f32.mrb[41].mxu1  ;;  %v22373_v12 = vld [vmem:[%s25959_s5 + $0xb0] sm:$0xff]  }
 0xb61   : > { %v15106_v14 = vmax.f32 %v15026_v26, 0.0  ;;  %v14404_v9 = vadd.f32 %v14109_v28, %v25404_v7  ;;  %v21334_v8 = vpop.f32.mrb[42].mxu1  ;;  %v14919_v7 = vpop.f32.mrb[13].mxu0  ;;  %v22374_v28 = vld [vmem:[%s25959_s5 + $0xf8] sm:$0xff]  }
 0xb62   : > { %v14112_v59 = vpop.f32.mrb[43].mxu1  ;;  %v21498_v47 = vpop.f32.mrb[14].mxu0  ;;  %v22380_v8 = vld [vmem:[%s25959_s5 + $0x1c0] sm:$0xff]  }
 0xb63   : > { %v14942_v62 = vadd.f32 %v26404_v52, %v14404_v9  ;;  %v14405_v49 = vadd.f32 %v14112_v59, %v25412_v15  ;;  %v15183_v16 = vpack.c.bf16 %v15106_v14, %v15105_v39  ;;  %v14922_v22 = vpop.f32.mrb[15].mxu0  ;;  %v22375_v14 = vld [vmem:[%s25959_s5 + $0xb8] sm:$0xff]  }
 0xb65   : > { %v15029_v19 = vadd.f32 %v25549_v4, %v14942_v62  ;;  %v14943_v27 = vadd.f32 %v26405_v38, %v14405_v49  ;;  %15885 = vmatprep.mubr.bf16.mxu1 %v15183_v16  ;;  %v26406_v38 = vld [vmem:[#allocation108_spill] sm:$0xff] }
 0xb66   : > { %15886 = vmatmul.mubr.bf16.vlgmr.msra.gmra.mrb[112].mxu1 %v15181_v41  ;;  %v22367_v41 = vld [vmem:[%s25959_s5 + $0xa0] sm:$0xff]  }
 0xb67   : > { %v15030_v15 = vadd.f32 %v25549_v4, %v14943_v27  ;;  %v21337_v24 = vpop.f32.mrb[44].mxu1  ;;  %19301 = vmatpush3.bf16.msra.mxu1 %v22358_v43  ;;  %v15109_v55 = vmax.f32 %v15029_v19, 0.0 }
 0xb68   : > { %v14125_v29 = vpop.f32.mrb[45].mxu1  ;;  %19302 = vmatprep.subr.bf16.mxu1 %v22360_v60 }
 0xb69   : > { %v15110_v51 = vmax.f32 %v15030_v15, 0.0  ;;  %v21338_v30 = vpop.f32.mrb[46].mxu1  ;;  %v26407_v15 = vld [vmem:[#allocation109_spill] sm:$0xff] }
 0xb6a   : > { %v14128_v46 = vpop.f32.mrb[47].mxu1 }
 0xb6b   : > { %v25584_v37 = vpack.c.bf16 %v15110_v51, %v15109_v55  ;;  %19303 = vmatpush3.bf16.msra.mxu1 %v22361_v32 }
 0xb6c   : > { %19304 = vmatprep.subr.bf16.mxu1 %v22362_v63 }
 0xb6f   : > { %v21341_v3 = vpop.f32.mrb[48].mxu1  ;;  %19305 = vmatpush3.bf16.msra.mxu1 %v22363_v54  ;;  %v26408_v54 = vld [vmem:[#allocation110_spill] sm:$0xff] }
 0xb70   : > { %v14141_v42 = vpop.f32.mrb[49].mxu1  ;;  %19306 = vmatprep.subr.bf16.mxu1 %v22364_v45 }
 0xb71   : > { %v21342_v58 = vpop.f32.mrb[50].mxu1  ;;  %v22382_v42 = vld [vmem:[%s25959_s5 + $0x1c8] sm:$0xff]  }
 0xb72   : > { %v14144_v11 = vpop.f32.mrb[51].mxu1  ;;  %v26409_v58 = vld [vmem:[#allocation111_spill] sm:$0xff] }
 0xb73   : > { %19307 = vmatpush3.bf16.msra.mxu1 %v22365_v20 }
 0xb74   : > { %19308 = vmatprep.subr.bf16.mxu1 %v22366_v61 }
 0xb77   : > { %v21345_v50 = vpop.f32.mrb[52].mxu1  ;;  %19309 = vmatpush3.bf16.msra.mxu1 %v22367_v41 }
 0xb78   : > { %v14157_v5 = vpop.f32.mrb[53].mxu1  ;;  %19310 = vmatprep.subr.bf16.mxu1 %v22368_v13  ;;  %v22384_v50 = vld [vmem:[%s25959_s5 + $0x1d0] sm:$0xff]  }
 0xb79   : > { %v21346_v23 = vpop.f32.mrb[54].mxu1 }
 0xb7a   : > { %v14160_v26 = vpop.f32.mrb[55].mxu1 }
 0xb7b   : > { %19311 = vmatpush3.bf16.msra.mxu1 %v22370_v31 }
 0xb7c   : > { %19312 = vmatprep.subr.bf16.mxu1 %v22372_v40 }
 0xb7f   : > { %v21349_v39 = vpop.f32.mrb[56].mxu1  ;;  %19313 = vmatpush3.bf16.msra.mxu1 %v22373_v12  ;;  %v26410_v12 = vld [vmem:[#allocation112_spill] sm:$0xff] }
 0xb80   : > { %v14173_v9 = vpop.f32.mrb[57].mxu1  ;;  %19314 = vmatprep.subr.bf16.mxu1 %v22374_v28 }
 0xb81   : > { %v21350_v57 = vpop.f32.mrb[58].mxu1  ;;  %v22387_v9 = vld [vmem:[%s25959_s5 + $0x1d8] sm:$0xff]  }
 0xb82   : > { %v14176_v59 = vpop.f32.mrb[59].mxu1 }
 0xb83   : > { %19315 = vmatpush3.bf16.msra.mxu1 %v22375_v14  ;;  %v22386_v14 = vld [vmem:[%s25959_s5 + $0x190] sm:$0xff]  }
 0xb84   : > { %19344 = vmatprep.subr.bf16.mxu1 %v22380_v8 }
 0xb87   : > { %v21353_v52 = vpop.f32.mrb[60].mxu1 }
 0xb88   : > { %v14189_v62 = vpop.f32.mrb[61].mxu1 }
 0xb89   : > { %v21354_v49 = vpop.f32.mrb[62].mxu1 }
 0xb8a   : > { %v14192_v16 = vpop.f32.mrb[63].mxu1  ;;  %v22390_v49 = vld [vmem:[%s25959_s5 + $0x1e0] sm:$0xff]  }
 0xb8f   : > { %v21357_v43 = vpop.f32.mrb[64].mxu1 }
 0xb90   : > { %v14205_v2 = vpop.f32.mrb[65].mxu1 }
 0xb91   : > { %v14428_v60 = vadd.f32 %v14205_v2, %v25463_v10  ;;  %v21358_v7 = vpop.f32.mrb[66].mxu1 }
 0xb92   : > { %v14208_v19 = vpop.f32.mrb[67].mxu1 }
 0xb93   : > { %v14966_v27 = vadd.f32 %v26406_v38, %v14428_v60  ;;  %v14429_v47 = vadd.f32 %v14208_v19, %v25468_v53  ;;  %v22381_v53 = vld [vmem:[%s25959_s5 + $0x180] sm:$0xff]  }
 0xb94   : > { %v22385_v19 = vld [vmem:[%s25959_s5 + $0x200] sm:$0xff]  }
 0xb95   : > { %v15053_v22 = vadd.f32 %v25549_v4, %v14966_v27  ;;  %v14967_v24 = vadd.f32 %v26407_v15, %v14429_v47  ;;  %v22392_v38 = vld [vmem:[%s25959_s5 + $0x1a0] sm:$0xff]   ;;  %v22393_v27 = vld [vmem:[%s25959_s5 + $0x1e8] sm:$0xff]  }
 0xb96   : > { %v22395_v15 = vld [vmem:[%s25959_s5 + $0x1a8] sm:$0xff]  }
 0xb97   : > { %v15054_v32 = vadd.f32 %v25549_v4, %v14967_v24  ;;  %v21361_v29 = vpop.f32.mrb[68].mxu1  ;;  %v15133_v55 = vmax.f32 %v15053_v22, 0.0  ;;  %v22388_v22 = vld [vmem:[%s25959_s5 + $0x208] sm:$0xff]  }
 0xb98   : > { %v14221_v63 = vpop.f32.mrb[69].mxu1 }
 0xb99   : > { %v15134_v51 = vmax.f32 %v15054_v32, 0.0  ;;  %v14432_v30 = vadd.f32 %v14221_v63, %v25479_v56  ;;  %v21362_v46 = vpop.f32.mrb[70].mxu1  ;;  %v22396_v32 = vld [vmem:[%s25959_s5 + $0x1f0] sm:$0xff]  }
 0xb9a   : > { %v14224_v10 = vpop.f32.mrb[71].mxu1 }
 0xb9b   : > { %v14970_v45 = vadd.f32 %v26408_v54, %v14432_v30  ;;  %v14433_v3 = vadd.f32 %v14224_v10, %v25484_v17  ;;  %v15197_v20 = vpack.c.bf16 %v15134_v51, %v15133_v55  ;;  %v22383_v17 = vld [vmem:[%s25959_s5 + $0x188] sm:$0xff]   ;;  %v22391_v55 = vld [vmem:[%s25959_s5 + $0x210] sm:$0xff]   ;;  %v22399_v30 = vld [vmem:[%s25959_s5 + $0x1f8] sm:$0xff]  }
 0xb9c   : > { %v22398_v51 = vld [vmem:[%s25959_s5 + $0x1b0] sm:$0xff]   ;;  %v22394_v10 = vld [vmem:[%s25959_s5 + $0x218] sm:$0xff]  }
 0xb9d   : > { %v15057_v61 = vadd.f32 %v25549_v4, %v14970_v45  ;;  %v14971_v11 = vadd.f32 %v26409_v58, %v14433_v3  ;;  %15926 = vmatprep.mubr.bf16.mxu1 %v15197_v20  ;;  %v22401_v54 = vld [vmem:[%s25959_s5 + $0x1b8] sm:$0xff]  }
 0xb9e   : > { %15927 = vmatmul.mubr.bf16.vlgmr.msra.gmra.mrb[116].mxu1 %v25584_v37 }
 0xb9f   : > { %v15058_v56 = vadd.f32 %v25549_v4, %v14971_v11  ;;  %v21365_v41 = vpop.f32.mrb[72].mxu1  ;;  %19345 = vmatpush3.bf16.msra.mxu1 %v22381_v53  ;;  %v15137_v31 = vmax.f32 %v15057_v61, 0.0  ;;  %v22397_v53 = vld [vmem:[%s25959_s5 + $0x220] sm:$0xff]   ;;  %v22400_v61 = vld [vmem:[%s25959_s5 + $0x228] sm:$0xff]  }
 0xba0   : > { %v14237_v13 = vpop.f32.mrb[73].mxu1  ;;  %19346 = vmatprep.subr.bf16.mxu1 %v22382_v42  ;;  %v22402_v41 = vld [vmem:[%s25959_s5 + $0x230] sm:$0xff]  }
 0xba1   : > { %v15138_v5 = vmax.f32 %v15058_v56, 0.0  ;;  %v14436_v40 = vadd.f32 %v14237_v13, %v25492_v34  ;;  %v21366_v23 = vpop.f32.mrb[74].mxu1  ;;  %v26411_v34 = vld [vmem:[#allocation113_spill] sm:$0xff]  ;;  %v22403_v13 = vld [vmem:[%s25959_s5 + $0x238] sm:$0xff]  }
 0xba2   : > { %v14240_v37 = vpop.f32.mrb[75].mxu1 }
 0xba3   : > { %v15199_v26 = vpack.c.bf16 %v15138_v5, %v15137_v31  ;;  %v14974_v28 = vadd.f32 %v26410_v12, %v14436_v40  ;;  %v14437_v39 = vadd.f32 %v14240_v37, %v25497_v0  ;;  %19347 = vmatpush3.bf16.msra.mxu1 %v22383_v17  ;;  %v22389_v0 = vld [vmem:[%s25959_s5 + $0x198] sm:$0xff]  }
 0xba4   : > { %19348 = vmatprep.subr.bf16.mxu1 %v22384_v50 }
 0xba5   : > { %v15061_v8 = vadd.f32 %v25549_v4, %v14974_v28  ;;  %v14975_v57 = vadd.f32 %v26411_v34, %v14437_v39  ;;  %v26412_v28 = vld [vmem:[#allocation14_spill] sm:$0xff] }
 0xba7   : > { %v15062_v59 = vadd.f32 %v25549_v4, %v14975_v57  ;;  %v21369_v52 = vpop.f32.mrb[76].mxu1  ;;  %19349 = vmatpush3.bf16.msra.mxu1 %v22386_v14  ;;  %v15141_v16 = vmax.f32 %v15061_v8, 0.0  ;;  %v26413_v8 = vld [vmem:[#allocation18_spill] sm:$0xff] }
 0xba8   : > { %v14253_v62 = vpop.f32.mrb[77].mxu1  ;;  %19350 = vmatprep.subr.bf16.mxu1 %v22387_v9 }
 0xba9   : > { %v15142_v43 = vmax.f32 %v15062_v59, 0.0  ;;  %v21370_v2 = vpop.f32.mrb[78].mxu1 }
 0xbaa   : > { %v14256_v60 = vpop.f32.mrb[79].mxu1 }
 0xbab   : > { %v15201_v7 = vpack.c.bf16 %v15142_v43, %v15141_v16  ;;  %19351 = vmatpush3.bf16.msra.mxu1 %v22389_v0  ;;  %v26414_v43 = vld [vmem:[#allocation13_spill] sm:$0xff] }
 0xbac   : > { %19352 = vmatprep.subr.bf16.mxu1 %v22390_v49 }
 0xbad   : > { %15967 = vmatprep.mubr.bf16.mxu0 %v15201_v7  ;;  %v26415_v7 = vld [vmem:[#allocation8_spill] sm:$0xff] }
 0xbae   : > { %15968 = vmatmul.mubr.bf16.vlgmr.msra.gmra.mrb[16].mxu0 %v15199_v26 }
 0xbaf   : > { %v21373_v47 = vpop.f32.mrb[80].mxu1  ;;  %21500 = vmatpush3.bf16.msra.mxu0 %v22385_v19  ;;  %19353 = vmatpush3.bf16.msra.mxu1 %v22392_v38 }
 0xbb0   : > { %v14269_v24 = vpop.f32.mrb[81].mxu1  ;;  %21501 = vmatprep.subr.bf16.mxu0 %v22510_v21  ;;  %19354 = vmatprep.subr.bf16.mxu1 %v22393_v27 }
 0xbb1   : > { %v21374_v29 = vpop.f32.mrb[82].mxu1  ;;  %21515 = vmatprep.mubr.msk.bf16.mxu0 %vm22511_vm1, %v22510_v21 }
 0xbb2   : > { %v14272_v63 = vpop.f32.mrb[83].mxu1 }
 0xbb3   : > { %21502 = vmatpush3.bf16.msra.mxu0 %v22388_v22  ;;  %19355 = vmatpush3.bf16.msra.mxu1 %v22395_v15 }
 0xbb4   : > { %21503 = vmatprep.subr.bf16.mxu0 %v22510_v21  ;;  %19356 = vmatprep.subr.bf16.mxu1 %v22396_v32 }
 0xbb7   : > { %v21377_v46 = vpop.f32.mrb[84].mxu1  ;;  %21504 = vmatpush3.bf16.msra.mxu0 %v22391_v55  ;;  %19357 = vmatpush3.bf16.msra.mxu1 %v22398_v51 }
 0xbb8   : > { %v14285_v45 = vpop.f32.mrb[85].mxu1  ;;  %21505 = vmatprep.subr.bf16.mxu0 %v22510_v21  ;;  %19358 = vmatprep.subr.bf16.mxu1 %v22399_v30 }
 0xbb9   : > { %v21378_v3 = vpop.f32.mrb[86].mxu1 }
 0xbba   : > { %v14288_v20 = vpop.f32.mrb[87].mxu1 }
 0xbbb   : > { %21506 = vmatpush3.bf16.msra.mxu0 %v22394_v10  ;;  %19359 = vmatpush3.bf16.msra.mxu1 %v22401_v54  ;;  %v22409_v20 = vld [vmem:[%s25961_s7 + $0xc] ss:$16 sps:$4 sm:$0xff]  }
 0xbbc   : > { %21507 = vmatprep.subr.bf16.mxu0 %v22510_v21 }
 0xbbf   : > { %v21381_v42 = vpop.f32.mrb[88].mxu1  ;;  %21508 = vmatpush3.bf16.msra.mxu0 %v22397_v53  ;;  %v22415_v53 = vld [vmem:[%s25961_s7 + $0x2c] ss:$16 sps:$4 sm:$0xff]  }
 0xbc0   : > { %v14301_v58 = vpop.f32.mrb[89].mxu1  ;;  %21509 = vmatprep.subr.bf16.mxu0 %v22510_v21  ;;  %v22410_v42 = vld [vmem:[%s25961_s7 + $0x20] ss:$16 sps:$4 sm:$0xff]  }
 0xbc1   : > { %v21382_v11 = vpop.f32.mrb[90].mxu1  ;;  %v22418_v58 = vld [vmem:[%s25961_s7 + $0x44] ss:$16 sps:$4 sm:$0xff]  }
 0xbc2   : > { %v14304_v56 = vpop.f32.mrb[91].mxu1  ;;  %v22421_v11 = vld [vmem:[%s25961_s7 + $0x4c] ss:$16 sps:$4 sm:$0xff]  }
 0xbc3   : > { %21510 = vmatpush3.bf16.msra.mxu0 %v22400_v61  ;;  %v22413_v61 = vld [vmem:[%s25961_s7 + $0x28] ss:$16 sps:$4 sm:$0xff]   ;;  %v22416_v56 = vld [vmem:[%s25961_s7 + $0x40] ss:$16 sps:$4 sm:$0xff]  }
 0xbc4   : > { %21511 = vmatprep.subr.bf16.mxu0 %v22510_v21 }
 0xbc7   : > { %v21385_v17 = vpop.f32.mrb[92].mxu1  ;;  %21512 = vmatpush3.bf16.msra.mxu0 %v22402_v41  ;;  %v22419_v41 = vld [vmem:[%s25961_s7 + $0x48] ss:$16 sps:$4 sm:$0xff]  }
 0xbc8   : > { %v14317_v50 = vpop.f32.mrb[93].mxu1  ;;  %21513 = vmatprep.subr.bf16.mxu0 %v22510_v21  ;;  %v22424_v17 = vld [vmem:[%s25961_s7 + $0x64] ss:$16 sps:$4 sm:$0xff]  }
 0xbc9   : > { %v21386_v31 = vpop.f32.mrb[94].mxu1  ;;  %v22422_v50 = vld [vmem:[%s25961_s7 + $0x60] ss:$16 sps:$4 sm:$0xff]  }
 0xbca   : > { %v14320_v5 = vpop.f32.mrb[95].mxu1  ;;  %v22425_v31 = vld [vmem:[%s25961_s7 + $0x68] ss:$16 sps:$4 sm:$0xff]  }
 0xbcb   : > { %21514 = vmatpush3.bf16.msra.mxu0 %v22403_v13  ;;  %v22427_v13 = vld [vmem:[%s25961_s7 + $0x6c] ss:$16 sps:$4 sm:$0xff]   ;;  %v22430_v5 = vld [vmem:[%s25961_s7 + $0x84] ss:$16 sps:$4 sm:$0xff]  }
 0xbcc   : > { %16318 = vmatprep.subr.bf16.mxu0 %v22409_v20 }
 0xbcf   : > { %v21389_v40 = vpop.f32.mrb[96].mxu1 }
 0xbd0   : > { %v14333_v23 = vpop.f32.mrb[97].mxu1  ;;  %v22433_v40 = vld [vmem:[%s25961_s7 + $0x8c] ss:$16 sps:$4 sm:$0xff]  }
 0xbd1   : > { %v14460_v37 = vadd.f32 %v14333_v23, %v25523_v36  ;;  %v21390_v26 = vpop.f32.mrb[98].mxu1 }
 0xbd2   : > { %v14336_v12 = vpop.f32.mrb[99].mxu1  ;;  %v22431_v26 = vld [vmem:[%s25961_s7 + $0x88] ss:$16 sps:$4 sm:$0xff]  }
 0xbd3   : > { %v14998_v39 = vadd.f32 %v26412_v28, %v14460_v37  ;;  %v14461_v14 = vadd.f32 %v14336_v12, %v25526_v25  ;;  %v22428_v37 = vld [vmem:[%s25961_s7 + $0x80] ss:$16 sps:$4 sm:$0xff]  }
 0xbd5   : > { %v15085_v9 = vadd.f32 %v25549_v4, %v14998_v39  ;;  %v14999_v34 = vadd.f32 %v26413_v8, %v14461_v14  ;;  %v22439_v8 = vld [vmem:[%s25961_s7 + $0xac] ss:$16 sps:$4 sm:$0xff]  }
 0xbd7   : > { %v15086_v57 = vadd.f32 %v25549_v4, %v14999_v34  ;;  %v21393_v21 = vpop.f32.mrb[100].mxu1  ;;  %v15165_v52 = vmax.f32 %v15085_v9, 0.0  ;;  %v22436_v9 = vld [vmem:[%s25961_s7 + $0xa4] ss:$16 sps:$4 sm:$0xff]  }
 0xbd8   : > { %v14349_v59 = vpop.f32.mrb[101].mxu1  ;;  %v22437_v21 = vld [vmem:[%s25961_s7 + $0xa8] ss:$16 sps:$4 sm:$0xff]  }
 0xbd9   : > { %v15166_v0 = vmax.f32 %v15086_v57, 0.0  ;;  %v14464_v62 = vadd.f32 %v14349_v59, %v25531_v18  ;;  %v21394_v49 = vpop.f32.mrb[102].mxu1  ;;  %v22434_v57 = vld [vmem:[%s25961_s7 + $0xa0] ss:$16 sps:$4 sm:$0xff]   ;;  %v22442_v59 = vld [vmem:[%s25961_s7 + $0xc4] ss:$16 sps:$4 sm:$0xff]  }
 0xbda   : > { %v14352_v36 = vpop.f32.mrb[103].mxu1  ;;  %v22448_v49 = vld [vmem:[%s25961_s7 + $0xe4] ss:$16 sps:$4 sm:$0xff]  }
 0xbdb   : > { %v15213_v16 = vpack.c.bf16 %v15166_v0, %v15165_v52  ;;  %v15002_v2 = vadd.f32 %v26414_v43, %v14464_v62  ;;  %v14465_v60 = vadd.f32 %v14352_v36, %v25534_v33  ;;  %v22445_v52 = vld [vmem:[%s25961_s7 + $0xcc] ss:$16 sps:$4 sm:$0xff]   ;;  %v22440_v0 = vld [vmem:[%s25961_s7 + $0xc0] ss:$16 sps:$4 sm:$0xff]   ;;  %v22443_v62 = vld [vmem:[%s25961_s7 + $0xc8] ss:$16 sps:$4 sm:$0xff]  }
 0xbdc   : > { %v22451_v36 = vld [vmem:[%s25961_s7 + $0xec] ss:$16 sps:$4 sm:$0xff]   ;;  %v22449_v43 = vld [vmem:[%s25961_s7 + $0xe8] ss:$16 sps:$4 sm:$0xff]  }
 0xbdd   : > { %v15089_v25 = vadd.f32 %v25549_v4, %v15002_v2  ;;  %v15003_v19 = vadd.f32 %v26415_v7, %v14465_v60  ;;  %v22452_v2 = vld [vmem:[%s25963_s9 + $0x40] sm:$0xff]  }
 0xbde   : > { %v22453_v60 = vld [vmem:[%s25963_s9 + $0xc0] sm:$0xff]  }
 0xbdf   : > { %v15090_v38 = vadd.f32 %v25549_v4, %v15003_v19  ;;  %v21397_v27 = vpop.f32.mrb[104].mxu1  ;;  %v15169_v22 = vmax.f32 %v15089_v25, 0.0  ;;  %v18097_v25 = vld [vmem:[%s25960_s6] ss:$0 sm:$0xff] }
 0xbe0   : > { %v14365_v47 = vpop.f32.mrb[105].mxu1 }
 0xbe1   : > { %v15170_v15 = vmax.f32 %v15090_v38, 0.0  ;;  %v14468_v24 = vadd.f32 %v14365_v47, %v25539_v48  ;;  %v21398_v18 = vpop.f32.mrb[106].mxu1 }
 0xbe2   : > { %v14368_v32 = vpop.f32.mrb[107].mxu1 }
 0xbe3   : > { %v15006_v29 = vadd.f32 %v25562_v35, %v14468_v24  ;;  %v14469_v63 = vadd.f32 %v14368_v32, %v25542_v6  ;;  %v15215_v55 = vpack.c.bf16 %v15170_v15, %v15169_v22  ;;  %v22404_v6 = vld [vmem:[%s25961_s7] ss:$16 sps:$4 sm:$0xff]  }
 0xbe5   : > { %v15093_v33 = vadd.f32 %v25549_v4, %v15006_v29  ;;  %v15007_v51 = vadd.f32 %v25565_v44, %v14469_v63  ;;  %16008 = vmatprep.mubr.bf16.mxu1 %v15215_v55  ;;  %v22407_v44 = vld [vmem:[%s25961_s7 + $0x8] ss:$16 sps:$4 sm:$0xff]  }
 0xbe6   : > { %16009 = vmatmul.mubr.bf16.vlgmr.msra.gmra.mrb[120].mxu1 %v15213_v16  ;;  %v22446_v16 = vld [vmem:[%s25961_s7 + $0xe0] ss:$16 sps:$4 sm:$0xff]  }
 0xbe7   : > { %v15094_v30 = vadd.f32 %v25549_v4, %v15007_v51  ;;  %v21401_v46 = vpop.f32.mrb[108].mxu1  ;;  %16307 = vmatprep.mubr.bf16.mxu1 %v26393_v1  ;;  %v15173_v48 = vmax.f32 %v15093_v33, 0.0  ;;  %v22406_v4 = vld [vmem:[%s25961_s7 + $0x4] ss:$16 sps:$4 sm:$0xff]  }
 0xbe8   : > { %v14381_v10 = vpop.f32.mrb[109].mxu1  ;;  %16275 = vmatprep.subr.bf16.mxu1 %v22406_v4 }
 0xbe9   : > { %v15174_v54 = vmax.f32 %v15094_v30, 0.0  ;;  %v21402_v45 = vpop.f32.mrb[110].mxu1  ;;  %16276 = vmatpush1.bf16.msra.mxu1 %v22404_v6 }
 0xbea   : > { %v14384_v3 = vpop.f32.mrb[111].mxu1 }
 0xbeb   : > { %v15217_v35 = vpack.c.bf16 %v15174_v54, %v15173_v48 }
 0xbed   : > { %21516 = vmatmul.mubr.bf16.vlgmr.msra.gmra.mrb[20].mxu0 %v15217_v35 }
 0xbee   : > { %16350 = vmatprep.mubr.bf16.mxu0 %v26393_v1  ;;  %v22412_v1 = vld [vmem:[%s25961_s7 + $0x24] ss:$16 sps:$4 sm:$0xff]   ;;  %16319 = vmatpush1.bf16.msra.mxu0 %v22407_v44 }
 0xbef   : > { %16277 = vmatprep.subr.bf16.mxu1 %v22412_v1  ;;  %16320 = vmatprep.subr.bf16.mxu0 %v22415_v53 }
 0xbf0   : > { %16278 = vmatpush1.bf16.msra.mxu1 %v22410_v42 }
 0xbf1   : > { %16279 = vmatprep.subr.bf16.mxu1 %v22418_v58 }
 0xbf2   : > { %16321 = vmatpush1.bf16.msra.mxu0 %v22413_v61 }
 0xbf3   : > { %16322 = vmatprep.subr.bf16.mxu0 %v22421_v11 }
 0xbf4   : > { %16280 = vmatpush1.bf16.msra.mxu1 %v22416_v56 }
 0xbf5   : > { %16281 = vmatprep.subr.bf16.mxu1 %v22424_v17  ;;  %v22455_v17 = vld [vmem:[%s25963_s9 + $0x80] sm:$0xff]  }
 0xbf6   : > { %16323 = vmatpush1.bf16.msra.mxu0 %v22419_v41  ;;  %v22454_v41 = vld [vmem:[%s25963_s9] sm:$0xff]  }
 0xbf7   : > { %16324 = vmatprep.subr.bf16.mxu0 %v22427_v13 }
 0xbf8   : > { %16282 = vmatpush1.bf16.msra.mxu1 %v22422_v50  ;;  %v22456_v50 = vld [vmem:[%s25963_s9 + $0x48] sm:$0xff]  }
 0xbf9   : > { %16283 = vmatprep.subr.bf16.mxu1 %v22430_v5  ;;  %v22458_v5 = vld [vmem:[%s25963_s9 + $0x8] sm:$0xff]  }
 0xbfa   : > { %16325 = vmatpush1.bf16.msra.mxu0 %v22425_v31  ;;  %v22457_v31 = vld [vmem:[%s25963_s9 + $0xc8] sm:$0xff]  }
 0xbfb   : > { %16326 = vmatprep.subr.bf16.mxu0 %v22433_v40  ;;  %v22459_v40 = vld [vmem:[%s25963_s9 + $0x88] sm:$0xff]  }
 0xbfc   : > { %16284 = vmatpush1.bf16.msra.mxu1 %v22428_v37  ;;  %v22461_v37 = vld [vmem:[%s25963_s9 + $0xd0] sm:$0xff]  }
 0xbfd   : > { %16285 = vmatprep.subr.bf16.mxu1 %v22436_v9  ;;  %v22467_v9 = vld [vmem:[%s25963_s9 + $0x98] sm:$0xff]  }
 0xbfe   : > { %16327 = vmatpush1.bf16.msra.mxu0 %v22431_v26  ;;  %v22462_v26 = vld [vmem:[%s25963_s9 + $0x10] sm:$0xff]  }
 0xbff   : > { %16328 = vmatprep.subr.bf16.mxu0 %v22439_v8  ;;  %v22468_v8 = vld [vmem:[%s25963_s9 + $0x60] sm:$0xff]  }
 0xc00   : > { %16286 = vmatpush1.bf16.msra.mxu1 %v22434_v57  ;;  %v22470_v57 = vld [vmem:[%s25963_s9 + $0x20] sm:$0xff]  }
 0xc01   : > { %16287 = vmatprep.subr.bf16.mxu1 %v22442_v59  ;;  %v22472_v59 = vld [vmem:[%s25963_s9 + $0x68] sm:$0xff]  }
 0xc02   : > { %16329 = vmatpush1.bf16.msra.mxu0 %v22437_v21  ;;  %v22471_v21 = vld [vmem:[%s25963_s9 + $0xa0] sm:$0xff]  }
 0xc03   : > { %16330 = vmatprep.subr.bf16.mxu0 %v22445_v52  ;;  %v22473_v52 = vld [vmem:[%s25963_s9 + $0xe8] sm:$0xff]  }
 0xc04   : > { %16288 = vmatpush1.bf16.msra.mxu1 %v22440_v0  ;;  %v22474_v0 = vld [vmem:[%s25963_s9 + $0x28] sm:$0xff]  }
 0xc05   : > { %16289 = vmatprep.subr.bf16.mxu1 %v22448_v49  ;;  %v22476_v49 = vld [vmem:[%s25963_s9 + $0x70] sm:$0xff]  }
 0xc06   : > { %16331 = vmatpush1.bf16.msra.mxu0 %v22443_v62  ;;  %v22475_v62 = vld [vmem:[%s25963_s9 + $0xa8] sm:$0xff]  }
 0xc07   : > { %16332 = vmatprep.subr.bf16.mxu0 %v22451_v36  ;;  %v22477_v36 = vld [vmem:[%s25963_s9 + $0xf0] sm:$0xff]  }
 0xc08   : > { %16290 = vmatpush1.bf16.msra.mxu1 %v22446_v16  ;;  %v22478_v16 = vld [vmem:[%s25963_s9 + $0x30] sm:$0xff]  }
 0xc09   : > { %19375 = vmatprep.subr.bf16.mxu1 %v22452_v2  ;;  %v22480_v2 = vld [vmem:[%s25963_s9 + $0x78] sm:$0xff]  }
 0xc0a   : > { %16333 = vmatpush1.bf16.msra.mxu0 %v22449_v43  ;;  %v22479_v43 = vld [vmem:[%s25963_s9 + $0xb0] sm:$0xff]  }
 0xc0b   : > { %19397 = vmatprep.subr.bf16.mxu0 %v22453_v60  ;;  %v22481_v60 = vld [vmem:[%s25963_s9 + $0xf8] sm:$0xff]  }
 0xc39   : > { %v19294_v23 = vpop.f32.mrb[112].mxu1 }
 0xc3a   : > { %v19295_v12 = vpop.f32.mrb[113].mxu1 }
 0xc3b   : > { %v19296_v28 = vadd.f32 %v19295_v12, %v19294_v23  ;;  %v19297_v39 = vpop.f32.mrb[114].mxu1  ;;  %v22460_v23 = vld [vmem:[%s25963_s9 + $0x50] sm:$0xff]  }
 0xc3c   : > { %v19298_v14 = vpop.f32.mrb[115].mxu1  ;;  %v22463_v12 = vld [vmem:[%s25963_s9 + $0x90] sm:$0xff]  }
 0xc3d   : > { %v19299_v34 = vadd.f32 %v19298_v14, %v19297_v39  ;;  %v15888_v38 = vadd.f32 %v19296_v28, %v18097_v25  ;;  %v22464_v28 = vld [vmem:[%s25963_s9 + $0x58] sm:$0xff]  }
 0xc3e   : > { %v22465_v39 = vld [vmem:[%s25963_s9 + $0xd8] sm:$0xff]  }
 0xc3f   : > { %v15891_v15 = vadd.f32 %v19299_v34, %v18097_v25  ;;  %v22466_v14 = vld [vmem:[%s25963_s9 + $0x18] sm:$0xff]   ;;  %v22469_v34 = vld [vmem:[%s25963_s9 + $0xe0] sm:$0xff]  }
 0xc40   : > { %v22482_v25 = vld [vmem:[%s25963_s9 + $0x38] sm:$0xff]  }
 0xc71   : > { %v19316_v7 = vpop.f32.mrb[116].mxu1 }
 0xc72   : > { %v19317_v19 = vpop.f32.mrb[117].mxu1 }
 0xc73   : > { %v19318_v27 = vadd.f32 %v19317_v19, %v19316_v7  ;;  %v19319_v47 = vpop.f32.mrb[118].mxu1  ;;  %v22483_v7 = vld [vmem:[%s25963_s9 + $0xb8] sm:$0xff]   ;;  %v16095_v19 = vlaneseq }
 0xc74   : > { %v19320_v22 = vpop.f32.mrb[119].mxu1 }
 0xc75   : > { %v15929_v24 = vadd.f32 %v19318_v27, %v15888_v38  ;;  %v19321_v18 = vadd.f32 %v19320_v22, %v19319_v47  ;;  %v16096_v38 = vshrl.u32 %v16095_v19, 7  ;;  %v16093_v22 = vld [vmem:[%s25962_s8] sm:$0xf] }
 0xc77   : > { %v15932_v32 = vadd.f32 %v19321_v18, %v15891_v15  ;;  %v16097_v27 = vsub.s32 0, %v16096_v38  ;;  %v16105_v47 = vsub.s32 2, %v16096_v38  ;;  %v16101_v15 = vsub.s32 1, %v16096_v38 }
 0xc79   : > { %v16098_v18 = vrot.slane %v16093_v22, %v16097_v27 }
 0xc81   : > { %v19338_v29 = vpop.f32.mrb[16].mxu0 }
 0xc82   : > { %v19339_v63 = vpop.f32.mrb[17].mxu0 }
 0xc83   : > { %v19340_v55 = vadd.f32 %v19339_v63, %v19338_v29  ;;  %v19341_v33 = vpop.f32.mrb[18].mxu0  ;;  %v16102_v29 = vrot.slane %v16093_v22, %v16101_v15 }
 0xc84   : > { %v19342_v51 = vpop.f32.mrb[19].mxu0 }
 0xc85   : > { %v15970_v30 = vadd.f32 %v19340_v55, %v15929_v24  ;;  %v19343_v46 = vadd.f32 %v19342_v51, %v19341_v33  ;;  %v16109_v24 = vsub.s32 3, %v16096_v38 }
 0xc87   : > { %v15973_v10 = vadd.f32 %v19343_v46, %v15932_v32  ;;  %v16106_v32 = vrot.slane %v16093_v22, %v16105_v47  ;;  %v16110_v63 = vrot.slane %v16093_v22, %v16109_v24 }
 0xcb9   : > { %v19360_v48 = vpop.f32.mrb[120].mxu1 }
 0xcba   : > { %v19361_v54 = vpop.f32.mrb[121].mxu1 }
 0xcbb   : > { %v19362_v45 = vadd.f32 %v19361_v54, %v19360_v48  ;;  %v19363_v3 = vpop.f32.mrb[122].mxu1 }
 0xcbc   : > { %v19364_v35 = vpop.f32.mrb[123].mxu1 }
 0xcbd   : > { %v19365_v6 = vadd.f32 %v19364_v35, %v19363_v3  ;;  %v16011_v4 = vadd.f32 %v19362_v45, %v15970_v30 }
 0xcbf   : > { %v16014_v44 = vadd.f32 %v19365_v6, %v15973_v10 }
 0xcc0   : > { %v16051_v20 = vpop.f32.mrb[20].mxu0 }
 0xcc1   : > { %v16052_v1 = vadd.f32 %v16051_v20, %v16011_v4  ;;  %v21517_v53 = vpop.f32.mrb[21].mxu0 }
 0xcc2   : > { %v16054_v42 = vpop.f32.mrb[22].mxu0 }
 0xcc3   : > { %v16055_v61 = vadd.f32 %v16054_v42, %v16014_v44  ;;  %v21518_v58 = vpop.f32.mrb[23].mxu0  ;;  %v16058_v11 = vmax.f32 %v16052_v1, 0.0 }
 0xcc5   : > { %v16059_v56 = vmax.f32 %v16055_v61, 0.0 }
 0xcc7   : > { %v16060_v13 = vpack.c.bf16 %v16059_v56, %v16058_v11 }
 0xcc9   : > { %16308 = vmatmul.mubr.bf16.vlgmr.msra.gmra.mrb[124].mxu1 %v16060_v13  ;;  %16351 = vmatmul.mubr.bf16.vlgmr.msra.gmra.mrb[24].mxu0 %v16060_v13 }
 0xcca   : > { %19376 = vmatpush3.bf16.msra.mxu1 %v22454_v41  ;;  %19398 = vmatpush3.bf16.msra.mxu0 %v22455_v17 }
 0xccb   : > { %19377 = vmatprep.subr.bf16.mxu1 %v22456_v50  ;;  %19399 = vmatprep.subr.bf16.mxu0 %v22457_v31 }
 0xcce   : > { %19378 = vmatpush3.bf16.msra.mxu1 %v22458_v5  ;;  %19400 = vmatpush3.bf16.msra.mxu0 %v22459_v40 }
 0xccf   : > { %19379 = vmatprep.subr.bf16.mxu1 %v22460_v23  ;;  %19401 = vmatprep.subr.bf16.mxu0 %v22461_v37  ;;  %v18202_v37 = vld [vmem:[%s25964_s10] ss:$0 sm:$0xff] }
 0xcd2   : > { %19380 = vmatpush3.bf16.msra.mxu1 %v22462_v26  ;;  %19402 = vmatpush3.bf16.msra.mxu0 %v22463_v12 }
 0xcd3   : > { %19381 = vmatprep.subr.bf16.mxu1 %v22464_v28  ;;  %19403 = vmatprep.subr.bf16.mxu0 %v22465_v39 }
 0xcd6   : > { %19382 = vmatpush3.bf16.msra.mxu1 %v22466_v14  ;;  %19404 = vmatpush3.bf16.msra.mxu0 %v22467_v9 }
 0xcd7   : > { %19383 = vmatprep.subr.bf16.mxu1 %v22468_v8  ;;  %19405 = vmatprep.subr.bf16.mxu0 %v22469_v34 }
 0xcda   : > { %19384 = vmatpush3.bf16.msra.mxu1 %v22470_v57  ;;  %19406 = vmatpush3.bf16.msra.mxu0 %v22471_v21 }
 0xcdb   : > { %19385 = vmatprep.subr.bf16.mxu1 %v22472_v59  ;;  %19407 = vmatprep.subr.bf16.mxu0 %v22473_v52 }
 0xcde   : > { %19386 = vmatpush3.bf16.msra.mxu1 %v22474_v0  ;;  %19408 = vmatpush3.bf16.msra.mxu0 %v22475_v62 }
 0xcdf   : > { %19387 = vmatprep.subr.bf16.mxu1 %v22476_v49  ;;  %19409 = vmatprep.subr.bf16.mxu0 %v22477_v36 }
 0xce2   : > { %19388 = vmatpush3.bf16.msra.mxu1 %v22478_v16  ;;  %19410 = vmatpush3.bf16.msra.mxu0 %v22479_v43 }
 0xce3   : > { %19389 = vmatprep.subr.bf16.mxu1 %v22480_v2  ;;  %19411 = vmatprep.subr.bf16.mxu0 %v22481_v60 }
 0xce6   : > { %19390 = vmatpush3.bf16.msra.mxu1 %v22482_v25  ;;  %19412 = vmatpush3.bf16.msra.mxu0 %v22483_v7 }
 0xd9c   : > { %v16309_v55 = vpop.f32.mrb[124].mxu1  ;;  %v16352_v33 = vpop.f32.mrb[24].mxu0 }
 0xd9d   : > { %v16310_v51 = vadd.f32 %v16309_v55, %v16098_v18  ;;  %v16353_v30 = vadd.f32 %v16352_v33, %v16106_v32  ;;  %v16311_v46 = vpop.f32.mrb[125].mxu1  ;;  %v16354_v10 = vpop.f32.mrb[25].mxu0 }
 0xd9e   : > { %v16312_v48 = vadd.f32 %v16311_v46, %v16102_v29  ;;  %v16355_v54 = vadd.f32 %v16354_v10, %v16110_v63  ;;  %v16313_v45 = vpop.f32.mrb[126].mxu1  ;;  %v16356_v3 = vpop.f32.mrb[26].mxu0 }
 0xd9f   : > { %v16314_v35 = vadd.f32 %v16313_v45, %v16098_v18  ;;  %v16357_v6 = vadd.f32 %v16356_v3, %v16106_v32  ;;  %v16315_v4 = vpop.f32.mrb[127].mxu1  ;;  %v16358_v44 = vpop.f32.mrb[27].mxu0  ;;  %v16361_v53 = vmax.f32 %v16310_v51, 0.0  ;;  %v16363_v42 = vmax.f32 %v16353_v30, 0.0 }
 0xda0   : > { %v16316_v20 = vadd.f32 %v16315_v4, %v16102_v29  ;;  %v16359_v1 = vadd.f32 %v16358_v44, %v16110_v63  ;;  %v16362_v11 = vmax.f32 %v16312_v48, 0.0  ;;  %v16364_v56 = vmax.f32 %v16355_v54, 0.0 }
 0xda1   : > { %v16365_v61 = vmax.f32 %v16314_v35, 0.0  ;;  %v16367_v58 = vmax.f32 %v16357_v6, 0.0 }
 0xda2   : > { %v16366_v41 = vmax.f32 %v16316_v20, 0.0  ;;  %v16368_v17 = vmax.f32 %v16359_v1, 0.0 }
 0xda3   : > { %v16369_v13 = vpack.c.bf16 %v16365_v61, %v16361_v53  ;;  %v16371_v50 = vpack.c.bf16 %v16367_v58, %v16363_v42 }
 0xda4   : > { %v16370_v31 = vpack.c.bf16 %v16366_v41, %v16362_v11  ;;  %v16372_v5 = vpack.c.bf16 %v16368_v17, %v16364_v56 }
 0xda6   : > { %16668 = vmatprep.mubr.bf16.mxu1 %v16370_v31  ;;  %16709 = vmatprep.mubr.bf16.mxu0 %v16372_v5 }
 0xda7   : > { %16669 = vmatmul.mubr.bf16.vlgmr.msra.gmra.mrb[128].mxu1 %v16369_v13  ;;  %16710 = vmatmul.mubr.bf16.vlgmr.msra.gmra.mrb[28].mxu0 %v16371_v50 }
 0xe7a   : > { %v19391_v40 = vpop.f32.mrb[128].mxu1  ;;  %v19413_v23 = vpop.f32.mrb[28].mxu0 }
 0xe7b   : > { %v19392_v26 = vpop.f32.mrb[129].mxu1  ;;  %v19414_v12 = vpop.f32.mrb[29].mxu0 }
 0xe7c   : > { %v19393_v28 = vadd.f32 %v19392_v26, %v19391_v40  ;;  %v19415_v39 = vadd.f32 %v19414_v12, %v19413_v23  ;;  %v19394_v14 = vpop.f32.mrb[130].mxu1  ;;  %v19416_v9 = vpop.f32.mrb[30].mxu0 }
 0xe7d   : > { %v19395_v8 = vpop.f32.mrb[131].mxu1  ;;  %v19417_v34 = vpop.f32.mrb[31].mxu0 }
 0xe7e   : > { %v16671_v57 = vadd.f32 %v19393_v28, %v18202_v37  ;;  %v19396_v21 = vadd.f32 %v19395_v8, %v19394_v14  ;;  %v19418_v59 = vadd.f32 %v19417_v34, %v19416_v9 }
 0xe80   : > { %v16712_v52 = vadd.f32 %v19415_v39, %v16671_v57  ;;  %v16674_v0 = vadd.f32 %v19396_v21, %v18202_v37 }
 0xe82   : > { %16718 = vst [vmem:[%s1073_s26] sm:$0xff] %v16712_v52  ;;  %v16715_v62 = vadd.f32 %v19418_v59, %v16674_v0 }
 0xe84   : > { %16719 = vst [vmem:[%s1073_s26 + $0x8] sm:$0xff] %v16715_v62 }
 0xe85 PF: > { %p18_p9 = scmp.ge.s32.totalorder %s22589_s21, 4   ;;  %s26416_s17 = smov %s22503_s18 }
 0xe86   : > { %s26417_s18 = smov %s22598_s24  ;;  %s26418_s19 = smov %s22589_s21 }
 0xe87   :  { %20 = sbr.rel (!%p18_p9) target bundleno = 2 (0x2), region = 161 }

</bundles_post_ra>
